<compile_context>
chip_gen: v6e
topology: v6e:2x2x1
jax: 0.10.0
libtpu: 0.0.40
codegen_flags: <defaults>
</compile_context>

<pallas_src>
import functools

import numpy as np
import jax
import jax.numpy as jnp
from jax.experimental import pallas as pl
from jax.experimental.pallas import tpu as pltpu


def _round_up(x, m):
    return ((x + m - 1) // m) * m


def _cdiv(a, b):
    return (a + b - 1) // b


def _gelu_exact(x):
    # nn.GELU() default: exact erf-based gelu.
    return 0.5 * x * (1.0 + jax.lax.erf(x / jnp.sqrt(2.0).astype(x.dtype)))


def _layernorm(x, gamma, beta, eps):
    mean = jnp.mean(x, axis=-1, keepdims=True)
    var = jnp.mean((x - mean) ** 2, axis=-1, keepdims=True)  # biased, like torch LN
    x = (x - mean) * jax.lax.rsqrt(var + eps)
    return x * gamma + beta


def _vmem_capacity_bytes():
    """Per-core VMEM capacity; conservative fallback (v7x) if the query fails."""
    try:
        info = pltpu.get_tpu_info()
        for name in ("vmem_capacity_bytes", "vmem_bytes", "vmem_size_bytes"):
            v = getattr(info, name, None)
            if v:
                return int(v)
    except Exception:
        pass
    return 64 * 1024 * 1024


def _working_set_bytes(tm, tn, H, out_bytes):
    """Rough VMEM footprint of one grid step (used to shrink tiles per chip)."""
    b = 0
    b += 2 * tm * H * 2            # x row tile (bf16), double-buffered
    b += 2 * H * H * 2             # w1 + w2 (bf16), single-buffered
    b += 6 * 2 * H * 4             # bias/gamma/beta vectors (f32), double-buffered
    b += 2 * H * tn * 2            # wd vocab tile (bf16), double-buffered (dominant stream)
    b += 2 * tn * 4                # bd vocab tile (f32), double-buffered
    b += 2 * tm * tn * out_bytes   # output tile, double-buffered
    b += tm * H * 2                # cached transform scratch (bf16)
    b += 4 * tm * H                # headroom for f32 transform intermediates
    return b


def mlm_head_kernel(x_ref,
                    w1_ref, b1_ref, g1_ref, be1_ref,
                    w2_ref, b2_ref, g2_ref, be2_ref,
                    wd_ref, bd_ref,
                    o_ref,
                    h_ref,          # VMEM scratch: cached transform output (tm, H) bf16
                    *, eps):
    # --- transform (dense + GELU + LN, twice), computed once per row tile ---
    # Padded rows are zeros; they stay finite through LN (var + eps > 0) and
    # their output rows are never written back (masked ragged block), so they
    # are harmless.
    @pl.when(pl.program_id(1) == 0)
    def _():
        x = x_ref[...]                                        # bf16 (cast in wrapper)
        h = jnp.dot(x, w1_ref[...],
                    preferred_element_type=jnp.float32) + b1_ref[...]
        h = _gelu_exact(h)
        h = _layernorm(h, g1_ref[...], be1_ref[...], eps)

        h = jnp.dot(h.astype(jnp.bfloat16), w2_ref[...],
                    preferred_element_type=jnp.float32) + b2_ref[...]
        h = _gelu_exact(h)
        h = _layernorm(h, g2_ref[...], be2_ref[...], eps)
        h_ref[...] = h.astype(jnp.bfloat16)

    # --- decoder: stream one (H, tn) slice of wd per vocab tile ---
    o_ref[...] = (jnp.dot(h_ref[...], wd_ref[...],
                          preferred_element_type=jnp.float32)
                  + bd_ref[...]).astype(o_ref.dtype)


def mlm_head(sequence_output, params, *, eps=1e-12, tm=1024, tn=2048,
             out_dtype=jnp.bfloat16):
    """sequence_output: [B, S, H]  ->  prediction scores [B, S, V]."""
    B, S, H = sequence_output.shape
    V = params["wd"].shape[1]
    M = B * S

    # Cast activations to bf16 once here (fused into the producer by XLA):
    # halves the x HBM read and the double-buffered x tile in VMEM.
    x2d = sequence_output.astype(jnp.bfloat16).reshape(M, H)

    # Tile alignment: tm a multiple of 16 (bf16 h-scratch sublane packing),
    # tn a multiple of 128 (lane width).
    tm = _round_up(max(16, min(tm, _round_up(M, 16))), 16)
    tn = _round_up(max(128, min(tn, _round_up(V, 128))), 128)

    # Generation-aware VMEM budget (v7x: 64 MiB/TC; v5e/v6e: 128 MiB).
    vmem_cap = _vmem_capacity_bytes()
    vmem_limit = int(max(32 * 2**20, min(100 * 2**20, vmem_cap - 12 * 2**20)))
    out_bytes = np.dtype(out_dtype).itemsize
    budget = int(0.70 * vmem_limit)       # leave compiler-scratch headroom
    while _working_set_bytes(tm, tn, H, out_bytes) > budget:
        if tn > 1024:
            tn = _round_up(max(tn // 2, 128), 128)
        elif tm > 256:
            tm = _round_up(max(tm // 2, 16), 16)
        else:
            break

    n_i, n_j = _cdiv(M, tm), _cdiv(V, tn)
    Mp, Vp = n_i * tm, n_j * tn

    # Pad INPUTS so every streamed block read is in-bounds.  The OUTPUT keeps
    # its exact (M, V) shape: Pallas masks the out-of-range part of the ragged
    # last row/vocab blocks on store, so there is no post-kernel slice copy
    # (which for BERT-size V would cost an extra full read+write of the logits).
    if Mp != M:
        x2d = jnp.pad(x2d, ((0, Mp - M), (0, 0)))
    wd, bd = params["wd"], params["bd"]
    if Vp != V:
        wd = jnp.pad(wd, ((0, 0), (0, Vp - V)))
        bd = jnp.pad(bd, ((0, 0), (0, Vp - V)))
    # Note: for small tn, pre-blocking wd to [Vp//tn, H, tn] would make the
    # streamed wd DMAs fully contiguous; unnecessary at the default tn>=2048.

    kernel = functools.partial(mlm_head_kernel, eps=eps)
    grid = (n_i, n_j)

    def _call(single_buffer_weights):
        if single_buffer_weights:
            # Grid-invariant HxH weights are fetched exactly once; single
            # buffering them frees one full VMEM copy of each.
            w_spec = lambda: pl.BlockSpec((H, H), lambda i, j: (0, 0),
                                          pipeline_mode=pl.Buffered(1))
        else:
            w_spec = lambda: pl.BlockSpec((H, H), lambda i, j: (0, 0))
        vec_spec = lambda: pl.BlockSpec((1, H), lambda i, j: (0, 0))

        return pl.pallas_call(
            kernel,
            out_shape=jax.ShapeDtypeStruct((M, V), out_dtype),
            grid_spec=pltpu.PrefetchScalarGridSpec(
                num_scalar_prefetch=0,
                grid=grid,
                in_specs=[
                    pl.BlockSpec((tm, H), lambda i, j: (i, 0)),   # x row tile
                    w_spec(),                                     # w1
                    vec_spec(), vec_spec(), vec_spec(),           # b1, gamma1, beta1
                    w_spec(),                                     # w2
                    vec_spec(), vec_spec(), vec_spec(),           # b2, gamma2, beta2
                    pl.BlockSpec((H, tn), lambda i, j: (0, j)),   # wd vocab tile (streamed)
                    pl.BlockSpec((1, tn), lambda i, j: (0, j)),   # bd vocab tile
                ],
                out_specs=pl.BlockSpec((tm, tn), lambda i, j: (i, j)),
                scratch_shapes=[pltpu.VMEM((tm, H), jnp.bfloat16)],
            ),
            compiler_params=pltpu.CompilerParams(
                dimension_semantics=("parallel", "arbitrary"),
                vmem_limit_bytes=vmem_limit,
            ),
        )(
            x2d,
            params["w1"], params["b1"], params["g1"], params["be1"],
            params["w2"], params["b2"], params["g2"], params["be2"],
            wd, bd,
        )

    try:
        out2d = _call(True)
    except Exception:
        # Fallback if single-buffered specs (pl.Buffered(1)) are not supported
        # by this jax version / backend.
        out2d = _call(False)

    return out2d.reshape(B, S, V)


def make_params(key, H, V):
    ks = jax.random.split(key, 5)
    scale = 0.02
    f32, bf = jnp.float32, jnp.bfloat16
    return {
        # Weight matrices stored as [in, out], bf16 (f32 accumulation in-kernel).
        "w1": (scale * jax.random.normal(ks[0], (H, H), f32)).astype(bf),
        "b1": scale * jax.random.normal(ks[1], (1, H), f32),
        "g1": jnp.ones((1, H), f32),
        "be1": jnp.zeros((1, H), f32),
        "w2": (scale * jax.random.normal(ks[2], (H, H), f32)).astype(bf),
        "b2": scale * jax.random.normal(ks[3], (1, H), f32),
        "g2": jnp.ones((1, H), f32),
        "be2": jnp.zeros((1, H), f32),
        "wd": (scale * jax.random.normal(ks[4], (H, V), f32)).astype(bf),
        "bd": jnp.zeros((1, V), f32),   # decoder bias (config.vocab_size)
    }


def mlm_head_ref(x, p, eps=1e-12):
    """Pure-JAX reference mirroring the kernel's bf16-input / f32-accum math."""
    f32, bf = jnp.float32, jnp.bfloat16

    def ln(h, g, b):
        m = jnp.mean(h, -1, keepdims=True)
        v = jnp.mean((h - m) ** 2, -1, keepdims=True)
        return (h - m) * jax.lax.rsqrt(v + eps) * g + b

    w1 = p["w1"].astype(f32)
    w2 = p["w2"].astype(f32)
    wd = p["wd"].astype(f32)

    h = jnp.dot(x.astype(bf).astype(f32), w1) + p["b1"]
    h = _gelu_exact(h)
    h = ln(h, p["g1"], p["be1"])
    h = jnp.dot(h.astype(bf).astype(f32), w2) + p["b2"]
    h = _gelu_exact(h)
    h = ln(h, p["g2"], p["be2"])
    return jnp.dot(h.astype(bf).astype(f32), wd) + p["bd"]


if __name__ == "__main__":
    # Small but non-trivial: M = 200 and V = 1000 are not tile multiples, so
    # the masked ragged last row/vocab blocks are exercised, as is the
    # transform-cached-across-vocab-tiles path (second call, 4x4 grid).
    B, S, H, V = 2, 100, 128, 1000
    key = jax.random.PRNGKey(0)
    kx, kp = jax.random.split(key)

    x = jax.random.normal(kx, (B, S, H), jnp.float32)
    params = make_params(kp, H, V)

    ref = mlm_head_ref(x.reshape(B * S, H), params).reshape(B, S, V)

    # 1) Default (large, generation-aware) tiles, bf16 logits.
    out = jax.block_until_ready(mlm_head(x, params))
    assert out.shape == (B, S, V) and out.dtype == jnp.bfloat16
    err = float(jnp.max(jnp.abs(out.astype(jnp.float32) - ref)))
    assert jnp.allclose(out.astype(jnp.float32), ref, atol=2e-2, rtol=2e-2), err

    # 2) Small tiles -> multi-tile grid (row and vocab loops), f32 logits.
    out2 = jax.block_until_ready(
        mlm_head(x, params, tm=64, tn=256, out_dtype=jnp.float32))
    err2 = float(jnp.max(jnp.abs(out2 - ref)))
    assert jnp.allclose(out2, ref, atol=1e-2, rtol=1e-2), err2

    print("KERNEL_OK")
</pallas_src>

<mosaic_0001>
module attributes {stable_mosaic.version = 11 : i64} {
  func.func @mlm_head_kernel(%arg0: i32, %arg1: i32, %arg2: memref<208x128xbf16, #tpu.memory_space<vmem>>, %arg3: memref<128x128xbf16, #tpu.memory_space<vmem>>, %arg4: memref<1x128xf32, #tpu.memory_space<vmem>>, %arg5: memref<1x128xf32, #tpu.memory_space<vmem>>, %arg6: memref<1x128xf32, #tpu.memory_space<vmem>>, %arg7: memref<128x128xbf16, #tpu.memory_space<vmem>>, %arg8: memref<1x128xf32, #tpu.memory_space<vmem>>, %arg9: memref<1x128xf32, #tpu.memory_space<vmem>>, %arg10: memref<1x128xf32, #tpu.memory_space<vmem>>, %arg11: memref<128x1024xbf16, #tpu.memory_space<vmem>>, %arg12: memref<1x1024xf32, #tpu.memory_space<vmem>>, %arg13: memref<208x1024xbf16, #tpu.memory_space<vmem>>, %arg14: memref<208x128xbf16, #tpu.memory_space<vmem>>) attributes {dimension_semantics = [#tpu.dimension_semantics<parallel>, #tpu.dimension_semantics<arbitrary>], iteration_bounds = array<i64: 1, 1>, scalar_prefetch = 0 : i64, scratch_operands = 1 : i64, tpu.core_type = #tpu.core_type<tc>, window_params = [{transform_indices = @transform_0, window_bounds = array<i64: 208, 128>}, {pipeline_mode = #tpu.pipeline_mode<synchronous>, transform_indices = @transform_1, window_bounds = array<i64: 128, 128>}, {pipeline_mode = #tpu.pipeline_mode<synchronous>, transform_indices = @transform_2, window_bounds = array<i64: 1, 128>}, {pipeline_mode = #tpu.pipeline_mode<synchronous>, transform_indices = @transform_3, window_bounds = array<i64: 1, 128>}, {pipeline_mode = #tpu.pipeline_mode<synchronous>, transform_indices = @transform_4, window_bounds = array<i64: 1, 128>}, {pipeline_mode = #tpu.pipeline_mode<synchronous>, transform_indices = @transform_5, window_bounds = array<i64: 128, 128>}, {pipeline_mode = #tpu.pipeline_mode<synchronous>, transform_indices = @transform_6, window_bounds = array<i64: 1, 128>}, {pipeline_mode = #tpu.pipeline_mode<synchronous>, transform_indices = @transform_7, window_bounds = array<i64: 1, 128>}, {pipeline_mode = #tpu.pipeline_mode<synchronous>, transform_indices = @transform_8, window_bounds = array<i64: 1, 128>}, {transform_indices = @transform_9, window_bounds = array<i64: 128, 1024>}, {transform_indices = @transform_10, window_bounds = array<i64: 1, 1024>}, {transform_indices = @transform_11, window_bounds = array<i64: 208, 1024>}]} {
    %c0_i32 = arith.constant 0 : i32
    %0 = arith.cmpi eq, %arg1, %c0_i32 : i32
    %1 = arith.extui %0 : i1 to i32
    %c0_i32_0 = arith.constant 0 : i32
    %2 = arith.cmpi ne, %1, %c0_i32_0 : i32
    scf.if %2 {
      %c0_8 = arith.constant 0 : index
      %c0_9 = arith.constant 0 : index
      %11 = vector.load %arg2[%c0_8, %c0_9] : memref<208x128xbf16, #tpu.memory_space<vmem>>, vector<208x128xbf16>
      %c0_10 = arith.constant 0 : index
      %c0_11 = arith.constant 0 : index
      %12 = vector.load %arg3[%c0_10, %c0_11] : memref<128x128xbf16, #tpu.memory_space<vmem>>, vector<128x128xbf16>
      %cst_12 = arith.constant dense<0.000000e+00> : vector<208x128xf32>
      %13 = tpu.matmul %11, %12, %cst_12 {dimension_numbers = #tpu.dot_dimension_numbers<[1], [0], [0], [1], [0, 0, 1, 1], [], []>} : vector<208x128xbf16>, vector<128x128xbf16>, vector<208x128xf32> -> vector<208x128xf32>
      %c0_13 = arith.constant 0 : index
      %c0_14 = arith.constant 0 : index
      %14 = vector.load %arg4[%c0_13, %c0_14] : memref<1x128xf32, #tpu.memory_space<vmem>>, vector<1x128xf32>
      %15 = vector.broadcast %14 : vector<1x128xf32> to vector<208x128xf32>
      %16 = arith.addf %13, %15 : vector<208x128xf32>
      %cst_15 = arith.constant 5.000000e-01 : f32
      %17 = vector.broadcast %cst_15 : f32 to vector<208x128xf32>
      %18 = arith.mulf %17, %16 : vector<208x128xf32>
      %cst_16 = arith.constant 2.000000e+00 : f32
      %19 = math.sqrt %cst_16 : f32
      %20 = vector.broadcast %19 : f32 to vector<208x128xf32>
      %21 = arith.divf %16, %20 : vector<208x128xf32>
      %22 = math.erf %21 : vector<208x128xf32>
      %cst_17 = arith.constant 1.000000e+00 : f32
      %23 = vector.broadcast %cst_17 : f32 to vector<208x128xf32>
      %24 = arith.addf %23, %22 : vector<208x128xf32>
      %25 = arith.mulf %18, %24 : vector<208x128xf32>
      %c0_18 = arith.constant 0 : index
      %c0_19 = arith.constant 0 : index
      %26 = vector.load %arg5[%c0_18, %c0_19] : memref<1x128xf32, #tpu.memory_space<vmem>>, vector<1x128xf32>
      %c0_20 = arith.constant 0 : index
      %c0_21 = arith.constant 0 : index
      %27 = vector.load %arg6[%c0_20, %c0_21] : memref<1x128xf32, #tpu.memory_space<vmem>>, vector<1x128xf32>
      %cst_22 = arith.constant dense<0.000000e+00> : vector<208xf32>
      %28 = vector.multi_reduction <add>, %25, %cst_22 [1] : vector<208x128xf32> to vector<208xf32>
      %29 = vector.shape_cast %28 : vector<208xf32> to vector<208x1xf32>
      %cst_23 = arith.constant 1.280000e+02 : f32
      %30 = vector.broadcast %cst_23 : f32 to vector<208x1xf32>
      %31 = arith.divf %29, %30 : vector<208x1xf32>
      %32 = vector.broadcast %31 : vector<208x1xf32> to vector<208x128xf32>
      %33 = arith.subf %25, %32 : vector<208x128xf32>
      %34 = arith.mulf %33, %33 : vector<208x128xf32>
      %cst_24 = arith.constant dense<0.000000e+00> : vector<208xf32>
      %35 = vector.multi_reduction <add>, %34, %cst_24 [1] : vector<208x128xf32> to vector<208xf32>
      %36 = vector.shape_cast %35 : vector<208xf32> to vector<208x1xf32>
      %cst_25 = arith.constant 1.280000e+02 : f32
      %37 = vector.broadcast %cst_25 : f32 to vector<208x1xf32>
      %38 = arith.divf %36, %37 : vector<208x1xf32>
      %39 = vector.broadcast %31 : vector<208x1xf32> to vector<208x128xf32>
      %40 = arith.subf %25, %39 : vector<208x128xf32>
      %cst_26 = arith.constant 9.99999996E-13 : f32
      %41 = vector.broadcast %cst_26 : f32 to vector<208x1xf32>
      %42 = arith.addf %38, %41 : vector<208x1xf32>
      %43 = math.rsqrt %42 : vector<208x1xf32>
      %44 = vector.broadcast %43 : vector<208x1xf32> to vector<208x128xf32>
      %45 = arith.mulf %40, %44 : vector<208x128xf32>
      %46 = vector.broadcast %26 : vector<1x128xf32> to vector<208x128xf32>
      %47 = arith.mulf %45, %46 : vector<208x128xf32>
      %48 = vector.broadcast %27 : vector<1x128xf32> to vector<208x128xf32>
      %49 = arith.addf %47, %48 : vector<208x128xf32>
      %50 = arith.truncf %49 : vector<208x128xf32> to vector<208x128xbf16>
      %c0_27 = arith.constant 0 : index
      %c0_28 = arith.constant 0 : index
      %51 = vector.load %arg7[%c0_27, %c0_28] : memref<128x128xbf16, #tpu.memory_space<vmem>>, vector<128x128xbf16>
      %cst_29 = arith.constant dense<0.000000e+00> : vector<208x128xf32>
      %52 = tpu.matmul %50, %51, %cst_29 {dimension_numbers = #tpu.dot_dimension_numbers<[1], [0], [0], [1], [0, 0, 1, 1], [], []>} : vector<208x128xbf16>, vector<128x128xbf16>, vector<208x128xf32> -> vector<208x128xf32>
      %c0_30 = arith.constant 0 : index
      %c0_31 = arith.constant 0 : index
      %53 = vector.load %arg8[%c0_30, %c0_31] : memref<1x128xf32, #tpu.memory_space<vmem>>, vector<1x128xf32>
      %54 = vector.broadcast %53 : vector<1x128xf32> to vector<208x128xf32>
      %55 = arith.addf %52, %54 : vector<208x128xf32>
      %cst_32 = arith.constant 5.000000e-01 : f32
      %56 = vector.broadcast %cst_32 : f32 to vector<208x128xf32>
      %57 = arith.mulf %56, %55 : vector<208x128xf32>
      %cst_33 = arith.constant 2.000000e+00 : f32
      %58 = math.sqrt %cst_33 : f32
      %59 = vector.broadcast %58 : f32 to vector<208x128xf32>
      %60 = arith.divf %55, %59 : vector<208x128xf32>
      %61 = math.erf %60 : vector<208x128xf32>
      %cst_34 = arith.constant 1.000000e+00 : f32
      %62 = vector.broadcast %cst_34 : f32 to vector<208x128xf32>
      %63 = arith.addf %62, %61 : vector<208x128xf32>
      %64 = arith.mulf %57, %63 : vector<208x128xf32>
      %c0_35 = arith.constant 0 : index
      %c0_36 = arith.constant 0 : index
      %65 = vector.load %arg9[%c0_35, %c0_36] : memref<1x128xf32, #tpu.memory_space<vmem>>, vector<1x128xf32>
      %c0_37 = arith.constant 0 : index
      %c0_38 = arith.constant 0 : index
      %66 = vector.load %arg10[%c0_37, %c0_38] : memref<1x128xf32, #tpu.memory_space<vmem>>, vector<1x128xf32>
      %cst_39 = arith.constant dense<0.000000e+00> : vector<208xf32>
      %67 = vector.multi_reduction <add>, %64, %cst_39 [1] : vector<208x128xf32> to vector<208xf32>
      %68 = vector.shape_cast %67 : vector<208xf32> to vector<208x1xf32>
      %cst_40 = arith.constant 1.280000e+02 : f32
      %69 = vector.broadcast %cst_40 : f32 to vector<208x1xf32>
      %70 = arith.divf %68, %69 : vector<208x1xf32>
      %71 = vector.broadcast %70 : vector<208x1xf32> to vector<208x128xf32>
      %72 = arith.subf %64, %71 : vector<208x128xf32>
      %73 = arith.mulf %72, %72 : vector<208x128xf32>
      %cst_41 = arith.constant dense<0.000000e+00> : vector<208xf32>
      %74 = vector.multi_reduction <add>, %73, %cst_41 [1] : vector<208x128xf32> to vector<208xf32>
      %75 = vector.shape_cast %74 : vector<208xf32> to vector<208x1xf32>
      %cst_42 = arith.constant 1.280000e+02 : f32
      %76 = vector.broadcast %cst_42 : f32 to vector<208x1xf32>
      %77 = arith.divf %75, %76 : vector<208x1xf32>
      %78 = vector.broadcast %70 : vector<208x1xf32> to vector<208x128xf32>
      %79 = arith.subf %64, %78 : vector<208x128xf32>
      %cst_43 = arith.constant 9.99999996E-13 : f32
      %80 = vector.broadcast %cst_43 : f32 to vector<208x1xf32>
      %81 = arith.addf %77, %80 : vector<208x1xf32>
      %82 = math.rsqrt %81 : vector<208x1xf32>
      %83 = vector.broadcast %82 : vector<208x1xf32> to vector<208x128xf32>
      %84 = arith.mulf %79, %83 : vector<208x128xf32>
      %85 = vector.broadcast %65 : vector<1x128xf32> to vector<208x128xf32>
      %86 = arith.mulf %84, %85 : vector<208x128xf32>
      %87 = vector.broadcast %66 : vector<1x128xf32> to vector<208x128xf32>
      %88 = arith.addf %86, %87 : vector<208x128xf32>
      %89 = arith.truncf %88 : vector<208x128xf32> to vector<208x128xbf16>
      %c0_44 = arith.constant 0 : index
      %c0_45 = arith.constant 0 : index
      %90 = vector.load %arg14[%c0_44, %c0_45] : memref<208x128xbf16, #tpu.memory_space<vmem>>, vector<208x128xbf16>
      tpu.vector_store %arg14[%c0_44, %c0_45], %89 {strides = array<i32>} : memref<208x128xbf16, #tpu.memory_space<vmem>>, vector<208x128xbf16>,
    } else {
    }
    %c0 = arith.constant 0 : index
    %c0_1 = arith.constant 0 : index
    %3 = vector.load %arg14[%c0, %c0_1] : memref<208x128xbf16, #tpu.memory_space<vmem>>, vector<208x128xbf16>
    %c0_2 = arith.constant 0 : index
    %c0_3 = arith.constant 0 : index
    %4 = vector.load %arg11[%c0_2, %c0_3] : memref<128x1024xbf16, #tpu.memory_space<vmem>>, vector<128x1024xbf16>
    %cst = arith.constant dense<0.000000e+00> : vector<208x1024xf32>
    %5 = tpu.matmul %3, %4, %cst {dimension_numbers = #tpu.dot_dimension_numbers<[1], [0], [0], [1], [0, 0, 1, 1], [], []>} : vector<208x128xbf16>, vector<128x1024xbf16>, vector<208x1024xf32> -> vector<208x1024xf32>
    %c0_4 = arith.constant 0 : index
    %c0_5 = arith.constant 0 : index
    %6 = vector.load %arg12[%c0_4, %c0_5] : memref<1x1024xf32, #tpu.memory_space<vmem>>, vector<1x1024xf32>
    %7 = vector.broadcast %6 : vector<1x1024xf32> to vector<208x1024xf32>
    %8 = arith.addf %5, %7 : vector<208x1024xf32>
    %9 = arith.truncf %8 : vector<208x1024xf32> to vector<208x1024xbf16>
    %c0_6 = arith.constant 0 : index
    %c0_7 = arith.constant 0 : index
    %10 = vector.load %arg13[%c0_6, %c0_7] : memref<208x1024xbf16, #tpu.memory_space<vmem>>, vector<208x1024xbf16>
    tpu.vector_store %arg13[%c0_6, %c0_7], %9 {strides = array<i32>} : memref<208x1024xbf16, #tpu.memory_space<vmem>>, vector<208x1024xbf16>,
    return
  }
  func.func @transform_0(%arg0: i32, %arg1: i32) -> (i32, i32) {
    %c0_i32 = arith.constant 0 : i32
    %c0_i32_0 = arith.constant 0 : i32
    return %arg0, %c0_i32 : i32, i32
  }
  func.func @transform_1(%arg0: i32, %arg1: i32) -> (i32, i32) {
    %c0_i32 = arith.constant 0 : i32
    %c0_i32_0 = arith.constant 0 : i32
    %c0_i32_1 = arith.constant 0 : i32
    return %c0_i32, %c0_i32_0 : i32, i32
  }
  func.func @transform_2(%arg0: i32, %arg1: i32) -> (i32, i32) {
    %c0_i32 = arith.constant 0 : i32
    %c0_i32_0 = arith.constant 0 : i32
    %c0_i32_1 = arith.constant 0 : i32
    return %c0_i32, %c0_i32_0 : i32, i32
  }
  func.func @transform_3(%arg0: i32, %arg1: i32) -> (i32, i32) {
    %c0_i32 = arith.constant 0 : i32
    %c0_i32_0 = arith.constant 0 : i32
    %c0_i32_1 = arith.constant 0 : i32
    return %c0_i32, %c0_i32_0 : i32, i32
  }
  func.func @transform_4(%arg0: i32, %arg1: i32) -> (i32, i32) {
    %c0_i32 = arith.constant 0 : i32
    %c0_i32_0 = arith.constant 0 : i32
    %c0_i32_1 = arith.constant 0 : i32
    return %c0_i32, %c0_i32_0 : i32, i32
  }
  func.func @transform_5(%arg0: i32, %arg1: i32) -> (i32, i32) {
    %c0_i32 = arith.constant 0 : i32
    %c0_i32_0 = arith.constant 0 : i32
    %c0_i32_1 = arith.constant 0 : i32
    return %c0_i32, %c0_i32_0 : i32, i32
  }
  func.func @transform_6(%arg0: i32, %arg1: i32) -> (i32, i32) {
    %c0_i32 = arith.constant 0 : i32
    %c0_i32_0 = arith.constant 0 : i32
    %c0_i32_1 = arith.constant 0 : i32
    return %c0_i32, %c0_i32_0 : i32, i32
  }
  func.func @transform_7(%arg0: i32, %arg1: i32) -> (i32, i32) {
    %c0_i32 = arith.constant 0 : i32
    %c0_i32_0 = arith.constant 0 : i32
    %c0_i32_1 = arith.constant 0 : i32
    return %c0_i32, %c0_i32_0 : i32, i32
  }
  func.func @transform_8(%arg0: i32, %arg1: i32) -> (i32, i32) {
    %c0_i32 = arith.constant 0 : i32
    %c0_i32_0 = arith.constant 0 : i32
    %c0_i32_1 = arith.constant 0 : i32
    return %c0_i32, %c0_i32_0 : i32, i32
  }
  func.func @transform_9(%arg0: i32, %arg1: i32) -> (i32, i32) {
    %c0_i32 = arith.constant 0 : i32
    %c0_i32_0 = arith.constant 0 : i32
    return %c0_i32, %arg1 : i32, i32
  }
  func.func @transform_10(%arg0: i32, %arg1: i32) -> (i32, i32) {
    %c0_i32 = arith.constant 0 : i32
    %c0_i32_0 = arith.constant 0 : i32
    return %c0_i32, %arg1 : i32, i32
  }
  func.func @transform_11(%arg0: i32, %arg1: i32) -> (i32, i32) {
    %c0_i32 = arith.constant 0 : i32
    return %arg0, %arg1 : i32, i32
  }
}

module attributes {stable_mosaic.version = 11 : i64} {
  func.func @mlm_head_kernel(%arg0: i32, %arg1: i32, %arg2: memref<208x128xbf16, #tpu.memory_space<vmem>>, %arg3: memref<128x128xbf16, #tpu.memory_space<vmem>>, %arg4: memref<1x128xf32, #tpu.memory_space<vmem>>, %arg5: memref<1x128xf32, #tpu.memory_space<vmem>>, %arg6: memref<1x128xf32, #tpu.memory_space<vmem>>, %arg7: memref<128x128xbf16, #tpu.memory_space<vmem>>, %arg8: memref<1x128xf32, #tpu.memory_space<vmem>>, %arg9: memref<1x128xf32, #tpu.memory_space<vmem>>, %arg10: memref<1x128xf32, #tpu.memory_space<vmem>>, %arg11: memref<128x1024xbf16, #tpu.memory_space<vmem>>, %arg12: memref<1x1024xf32, #tpu.memory_space<vmem>>, %arg13: memref<208x1024xbf16, #tpu.memory_space<vmem>>, %arg14: memref<208x128xbf16, #tpu.memory_space<vmem>>) attributes {dimension_semantics = [#tpu.dimension_semantics<parallel>, #tpu.dimension_semantics<arbitrary>], iteration_bounds = array<i64: 1, 1>, scalar_prefetch = 0 : i64, scratch_operands = 1 : i64, tpu.core_type = #tpu.core_type<tc>, window_params = [{transform_indices = @transform_0, window_bounds = array<i64: 208, 128>}, {pipeline_mode = #tpu.pipeline_mode<synchronous>, transform_indices = @transform_1, window_bounds = array<i64: 128, 128>}, {pipeline_mode = #tpu.pipeline_mode<synchronous>, transform_indices = @transform_2, window_bounds = array<i64: 1, 128>}, {pipeline_mode = #tpu.pipeline_mode<synchronous>, transform_indices = @transform_3, window_bounds = array<i64: 1, 128>}, {pipeline_mode = #tpu.pipeline_mode<synchronous>, transform_indices = @transform_4, window_bounds = array<i64: 1, 128>}, {pipeline_mode = #tpu.pipeline_mode<synchronous>, transform_indices = @transform_5, window_bounds = array<i64: 128, 128>}, {pipeline_mode = #tpu.pipeline_mode<synchronous>, transform_indices = @transform_6, window_bounds = array<i64: 1, 128>}, {pipeline_mode = #tpu.pipeline_mode<synchronous>, transform_indices = @transform_7, window_bounds = array<i64: 1, 128>}, {pipeline_mode = #tpu.pipeline_mode<synchronous>, transform_indices = @transform_8, window_bounds = array<i64: 1, 128>}, {transform_indices = @transform_9, window_bounds = array<i64: 128, 1024>}, {transform_indices = @transform_10, window_bounds = array<i64: 1, 1024>}, {transform_indices = @transform_11, window_bounds = array<i64: 208, 1024>}]} {
    %c0_i32 = arith.constant 0 : i32
    %0 = arith.cmpi eq, %arg1, %c0_i32 : i32
    %1 = arith.extui %0 : i1 to i32
    %c0_i32_0 = arith.constant 0 : i32
    %2 = arith.cmpi ne, %1, %c0_i32_0 : i32
    scf.if %2 {
      %c0_8 = arith.constant 0 : index
      %c0_9 = arith.constant 0 : index
      %11 = vector.load %arg2[%c0_8, %c0_9] : memref<208x128xbf16, #tpu.memory_space<vmem>>, vector<208x128xbf16>
      %c0_10 = arith.constant 0 : index
      %c0_11 = arith.constant 0 : index
      %12 = vector.load %arg3[%c0_10, %c0_11] : memref<128x128xbf16, #tpu.memory_space<vmem>>, vector<128x128xbf16>
      %cst_12 = arith.constant dense<0.000000e+00> : vector<208x128xf32>
      %13 = tpu.matmul %11, %12, %cst_12 {dimension_numbers = #tpu.dot_dimension_numbers<[1], [0], [0], [1], [0, 0, 1, 1], [], []>} : vector<208x128xbf16>, vector<128x128xbf16>, vector<208x128xf32> -> vector<208x128xf32>
      %c0_13 = arith.constant 0 : index
      %c0_14 = arith.constant 0 : index
      %14 = vector.load %arg4[%c0_13, %c0_14] : memref<1x128xf32, #tpu.memory_space<vmem>>, vector<1x128xf32>
      %15 = vector.broadcast %14 : vector<1x128xf32> to vector<208x128xf32>
      %16 = arith.addf %13, %15 : vector<208x128xf32>
      %cst_15 = arith.constant 5.000000e-01 : f32
      %17 = vector.broadcast %cst_15 : f32 to vector<208x128xf32>
      %18 = arith.mulf %17, %16 : vector<208x128xf32>
      %cst_16 = arith.constant 2.000000e+00 : f32
      %19 = math.sqrt %cst_16 : f32
      %20 = vector.broadcast %19 : f32 to vector<208x128xf32>
      %21 = arith.divf %16, %20 : vector<208x128xf32>
      %22 = math.erf %21 : vector<208x128xf32>
      %cst_17 = arith.constant 1.000000e+00 : f32
      %23 = vector.broadcast %cst_17 : f32 to vector<208x128xf32>
      %24 = arith.addf %23, %22 : vector<208x128xf32>
      %25 = arith.mulf %18, %24 : vector<208x128xf32>
      %c0_18 = arith.constant 0 : index
      %c0_19 = arith.constant 0 : index
      %26 = vector.load %arg5[%c0_18, %c0_19] : memref<1x128xf32, #tpu.memory_space<vmem>>, vector<1x128xf32>
      %c0_20 = arith.constant 0 : index
      %c0_21 = arith.constant 0 : index
      %27 = vector.load %arg6[%c0_20, %c0_21] : memref<1x128xf32, #tpu.memory_space<vmem>>, vector<1x128xf32>
      %cst_22 = arith.constant dense<0.000000e+00> : vector<208xf32>
      %28 = vector.multi_reduction <add>, %25, %cst_22 [1] : vector<208x128xf32> to vector<208xf32>
      %29 = vector.shape_cast %28 : vector<208xf32> to vector<208x1xf32>
      %cst_23 = arith.constant 1.280000e+02 : f32
      %30 = vector.broadcast %cst_23 : f32 to vector<208x1xf32>
      %31 = arith.divf %29, %30 : vector<208x1xf32>
      %32 = vector.broadcast %31 : vector<208x1xf32> to vector<208x128xf32>
      %33 = arith.subf %25, %32 : vector<208x128xf32>
      %34 = arith.mulf %33, %33 : vector<208x128xf32>
      %cst_24 = arith.constant dense<0.000000e+00> : vector<208xf32>
      %35 = vector.multi_reduction <add>, %34, %cst_24 [1] : vector<208x128xf32> to vector<208xf32>
      %36 = vector.shape_cast %35 : vector<208xf32> to vector<208x1xf32>
      %cst_25 = arith.constant 1.280000e+02 : f32
      %37 = vector.broadcast %cst_25 : f32 to vector<208x1xf32>
      %38 = arith.divf %36, %37 : vector<208x1xf32>
      %39 = vector.broadcast %31 : vector<208x1xf32> to vector<208x128xf32>
      %40 = arith.subf %25, %39 : vector<208x128xf32>
      %cst_26 = arith.constant 9.99999996E-13 : f32
      %41 = vector.broadcast %cst_26 : f32 to vector<208x1xf32>
      %42 = arith.addf %38, %41 : vector<208x1xf32>
      %43 = math.rsqrt %42 : vector<208x1xf32>
      %44 = vector.broadcast %43 : vector<208x1xf32> to vector<208x128xf32>
      %45 = arith.mulf %40, %44 : vector<208x128xf32>
      %46 = vector.broadcast %26 : vector<1x128xf32> to vector<208x128xf32>
      %47 = arith.mulf %45, %46 : vector<208x128xf32>
      %48 = vector.broadcast %27 : vector<1x128xf32> to vector<208x128xf32>
      %49 = arith.addf %47, %48 : vector<208x128xf32>
      %50 = arith.truncf %49 : vector<208x128xf32> to vector<208x128xbf16>
      %c0_27 = arith.constant 0 : index
      %c0_28 = arith.constant 0 : index
      %51 = vector.load %arg7[%c0_27, %c0_28] : memref<128x128xbf16, #tpu.memory_space<vmem>>, vector<128x128xbf16>
      %cst_29 = arith.constant dense<0.000000e+00> : vector<208x128xf32>
      %52 = tpu.matmul %50, %51, %cst_29 {dimension_numbers = #tpu.dot_dimension_numbers<[1], [0], [0], [1], [0, 0, 1, 1], [], []>} : vector<208x128xbf16>, vector<128x128xbf16>, vector<208x128xf32> -> vector<208x128xf32>
      %c0_30 = arith.constant 0 : index
      %c0_31 = arith.constant 0 : index
      %53 = vector.load %arg8[%c0_30, %c0_31] : memref<1x128xf32, #tpu.memory_space<vmem>>, vector<1x128xf32>
      %54 = vector.broadcast %53 : vector<1x128xf32> to vector<208x128xf32>
      %55 = arith.addf %52, %54 : vector<208x128xf32>
      %cst_32 = arith.constant 5.000000e-01 : f32
      %56 = vector.broadcast %cst_32 : f32 to vector<208x128xf32>
      %57 = arith.mulf %56, %55 : vector<208x128xf32>
      %cst_33 = arith.constant 2.000000e+00 : f32
      %58 = math.sqrt %cst_33 : f32
      %59 = vector.broadcast %58 : f32 to vector<208x128xf32>
      %60 = arith.divf %55, %59 : vector<208x128xf32>
      %61 = math.erf %60 : vector<208x128xf32>
      %cst_34 = arith.constant 1.000000e+00 : f32
      %62 = vector.broadcast %cst_34 : f32 to vector<208x128xf32>
      %63 = arith.addf %62, %61 : vector<208x128xf32>
      %64 = arith.mulf %57, %63 : vector<208x128xf32>
      %c0_35 = arith.constant 0 : index
      %c0_36 = arith.constant 0 : index
      %65 = vector.load %arg9[%c0_35, %c0_36] : memref<1x128xf32, #tpu.memory_space<vmem>>, vector<1x128xf32>
      %c0_37 = arith.constant 0 : index
      %c0_38 = arith.constant 0 : index
      %66 = vector.load %arg10[%c0_37, %c0_38] : memref<1x128xf32, #tpu.memory_space<vmem>>, vector<1x128xf32>
      %cst_39 = arith.constant dense<0.000000e+00> : vector<208xf32>
      %67 = vector.multi_reduction <add>, %64, %cst_39 [1] : vector<208x128xf32> to vector<208xf32>
      %68 = vector.shape_cast %67 : vector<208xf32> to vector<208x1xf32>
      %cst_40 = arith.constant 1.280000e+02 : f32
      %69 = vector.broadcast %cst_40 : f32 to vector<208x1xf32>
      %70 = arith.divf %68, %69 : vector<208x1xf32>
      %71 = vector.broadcast %70 : vector<208x1xf32> to vector<208x128xf32>
      %72 = arith.subf %64, %71 : vector<208x128xf32>
      %73 = arith.mulf %72, %72 : vector<208x128xf32>
      %cst_41 = arith.constant dense<0.000000e+00> : vector<208xf32>
      %74 = vector.multi_reduction <add>, %73, %cst_41 [1] : vector<208x128xf32> to vector<208xf32>
      %75 = vector.shape_cast %74 : vector<208xf32> to vector<208x1xf32>
      %cst_42 = arith.constant 1.280000e+02 : f32
      %76 = vector.broadcast %cst_42 : f32 to vector<208x1xf32>
      %77 = arith.divf %75, %76 : vector<208x1xf32>
      %78 = vector.broadcast %70 : vector<208x1xf32> to vector<208x128xf32>
      %79 = arith.subf %64, %78 : vector<208x128xf32>
      %cst_43 = arith.constant 9.99999996E-13 : f32
      %80 = vector.broadcast %cst_43 : f32 to vector<208x1xf32>
      %81 = arith.addf %77, %80 : vector<208x1xf32>
      %82 = math.rsqrt %81 : vector<208x1xf32>
      %83 = vector.broadcast %82 : vector<208x1xf32> to vector<208x128xf32>
      %84 = arith.mulf %79, %83 : vector<208x128xf32>
      %85 = vector.broadcast %65 : vector<1x128xf32> to vector<208x128xf32>
      %86 = arith.mulf %84, %85 : vector<208x128xf32>
      %87 = vector.broadcast %66 : vector<1x128xf32> to vector<208x128xf32>
      %88 = arith.addf %86, %87 : vector<208x128xf32>
      %89 = arith.truncf %88 : vector<208x128xf32> to vector<208x128xbf16>
      %c0_44 = arith.constant 0 : index
      %c0_45 = arith.constant 0 : index
      %90 = vector.load %arg14[%c0_44, %c0_45] : memref<208x128xbf16, #tpu.memory_space<vmem>>, vector<208x128xbf16>
      tpu.vector_store %arg14[%c0_44, %c0_45], %89 {strides = array<i32>} : memref<208x128xbf16, #tpu.memory_space<vmem>>, vector<208x128xbf16>,
    } else {
    }
    %c0 = arith.constant 0 : index
    %c0_1 = arith.constant 0 : index
    %3 = vector.load %arg14[%c0, %c0_1] : memref<208x128xbf16, #tpu.memory_space<vmem>>, vector<208x128xbf16>
    %c0_2 = arith.constant 0 : index
    %c0_3 = arith.constant 0 : index
    %4 = vector.load %arg11[%c0_2, %c0_3] : memref<128x1024xbf16, #tpu.memory_space<vmem>>, vector<128x1024xbf16>
    %cst = arith.constant dense<0.000000e+00> : vector<208x1024xf32>
    %5 = tpu.matmul %3, %4, %cst {dimension_numbers = #tpu.dot_dimension_numbers<[1], [0], [0], [1], [0, 0, 1, 1], [], []>} : vector<208x128xbf16>, vector<128x1024xbf16>, vector<208x1024xf32> -> vector<208x1024xf32>
    %c0_4 = arith.constant 0 : index
    %c0_5 = arith.constant 0 : index
    %6 = vector.load %arg12[%c0_4, %c0_5] : memref<1x1024xf32, #tpu.memory_space<vmem>>, vector<1x1024xf32>
    %7 = vector.broadcast %6 : vector<1x1024xf32> to vector<208x1024xf32>
    %8 = arith.addf %5, %7 : vector<208x1024xf32>
    %9 = arith.truncf %8 : vector<208x1024xf32> to vector<208x1024xbf16>
    %c0_6 = arith.constant 0 : index
    %c0_7 = arith.constant 0 : index
    %10 = vector.load %arg13[%c0_6, %c0_7] : memref<208x1024xbf16, #tpu.memory_space<vmem>>, vector<208x1024xbf16>
    tpu.vector_store %arg13[%c0_6, %c0_7], %9 {strides = array<i32>} : memref<208x1024xbf16, #tpu.memory_space<vmem>>, vector<208x1024xbf16>,
    return
  }
  func.func @transform_0(%arg0: i32, %arg1: i32) -> (i32, i32) {
    %c0_i32 = arith.constant 0 : i32
    %c0_i32_0 = arith.constant 0 : i32
    return %arg0, %c0_i32 : i32, i32
  }
  func.func @transform_1(%arg0: i32, %arg1: i32) -> (i32, i32) {
    %c0_i32 = arith.constant 0 : i32
    %c0_i32_0 = arith.constant 0 : i32
    %c0_i32_1 = arith.constant 0 : i32
    return %c0_i32, %c0_i32_0 : i32, i32
  }
  func.func @transform_2(%arg0: i32, %arg1: i32) -> (i32, i32) {
    %c0_i32 = arith.constant 0 : i32
    %c0_i32_0 = arith.constant 0 : i32
    %c0_i32_1 = arith.constant 0 : i32
    return %c0_i32, %c0_i32_0 : i32, i32
  }
  func.func @transform_3(%arg0: i32, %arg1: i32) -> (i32, i32) {
    %c0_i32 = arith.constant 0 : i32
    %c0_i32_0 = arith.constant 0 : i32
    %c0_i32_1 = arith.constant 0 : i32
    return %c0_i32, %c0_i32_0 : i32, i32
  }
  func.func @transform_4(%arg0: i32, %arg1: i32) -> (i32, i32) {
    %c0_i32 = arith.constant 0 : i32
    %c0_i32_0 = arith.constant 0 : i32
    %c0_i32_1 = arith.constant 0 : i32
    return %c0_i32, %c0_i32_0 : i32, i32
  }
  func.func @transform_5(%arg0: i32, %arg1: i32) -> (i32, i32) {
    %c0_i32 = arith.constant 0 : i32
    %c0_i32_0 = arith.constant 0 : i32
    %c0_i32_1 = arith.constant 0 : i32
    return %c0_i32, %c0_i32_0 : i32, i32
  }
  func.func @transform_6(%arg0: i32, %arg1: i32) -> (i32, i32) {
    %c0_i32 = arith.constant 0 : i32
    %c0_i32_0 = arith.constant 0 : i32
    %c0_i32_1 = arith.constant 0 : i32
    return %c0_i32, %c0_i32_0 : i32, i32
  }
  func.func @transform_7(%arg0: i32, %arg1: i32) -> (i32, i32) {
    %c0_i32 = arith.constant 0 : i32
    %c0_i32_0 = arith.constant 0 : i32
    %c0_i32_1 = arith.constant 0 : i32
    return %c0_i32, %c0_i32_0 : i32, i32
  }
  func.func @transform_8(%arg0: i32, %arg1: i32) -> (i32, i32) {
    %c0_i32 = arith.constant 0 : i32
    %c0_i32_0 = arith.constant 0 : i32
    %c0_i32_1 = arith.constant 0 : i32
    return %c0_i32, %c0_i32_0 : i32, i32
  }
  func.func @transform_9(%arg0: i32, %arg1: i32) -> (i32, i32) {
    %c0_i32 = arith.constant 0 : i32
    %c0_i32_0 = arith.constant 0 : i32
    return %c0_i32, %arg1 : i32, i32
  }
  func.func @transform_10(%arg0: i32, %arg1: i32) -> (i32, i32) {
    %c0_i32 = arith.constant 0 : i32
    %c0_i32_0 = arith.constant 0 : i32
    return %c0_i32, %arg1 : i32, i32
  }
  func.func @transform_11(%arg0: i32, %arg1: i32) -> (i32, i32) {
    %c0_i32 = arith.constant 0 : i32
    return %arg0, %arg1 : i32, i32
  }
}

</mosaic_0001>

<bundles_post_ra>
// kernel: tpu_custom_call.1
= control target key start
LH: loop header
LB: loop body
LE: loop exit
PB: predicated region body
PF: predicated region fallthrough
CT: control target
= control target key end

     0   :  { %16 = vsyncpa [#allocation4], 0  ;;  %s5866_s0 = inlined_call_operand.hbm [shape: bf16[208,128], index: 0, kind: input, shape index: {}]   ;;  %s5867_s1 = inlined_call_operand.hbm [shape: bf16[128,128], index: 1, kind: input, shape index: {}]   ;;  %s5868_s2 = inlined_call_operand.vmem [shape: f32[1,128], index: 2, kind: input, shape index: {}]   ;;  %s5869_s3 = inlined_call_operand.vmem [shape: f32[1,128], index: 3, kind: input, shape index: {}]   ;;  %s5870_s4 = inlined_call_operand.vmem [shape: f32[1,128], index: 4, kind: input, shape index: {}]   ;;  %s5871_s5 = inlined_call_operand.hbm [shape: bf16[128,128], index: 5, kind: input, shape index: {}]   ;;  %s5872_s6 = inlined_call_operand.vmem [shape: f32[1,128], index: 6, kind: input, shape index: {}]   ;;  %s5873_s7 = inlined_call_operand.vmem [shape: f32[1,128], index: 7, kind: input, shape index: {}]   ;;  %s5874_s8 = inlined_call_operand.vmem [shape: f32[1,128], index: 8, kind: input, shape index: {}]   ;;  %s5875_s9 = inlined_call_operand.hbm [shape: bf16[128,1024], index: 9, kind: input, shape index: {}]   ;;  %s5876_s10 = inlined_call_operand.vmem [shape: f32[1,1024], index: 10, kind: input, shape index: {}]   ;;  %s5877_s11 = inlined_call_operand.hbm [shape: bf16[200,1000], index: 11, kind: output, shape index: {}]  }
   0x1   :  { %17 = vsyncpa [#allocation7], 0 }
   0x2   :  { %18 = vsyncpa [#allocation10], 0 }
   0x3   :  { %19 = vsyncpa [#allocation5], 0  ;;  %s4654_s17 = smov [#allocation6]   ;;  %s4655_s19 = smov [#allocation3]  }
   0x4   :  { %s37_s18 = sshll.u32 %s4654_s17, 4  ;;  %s25_s20 = sshll.u32 %s4655_s19, 4  ;;  %s38_s18 = int_to_ptr.vmem [resolvable:$true] %s37_s18  ;;  %s26_s20 = int_to_ptr.vmem [resolvable:$true] %s25_s20 }
   0x5   :  { %s4554_s21 = scalar_lea.vmem %s38_s18, 1024  ;;  %p4559_p1 = scmp.lt.s32.totalorder %s38_s18, %s38_s18 }
   0x6   :  { %p4555_p0 = scmp.ne.s32.totalorder %s38_s18, %s4554_s21  ;;  %p4560_p2 = scmp.lt.s32.totalorder %s4554_s21, %s4554_s21 }
   0x8   :  { %p4561_p3 = por %p4560_p2, %p4559_p1 }
   0xa   :  { %p4562_p4 = pnand %p4561_p3, %p4555_p0 }
   0xc   :  { %4565 = shalt.err (!%p4562_p4)
}
   0xd   :  { %s4656_s22 = smov 64   ;;  %s4657_s23 = smov 4  }
   0xe   :  { %43 = dma.hbm_to_vmem [thread:$0]  %s5867_s1, 1024, %s38_s18, [#allocation7], %s4656_s22, %s4656_s22, %s4657_s23  }
   0xf   :  { %s4574_s26 = scalar_lea.vmem %s26_s20, 1664  ;;  %p4579_p6 = scmp.lt.s32.totalorder %s26_s20, %s26_s20 }
  0x10   :  { %p4575_p5 = scmp.ne.s32.totalorder %s26_s20, %s4574_s26  ;;  %p4580_p7 = scmp.lt.s32.totalorder %s4574_s26, %s4574_s26 }
  0x12   :  { %p4581_p8 = por %p4580_p7, %p4579_p6 }
  0x14   :  { %p4582_p9 = pnand %p4581_p8, %p4575_p5 }
  0x16   :  { %4585 = shalt.err (!%p4582_p9)
}
  0x17   :  { %31 = dma.hbm_to_vmem [thread:$0]  %s5866_s0, 1664, %s26_s20, [#allocation4], %s4656_s22, %s4656_s22, %s4657_s23  }
  0x18   :  { %s4658_s29 = smov [#allocation8]   ;;  %s4659_s12 = smov [#allocation9]  }
  0x19   :  { %s55_s30 = sshll.u32 %s4658_s29, 4  ;;  %s73_s13 = sshll.u32 %s4659_s12, 4  ;;  %s56_s30 = int_to_ptr.vmem [resolvable:$true] %s55_s30  ;;  %s74_s13 = int_to_ptr.vmem [resolvable:$true] %s73_s13 }
  0x1a   :  { %s4594_s14 = scalar_lea.vmem %s56_s30, 1024  ;;  %p4599_p11 = scmp.lt.s32.totalorder %s56_s30, %s56_s30 }
  0x1b   :  { %p4595_p10 = scmp.ne.s32.totalorder %s56_s30, %s4594_s14  ;;  %p4600_p12 = scmp.lt.s32.totalorder %s4594_s14, %s4594_s14 }
  0x1d   :  { %p4601_p13 = por %p4600_p12, %p4599_p11 }
  0x1f   :  { %p4602_p0 = pnand %p4601_p13, %p4595_p10 }
  0x21   :  { %4605 = shalt.err (!%p4602_p0)
}
  0x22   :  { %61 = dma.hbm_to_vmem [thread:$0]  %s5871_s5, 1024, %s56_s30, [#allocation7], %s4656_s22, %s4656_s22, %s4657_s23  }
  0x23   :  { %s4614_s16 = scalar_lea.vmem %s74_s13, 8192  ;;  %p4619_p2 = scmp.lt.s32.totalorder %s74_s13, %s74_s13 }
  0x24   :  { %p4615_p1 = scmp.ne.s32.totalorder %s74_s13, %s4614_s16  ;;  %p4620_p3 = scmp.lt.s32.totalorder %s4614_s16, %s4614_s16 }
  0x26   :  { %p4621_p4 = por %p4620_p3, %p4619_p2 }
  0x28   :  { %p4622_p5 = pnand %p4621_p4, %p4615_p1 }
  0x2a   :  { %4625 = shalt.err (!%p4622_p5)
}
  0x2b   :  { %s4660_s0 = smov 512   ;;  %s4661_s17 = smov 32  }
  0x2c   :  { %79 = dma.hbm_to_vmem [thread:$0]  %s5875_s9, 8192, %s74_s13, [#allocation10], %s4660_s0, %s4660_s0, %s4661_s17  }
  0x2d   :  { %4646 = dma.done.wait [#allocation4], 1664  }
  0x2e   :  { %4647 = vsyncadd [#allocation4], 4294965632 }
  0x2f   :  { %4648 = dma.done.wait [#allocation7], 2048  }
  0x30   :  { %4649 = vsyncadd [#allocation7], 4294965248 }
  0x31   :  { %4650 = dma.done.wait [#allocation10], 8192  }
  0x32   :  { %4651 = vsyncadd [#allocation10], 4294959104  ;;  %v4662_v0 = vmov 0.0   ;;  %vm4663_vm0 = vmmov 0   ;;  %v4296_v1 = vld [vmem:[#allocation6 + $0x38] sm:$0xff]   ;;  %v4297_v2 = vld [vmem:[#allocation6 + $0x30] sm:$0xff]  }
  0x33   :  { %4148 = vmatprep.subr.bf16.mxu0 %v4662_v0  ;;  %4164 = vmatprep.mubr.msk.bf16.mxu0 %vm4663_vm0, %v4662_v0  ;;  %v4298_v3 = vld [vmem:[#allocation6 + $0x28] sm:$0xff]   ;;  %v4299_v4 = vld [vmem:[#allocation6 + $0x20] sm:$0xff]   ;;  %v4300_v5 = vld [vmem:[#allocation6 + $0x18] sm:$0xff]  }
  0x34   :  { %4216 = vmatprep.subr.bf16.mxu1 %v4662_v0  ;;  %4232 = vmatprep.mubr.msk.bf16.mxu1 %vm4663_vm0, %v4662_v0  ;;  %v4301_v6 = vld [vmem:[#allocation6 + $0x10] sm:$0xff]   ;;  %v4302_v7 = vld [vmem:[#allocation6 + $0x8] sm:$0xff]   ;;  %v4303_v8 = vld [vmem:[#allocation6] sm:$0xff]  }
  0x35   :  { %4149 = vmatpush3.bf16.msra.mxu0 %v4296_v1  ;;  %v4304_v9 = vld [vmem:[#allocation3] sm:$0xff]   ;;  %v4305_v10 = vld [vmem:[#allocation3 + $0x8] sm:$0xff]   ;;  %v4306_v11 = vld [vmem:[#allocation3 + $0x10] sm:$0xff]  }
  0x36   :  { %4150 = vmatprep.subr.bf16.mxu0 %v4662_v0  ;;  %v4307_v12 = vld [vmem:[#allocation3 + $0x18] sm:$0xff]   ;;  %v4308_v13 = vld [vmem:[#allocation3 + $0x20] sm:$0xff]   ;;  %v4309_v14 = vld [vmem:[#allocation3 + $0x28] sm:$0xff]  }
  0x37   :  { %v4310_v15 = vld [vmem:[#allocation3 + $0x30] sm:$0xff]   ;;  %v4311_v16 = vld [vmem:[#allocation3 + $0x38] sm:$0xff]   ;;  %v4312_v17 = vld [vmem:[#allocation3 + $0x40] sm:$0xff]  }
  0x38   :  { %v4313_v18 = vld [vmem:[#allocation3 + $0x48] sm:$0xff]   ;;  %v4314_v19 = vld [vmem:[#allocation3 + $0x50] sm:$0xff]   ;;  %v4315_v20 = vld [vmem:[#allocation3 + $0x58] sm:$0xff]  }
  0x39   :  { %4151 = vmatpush3.bf16.msra.mxu0 %v4297_v2  ;;  %v4316_v21 = vld [vmem:[#allocation3 + $0x60] sm:$0xff]   ;;  %v4781_v22 = vld [vmem:[%s5868_s2] ss:$0 sm:$0xff] }
  0x3a   :  { %4152 = vmatprep.subr.bf16.mxu0 %v4662_v0 }
  0x3d   :  { %4153 = vmatpush3.bf16.msra.mxu0 %v4298_v3 }
  0x3e   :  { %4154 = vmatprep.subr.bf16.mxu0 %v4662_v0 }
  0x41   :  { %4155 = vmatpush3.bf16.msra.mxu0 %v4299_v4 }
  0x42   :  { %4156 = vmatprep.subr.bf16.mxu0 %v4662_v0 }
  0x45   :  { %4157 = vmatpush3.bf16.msra.mxu0 %v4300_v5 }
  0x46   :  { %4158 = vmatprep.subr.bf16.mxu0 %v4662_v0 }
  0x49   :  { %4159 = vmatpush3.bf16.msra.mxu0 %v4301_v6 }
  0x4a   :  { %4160 = vmatprep.subr.bf16.mxu0 %v4662_v0 }
  0x4d   :  { %4161 = vmatpush3.bf16.msra.mxu0 %v4302_v7 }
  0x4e   :  { %4162 = vmatprep.subr.bf16.mxu0 %v4662_v0 }
  0x51   :  { %4163 = vmatpush3.bf16.msra.mxu0 %v4303_v8 }
  0x54   :  { %4165 = vmatmul.mubr.bf16.vlgmr.msra.gmra.mxu0 %v4304_v9 }
  0x55   :  { %4168 = vmatprep.mubr.msk.bf16.mxu0 %vm4663_vm0, %v4662_v0 }
  0x5c   :  { %4169 = vmatmul.mubr.bf16.gmra.mxu0 %v4305_v10 }
  0x5d   :  { %4172 = vmatprep.mubr.msk.bf16.mxu0 %vm4663_vm0, %v4662_v0 }
  0x64   :  { %4173 = vmatmul.mubr.bf16.gmra.mxu0 %v4306_v11 }
  0x65   :  { %4176 = vmatprep.mubr.msk.bf16.mxu0 %vm4663_vm0, %v4662_v0 }
  0x6c   :  { %4177 = vmatmul.mubr.bf16.gmra.mxu0 %v4307_v12 }
  0x6d   :  { %4180 = vmatprep.mubr.msk.bf16.mxu0 %vm4663_vm0, %v4662_v0 }
  0x74   :  { %4181 = vmatmul.mubr.bf16.gmra.mxu0 %v4308_v13 }
  0x75   :  { %4184 = vmatprep.mubr.msk.bf16.mxu0 %vm4663_vm0, %v4662_v0 }
  0x7c   :  { %4185 = vmatmul.mubr.bf16.gmra.mxu0 %v4309_v14 }
  0x7d   :  { %4188 = vmatprep.mubr.msk.bf16.mxu0 %vm4663_vm0, %v4662_v0 }
  0x84   :  { %4189 = vmatmul.mubr.bf16.gmra.mxu0 %v4310_v15 }
  0x85   :  { %4192 = vmatprep.mubr.msk.bf16.mxu0 %vm4663_vm0, %v4662_v0 }
  0x8c   :  { %4193 = vmatmul.mubr.bf16.gmra.mxu0 %v4311_v16 }
  0x8d   :  { %4196 = vmatprep.mubr.msk.bf16.mxu0 %vm4663_vm0, %v4662_v0 }
  0x94   :  { %4197 = vmatmul.mubr.bf16.gmra.mxu0 %v4312_v17 }
  0x95   :  { %4200 = vmatprep.mubr.msk.bf16.mxu0 %vm4663_vm0, %v4662_v0 }
  0x9c   :  { %4201 = vmatmul.mubr.bf16.gmra.mxu0 %v4313_v18 }
  0x9d   :  { %4204 = vmatprep.mubr.msk.bf16.mxu0 %vm4663_vm0, %v4662_v0 }
  0xa4   :  { %4205 = vmatmul.mubr.bf16.gmra.mxu0 %v4314_v19 }
  0xa5   :  { %4208 = vmatprep.mubr.msk.bf16.mxu0 %vm4663_vm0, %v4662_v0 }
  0xac   :  { %4209 = vmatmul.mubr.bf16.gmra.mxu0 %v4315_v20 }
  0xad   :  { %4212 = vmatprep.mubr.msk.bf16.mxu0 %vm4663_vm0, %v4662_v0 }
  0xb4   :  { %4213 = vmatmul.mubr.bf16.gmra.mxu0 %v4316_v21 }
 0x114   :  { %v308_v23 = vpop.f32.mrf.mxu0 }
 0x115   :  { %v309_v24 = vadd.f32 %v4781_v22, %v308_v23 }
 0x116   :  { %v4166_v25 = vpop.f32.mrf.mxu0 }
 0x117   :  { %v438_v26 = vmul.f32 0.70710677, %v309_v24  ;;  %v411_v43 = vmul.f32 0.5, %v309_v24 }
 0x118   :  { %v311_v27 = vpop.f32.mrf.mxu0 }
 0x119   :  { %4338 = verf.f32 %v438_v26  ;;  %v312_v28 = vadd.f32 %v4781_v22, %v311_v27 }
 0x11a   :  { %v4167_v29 = vpop.f32.mrf.mxu0 }
 0x11b   :  { %v439_v30 = vmul.f32 0.70710677, %v312_v28  ;;  %v412_v51 = vmul.f32 0.5, %v312_v28 }
 0x11c   :  { %v316_v31 = vpop.f32.mrf.mxu0 }
 0x11d   :  { %4340 = verf.f32 %v439_v30  ;;  %v317_v32 = vadd.f32 %v4781_v22, %v316_v31 }
 0x11e   :  { %v4170_v33 = vpop.f32.mrf.mxu0 }
 0x11f   :  { %v440_v34 = vmul.f32 0.70710677, %v317_v32  ;;  %v413_v59 = vmul.f32 0.5, %v317_v32 }
 0x120   :  { %v319_v35 = vpop.f32.mrf.mxu0 }
 0x121   :  { %4342 = verf.f32 %v440_v34  ;;  %v320_v36 = vadd.f32 %v4781_v22, %v319_v35 }
 0x122   :  { %v4171_v37 = vpop.f32.mrf.mxu0 }
 0x123   :  { %v441_v38 = vmul.f32 0.70710677, %v320_v36  ;;  %v414_v4 = vmul.f32 0.5, %v320_v36 }
 0x124   :  { %v324_v39 = vpop.f32.mrf.mxu0 }
 0x125   :  { %4344 = verf.f32 %v441_v38  ;;  %v325_v40 = vadd.f32 %v4781_v22, %v324_v39 }
 0x126   :  { %v4339_v41 = vpop.eup %4338  ;;  %v4174_v42 = vpop.f32.mrf.mxu0 }
 0x127   :  { %v442_v44 = vmul.f32 0.70710677, %v325_v40  ;;  %v490_v45 = vadd.f32 1.0, %v4339_v41  ;;  %v415_v12 = vmul.f32 0.5, %v325_v40 }
 0x128   :  { %v327_v46 = vpop.f32.mrf.mxu0 }
 0x129   :  { %4346 = verf.f32 %v442_v44  ;;  %v328_v47 = vadd.f32 %v4781_v22, %v327_v46  ;;  %v4789_v48 = vmul.f32 %v490_v45, %v411_v43 }
 0x12a   :  { %v4341_v49 = vpop.eup %4340  ;;  %v4175_v50 = vpop.f32.mrf.mxu0 }
 0x12b   :  { %v443_v52 = vmul.f32 0.70710677, %v328_v47  ;;  %544 = vadd.xlane.f32.xlu0 %v4789_v48  ;;  %v491_v53 = vadd.f32 1.0, %v4341_v49  ;;  %v416_v20 = vmul.f32 0.5, %v328_v47 }
 0x12c   :  { %v332_v54 = vpop.f32.mrf.mxu0 }
 0x12d   :  { %4348 = verf.f32 %v443_v52  ;;  %v333_v55 = vadd.f32 %v4781_v22, %v332_v54  ;;  %v4793_v56 = vmul.f32 %v491_v53, %v412_v51 }
 0x12e   :  { %v4343_v57 = vpop.eup %4342  ;;  %v4178_v58 = vpop.f32.mrf.mxu0 }
 0x12f   :  { %v444_v60 = vmul.f32 0.70710677, %v333_v55  ;;  %546 = vadd.xlane.f32.xlu0 %v4793_v56  ;;  %v492_v61 = vadd.f32 1.0, %v4343_v57  ;;  %v417_v25 = vmul.f32 0.5, %v333_v55 }
 0x130   :  { %v335_v62 = vpop.f32.mrf.mxu0 }
 0x131   :  { %4350 = verf.f32 %v444_v60  ;;  %v336_v63 = vadd.f32 %v4781_v22, %v335_v62  ;;  %v4797_v1 = vmul.f32 %v492_v61, %v413_v59 }
 0x132   :  { %v4345_v2 = vpop.eup %4344  ;;  %v4179_v3 = vpop.f32.mrf.mxu0 }
 0x133   :  { %v445_v5 = vmul.f32 0.70710677, %v336_v63  ;;  %548 = vadd.xlane.f32.xlu1 %v4797_v1  ;;  %v493_v6 = vadd.f32 1.0, %v4345_v2  ;;  %v418_v33 = vmul.f32 0.5, %v336_v63 }
 0x134   :  { %v340_v7 = vpop.f32.mrf.mxu0 }
 0x135   :  { %4352 = verf.f32 %v445_v5  ;;  %v341_v8 = vadd.f32 %v4781_v22, %v340_v7  ;;  %v4801_v9 = vmul.f32 %v493_v6, %v414_v4 }
 0x136   :  { %v4347_v10 = vpop.eup %4346  ;;  %v4182_v11 = vpop.f32.mrf.mxu0 }
 0x137   :  { %v446_v13 = vmul.f32 0.70710677, %v341_v8  ;;  %550 = vadd.xlane.f32.xlu1 %v4801_v9  ;;  %v494_v14 = vadd.f32 1.0, %v4347_v10  ;;  %v419_v41 = vmul.f32 0.5, %v341_v8 }
 0x138   :  { %v343_v15 = vpop.f32.mrf.mxu0 }
 0x139   :  { %4354 = verf.f32 %v446_v13  ;;  %v344_v16 = vadd.f32 %v4781_v22, %v343_v15  ;;  %v4805_v17 = vmul.f32 %v494_v14, %v415_v12 }
 0x13a   :  { %v4349_v18 = vpop.eup %4348  ;;  %v4183_v19 = vpop.f32.mrf.mxu0 }
 0x13b   :  { %v447_v21 = vmul.f32 0.70710677, %v344_v16  ;;  %552 = vadd.xlane.f32.xlu0 %v4805_v17  ;;  %v495_v23 = vadd.f32 1.0, %v4349_v18  ;;  %v420_v50 = vmul.f32 0.5, %v344_v16 }
 0x13c   :  { %v348_v24 = vpop.f32.mrf.mxu0 }
 0x13d   :  { %4356 = verf.f32 %v447_v21  ;;  %v349_v26 = vadd.f32 %v4781_v22, %v348_v24  ;;  %v4809_v27 = vmul.f32 %v495_v23, %v416_v20 }
 0x13e   :  { %v4351_v28 = vpop.eup %4350  ;;  %v4186_v29 = vpop.f32.mrf.mxu0 }
 0x13f   :  { %v448_v30 = vmul.f32 0.70710677, %v349_v26  ;;  %554 = vadd.xlane.f32.xlu1 %v4809_v27  ;;  %v496_v31 = vadd.f32 1.0, %v4351_v28  ;;  %v421_v59 = vmul.f32 0.5, %v349_v26 }
 0x140   :  { %v351_v32 = vpop.f32.mrf.mxu0 }
 0x141   :  { %4358 = verf.f32 %v448_v30  ;;  %v352_v34 = vadd.f32 %v4781_v22, %v351_v32  ;;  %v4813_v35 = vmul.f32 %v496_v31, %v417_v25 }
 0x142   :  { %v4353_v36 = vpop.eup %4352  ;;  %v4187_v37 = vpop.f32.mrf.mxu0 }
 0x143   :  { %v449_v38 = vmul.f32 0.70710677, %v352_v34  ;;  %556 = vadd.xlane.f32.xlu0 %v4813_v35  ;;  %v497_v39 = vadd.f32 1.0, %v4353_v36  ;;  %v422_v5 = vmul.f32 0.5, %v352_v34 }
 0x144   :  { %v356_v40 = vpop.f32.mrf.mxu0 }
 0x145   :  { %4360 = verf.f32 %v449_v38  ;;  %v357_v42 = vadd.f32 %v4781_v22, %v356_v40  ;;  %v4817_v43 = vmul.f32 %v497_v39, %v418_v33 }
 0x146   :  { %v4355_v44 = vpop.eup %4354  ;;  %v4190_v45 = vpop.f32.mrf.mxu0 }
 0x147   :  { %v450_v46 = vmul.f32 0.70710677, %v357_v42  ;;  %558 = vadd.xlane.f32.xlu1 %v4817_v43  ;;  %v498_v47 = vadd.f32 1.0, %v4355_v44  ;;  %v423_v14 = vmul.f32 0.5, %v357_v42 }
 0x148   :  { %v359_v49 = vpop.f32.mrf.mxu0 }
 0x149   :  { %4362 = verf.f32 %v450_v46  ;;  %v360_v51 = vadd.f32 %v4781_v22, %v359_v49  ;;  %v4821_v52 = vmul.f32 %v498_v47, %v419_v41 }
 0x14a   :  { %v4357_v53 = vpop.eup %4356  ;;  %v4191_v54 = vpop.f32.mrf.mxu0 }
 0x14b   :  { %v451_v55 = vmul.f32 0.70710677, %v360_v51  ;;  %560 = vadd.xlane.f32.xlu0 %v4821_v52  ;;  %v499_v57 = vadd.f32 1.0, %v4357_v53  ;;  %v424_v24 = vmul.f32 0.5, %v360_v51 }
 0x14c   :  { %v364_v58 = vpop.f32.mrf.mxu0 }
 0x14d   :  { %4364 = verf.f32 %v451_v55  ;;  %v365_v60 = vadd.f32 %v4781_v22, %v364_v58  ;;  %v4825_v61 = vmul.f32 %v499_v57, %v420_v50 }
 0x14e   :  { %v4359_v62 = vpop.eup %4358  ;;  %v4194_v63 = vpop.f32.mrf.mxu0 }
 0x14f   :  { %v452_v2 = vmul.f32 0.70710677, %v365_v60  ;;  %562 = vadd.xlane.f32.xlu1 %v4825_v61  ;;  %v500_v3 = vadd.f32 1.0, %v4359_v62  ;;  %v425_v33 = vmul.f32 0.5, %v365_v60 }
 0x150   :  { %v367_v4 = vpop.f32.mrf.mxu0 }
 0x151   :  { %4366 = verf.f32 %v452_v2  ;;  %v368_v6 = vadd.f32 %v4781_v22, %v367_v4  ;;  %v4829_v7 = vmul.f32 %v500_v3, %v421_v59 }
 0x152   :  { %v4361_v8 = vpop.eup %4360  ;;  %v4195_v10 = vpop.f32.mrf.mxu0 }
 0x153   :  { %v453_v11 = vmul.f32 0.70710677, %v368_v6  ;;  %564 = vadd.xlane.f32.xlu0 %v4829_v7  ;;  %v501_v12 = vadd.f32 1.0, %v4361_v8  ;;  %v426_v42 = vmul.f32 0.5, %v368_v6 }
 0x154   :  { %v372_v13 = vpop.f32.mrf.mxu0 }
 0x155   :  { %4368 = verf.f32 %v453_v11  ;;  %v373_v15 = vadd.f32 %v4781_v22, %v372_v13  ;;  %v4833_v16 = vmul.f32 %v501_v12, %v422_v5 }
 0x156   :  { %v4363_v18 = vpop.eup %4362  ;;  %v4198_v19 = vpop.f32.mrf.mxu0 }
 0x157   :  { %v454_v20 = vmul.f32 0.70710677, %v373_v15  ;;  %566 = vadd.xlane.f32.xlu1 %v4833_v16  ;;  %v502_v21 = vadd.f32 1.0, %v4363_v18  ;;  %v427_v53 = vmul.f32 0.5, %v373_v15 }
 0x158   :  { %v375_v23 = vpop.f32.mrf.mxu0 }
 0x159   :  { %4370 = verf.f32 %v454_v20  ;;  %v376_v25 = vadd.f32 %v4781_v22, %v375_v23  ;;  %v4837_v26 = vmul.f32 %v502_v21, %v423_v14 }
 0x15a   :  { %v4365_v28 = vpop.eup %4364  ;;  %v4199_v29 = vpop.f32.mrf.mxu0 }
 0x15b   :  { %v455_v30 = vmul.f32 0.70710677, %v376_v25  ;;  %568 = vadd.xlane.f32.xlu0 %v4837_v26  ;;  %v503_v31 = vadd.f32 1.0, %v4365_v28  ;;  %v428_v60 = vmul.f32 0.5, %v376_v25  ;;  %v4317_v28 = vld [vmem:[#allocation8 + $0x38] sm:$0xff]  }
 0x15c   :  { %v380_v32 = vpop.f32.mrf.mxu0  ;;  %4217 = vmatpush3.bf16.msra.mxu1 %v4317_v28 }
 0x15d   :  { %4372 = verf.f32 %v455_v30  ;;  %v381_v34 = vadd.f32 %v4781_v22, %v380_v32  ;;  %v4841_v36 = vmul.f32 %v503_v31, %v424_v24  ;;  %4218 = vmatprep.subr.bf16.mxu1 %v4662_v0 }
 0x15e   :  { %v4367_v37 = vpop.eup %4366  ;;  %v4202_v38 = vpop.f32.mrf.mxu0 }
 0x15f   :  { %v456_v39 = vmul.f32 0.70710677, %v381_v34  ;;  %570 = vadd.xlane.f32.xlu1 %v4841_v36  ;;  %v504_v40 = vadd.f32 1.0, %v4367_v37  ;;  %v429_v5 = vmul.f32 0.5, %v381_v34 }
 0x160   :  { %v383_v41 = vpop.f32.mrf.mxu0 }
 0x161   :  { %4374 = verf.f32 %v456_v39  ;;  %v384_v44 = vadd.f32 %v4781_v22, %v383_v41  ;;  %v4845_v45 = vmul.f32 %v504_v40, %v425_v33 }
 0x162   :  { %v4369_v46 = vpop.eup %4368  ;;  %v4203_v47 = vpop.f32.mrf.mxu0 }
 0x163   :  { %v457_v49 = vmul.f32 0.70710677, %v384_v44  ;;  %572 = vadd.xlane.f32.xlu0 %v4845_v45  ;;  %v505_v50 = vadd.f32 1.0, %v4369_v46  ;;  %v430_v13 = vmul.f32 0.5, %v384_v44 }
 0x164   :  { %v388_v51 = vpop.f32.mrf.mxu0 }
 0x165   :  { %4376 = verf.f32 %v457_v49  ;;  %v4848_v54 = vmul.f32 %v505_v50, %v426_v42  ;;  %v389_v29 = vadd.f32 %v4781_v22, %v388_v51 }
 0x166   :  { %v4371_v55 = vpop.eup %4370  ;;  %v4206_v57 = vpop.f32.mrf.mxu0 }
 0x167   :  { %574 = vadd.xlane.f32.xlu1 %v4848_v54  ;;  %v506_v58 = vadd.f32 1.0, %v4371_v55  ;;  %v458_v30 = vmul.f32 0.70710677, %v389_v29  ;;  %v431_v49 = vmul.f32 0.5, %v389_v29  ;;  %v4318_v29 = vld [vmem:[#allocation8 + $0x30] sm:$0xff]  }
 0x168   :  { %v391_v59 = vpop.f32.mrf.mxu0  ;;  %4219 = vmatpush3.bf16.msra.mxu1 %v4318_v29 }
 0x169   :  { %v4851_v62 = vmul.f32 %v506_v58, %v427_v53  ;;  %v392_v31 = vadd.f32 %v4781_v22, %v391_v59  ;;  %4378 = verf.f32 %v458_v30  ;;  %4220 = vmatprep.subr.bf16.mxu1 %v4662_v0 }
 0x16a   :  { %v4373_v63 = vpop.eup %4372  ;;  %v4207_v2 = vpop.f32.mrf.mxu0 }
 0x16b   :  { %576 = vadd.xlane.f32.xlu0 %v4851_v62  ;;  %v507_v3 = vadd.f32 1.0, %v4373_v63  ;;  %v459_v32 = vmul.f32 0.70710677, %v392_v31 }
 0x16c   :  { %v396_v4 = vpop.f32.mrf.mxu0 }
 0x16d   :  { %v4854_v6 = vmul.f32 %v507_v3, %v428_v60  ;;  %v397_v33 = vadd.f32 %v4781_v22, %v396_v4  ;;  %4380 = verf.f32 %v459_v32  ;;  %v432_v60 = vmul.f32 0.5, %v392_v31 }
 0x16e   :  { %v4375_v8 = vpop.eup %4374  ;;  %v4210_v10 = vpop.f32.mrf.mxu0 }
 0x16f   :  { %578 = vadd.xlane.f32.xlu1 %v4854_v6  ;;  %v508_v11 = vadd.f32 1.0, %v4375_v8  ;;  %v460_v34 = vmul.f32 0.70710677, %v397_v33  ;;  %v433_v8 = vmul.f32 0.5, %v397_v33 }
 0x170   :  { %v399_v12 = vpop.f32.mrf.mxu0 }
 0x171   :  { %v4857_v14 = vmul.f32 %v508_v11, %v429_v5  ;;  %v400_v37 = vadd.f32 %v4781_v22, %v399_v12  ;;  %4382 = verf.f32 %v460_v34 }
 0x172   :  { %v4377_v15 = vpop.eup %4376  ;;  %v4211_v18 = vpop.f32.mrf.mxu0 }
 0x173   :  { %580 = vadd.xlane.f32.xlu0 %v4857_v14  ;;  %v509_v19 = vadd.f32 1.0, %v4377_v15  ;;  %v461_v38 = vmul.f32 0.70710677, %v400_v37 }
 0x174   :  { %v404_v20 = vpop.f32.mrf.mxu0 }
 0x175   :  { %v4860_v21 = vmul.f32 %v509_v19, %v430_v13  ;;  %v405_v39 = vadd.f32 %v4781_v22, %v404_v20  ;;  %4384 = verf.f32 %v461_v38  ;;  %v434_v19 = vmul.f32 0.5, %v400_v37 }
 0x176   :  { %v4214_v23 = vpop.f32.mrf.mxu0  ;;  %v4379_v41 = vpop.eup %4378 }
 0x177   :  { %582 = vadd.xlane.f32.xlu1 %v4860_v21  ;;  %v462_v42 = vmul.f32 0.70710677, %v405_v39  ;;  %v510_v51 = vadd.f32 1.0, %v4379_v41  ;;  %v435_v31 = vmul.f32 0.5, %v405_v39 }
 0x178   :  { %v407_v24 = vpop.f32.mrf.mxu0 }
 0x179   :  { %v408_v44 = vadd.f32 %v4781_v22, %v407_v24  ;;  %4386 = verf.f32 %v462_v42  ;;  %v4878_v63 = vmul.f32 %v510_v51, %v431_v49  ;;  %v4320_v51 = vld [vmem:[#allocation8 + $0x20] sm:$0xff]  }
 0x17a   :  { %v4215_v25 = vpop.f32.mrf.mxu0  ;;  %v4381_v58 = vpop.eup %4380 }
 0x17b   :  { %v463_v53 = vmul.f32 0.70710677, %v408_v44  ;;  %v511_v3 = vadd.f32 1.0, %v4381_v58  ;;  %v436_v39 = vmul.f32 0.5, %v408_v44  ;;  %v4321_v58 = vld [vmem:[#allocation8 + $0x18] sm:$0xff]  }
 0x17d   :  { %4388 = verf.f32 %v463_v53  ;;  %v4888_v12 = vmul.f32 %v511_v3, %v432_v60 }
 0x17e   :  { %v4383_v4 = vpop.eup %4382 }
 0x17f   :  { %v512_v13 = vadd.f32 1.0, %v4383_v4 }
 0x181   :  { %v4896_v24 = vmul.f32 %v512_v13, %v433_v8 }
 0x182   :  { %v4385_v15 = vpop.eup %4384 }
 0x183   :  { %v513_v25 = vadd.f32 1.0, %v4385_v15  ;;  %v4324_v15 = vld [vmem:[#allocation8] sm:$0xff]  }
 0x185   :  { %v4904_v34 = vmul.f32 %v513_v25, %v434_v19 }
 0x186   :  { %v4387_v28 = vpop.eup %4386 }
 0x187   :  { %v514_v37 = vadd.f32 1.0, %v4387_v28 }
 0x189   :  { %v4913_v49 = vmul.f32 %v514_v37, %v435_v31 }
 0x18a   :  { %v4389_v38 = vpop.eup %4388 }
 0x1b4   :  { %v545_v40 = vpop.xlane.xlu0 %544 }
 0x1b5   :  { %v597_v46 = vmul.f32 0.0078125, %v545_v40  ;;  %v4319_v40 = vld [vmem:[#allocation8 + $0x28] sm:$0xff]  }
 0x1b6   :  { %4221 = vmatpush3.bf16.msra.mxu1 %v4319_v40 }
 0x1b7   :  { %v4871_v47 = vsub.f32 %v4789_v48, %v597_v46  ;;  %4222 = vmatprep.subr.bf16.mxu1 %v4662_v0 }
 0x1b8   :  { %v547_v50 = vpop.xlane.xlu0 %546 }
 0x1b9   :  { %v598_v55 = vmul.f32 0.0078125, %v547_v50  ;;  %v649_v57 = vmul.f32 %v4871_v47, %v4871_v47  ;;  %v515_v50 = vadd.f32 1.0, %v4389_v38 }
 0x1ba   :  { %4223 = vmatpush3.bf16.msra.mxu1 %v4320_v51 }
 0x1bb   :  { %675 = vadd.xlane.f32.xlu0 %v649_v57  ;;  %v4876_v59 = vsub.f32 %v4793_v56, %v598_v55  ;;  %v4922_v57 = vmul.f32 %v515_v50, %v436_v39  ;;  %4224 = vmatprep.subr.bf16.mxu1 %v4662_v0 }
 0x1bc   :  { %v549_v22 = vpop.xlane.xlu1 %548 }
 0x1bd   :  { %v599_v48 = vmul.f32 0.0078125, %v549_v22  ;;  %v650_v2 = vmul.f32 %v4876_v59, %v4876_v59 }
 0x1be   :  { %4225 = vmatpush3.bf16.msra.mxu1 %v4321_v58 }
 0x1bf   :  { %677 = vadd.xlane.f32.xlu1 %v650_v2  ;;  %584 = vadd.xlane.f32.xlu0 %v4878_v63  ;;  %v4884_v5 = vsub.f32 %v4797_v1, %v599_v48  ;;  %v4322_v2 = vld [vmem:[#allocation8 + $0x10] sm:$0xff]  }
 0x1c0   :  { %v551_v56 = vpop.xlane.xlu1 %550  ;;  %4226 = vmatprep.subr.bf16.mxu1 %v4662_v0 }
 0x1c1   :  { %v600_v10 = vmul.f32 0.0078125, %v551_v56  ;;  %v651_v11 = vmul.f32 %v4884_v5, %v4884_v5  ;;  %v4323_v56 = vld [vmem:[#allocation8 + $0x8] sm:$0xff]  }
 0x1c2   :  { %4227 = vmatpush3.bf16.msra.mxu1 %v4322_v2 }
 0x1c3   :  { %679 = vadd.xlane.f32.xlu0 %v651_v11  ;;  %586 = vadd.xlane.f32.xlu1 %v4888_v12  ;;  %v4892_v18 = vsub.f32 %v4801_v9, %v600_v10 }
 0x1c4   :  { %v553_v20 = vpop.xlane.xlu0 %552  ;;  %4228 = vmatprep.subr.bf16.mxu1 %v4662_v0 }
 0x1c5   :  { %v601_v1 = vmul.f32 0.0078125, %v553_v20  ;;  %v652_v23 = vmul.f32 %v4892_v18, %v4892_v18 }
 0x1c6   :  { %4229 = vmatpush3.bf16.msra.mxu1 %v4323_v56 }
 0x1c7   :  { %681 = vadd.xlane.f32.xlu1 %v652_v23  ;;  %588 = vadd.xlane.f32.xlu0 %v4896_v24  ;;  %v4900_v30 = vsub.f32 %v4805_v17, %v601_v1 }
 0x1c8   :  { %v555_v9 = vpop.xlane.xlu1 %554  ;;  %4230 = vmatprep.subr.bf16.mxu1 %v4662_v0 }
 0x1c9   :  { %v602_v32 = vmul.f32 0.0078125, %v555_v9  ;;  %v653_v33 = vmul.f32 %v4900_v30, %v4900_v30 }
 0x1ca   :  { %4231 = vmatpush3.bf16.msra.mxu1 %v4324_v15 }
 0x1cb   :  { %683 = vadd.xlane.f32.xlu0 %v653_v33  ;;  %590 = vadd.xlane.f32.xlu1 %v4904_v34  ;;  %v4909_v17 = vsub.f32 %v4809_v27, %v602_v32 }
 0x1cc   :  { %v557_v41 = vpop.xlane.xlu0 %556 }
 0x1cd   :  { %v603_v42 = vmul.f32 0.0078125, %v557_v41  ;;  %v654_v46 = vmul.f32 %v4909_v17, %v4909_v17 }
 0x1cf   :  { %v4917_v53 = vsub.f32 %v4813_v35, %v603_v42  ;;  %685 = vadd.xlane.f32.xlu1 %v654_v46  ;;  %592 = vadd.xlane.f32.xlu0 %v4913_v49 }
 0x1d0   :  { %v559_v27 = vpop.xlane.xlu1 %558 }
 0x1d1   :  { %v604_v44 = vmul.f32 0.0078125, %v559_v27  ;;  %v655_v55 = vmul.f32 %v4917_v53, %v4917_v53 }
 0x1d3   :  { %v4926_v60 = vsub.f32 %v4817_v43, %v604_v44  ;;  %687 = vadd.xlane.f32.xlu0 %v655_v55  ;;  %594 = vadd.xlane.f32.xlu1 %v4922_v57 }
 0x1d4   :  { %v561_v35 = vpop.xlane.xlu0 %560 }
 0x1d5   :  { %v605_v22 = vmul.f32 0.0078125, %v561_v35  ;;  %v656_v48 = vmul.f32 %v4926_v60, %v4926_v60 }
 0x1d7   :  { %v4933_v3 = vsub.f32 %v4821_v52, %v605_v22  ;;  %689 = vadd.xlane.f32.xlu1 %v656_v48 }
 0x1d8   :  { %v563_v4 = vpop.xlane.xlu1 %562 }
 0x1d9   :  { %v606_v43 = vmul.f32 0.0078125, %v563_v4  ;;  %v657_v8 = vmul.f32 %v4933_v3, %v4933_v3 }
 0x1db   :  { %v4939_v10 = vsub.f32 %v4825_v61, %v606_v43  ;;  %691 = vadd.xlane.f32.xlu0 %v657_v8 }
 0x1dc   :  { %v565_v11 = vpop.xlane.xlu0 %564 }
 0x1dd   :  { %v607_v13 = vmul.f32 0.0078125, %v565_v11  ;;  %v658_v52 = vmul.f32 %v4939_v10, %v4939_v10 }
 0x1df   :  { %v4945_v19 = vsub.f32 %v4829_v7, %v607_v13  ;;  %693 = vadd.xlane.f32.xlu1 %v658_v52 }
 0x1e0   :  { %v567_v20 = vpop.xlane.xlu1 %566 }
 0x1e1   :  { %v608_v1 = vmul.f32 0.0078125, %v567_v20  ;;  %v659_v61 = vmul.f32 %v4945_v19, %v4945_v19 }
 0x1e3   :  { %v4950_v23 = vsub.f32 %v4833_v16, %v608_v1  ;;  %695 = vadd.xlane.f32.xlu0 %v659_v61 }
 0x1e4   :  { %v569_v25 = vpop.xlane.xlu0 %568 }
 0x1e5   :  { %v609_v28 = vmul.f32 0.0078125, %v569_v25  ;;  %v660_v29 = vmul.f32 %v4950_v23, %v4950_v23 }
 0x1e7   :  { %v4955_v31 = vsub.f32 %v4837_v26, %v609_v28  ;;  %697 = vadd.xlane.f32.xlu1 %v660_v29 }
 0x1e8   :  { %v571_v7 = vpop.xlane.xlu1 %570 }
 0x1e9   :  { %v610_v9 = vmul.f32 0.0078125, %v571_v7  ;;  %v661_v32 = vmul.f32 %v4955_v31, %v4955_v31 }
 0x1eb   :  { %v4960_v33 = vsub.f32 %v4841_v36, %v610_v9  ;;  %699 = vadd.xlane.f32.xlu0 %v661_v32 }
 0x1ec   :  { %v573_v16 = vpop.xlane.xlu0 %572 }
 0x1ed   :  { %v611_v37 = vmul.f32 0.0078125, %v573_v16  ;;  %v662_v38 = vmul.f32 %v4960_v33, %v4960_v33 }
 0x1ef   :  { %v4965_v40 = vsub.f32 %v4845_v45, %v611_v37  ;;  %701 = vadd.xlane.f32.xlu1 %v662_v38 }
 0x1f0   :  { %v575_v26 = vpop.xlane.xlu1 %574 }
 0x1f1   :  { %v612_v39 = vmul.f32 0.0078125, %v575_v26  ;;  %v663_v41 = vmul.f32 %v4965_v40, %v4965_v40 }
 0x1f3   :  { %v4970_v42 = vsub.f32 %v4848_v54, %v612_v39  ;;  %703 = vadd.xlane.f32.xlu0 %v663_v41 }
 0x1f4   :  { %v577_v36 = vpop.xlane.xlu0 %576 }
 0x1f5   :  { %v613_v46 = vmul.f32 0.0078125, %v577_v36  ;;  %v664_v50 = vmul.f32 %v4970_v42, %v4970_v42 }
 0x1f7   :  { %v4975_v51 = vsub.f32 %v4851_v62, %v613_v46  ;;  %705 = vadd.xlane.f32.xlu1 %v664_v50 }
 0x1f8   :  { %v579_v45 = vpop.xlane.xlu1 %578 }
 0x1f9   :  { %v614_v27 = vmul.f32 0.0078125, %v579_v45  ;;  %v665_v44 = vmul.f32 %v4975_v51, %v4975_v51 }
 0x1fb   :  { %v4980_v55 = vsub.f32 %v4854_v6, %v614_v27  ;;  %707 = vadd.xlane.f32.xlu0 %v665_v44 }
 0x1fc   :  { %v581_v54 = vpop.xlane.xlu0 %580 }
 0x1fd   :  { %v615_v58 = vmul.f32 0.0078125, %v581_v54  ;;  %v666_v35 = vmul.f32 %v4980_v55, %v4980_v55 }
 0x1ff   :  { %v4985_v22 = vsub.f32 %v4857_v14, %v615_v58  ;;  %709 = vadd.xlane.f32.xlu1 %v666_v35 }
 0x200   :  { %v583_v62 = vpop.xlane.xlu1 %582 }
 0x201   :  { %v616_v48 = vmul.f32 0.0078125, %v583_v62  ;;  %v667_v2 = vmul.f32 %v4985_v22, %v4985_v22 }
 0x203   :  { %v4990_v4 = vsub.f32 %v4860_v21, %v616_v48  ;;  %711 = vadd.xlane.f32.xlu0 %v667_v2  ;;  %v5018_v48 = vld [vmem:[%s5869_s3] ss:$0 sm:$0xff] }
 0x205   :  { %v668_v6 = vmul.f32 %v4990_v4, %v4990_v4 }
 0x207   :  { %713 = vadd.xlane.f32.xlu1 %v668_v6 }
 0x244   :  { %v676_v43 = vpop.xlane.xlu0 %675 }
 0x245   :  { %v727_v8 = vmul.f32 0.0078125, %v676_v43 }
 0x247   :  { %v753_v56 = vadd.f32 1e-12, %v727_v8 }
 0x248   :  { %v678_v11 = vpop.xlane.xlu1 %677  ;;  %v585_v14 = vpop.xlane.xlu0 %584 }
 0x249   :  { %4390 = vrsqrt.f32 %v753_v56  ;;  %v728_v13 = vmul.f32 0.0078125, %v678_v11  ;;  %v617_v52 = vmul.f32 0.0078125, %v585_v14 }
 0x24b   :  { %v754_v15 = vadd.f32 1e-12, %v728_v13  ;;  %v4995_v20 = vsub.f32 %v4878_v63, %v617_v52  ;;  %v5030_v52 = vld [vmem:[%s5870_s4] ss:$0 sm:$0xff] }
 0x24c   :  { %v680_v1 = vpop.xlane.xlu0 %679  ;;  %v587_v21 = vpop.xlane.xlu1 %586 }
 0x24d   :  { %4392 = vrsqrt.f32 %v754_v15  ;;  %v729_v61 = vmul.f32 0.0078125, %v680_v1  ;;  %v618_v25 = vmul.f32 0.0078125, %v587_v21  ;;  %v669_v28 = vmul.f32 %v4995_v20, %v4995_v20 }
 0x24f   :  { %v755_v29 = vadd.f32 1e-12, %v729_v61  ;;  %v5000_v7 = vsub.f32 %v4888_v12, %v618_v25  ;;  %715 = vadd.xlane.f32.xlu0 %v669_v28 }
 0x250   :  { %v682_v9 = vpop.xlane.xlu1 %681  ;;  %v589_v32 = vpop.xlane.xlu0 %588 }
 0x251   :  { %4394 = vrsqrt.f32 %v755_v29  ;;  %v730_v16 = vmul.f32 0.0078125, %v682_v9  ;;  %v619_v37 = vmul.f32 0.0078125, %v589_v32  ;;  %v670_v63 = vmul.f32 %v5000_v7, %v5000_v7 }
 0x253   :  { %v756_v38 = vadd.f32 1e-12, %v730_v16  ;;  %v5005_v26 = vsub.f32 %v4896_v24, %v619_v37  ;;  %717 = vadd.xlane.f32.xlu1 %v670_v63 }
 0x254   :  { %v684_v39 = vpop.xlane.xlu0 %683  ;;  %v591_v41 = vpop.xlane.xlu1 %590 }
 0x255   :  { %4396 = vrsqrt.f32 %v756_v38  ;;  %v731_v36 = vmul.f32 0.0078125, %v684_v39  ;;  %v620_v12 = vmul.f32 0.0078125, %v591_v41  ;;  %v671_v46 = vmul.f32 %v5005_v26, %v5005_v26 }
 0x256   :  { %v4391_v50 = vpop.eup %4390 }
 0x257   :  { %v757_v45 = vadd.f32 1e-12, %v731_v36  ;;  %v5010_v27 = vsub.f32 %v4904_v34, %v620_v12  ;;  %719 = vadd.xlane.f32.xlu0 %v671_v46  ;;  %v805_v24 = vmul.f32 %v4391_v50, %v4871_v47 }
 0x258   :  { %v686_v44 = vpop.xlane.xlu1 %685  ;;  %v593_v54 = vpop.xlane.xlu0 %592 }
 0x259   :  { %4398 = vrsqrt.f32 %v757_v45  ;;  %v732_v58 = vmul.f32 0.0078125, %v686_v44  ;;  %v621_v35 = vmul.f32 0.0078125, %v593_v54  ;;  %v672_v62 = vmul.f32 %v5010_v27, %v5010_v27 }
 0x25a   :  { %v4393_v2 = vpop.eup %4392  ;;  %v837_v56 = vmul.f32 %v5018_v48, %v805_v24 }
 0x25b   :  { %v758_v6 = vadd.f32 1e-12, %v732_v58  ;;  %v5021_v34 = vsub.f32 %v4913_v49, %v621_v35  ;;  %721 = vadd.xlane.f32.xlu1 %v672_v62  ;;  %v806_v43 = vmul.f32 %v4393_v2, %v4876_v59 }
 0x25c   :  { %v688_v47 = vpop.xlane.xlu0 %687  ;;  %v595_v8 = vpop.xlane.xlu1 %594  ;;  %v869_v25 = vadd.f32 %v5030_v52, %v837_v56 }
 0x25d   :  { %4400 = vrsqrt.f32 %v758_v6  ;;  %v733_v11 = vmul.f32 0.0078125, %v688_v47  ;;  %v622_v14 = vmul.f32 0.0078125, %v595_v8  ;;  %v673_v13 = vmul.f32 %v5021_v34, %v5021_v34 }
 0x25e   :  { %v4395_v49 = vpop.eup %4394  ;;  %v838_v15 = vmul.f32 %v5018_v48, %v806_v43 }
 0x25f   :  { %v759_v1 = vadd.f32 1e-12, %v733_v11  ;;  %v5034_v59 = vsub.f32 %v4922_v57, %v622_v14  ;;  %723 = vadd.xlane.f32.xlu0 %v673_v13  ;;  %v807_v21 = vmul.f32 %v4395_v49, %v4884_v5 }
 0x260   :  { %v690_v61 = vpop.xlane.xlu1 %689  ;;  %v870_v28 = vadd.f32 %v5030_v52, %v838_v15 }
 0x261   :  { %4402 = vrsqrt.f32 %v759_v1  ;;  %v734_v29 = vmul.f32 0.0078125, %v690_v61  ;;  %v674_v9 = vmul.f32 %v5034_v59, %v5034_v59  ;;  %v839_v63 = vmul.f32 %v5018_v48, %v807_v21 }
 0x262   :  { %v4397_v32 = vpop.eup %4396  ;;  %v895_v16 = vpack.c.bf16 %v870_v28, %v869_v25 }
 0x263   :  { %v760_v37 = vadd.f32 1e-12, %v734_v29  ;;  %725 = vadd.xlane.f32.xlu1 %v674_v9  ;;  %v808_v57 = vmul.f32 %v4397_v32, %v4892_v18  ;;  %v871_v12 = vadd.f32 %v5030_v52, %v839_v63 }
 0x264   :  { %4233 = vmatmul.mubr.bf16.vlgmr.msra.gmra.mxu1 %v895_v16  ;;  %v692_v5 = vpop.xlane.xlu0 %691 }
 0x265   :  { %4404 = vrsqrt.f32 %v760_v37  ;;  %v735_v38 = vmul.f32 0.0078125, %v692_v5  ;;  %4236 = vmatprep.mubr.msk.bf16.mxu1 %vm4663_vm0, %v4662_v0  ;;  %v840_v39 = vmul.f32 %v5018_v48, %v808_v57 }
 0x266   :  { %v4399_v41 = vpop.eup %4398 }
 0x267   :  { %v761_v36 = vadd.f32 1e-12, %v735_v38  ;;  %v872_v46 = vadd.f32 %v5030_v52, %v840_v39  ;;  %v809_v50 = vmul.f32 %v4399_v41, %v4900_v30 }
 0x268   :  { %v694_v18 = vpop.xlane.xlu1 %693 }
 0x269   :  { %4406 = vrsqrt.f32 %v761_v36  ;;  %v736_v45 = vmul.f32 0.0078125, %v694_v18  ;;  %v896_v44 = vpack.c.bf16 %v872_v46, %v871_v12  ;;  %v841_v35 = vmul.f32 %v5018_v48, %v809_v50 }
 0x26a   :  { %v4401_v54 = vpop.eup %4400 }
 0x26b   :  { %v762_v24 = vadd.f32 1e-12, %v736_v45  ;;  %v810_v58 = vmul.f32 %v4401_v54, %v4909_v17  ;;  %v873_v47 = vadd.f32 %v5030_v52, %v841_v35 }
 0x26c   :  { %4237 = vmatmul.mubr.bf16.gmra.mxu1 %v896_v44  ;;  %v696_v62 = vpop.xlane.xlu0 %695 }
 0x26d   :  { %4408 = vrsqrt.f32 %v762_v24  ;;  %v737_v2 = vmul.f32 0.0078125, %v696_v62  ;;  %4240 = vmatprep.mubr.msk.bf16.mxu1 %vm4663_vm0, %v4662_v0  ;;  %v842_v6 = vmul.f32 %v5018_v48, %v810_v58 }
 0x26e   :  { %v4403_v30 = vpop.eup %4402 }
 0x26f   :  { %v763_v43 = vadd.f32 1e-12, %v737_v2  ;;  %v874_v8 = vadd.f32 %v5030_v52, %v842_v6  ;;  %v811_v56 = vmul.f32 %v4403_v30, %v4917_v53 }
 0x270   :  { %v698_v17 = vpop.xlane.xlu1 %697 }
 0x271   :  { %4410 = vrsqrt.f32 %v763_v43  ;;  %v738_v11 = vmul.f32 0.0078125, %v698_v17  ;;  %v897_v14 = vpack.c.bf16 %v874_v8, %v873_v47  ;;  %v843_v1 = vmul.f32 %v5018_v48, %v811_v56 }
 0x272   :  { %v4405_v13 = vpop.eup %4404 }
 0x273   :  { %v764_v49 = vadd.f32 1e-12, %v738_v11  ;;  %v812_v15 = vmul.f32 %v4405_v13, %v4926_v60  ;;  %v875_v29 = vadd.f32 %v5030_v52, %v843_v1 }
 0x274   :  { %4241 = vmatmul.mubr.bf16.gmra.mxu1 %v897_v14  ;;  %v700_v21 = vpop.xlane.xlu0 %699 }
 0x275   :  { %4412 = vrsqrt.f32 %v764_v49  ;;  %v739_v61 = vmul.f32 0.0078125, %v700_v21  ;;  %4244 = vmatprep.mubr.msk.bf16.mxu1 %vm4663_vm0, %v4662_v0  ;;  %v844_v25 = vmul.f32 %v5018_v48, %v812_v15 }
 0x276   :  { %v4407_v53 = vpop.eup %4406 }
 0x277   :  { %v765_v28 = vadd.f32 1e-12, %v739_v61  ;;  %v876_v9 = vadd.f32 %v5030_v52, %v844_v25  ;;  %v813_v32 = vmul.f32 %v4407_v53, %v4933_v3 }
 0x278   :  { %v702_v60 = vpop.xlane.xlu1 %701 }
 0x279   :  { %4414 = vrsqrt.f32 %v765_v28  ;;  %v740_v16 = vmul.f32 0.0078125, %v702_v60  ;;  %v898_v37 = vpack.c.bf16 %v876_v9, %v875_v29  ;;  %v845_v38 = vmul.f32 %v5018_v48, %v813_v32 }
 0x27a   :  { %v4409_v57 = vpop.eup %4408 }
 0x27b   :  { %v766_v63 = vadd.f32 1e-12, %v740_v16  ;;  %v814_v5 = vmul.f32 %v4409_v57, %v4939_v10  ;;  %v877_v46 = vadd.f32 %v5030_v52, %v845_v38 }
 0x27c   :  { %4245 = vmatmul.mubr.bf16.gmra.mxu1 %v898_v37  ;;  %v704_v39 = vpop.xlane.xlu0 %703 }
 0x27d   :  { %4416 = vrsqrt.f32 %v766_v63  ;;  %v741_v41 = vmul.f32 0.0078125, %v704_v39  ;;  %4248 = vmatprep.mubr.msk.bf16.mxu1 %vm4663_vm0, %v4662_v0  ;;  %v846_v36 = vmul.f32 %v5018_v48, %v814_v5 }
 0x27e   :  { %v4411_v3 = vpop.eup %4410 }
 0x27f   :  { %v767_v12 = vadd.f32 1e-12, %v741_v41  ;;  %v878_v50 = vadd.f32 %v5030_v52, %v846_v36  ;;  %v815_v18 = vmul.f32 %v4411_v3, %v4945_v19 }
 0x280   :  { %v706_v10 = vpop.xlane.xlu1 %705 }
 0x281   :  { %4418 = vrsqrt.f32 %v767_v12  ;;  %v742_v45 = vmul.f32 0.0078125, %v706_v10  ;;  %v899_v44 = vpack.c.bf16 %v878_v50, %v877_v46  ;;  %v847_v35 = vmul.f32 %v5018_v48, %v815_v18 }
 0x282   :  { %v4413_v54 = vpop.eup %4412 }
 0x283   :  { %v768_v24 = vadd.f32 1e-12, %v742_v45  ;;  %v816_v58 = vmul.f32 %v4413_v54, %v4950_v23  ;;  %v879_v43 = vadd.f32 %v5030_v52, %v847_v35 }
 0x284   :  { %4249 = vmatmul.mubr.bf16.gmra.mxu1 %v899_v44  ;;  %v708_v62 = vpop.xlane.xlu0 %707 }
 0x285   :  { %4420 = vrsqrt.f32 %v768_v24  ;;  %v743_v2 = vmul.f32 0.0078125, %v708_v62  ;;  %4252 = vmatprep.mubr.msk.bf16.mxu1 %vm4663_vm0, %v4662_v0  ;;  %v848_v6 = vmul.f32 %v5018_v48, %v816_v58 }
 0x286   :  { %v4415_v19 = vpop.eup %4414 }
 0x287   :  { %v769_v30 = vadd.f32 1e-12, %v743_v2  ;;  %v880_v47 = vadd.f32 %v5030_v52, %v848_v6  ;;  %v817_v8 = vmul.f32 %v4415_v19, %v4955_v31 }
 0x288   :  { %v710_v23 = vpop.xlane.xlu1 %709 }
 0x289   :  { %4422 = vrsqrt.f32 %v769_v30  ;;  %v744_v56 = vmul.f32 0.0078125, %v710_v23  ;;  %v900_v17 = vpack.c.bf16 %v880_v47, %v879_v43  ;;  %v849_v49 = vmul.f32 %v5018_v48, %v817_v8 }
 0x28a   :  { %v4417_v11 = vpop.eup %4416 }
 0x28b   :  { %v770_v14 = vadd.f32 1e-12, %v744_v56  ;;  %v818_v13 = vmul.f32 %v4417_v11, %v4960_v33  ;;  %v881_v25 = vadd.f32 %v5030_v52, %v849_v49 }
 0x28c   :  { %4253 = vmatmul.mubr.bf16.gmra.mxu1 %v900_v17  ;;  %v712_v15 = vpop.xlane.xlu0 %711 }
 0x28d   :  { %4424 = vrsqrt.f32 %v770_v14  ;;  %v745_v1 = vmul.f32 0.0078125, %v712_v15  ;;  %4256 = vmatprep.mubr.msk.bf16.mxu1 %vm4663_vm0, %v4662_v0  ;;  %v850_v21 = vmul.f32 %v5018_v48, %v818_v13 }
 0x28e   :  { %v4419_v31 = vpop.eup %4418 }
 0x28f   :  { %v771_v61 = vadd.f32 1e-12, %v745_v1  ;;  %v882_v53 = vadd.f32 %v5030_v52, %v850_v21  ;;  %v819_v28 = vmul.f32 %v4419_v31, %v4965_v40 }
 0x290   :  { %v714_v33 = vpop.xlane.xlu1 %713 }
 0x291   :  { %4426 = vrsqrt.f32 %v771_v61  ;;  %v746_v29 = vmul.f32 0.0078125, %v714_v33  ;;  %v901_v9 = vpack.c.bf16 %v882_v53, %v881_v25  ;;  %v851_v37 = vmul.f32 %v5018_v48, %v819_v28 }
 0x292   :  { %v4421_v32 = vpop.eup %4420 }
 0x293   :  { %v772_v60 = vadd.f32 1e-12, %v746_v29  ;;  %v820_v16 = vmul.f32 %v4421_v32, %v4970_v42  ;;  %v883_v40 = vadd.f32 %v5030_v52, %v851_v37 }
 0x294   :  { %4257 = vmatmul.mubr.bf16.gmra.mxu1 %v901_v9 }
 0x295   :  { %4428 = vrsqrt.f32 %v772_v60  ;;  %4260 = vmatprep.mubr.msk.bf16.mxu1 %vm4663_vm0, %v4662_v0  ;;  %v852_v57 = vmul.f32 %v5018_v48, %v820_v16 }
 0x296   :  { %v4423_v63 = vpop.eup %4422 }
 0x297   :  { %v884_v5 = vadd.f32 %v5030_v52, %v852_v57  ;;  %v821_v38 = vmul.f32 %v4423_v63, %v4975_v51 }
 0x299   :  { %v902_v39 = vpack.c.bf16 %v884_v5, %v883_v40  ;;  %v853_v36 = vmul.f32 %v5018_v48, %v821_v38 }
 0x29a   :  { %v4425_v41 = vpop.eup %4424 }
 0x29b   :  { %v822_v42 = vmul.f32 %v4425_v41, %v4980_v55  ;;  %v885_v46 = vadd.f32 %v5030_v52, %v853_v36 }
 0x29c   :  { %4261 = vmatmul.mubr.bf16.gmra.mxu1 %v902_v39 }
 0x29d   :  { %4264 = vmatprep.mubr.msk.bf16.mxu1 %vm4663_vm0, %v4662_v0  ;;  %v854_v3 = vmul.f32 %v5018_v48, %v822_v42 }
 0x29e   :  { %v4427_v12 = vpop.eup %4426 }
 0x29f   :  { %v886_v50 = vadd.f32 %v5030_v52, %v854_v3  ;;  %v823_v18 = vmul.f32 %v4427_v12, %v4985_v22 }
 0x2a1   :  { %v903_v51 = vpack.c.bf16 %v886_v50, %v885_v46  ;;  %v855_v55 = vmul.f32 %v5018_v48, %v823_v18 }
 0x2a2   :  { %v4429_v10 = vpop.eup %4428 }
 0x2a3   :  { %v824_v45 = vmul.f32 %v4429_v10, %v4990_v4  ;;  %v887_v54 = vadd.f32 %v5030_v52, %v855_v55 }
 0x2a4   :  { %4265 = vmatmul.mubr.bf16.gmra.mxu1 %v903_v51 }
 0x2a5   :  { %4268 = vmatprep.mubr.msk.bf16.mxu1 %vm4663_vm0, %v4662_v0  ;;  %v856_v44 = vmul.f32 %v5018_v48, %v824_v45 }
 0x2a7   :  { %v888_v24 = vadd.f32 %v5030_v52, %v856_v44 }
 0x2a9   :  { %v904_v58 = vpack.c.bf16 %v888_v24, %v887_v54 }
 0x2ac   :  { %4269 = vmatmul.mubr.bf16.gmra.mxu1 %v904_v58 }
 0x2ad   :  { %4272 = vmatprep.mubr.msk.bf16.mxu1 %vm4663_vm0, %v4662_v0 }
 0x2d8   :  { %v716_v22 = vpop.xlane.xlu0 %715 }
 0x2d9   :  { %v747_v35 = vmul.f32 0.0078125, %v716_v22 }
 0x2db   :  { %v773_v4 = vadd.f32 1e-12, %v747_v35 }
 0x2dc   :  { %v718_v62 = vpop.xlane.xlu1 %717 }
 0x2dd   :  { %4430 = vrsqrt.f32 %v773_v4  ;;  %v748_v2 = vmul.f32 0.0078125, %v718_v62 }
 0x2df   :  { %v774_v6 = vadd.f32 1e-12, %v748_v2 }
 0x2e0   :  { %v720_v19 = vpop.xlane.xlu0 %719 }
 0x2e1   :  { %4432 = vrsqrt.f32 %v774_v6  ;;  %v749_v30 = vmul.f32 0.0078125, %v720_v19 }
 0x2e3   :  { %v775_v43 = vadd.f32 1e-12, %v749_v30 }
 0x2e4   :  { %v722_v47 = vpop.xlane.xlu1 %721 }
 0x2e5   :  { %4434 = vrsqrt.f32 %v775_v43  ;;  %v750_v8 = vmul.f32 0.0078125, %v722_v47 }
 0x2e7   :  { %v776_v23 = vadd.f32 1e-12, %v750_v8 }
 0x2e8   :  { %v724_v56 = vpop.xlane.xlu0 %723 }
 0x2e9   :  { %4436 = vrsqrt.f32 %v776_v23  ;;  %v751_v17 = vmul.f32 0.0078125, %v724_v56 }
 0x2ea   :  { %v4431_v11 = vpop.eup %4430 }
 0x2eb   :  { %v777_v14 = vadd.f32 1e-12, %v751_v17  ;;  %v825_v13 = vmul.f32 %v4431_v11, %v4995_v20 }
 0x2ec   :  { %v726_v49 = vpop.xlane.xlu1 %725 }
 0x2ed   :  { %4438 = vrsqrt.f32 %v777_v14  ;;  %v752_v15 = vmul.f32 0.0078125, %v726_v49  ;;  %v857_v61 = vmul.f32 %v5018_v48, %v825_v13 }
 0x2ee   :  { %v4433_v1 = vpop.eup %4432 }
 0x2ef   :  { %v778_v21 = vadd.f32 1e-12, %v752_v15  ;;  %v826_v31 = vmul.f32 %v4433_v1, %v5000_v7  ;;  %v889_v28 = vadd.f32 %v5030_v52, %v857_v61 }
 0x2f1   :  { %4440 = vrsqrt.f32 %v778_v21  ;;  %v858_v25 = vmul.f32 %v5018_v48, %v826_v31 }
 0x2f2   :  { %v4435_v53 = vpop.eup %4434 }
 0x2f3   :  { %v890_v33 = vadd.f32 %v5030_v52, %v858_v25  ;;  %v827_v29 = vmul.f32 %v4435_v53, %v5005_v26 }
 0x2f5   :  { %v905_v20 = vpack.c.bf16 %v890_v33, %v889_v28  ;;  %v859_v60 = vmul.f32 %v5018_v48, %v827_v29 }
 0x2f6   :  { %v4437_v9 = vpop.eup %4436 }
 0x2f7   :  { %4273 = vmatmul.mubr.bf16.gmra.mxu1 %v905_v20  ;;  %v828_v32 = vmul.f32 %v4437_v9, %v5010_v27  ;;  %v891_v37 = vadd.f32 %v5030_v52, %v859_v60 }
 0x2f8   :  { %4276 = vmatprep.mubr.msk.bf16.mxu1 %vm4663_vm0, %v4662_v0 }
 0x2f9   :  { %v860_v7 = vmul.f32 %v5018_v48, %v828_v32 }
 0x2fa   :  { %v4439_v16 = vpop.eup %4438 }
 0x2fb   :  { %v892_v57 = vadd.f32 %v5030_v52, %v860_v7  ;;  %v829_v63 = vmul.f32 %v4439_v16, %v5021_v34  ;;  %v5139_v34 = vld [vmem:[%s5872_s6] ss:$0 sm:$0xff] }
 0x2fd   :  { %v906_v26 = vpack.c.bf16 %v892_v57, %v891_v37  ;;  %v861_v27 = vmul.f32 %v5018_v48, %v829_v63 }
 0x2fe   :  { %v4441_v40 = vpop.eup %4440 }
 0x2ff   :  { %4277 = vmatmul.mubr.bf16.gmra.mxu1 %v906_v26  ;;  %v830_v5 = vmul.f32 %v4441_v40, %v5034_v59  ;;  %v893_v39 = vadd.f32 %v5030_v52, %v861_v27 }
 0x300   :  { %4280 = vmatprep.mubr.msk.bf16.mxu1 %vm4663_vm0, %v4662_v0 }
 0x301   :  { %v862_v38 = vmul.f32 %v5018_v48, %v830_v5 }
 0x303   :  { %v894_v41 = vadd.f32 %v5030_v52, %v862_v38 }
 0x305   :  { %v907_v42 = vpack.c.bf16 %v894_v41, %v893_v39 }
 0x307   :  { %4281 = vmatmul.mubr.bf16.gmra.mxu1 %v907_v42 }
 0x324   :  { %v1013_v36 = vpop.f32.mrf.mxu1 }
 0x325   :  { %v1014_v59 = vadd.f32 %v5139_v34, %v1013_v36 }
 0x326   :  { %v4234_v3 = vpop.f32.mrf.mxu1 }
 0x327   :  { %v1142_v12 = vmul.f32 0.70710677, %v1014_v59  ;;  %v1116_v4 = vmul.f32 0.5, %v1014_v59 }
 0x328   :  { %v1016_v46 = vpop.f32.mrf.mxu1 }
 0x329   :  { %4442 = verf.f32 %v1142_v12  ;;  %v1017_v0 = vadd.f32 %v5139_v34, %v1016_v46 }
 0x32a   :  { %v4235_v48 = vpop.f32.mrf.mxu1 }
 0x32b   :  { %v1143_v50 = vmul.f32 0.70710677, %v1017_v0  ;;  %v1117_v8 = vmul.f32 0.5, %v1017_v0 }
 0x32c   :  { %v1021_v18 = vpop.f32.mrf.mxu1 }
 0x32d   :  { %4444 = verf.f32 %v1143_v50  ;;  %v1022_v52 = vadd.f32 %v5139_v34, %v1021_v18 }
 0x32e   :  { %v4238_v51 = vpop.f32.mrf.mxu1 }
 0x32f   :  { %v1144_v10 = vmul.f32 0.70710677, %v1022_v52  ;;  %v1118_v15 = vmul.f32 0.5, %v1022_v52 }
 0x330   :  { %v1024_v45 = vpop.f32.mrf.mxu1 }
 0x331   :  { %4446 = verf.f32 %v1144_v10  ;;  %v1025_v55 = vadd.f32 %v5139_v34, %v1024_v45 }
 0x332   :  { %v4239_v44 = vpop.f32.mrf.mxu1 }
 0x333   :  { %v1145_v54 = vmul.f32 0.70710677, %v1025_v55  ;;  %v1119_v33 = vmul.f32 0.5, %v1025_v55 }
 0x334   :  { %v1029_v24 = vpop.f32.mrf.mxu1 }
 0x335   :  { %4448 = verf.f32 %v1145_v54  ;;  %v1030_v58 = vadd.f32 %v5139_v34, %v1029_v24 }
 0x336   :  { %v4443_v22 = vpop.eup %4442  ;;  %v4242_v35 = vpop.f32.mrf.mxu1 }
 0x337   :  { %v1146_v62 = vmul.f32 0.70710677, %v1030_v58  ;;  %v1194_v2 = vadd.f32 1.0, %v4443_v22  ;;  %v1120_v37 = vmul.f32 0.5, %v1030_v58 }
 0x338   :  { %v1032_v6 = vpop.f32.mrf.mxu1 }
 0x339   :  { %4450 = verf.f32 %v1146_v62  ;;  %v1033_v19 = vadd.f32 %v5139_v34, %v1032_v6  ;;  %v5147_v30 = vmul.f32 %v1194_v2, %v1116_v4 }
 0x33a   :  { %v4445_v43 = vpop.eup %4444  ;;  %v4243_v47 = vpop.f32.mrf.mxu1 }
 0x33b   :  { %v1147_v23 = vmul.f32 0.70710677, %v1033_v19  ;;  %1248 = vadd.xlane.f32.xlu0 %v5147_v30  ;;  %v1195_v56 = vadd.f32 1.0, %v4445_v43  ;;  %v1121_v39 = vmul.f32 0.5, %v1033_v19 }
 0x33c   :  { %v1037_v17 = vpop.f32.mrf.mxu1 }
 0x33d   :  { %4452 = verf.f32 %v1147_v23  ;;  %v1038_v11 = vadd.f32 %v5139_v34, %v1037_v17  ;;  %v5151_v14 = vmul.f32 %v1195_v56, %v1117_v8 }
 0x33e   :  { %v4447_v13 = vpop.eup %4446  ;;  %v4246_v49 = vpop.f32.mrf.mxu1 }
 0x33f   :  { %v1148_v1 = vmul.f32 0.70710677, %v1038_v11  ;;  %1250 = vadd.xlane.f32.xlu1 %v5151_v14  ;;  %v1196_v21 = vadd.f32 1.0, %v4447_v13  ;;  %v1122_v0 = vmul.f32 0.5, %v1038_v11 }
 0x340   :  { %v1040_v31 = vpop.f32.mrf.mxu1 }
 0x341   :  { %4454 = verf.f32 %v1148_v1  ;;  %v1041_v61 = vadd.f32 %v5139_v34, %v1040_v31  ;;  %v5155_v25 = vmul.f32 %v1196_v21, %v1118_v15 }
 0x342   :  { %v4449_v53 = vpop.eup %4448  ;;  %v4247_v28 = vpop.f32.mrf.mxu1 }
 0x343   :  { %v1149_v29 = vmul.f32 0.70710677, %v1041_v61  ;;  %1252 = vadd.xlane.f32.xlu0 %v5155_v25  ;;  %v1197_v20 = vadd.f32 1.0, %v4449_v53  ;;  %v1123_v55 = vmul.f32 0.5, %v1041_v61 }
 0x344   :  { %v1045_v9 = vpop.f32.mrf.mxu1 }
 0x345   :  { %4456 = verf.f32 %v1149_v29  ;;  %v1046_v32 = vadd.f32 %v5139_v34, %v1045_v9  ;;  %v5159_v60 = vmul.f32 %v1197_v20, %v1119_v33 }
 0x346   :  { %v4451_v7 = vpop.eup %4450  ;;  %v4250_v16 = vpop.f32.mrf.mxu1 }
 0x347   :  { %v1150_v57 = vmul.f32 0.70710677, %v1046_v32  ;;  %1254 = vadd.xlane.f32.xlu1 %v5159_v60  ;;  %v1198_v63 = vadd.f32 1.0, %v4451_v7  ;;  %v1124_v62 = vmul.f32 0.5, %v1046_v32 }
 0x348   :  { %v1048_v26 = vpop.f32.mrf.mxu1 }
 0x349   :  { %4458 = verf.f32 %v1150_v57  ;;  %v1049_v40 = vadd.f32 %v5139_v34, %v1048_v26  ;;  %v5163_v5 = vmul.f32 %v1198_v63, %v1120_v37 }
 0x34a   :  { %v4453_v27 = vpop.eup %4452  ;;  %v4251_v38 = vpop.f32.mrf.mxu1 }
 0x34b   :  { %v1151_v41 = vmul.f32 0.70710677, %v1049_v40  ;;  %1256 = vadd.xlane.f32.xlu0 %v5163_v5  ;;  %v1199_v42 = vadd.f32 1.0, %v4453_v27  ;;  %v1125_v56 = vmul.f32 0.5, %v1049_v40 }
 0x34c   :  { %v1053_v36 = vpop.f32.mrf.mxu1 }
 0x34d   :  { %4460 = verf.f32 %v1151_v41  ;;  %v1054_v59 = vadd.f32 %v5139_v34, %v1053_v36  ;;  %v5167_v3 = vmul.f32 %v1199_v42, %v1121_v39 }
 0x34e   :  { %v4455_v12 = vpop.eup %4454  ;;  %v4254_v46 = vpop.f32.mrf.mxu1 }
 0x34f   :  { %v1152_v48 = vmul.f32 0.70710677, %v1054_v59  ;;  %1258 = vadd.xlane.f32.xlu1 %v5167_v3  ;;  %v1200_v50 = vadd.f32 1.0, %v4455_v12  ;;  %v1126_v31 = vmul.f32 0.5, %v1054_v59 }
 0x350   :  { %v1056_v18 = vpop.f32.mrf.mxu1 }
 0x351   :  { %4462 = verf.f32 %v1152_v48  ;;  %v1057_v52 = vadd.f32 %v5139_v34, %v1056_v18  ;;  %v5171_v51 = vmul.f32 %v1200_v50, %v1122_v0 }
 0x352   :  { %v4457_v10 = vpop.eup %4456  ;;  %v4255_v45 = vpop.f32.mrf.mxu1 }
 0x353   :  { %v1153_v44 = vmul.f32 0.70710677, %v1057_v52  ;;  %1260 = vadd.xlane.f32.xlu0 %v5171_v51  ;;  %v1201_v54 = vadd.f32 1.0, %v4457_v10  ;;  %v1127_v32 = vmul.f32 0.5, %v1057_v52 }
 0x354   :  { %v1061_v24 = vpop.f32.mrf.mxu1 }
 0x355   :  { %4464 = verf.f32 %v1153_v44  ;;  %v1062_v58 = vadd.f32 %v5139_v34, %v1061_v24  ;;  %v5175_v22 = vmul.f32 %v1201_v54, %v1123_v55 }
 0x356   :  { %v4459_v35 = vpop.eup %4458  ;;  %v4258_v4 = vpop.f32.mrf.mxu1 }
 0x357   :  { %v1154_v2 = vmul.f32 0.70710677, %v1062_v58  ;;  %1262 = vadd.xlane.f32.xlu1 %v5175_v22  ;;  %v1202_v6 = vadd.f32 1.0, %v4459_v35  ;;  %v1128_v27 = vmul.f32 0.5, %v1062_v58 }
 0x358   :  { %v1064_v19 = vpop.f32.mrf.mxu1 }
 0x359   :  { %4466 = verf.f32 %v1154_v2  ;;  %v1065_v43 = vadd.f32 %v5139_v34, %v1064_v19  ;;  %v5179_v47 = vmul.f32 %v1202_v6, %v1124_v62 }
 0x35a   :  { %v4461_v8 = vpop.eup %4460  ;;  %v4259_v23 = vpop.f32.mrf.mxu1 }
 0x35b   :  { %v1155_v17 = vmul.f32 0.70710677, %v1065_v43  ;;  %1264 = vadd.xlane.f32.xlu0 %v5179_v47  ;;  %v1203_v11 = vadd.f32 1.0, %v4461_v8  ;;  %v1129_v46 = vmul.f32 0.5, %v1065_v43 }
 0x35c   :  { %v1069_v13 = vpop.f32.mrf.mxu1 }
 0x35d   :  { %4468 = verf.f32 %v1155_v17  ;;  %v1070_v49 = vadd.f32 %v5139_v34, %v1069_v13  ;;  %v5183_v15 = vmul.f32 %v1203_v11, %v1125_v56 }
 0x35e   :  { %v4463_v1 = vpop.eup %4462  ;;  %v4262_v21 = vpop.f32.mrf.mxu1 }
 0x35f   :  { %v1156_v61 = vmul.f32 0.70710677, %v1070_v49  ;;  %1266 = vadd.xlane.f32.xlu1 %v5183_v15  ;;  %v1204_v53 = vadd.f32 1.0, %v4463_v1  ;;  %v1130_v55 = vmul.f32 0.5, %v1070_v49 }
 0x360   :  { %v1072_v28 = vpop.f32.mrf.mxu1 }
 0x361   :  { %4470 = verf.f32 %v1156_v61  ;;  %v1073_v33 = vadd.f32 %v5139_v34, %v1072_v28  ;;  %v5187_v29 = vmul.f32 %v1204_v53, %v1126_v31 }
 0x362   :  { %v4465_v20 = vpop.eup %4464  ;;  %v4263_v9 = vpop.f32.mrf.mxu1 }
 0x363   :  { %v1157_v7 = vmul.f32 0.70710677, %v1073_v33  ;;  %1268 = vadd.xlane.f32.xlu0 %v5187_v29  ;;  %v1205_v16 = vadd.f32 1.0, %v4465_v20  ;;  %v1131_v2 = vmul.f32 0.5, %v1073_v33 }
 0x364   :  { %v1077_v37 = vpop.f32.mrf.mxu1 }
 0x365   :  { %4472 = verf.f32 %v1157_v7  ;;  %v1078_v57 = vadd.f32 %v5139_v34, %v1077_v37  ;;  %v5191_v63 = vmul.f32 %v1205_v16, %v1127_v32 }
 0x366   :  { %v4467_v26 = vpop.eup %4466  ;;  %v4266_v40 = vpop.f32.mrf.mxu1 }
 0x367   :  { %v1158_v38 = vmul.f32 0.70710677, %v1078_v57  ;;  %1270 = vadd.xlane.f32.xlu1 %v5191_v63  ;;  %v1206_v39 = vadd.f32 1.0, %v4467_v26  ;;  %v1132_v23 = vmul.f32 0.5, %v1078_v57 }
 0x368   :  { %v1080_v41 = vpop.f32.mrf.mxu1 }
 0x369   :  { %4474 = verf.f32 %v1158_v38  ;;  %v1081_v42 = vadd.f32 %v5139_v34, %v1080_v41  ;;  %v5195_v36 = vmul.f32 %v1206_v39, %v1128_v27 }
 0x36a   :  { %v4469_v59 = vpop.eup %4468  ;;  %v4267_v12 = vpop.f32.mrf.mxu1 }
 0x36b   :  { %v1159_v0 = vmul.f32 0.70710677, %v1081_v42  ;;  %1272 = vadd.xlane.f32.xlu0 %v5195_v36  ;;  %v1207_v48 = vadd.f32 1.0, %v4469_v59  ;;  %v1133_v13 = vmul.f32 0.5, %v1081_v42 }
 0x36c   :  { %v1085_v50 = vpop.f32.mrf.mxu1 }
 0x36d   :  { %4476 = verf.f32 %v1159_v0  ;;  %v1086_v18 = vadd.f32 %v5139_v34, %v1085_v50  ;;  %v5199_v52 = vmul.f32 %v1207_v48, %v1129_v46 }
 0x36e   :  { %v4471_v10 = vpop.eup %4470  ;;  %v4270_v45 = vpop.f32.mrf.mxu1 }
 0x36f   :  { %v1160_v44 = vmul.f32 0.70710677, %v1086_v18  ;;  %1274 = vadd.xlane.f32.xlu1 %v5199_v52  ;;  %v1208_v54 = vadd.f32 1.0, %v4471_v10  ;;  %v1134_v31 = vmul.f32 0.5, %v1086_v18 }
 0x370   :  { %v1088_v24 = vpop.f32.mrf.mxu1 }
 0x371   :  { %4478 = verf.f32 %v1160_v44  ;;  %v1089_v58 = vadd.f32 %v5139_v34, %v1088_v24  ;;  %v5203_v35 = vmul.f32 %v1208_v54, %v1130_v55 }
 0x372   :  { %v4473_v4 = vpop.eup %4472  ;;  %v4271_v62 = vpop.f32.mrf.mxu1 }
 0x373   :  { %v1161_v6 = vmul.f32 0.70710677, %v1089_v58  ;;  %1276 = vadd.xlane.f32.xlu0 %v5203_v35  ;;  %v1209_v19 = vadd.f32 1.0, %v4473_v4  ;;  %v1135_v33 = vmul.f32 0.5, %v1089_v58 }
 0x375   :  { %4480 = verf.f32 %v1161_v6  ;;  %v5206_v43 = vmul.f32 %v1209_v19, %v1131_v2 }
 0x376   :  { %v4475_v8 = vpop.eup %4474 }
 0x377   :  { %1278 = vadd.xlane.f32.xlu1 %v5206_v43  ;;  %v1210_v56 = vadd.f32 1.0, %v4475_v8 }
 0x379   :  { %v5209_v17 = vmul.f32 %v1210_v56, %v1132_v23 }
 0x37a   :  { %v4477_v11 = vpop.eup %4476 }
 0x37b   :  { %1280 = vadd.xlane.f32.xlu0 %v5209_v17  ;;  %v1211_v49 = vadd.f32 1.0, %v4477_v11 }
 0x37d   :  { %v5212_v1 = vmul.f32 %v1211_v49, %v1133_v13 }
 0x37e   :  { %v4479_v21 = vpop.eup %4478 }
 0x37f   :  { %1282 = vadd.xlane.f32.xlu1 %v5212_v1  ;;  %v1212_v61 = vadd.f32 1.0, %v4479_v21 }
 0x381   :  { %v5215_v53 = vmul.f32 %v1212_v61, %v1134_v31 }
 0x382   :  { %v4481_v28 = vpop.eup %4480 }
 0x383   :  { %1284 = vadd.xlane.f32.xlu0 %v5215_v53  ;;  %v1213_v20 = vadd.f32 1.0, %v4481_v28 }
 0x385   :  { %v5218_v9 = vmul.f32 %v1213_v20, %v1135_v33 }
 0x387   :  { %1286 = vadd.xlane.f32.xlu1 %v5218_v9 }
 0x3b7   :  { %v1093_v32 = vpop.f32.mrf.mxu1 }
 0x3b8   :  { %v1094_v7 = vadd.f32 %v5139_v34, %v1093_v32 }
 0x3b9   :  { %v4274_v16 = vpop.f32.mrf.mxu1 }
 0x3ba   :  { %v1162_v37 = vmul.f32 0.70710677, %v1094_v7  ;;  %v1136_v4 = vmul.f32 0.5, %v1094_v7 }
 0x3bb   :  { %v1096_v57 = vpop.f32.mrf.mxu1 }
 0x3bc   :  { %4482 = verf.f32 %v1162_v37  ;;  %v1097_v26 = vadd.f32 %v5139_v34, %v1096_v57 }
 0x3bd   :  { %v4275_v40 = vpop.f32.mrf.mxu1 }
 0x3be   :  { %v1163_v27 = vmul.f32 0.70710677, %v1097_v26  ;;  %v1137_v21 = vmul.f32 0.5, %v1097_v26 }
 0x3bf   :  { %v1101_v38 = vpop.f32.mrf.mxu1 }
 0x3c0   :  { %4484 = verf.f32 %v1163_v27  ;;  %v1102_v39 = vadd.f32 %v5139_v34, %v1101_v38 }
 0x3c1   :  { %v4278_v41 = vpop.f32.mrf.mxu1 }
 0x3c2   :  { %v1164_v42 = vmul.f32 0.70710677, %v1102_v39  ;;  %v1138_v7 = vmul.f32 0.5, %v1102_v39 }
 0x3c3   :  { %v1104_v59 = vpop.f32.mrf.mxu1 }
 0x3c4   :  { %4486 = verf.f32 %v1164_v42  ;;  %v1249_v12 = vpop.xlane.xlu0 %1248  ;;  %v1105_v46 = vadd.f32 %v5139_v34, %v1104_v59 }
 0x3c5   :  { %v1300_v0 = vmul.f32 0.0078125, %v1249_v12  ;;  %v4279_v48 = vpop.f32.mrf.mxu1 }
 0x3c6   :  { %v1165_v50 = vmul.f32 0.70710677, %v1105_v46  ;;  %v1139_v38 = vmul.f32 0.5, %v1105_v46  ;;  %v1810_v48 = vld [vmem:[#allocation9 + $0x1c0] sm:$0xff] }
 0x3c7   :  { %v5226_v18 = vsub.f32 %v5147_v30, %v1300_v0  ;;  %v1109_v10 = vpop.f32.mrf.mxu1 }
 0x3c8   :  { %4488 = verf.f32 %v1165_v50  ;;  %v1110_v45 = vadd.f32 %v5139_v34, %v1109_v10  ;;  %v1251_v55 = vpop.xlane.xlu1 %1250  ;;  %v1814_v50 = vld [vmem:[#allocation9 + $0x1e0] sm:$0xff]  ;;  %v1811_v10 = vld [vmem:[#allocation9 + $0x1c8] sm:$0xff] }
 0x3c9   :  { %v4483_v44 = vpop.eup %4482  ;;  %v1301_v54 = vmul.f32 0.0078125, %v1251_v55  ;;  %v4282_v24 = vpop.f32.mrf.mxu1  ;;  %v1352_v58 = vmul.f32 %v5226_v18, %v5226_v18 }
 0x3ca   :  { %v1166_v62 = vmul.f32 0.70710677, %v1110_v45  ;;  %v1214_v2 = vadd.f32 1.0, %v4483_v44  ;;  %v1140_v55 = vmul.f32 0.5, %v1110_v45  ;;  %v3788_v44 = vcombine.high %v1810_v48, %v1814_v50 }
 0x3cb   :  { %v5232_v6 = vsub.f32 %v5151_v14, %v1301_v54  ;;  %1378 = vadd.xlane.f32.xlu0 %v1352_v58  ;;  %v1112_v30 = vpop.f32.mrf.mxu1  ;;  %v1815_v54 = vld [vmem:[#allocation9 + $0x1e8] sm:$0xff]  ;;  %v3787_v24 = vcombine.low %v1810_v48, %v1814_v50  ;;  %v1786_v50 = vld [vmem:[#allocation9 + $0x100] sm:$0xff] }
 0x3cc   :  { %4490 = verf.f32 %v1166_v62  ;;  %v1253_v19 = vpop.xlane.xlu0 %1252  ;;  %v1113_v8 = vadd.f32 %v5139_v34, %v1112_v30  ;;  %v5235_v23 = vmul.f32 %v1214_v2, %v1136_v4  ;;  %2258 = vmatprep.subr.bf16.mxu0 %v3788_v44  ;;  %v3789_v62 = vcombine.low %v1811_v10, %v1815_v54 }
 0x3cd   :  { %v4485_v56 = vpop.eup %4484  ;;  %v1302_v11 = vmul.f32 0.0078125, %v1253_v19  ;;  %v4283_v13 = vpop.f32.mrf.mxu1  ;;  %v1353_v49 = vmul.f32 %v5232_v6, %v5232_v6  ;;  %v3790_v2 = vcombine.high %v1811_v10, %v1815_v54  ;;  %2259 = vmatpush1.bf16.msra.mxu0 %v3787_v24  ;;  %v1790_v10 = vld [vmem:[#allocation9 + $0x120] sm:$0xff] }
 0x3ce   :  { %v1167_v31 = vmul.f32 0.70710677, %v1113_v8  ;;  %v1215_v61 = vadd.f32 1.0, %v4485_v56  ;;  %v1802_v56 = vld [vmem:[#allocation9 + $0x180] sm:$0xff]  ;;  %v1141_v13 = vmul.f32 0.5, %v1113_v8  ;;  %v3763_v54 = vcombine.low %v1786_v50, %v1790_v10 }
 0x3cf   :  { %v5240_v14 = vsub.f32 %v5155_v25, %v1302_v11  ;;  %1288 = vadd.xlane.f32.xlu0 %v5235_v23  ;;  %1380 = vadd.xlane.f32.xlu1 %v1353_v49  ;;  %v1806_v11 = vld [vmem:[#allocation9 + $0x1a0] sm:$0xff] }
 0x3d0   :  { %4492 = verf.f32 %v1167_v31  ;;  %v1255_v28 = vpop.xlane.xlu1 %1254  ;;  %v5243_v34 = vmul.f32 %v1215_v61, %v1137_v21  ;;  %2421 = vmatprep.subr.bf16.mxu1 %v3790_v2  ;;  %v3780_v21 = vcombine.high %v1802_v56, %v1806_v11  ;;  %v1807_v31 = vld [vmem:[#allocation9 + $0x1a8] sm:$0xff] }
 0x3d1   :  { %v4487_v33 = vpop.eup %4486  ;;  %v1303_v20 = vmul.f32 0.0078125, %v1255_v28  ;;  %v1354_v32 = vmul.f32 %v5240_v14, %v5240_v14  ;;  %v3779_v28 = vcombine.low %v1802_v56, %v1806_v11  ;;  %2422 = vmatpush1.bf16.msra.mxu1 %v3789_v62  ;;  %v1779_v56 = vld [vmem:[#allocation9 + $0xc8] sm:$0xff] }
 0x3d2   :  { %v1216_v16 = vadd.f32 1.0, %v4487_v33  ;;  %2260 = vmatprep.subr.bf16.mxu0 %v3780_v21 }
 0x3d3   :  { %v5248_v37 = vsub.f32 %v5159_v60, %v1303_v20  ;;  %1382 = vadd.xlane.f32.xlu0 %v1354_v32  ;;  %1290 = vadd.xlane.f32.xlu1 %v5243_v34 }
 0x3d4   :  { %v1257_v25 = vpop.xlane.xlu0 %1256  ;;  %v5251_v57 = vmul.f32 %v1216_v16, %v1138_v7  ;;  %2261 = vmatpush1.bf16.msra.mxu0 %v3779_v28 }
 0x3d5   :  { %v4489_v26 = vpop.eup %4488  ;;  %v1304_v40 = vmul.f32 0.0078125, %v1257_v25  ;;  %v1355_v27 = vmul.f32 %v5248_v37, %v5248_v37  ;;  %v1794_v25 = vld [vmem:[#allocation9 + $0x140] sm:$0xff] }
 0x3d6   :  { %v1217_v41 = vadd.f32 1.0, %v4489_v26  ;;  %v1798_v26 = vld [vmem:[#allocation9 + $0x160] sm:$0xff] }
 0x3d7   :  { %v5256_v42 = vsub.f32 %v5163_v5, %v1304_v40  ;;  %1292 = vadd.xlane.f32.xlu0 %v5251_v57  ;;  %1384 = vadd.xlane.f32.xlu1 %v1355_v27  ;;  %v3772_v40 = vcombine.high %v1794_v25, %v1798_v26  ;;  %v1799_v27 = vld [vmem:[#allocation9 + $0x168] sm:$0xff] }
 0x3d8   :  { %v1259_v60 = vpop.xlane.xlu1 %1258  ;;  %v5259_v39 = vmul.f32 %v1217_v41, %v1139_v38  ;;  %v3771_v41 = vcombine.low %v1794_v25, %v1798_v26  ;;  %v1775_v25 = vld [vmem:[#allocation9 + $0xa8] sm:$0xff] }
 0x3d9   :  { %v4491_v59 = vpop.eup %4490  ;;  %v1305_v12 = vmul.f32 0.0078125, %v1259_v60  ;;  %v1356_v0 = vmul.f32 %v5256_v42, %v5256_v42  ;;  %2262 = vmatprep.subr.bf16.mxu0 %v3772_v40 }
 0x3da   :  { %v1218_v46 = vadd.f32 1.0, %v4491_v59  ;;  %2263 = vmatpush1.bf16.msra.mxu0 %v3771_v41 }
 0x3db   :  { %v5264_v5 = vsub.f32 %v5167_v3, %v1305_v12  ;;  %1386 = vadd.xlane.f32.xlu0 %v1356_v0  ;;  %1294 = vadd.xlane.f32.xlu1 %v5259_v39  ;;  %v1803_v3 = vld [vmem:[#allocation9 + $0x188] sm:$0xff] }
 0x3dc   :  { %v1261_v58 = vpop.xlane.xlu0 %1260  ;;  %v5267_v4 = vmul.f32 %v1218_v46, %v1140_v55  ;;  %v3781_v32 = vcombine.low %v1803_v3, %v1807_v31  ;;  %v3782_v7 = vcombine.high %v1803_v3, %v1807_v31  ;;  %v1787_v55 = vld [vmem:[#allocation9 + $0x108] sm:$0xff] }
 0x3dd   :  { %v4493_v30 = vpop.eup %4492  ;;  %v1306_v19 = vmul.f32 0.0078125, %v1261_v58  ;;  %v1357_v45 = vmul.f32 %v5264_v5, %v5264_v5  ;;  %v1791_v46 = vld [vmem:[#allocation9 + $0x128] sm:$0xff] }
 0x3de   :  { %v1219_v49 = vadd.f32 1.0, %v4493_v30  ;;  %2423 = vmatprep.subr.bf16.mxu1 %v3782_v7  ;;  %v3766_v24 = vcombine.high %v1787_v55, %v1791_v46  ;;  %v3765_v62 = vcombine.low %v1787_v55, %v1791_v46  ;;  %v1783_v3 = vld [vmem:[#allocation9 + $0xe8] sm:$0xff]  ;;  %v1774_v7 = vld [vmem:[#allocation9 + $0xa0] sm:$0xff] }
 0x3df   :  { %v5272_v61 = vsub.f32 %v5171_v51, %v1306_v19  ;;  %1296 = vadd.xlane.f32.xlu0 %v5267_v4  ;;  %1388 = vadd.xlane.f32.xlu1 %v1357_v45  ;;  %v1795_v51 = vld [vmem:[#allocation9 + $0x148] sm:$0xff]  ;;  %v1778_v19 = vld [vmem:[#allocation9 + $0xc0] sm:$0xff]  ;;  %v3757_v21 = vcombine.low %v1779_v56, %v1783_v3  ;;  %v3758_v31 = vcombine.high %v1779_v56, %v1783_v3 }
 0x3e0   :  { %v1263_v33 = vpop.xlane.xlu1 %1262  ;;  %v5275_v20 = vmul.f32 %v1219_v49, %v1141_v13  ;;  %2424 = vmatpush1.bf16.msra.mxu1 %v3781_v32  ;;  %v3773_v59 = vcombine.low %v1795_v51, %v1799_v27  ;;  %v3774_v12 = vcombine.high %v1795_v51, %v1799_v27  ;;  %v1782_v45 = vld [vmem:[#allocation9 + $0xe0] sm:$0xff] }
 0x3e1   :  { %v1307_v16 = vmul.f32 0.0078125, %v1263_v33  ;;  %v1358_v8 = vmul.f32 %v5272_v61, %v5272_v61  ;;  %v3755_v49 = vcombine.low %v1778_v19, %v1782_v45  ;;  %v1770_v32 = vld [vmem:[#allocation9 + $0x80] sm:$0xff] }
 0x3e2   :  { %2425 = vmatprep.subr.bf16.mxu1 %v3774_v12  ;;  %v3747_v51 = vcombine.low %v1770_v32, %v1774_v7  ;;  %v1766_v12 = vld [vmem:[#allocation9 + $0x60] sm:$0xff] }
 0x3e3   :  { %v5280_v38 = vsub.f32 %v5175_v22, %v1307_v16  ;;  %1390 = vadd.xlane.f32.xlu0 %v1358_v8  ;;  %1298 = vadd.xlane.f32.xlu1 %v5275_v20  ;;  %v3764_v22 = vcombine.high %v1786_v50, %v1790_v10  ;;  %v1771_v16 = vld [vmem:[#allocation9 + $0x88] sm:$0xff]  ;;  %v3748_v8 = vcombine.high %v1770_v32, %v1774_v7 }
 0x3e4   :  { %v1265_v60 = vpop.xlane.xlu0 %1264  ;;  %2426 = vmatpush1.bf16.msra.mxu1 %v3773_v59  ;;  %v3749_v40 = vcombine.low %v1771_v16, %v1775_v25  ;;  %v3750_v27 = vcombine.high %v1771_v16, %v1775_v25  ;;  %v1762_v59 = vld [vmem:[#allocation9 + $0x40] sm:$0xff]  ;;  %v1767_v50 = vld [vmem:[#allocation9 + $0x68] sm:$0xff] }
 0x3e5   :  { %v1308_v0 = vmul.f32 0.0078125, %v1265_v60  ;;  %v1359_v48 = vmul.f32 %v5280_v38, %v5280_v38  ;;  %2264 = vmatprep.subr.bf16.mxu0 %v3764_v22  ;;  %2427 = vmatprep.subr.bf16.mxu1 %v3766_v24  ;;  %v3739_v55 = vcombine.low %v1762_v59, %v1766_v12 }
 0x3e6   :  { %2265 = vmatpush1.bf16.msra.mxu0 %v3763_v54 }
 0x3e7   :  { %v5286_v44 = vsub.f32 %v5179_v47, %v1308_v0  ;;  %1392 = vadd.xlane.f32.xlu1 %v1359_v48  ;;  %v3756_v47 = vcombine.high %v1778_v19, %v1782_v45  ;;  %v1763_v0 = vld [vmem:[#allocation9 + $0x48] sm:$0xff]  ;;  %v3740_v48 = vcombine.high %v1762_v59, %v1766_v12 }
 0x3e8   :  { %v1267_v58 = vpop.xlane.xlu1 %1266  ;;  %2428 = vmatpush1.bf16.msra.mxu1 %v3765_v62  ;;  %v3741_v22 = vcombine.low %v1763_v0, %v1767_v50  ;;  %v3742_v46 = vcombine.high %v1763_v0, %v1767_v50  ;;  %v1758_v62 = vld [vmem:[#allocation9 + $0x20] sm:$0xff]  ;;  %v1759_v19 = vld [vmem:[#allocation9 + $0x28] sm:$0xff] }
 0x3e9   :  { %v1309_v2 = vmul.f32 0.0078125, %v1267_v58  ;;  %v1360_v30 = vmul.f32 %v5286_v44, %v5286_v44  ;;  %2266 = vmatprep.subr.bf16.mxu0 %v3756_v47  ;;  %2429 = vmatprep.subr.bf16.mxu1 %v3758_v31  ;;  %v1754_v58 = vld [vmem:[#allocation9] sm:$0xff]  ;;  %v4664_v31 = vmov 0  }
 0x3ea   :  { %2267 = vmatpush1.bf16.msra.mxu0 %v3755_v49  ;;  %v3731_v56 = vcombine.low %v1754_v58, %v1758_v62  ;;  %2290 = vmatprep.mubr.bf16.mxu0 %v4664_v31 }
 0x3eb   :  { %v5291_v11 = vsub.f32 %v5183_v15, %v1309_v2  ;;  %1394 = vadd.xlane.f32.xlu0 %v1360_v30  ;;  %2268 = vmatprep.subr.bf16.mxu0 %v3748_v8  ;;  %v1755_v2 = vld [vmem:[#allocation9 + $0x8] sm:$0xff]  ;;  %v3732_v30 = vcombine.high %v1754_v58, %v1758_v62 }
 0x3ec   :  { %v1269_v13 = vpop.xlane.xlu0 %1268  ;;  %2430 = vmatpush1.bf16.msra.mxu1 %v3757_v21  ;;  %v3733_v47 = vcombine.low %v1755_v2, %v1759_v19  ;;  %v3734_v3 = vcombine.high %v1755_v2, %v1759_v19  ;;  %2453 = vmatprep.mubr.bf16.mxu1 %v4664_v31 }
 0x3ed   :  { %v1310_v28 = vmul.f32 0.0078125, %v1269_v13  ;;  %v1361_v33 = vmul.f32 %v5291_v11, %v5291_v11  ;;  %2431 = vmatprep.subr.bf16.mxu1 %v3750_v27 }
 0x3ee   :  { %2269 = vmatpush1.bf16.msra.mxu0 %v3747_v51 }
 0x3ef   :  { %v5296_v15 = vsub.f32 %v5187_v29, %v1310_v28  ;;  %1396 = vadd.xlane.f32.xlu1 %v1361_v33  ;;  %2270 = vmatprep.subr.bf16.mxu0 %v3740_v48 }
 0x3f0   :  { %v1271_v26 = vpop.xlane.xlu1 %1270  ;;  %2432 = vmatpush1.bf16.msra.mxu1 %v3749_v40 }
 0x3f1   :  { %v1311_v41 = vmul.f32 0.0078125, %v1271_v26  ;;  %v1362_v60 = vmul.f32 %v5296_v15, %v5296_v15  ;;  %2433 = vmatprep.subr.bf16.mxu1 %v3742_v46 }
 0x3f2   :  { %2271 = vmatpush1.bf16.msra.mxu0 %v3739_v55  ;;  %v5347_v55 = vld [vmem:[#allocation9 + $0x1d0] sm:$0xff] }
 0x3f3   :  { %v5301_v29 = vsub.f32 %v5191_v63, %v1311_v41  ;;  %1398 = vadd.xlane.f32.xlu0 %v1362_v60  ;;  %2272 = vmatprep.subr.bf16.mxu0 %v3732_v30 }
 0x3f4   :  { %v1273_v10 = vpop.xlane.xlu0 %1272  ;;  %2434 = vmatpush1.bf16.msra.mxu1 %v3741_v22  ;;  %v5349_v22 = vld [vmem:[#allocation9 + $0x1f0] sm:$0xff] }
 0x3f5   :  { %v1312_v54 = vmul.f32 0.0078125, %v1273_v10  ;;  %v1363_v24 = vmul.f32 %v5301_v29, %v5301_v29  ;;  %2435 = vmatprep.subr.bf16.mxu1 %v3734_v3  ;;  %v3792_v46 = vcombine.high %v5347_v55, %v5349_v22 }
 0x3f6   :  { %2273 = vmatpush1.bf16.msra.mxu0 %v3731_v56 }
 0x3f7   :  { %v5306_v63 = vsub.f32 %v5195_v36, %v1312_v54  ;;  %1400 = vadd.xlane.f32.xlu1 %v1363_v24  ;;  %v5355_v54 = vld [vmem:[#allocation9 + $0x1f8] sm:$0xff]  ;;  %2584 = vmatprep.subr.bf16.mxu0 %v3792_v46 }
 0x3f8   :  { %v1275_v45 = vpop.xlane.xlu1 %1274  ;;  %2436 = vmatpush1.bf16.msra.mxu1 %v3733_v47 }
 0x3f9   :  { %v1313_v13 = vmul.f32 0.0078125, %v1275_v45  ;;  %v1364_v49 = vmul.f32 %v5306_v63, %v5306_v63 }
 0x3fb   :  { %v5311_v21 = vsub.f32 %v5199_v52, %v1313_v13  ;;  %1402 = vadd.xlane.f32.xlu0 %v1364_v49 }
 0x3fc   :  { %v1277_v36 = vpop.xlane.xlu0 %1276 }
 0x3fd   :  { %v1314_v28 = vmul.f32 0.0078125, %v1277_v36  ;;  %v1365_v33 = vmul.f32 %v5311_v21, %v5311_v21 }
 0x3ff   :  { %v5318_v32 = vsub.f32 %v5203_v35, %v1314_v28  ;;  %1404 = vadd.xlane.f32.xlu1 %v1365_v33 }
 0x400   :  { %v1279_v7 = vpop.xlane.xlu1 %1278 }
 0x401   :  { %v1315_v16 = vmul.f32 0.0078125, %v1279_v7  ;;  %v1366_v52 = vmul.f32 %v5318_v32, %v5318_v32 }
 0x403   :  { %v5323_v8 = vsub.f32 %v5206_v43, %v1315_v16  ;;  %1406 = vadd.xlane.f32.xlu0 %v1366_v52 }
 0x404   :  { %v1281_v25 = vpop.xlane.xlu0 %1280 }
 0x405   :  { %v1316_v26 = vmul.f32 0.0078125, %v1281_v25  ;;  %v1367_v51 = vmul.f32 %v5323_v8, %v5323_v8 }
 0x407   :  { %v5328_v40 = vsub.f32 %v5209_v17, %v1316_v26  ;;  %1408 = vadd.xlane.f32.xlu1 %v1367_v51 }
 0x408   :  { %v1283_v35 = vpop.xlane.xlu1 %1282 }
 0x409   :  { %v1317_v27 = vmul.f32 0.0078125, %v1283_v35  ;;  %v1368_v41 = vmul.f32 %v5328_v40, %v5328_v40 }
 0x40b   :  { %v5333_v60 = vsub.f32 %v5212_v1, %v1317_v27  ;;  %1410 = vadd.xlane.f32.xlu0 %v1368_v41 }
 0x40c   :  { %v1285_v43 = vpop.xlane.xlu0 %1284 }
 0x40d   :  { %v1318_v59 = vmul.f32 0.0078125, %v1285_v43  ;;  %v1369_v12 = vmul.f32 %v5333_v60, %v5333_v60 }
 0x40f   :  { %v5338_v0 = vsub.f32 %v5215_v53, %v1318_v59  ;;  %1412 = vadd.xlane.f32.xlu1 %v1369_v12  ;;  %v5351_v53 = vld [vmem:[#allocation9 + $0x1d8] sm:$0xff] }
 0x410   :  { %v1287_v17 = vpop.xlane.xlu1 %1286 }
 0x411   :  { %v1319_v48 = vmul.f32 0.0078125, %v1287_v17  ;;  %v1370_v50 = vmul.f32 %v5338_v0, %v5338_v0  ;;  %v5377_v17 = vld [vmem:[%s5873_s7] ss:$0 sm:$0xff] }
 0x413   :  { %v5343_v10 = vsub.f32 %v5218_v9, %v1319_v48  ;;  %1414 = vadd.xlane.f32.xlu0 %v1370_v50  ;;  %v3794_v9 = vcombine.high %v5351_v53, %v5355_v54 }
 0x415   :  { %v1371_v1 = vmul.f32 %v5343_v10, %v5343_v10  ;;  %2747 = vmatprep.subr.bf16.mxu1 %v3794_v9 }
 0x417   :  { %1416 = vadd.xlane.f32.xlu1 %v1371_v1 }
 0x454   :  { %v1379_v24 = vpop.xlane.xlu0 %1378 }
 0x455   :  { %v1430_v58 = vmul.f32 0.0078125, %v1379_v24 }
 0x457   :  { %v1456_v62 = vadd.f32 1e-12, %v1430_v58 }
 0x458   :  { %v1289_v2 = vpop.xlane.xlu0 %1288  ;;  %v1381_v30 = vpop.xlane.xlu1 %1380 }
 0x459   :  { %4494 = vrsqrt.f32 %v1456_v62  ;;  %v1320_v19 = vmul.f32 0.0078125, %v1289_v2  ;;  %v1431_v45 = vmul.f32 0.0078125, %v1381_v30 }
 0x45b   :  { %v5360_v56 = vsub.f32 %v5235_v23, %v1320_v19  ;;  %v1457_v47 = vadd.f32 1e-12, %v1431_v45 }
 0x45c   :  { %v1383_v3 = vpop.xlane.xlu0 %1382  ;;  %v1291_v13 = vpop.xlane.xlu1 %1290 }
 0x45d   :  { %4496 = vrsqrt.f32 %v1457_v47  ;;  %v1432_v49 = vmul.f32 0.0078125, %v1383_v3  ;;  %v1321_v36 = vmul.f32 0.0078125, %v1291_v13  ;;  %v1372_v28 = vmul.f32 %v5360_v56, %v5360_v56 }
 0x45f   :  { %v1458_v33 = vadd.f32 1e-12, %v1432_v49  ;;  %v5365_v7 = vsub.f32 %v5243_v34, %v1321_v36  ;;  %1418 = vadd.xlane.f32.xlu0 %v1372_v28 }
 0x460   :  { %v1293_v16 = vpop.xlane.xlu0 %1292  ;;  %v1385_v52 = vpop.xlane.xlu1 %1384 }
 0x461   :  { %4498 = vrsqrt.f32 %v1458_v33  ;;  %v1322_v25 = vmul.f32 0.0078125, %v1293_v16  ;;  %v1433_v23 = vmul.f32 0.0078125, %v1385_v52  ;;  %v1373_v26 = vmul.f32 %v5365_v7, %v5365_v7 }
 0x463   :  { %v5370_v51 = vsub.f32 %v5251_v57, %v1322_v25  ;;  %v1459_v35 = vadd.f32 1e-12, %v1433_v23  ;;  %1420 = vadd.xlane.f32.xlu1 %v1373_v26 }
 0x464   :  { %v1387_v27 = vpop.xlane.xlu0 %1386  ;;  %v1295_v41 = vpop.xlane.xlu1 %1294 }
 0x465   :  { %4500 = vrsqrt.f32 %v1459_v35  ;;  %v1434_v43 = vmul.f32 0.0078125, %v1387_v27  ;;  %v1323_v34 = vmul.f32 0.0078125, %v1295_v41  ;;  %v1374_v59 = vmul.f32 %v5370_v51, %v5370_v51 }
 0x466   :  { %v4495_v12 = vpop.eup %4494 }
 0x467   :  { %v1508_v48 = vmul.f32 %v4495_v12, %v5226_v18  ;;  %v1460_v57 = vadd.f32 1e-12, %v1434_v43  ;;  %v5381_v50 = vsub.f32 %v5259_v39, %v1323_v34  ;;  %1422 = vadd.xlane.f32.xlu0 %v1374_v59  ;;  %v5389_v18 = vld [vmem:[%s5874_s8] ss:$0 sm:$0xff] }
 0x468   :  { %v1297_v1 = vpop.xlane.xlu0 %1296  ;;  %v1389_v46 = vpop.xlane.xlu1 %1388 }
 0x469   :  { %4502 = vrsqrt.f32 %v1460_v57  ;;  %v1324_v9 = vmul.f32 0.0078125, %v1297_v1  ;;  %v1435_v24 = vmul.f32 0.0078125, %v1389_v46  ;;  %v1540_v62 = vmul.f32 %v5377_v17, %v1508_v48 }
 0x46a   :  { %v4497_v58 = vpop.eup %4496  ;;  %v1375_v2 = vmul.f32 %v5381_v50, %v5381_v50 }
 0x46b   :  { %v1509_v39 = vmul.f32 %v4497_v58, %v5232_v6  ;;  %v5393_v30 = vsub.f32 %v5267_v4, %v1324_v9  ;;  %v1461_v19 = vadd.f32 1e-12, %v1435_v24  ;;  %v1572_v28 = vadd.f32 %v5389_v18, %v1540_v62  ;;  %v1804_v9 = vld [vmem:[#allocation9 + $0x190] sm:$0xff]  ;;  %v1805_v62 = vld [vmem:[#allocation9 + $0x198] sm:$0xff] }
 0x46c   :  { %1424 = vadd.xlane.f32.xlu1 %v1375_v2  ;;  %v1391_v45 = vpop.xlane.xlu0 %1390  ;;  %v1299_v47 = vpop.xlane.xlu1 %1298  ;;  %v1808_v24 = vld [vmem:[#allocation9 + $0x1b0] sm:$0xff] }
 0x46d   :  { %v1541_v3 = vmul.f32 %v5377_v17, %v1509_v39  ;;  %4504 = vrsqrt.f32 %v1461_v19  ;;  %v1436_v13 = vmul.f32 0.0078125, %v1391_v45  ;;  %v1325_v49 = vmul.f32 0.0078125, %v1299_v47  ;;  %v5412_v19 = vld [vmem:[#allocation9 + $0x150] sm:$0xff] }
 0x46e   :  { %v4499_v36 = vpop.eup %4498  ;;  %v1376_v33 = vmul.f32 %v5393_v30, %v5393_v30 }
 0x46f   :  { %v1573_v6 = vadd.f32 %v5389_v18, %v1541_v3  ;;  %v1510_v4 = vmul.f32 %v4499_v36, %v5240_v14  ;;  %v1462_v16 = vadd.f32 1e-12, %v1436_v13  ;;  %v5402_v52 = vsub.f32 %v5275_v20, %v1325_v49 }
 0x470   :  { %1426 = vadd.xlane.f32.xlu0 %v1376_v33  ;;  %v1393_v25 = vpop.xlane.xlu1 %1392  ;;  %v3791_v3 = vcombine.low %v5347_v55, %v5349_v22  ;;  %v3784_v13 = vcombine.high %v1804_v9, %v1808_v24 }
 0x471   :  { %v4032_v23 = vpack.c.bf16 %v1573_v6, %v1572_v28  ;;  %4506 = vrsqrt.f32 %v1462_v16  ;;  %v1437_v26 = vmul.f32 0.0078125, %v1393_v25  ;;  %v1377_v27 = vmul.f32 %v5402_v52, %v5402_v52  ;;  %v1800_v6 = vld [vmem:[#allocation9 + $0x170] sm:$0xff]  ;;  %v1801_v16 = vld [vmem:[#allocation9 + $0x178] sm:$0xff] }
 0x472   :  { %v4501_v35 = vpop.eup %4500  ;;  %v1542_v41 = vmul.f32 %v5377_v17, %v1510_v4  ;;  %v1797_v4 = vld [vmem:[#allocation9 + $0x158] sm:$0xff] }
 0x473   :  { %4033 = vst [vmem:[#allocation2] sm:$0xff] %v4032_v23   ;;  %v1511_v43 = vmul.f32 %v4501_v35, %v5248_v37  ;;  %v1463_v34 = vadd.f32 1e-12, %v1437_v26  ;;  %1428 = vadd.xlane.f32.xlu1 %v1377_v27  ;;  %v1809_v37 = vld [vmem:[#allocation9 + $0x1b8] sm:$0xff]  ;;  %v3776_v23 = vcombine.high %v5412_v19, %v1800_v6  ;;  %v3778_v26 = vcombine.high %v1797_v4, %v1801_v16 }
 0x474   :  { %v1395_v14 = vpop.xlane.xlu0 %1394  ;;  %v1574_v48 = vadd.f32 %v5389_v18, %v1542_v41  ;;  %v3786_v33 = vcombine.high %v1805_v62, %v1809_v37 }
 0x475   :  { %v1543_v20 = vmul.f32 %v5377_v17, %v1511_v43  ;;  %4508 = vrsqrt.f32 %v1463_v34  ;;  %v1438_v59 = vmul.f32 0.0078125, %v1395_v14  ;;  %v1788_v34 = vld [vmem:[#allocation9 + $0x110] sm:$0xff] }
 0x476   :  { %v4503_v12 = vpop.eup %4502  ;;  %v1792_v14 = vld [vmem:[#allocation9 + $0x130] sm:$0xff] }
 0x477   :  { %v1575_v57 = vadd.f32 %v5389_v18, %v1543_v20  ;;  %v1512_v1 = vmul.f32 %v4503_v12, %v5256_v42  ;;  %v1464_v46 = vadd.f32 1e-12, %v1438_v59  ;;  %v3793_v42 = vcombine.low %v5351_v53, %v5355_v54  ;;  %v1789_v59 = vld [vmem:[#allocation9 + $0x118] sm:$0xff] }
 0x478   :  { %v1397_v58 = vpop.xlane.xlu1 %1396  ;;  %v3783_v53 = vcombine.low %v1804_v9, %v1808_v24  ;;  %v3785_v54 = vcombine.low %v1805_v62, %v1809_v37  ;;  %v1793_v12 = vld [vmem:[#allocation9 + $0x138] sm:$0xff]  ;;  %v3775_v9 = vcombine.low %v5412_v19, %v1800_v6  ;;  %v3777_v24 = vcombine.low %v1797_v4, %v1801_v16  ;;  %v1784_v6 = vld [vmem:[#allocation9 + $0xf0] sm:$0xff] }
 0x479   :  { %v4037_v2 = vpack.c.bf16 %v1575_v57, %v1574_v48  ;;  %4510 = vrsqrt.f32 %v1464_v46  ;;  %v1439_v39 = vmul.f32 0.0078125, %v1397_v58  ;;  %v1544_v49 = vmul.f32 %v5377_v17, %v1512_v1  ;;  %v1781_v4 = vld [vmem:[#allocation9 + $0xd8] sm:$0xff] }
 0x47a   :  { %v4505_v45 = vpop.eup %4504  ;;  %v5414_v47 = vld [vmem:[#allocation2] sm:$0xff]  }
 0x47b   :  { %4094 = vst [vmem:[#allocation2 + $0x8] sm:$0xff] %v4037_v2   ;;  %v1513_v36 = vmul.f32 %v4505_v45, %v5264_v5  ;;  %v1465_v28 = vadd.f32 1e-12, %v1439_v39  ;;  %2291 = vmatmul.mubr.bf16.vlgmr.msra.gmra.mxu0 %v5414_v47  ;;  %2454 = vmatmul.mubr.bf16.vlgmr.msra.gmra.mxu1 %v5414_v47  ;;  %v1576_v35 = vadd.f32 %v5389_v18, %v1544_v49 }
 0x47c   :  { %v1399_v25 = vpop.xlane.xlu0 %1398  ;;  %2300 = vmatprep.mubr.bf16.mxu0 %v4664_v31  ;;  %2463 = vmatprep.mubr.bf16.mxu1 %v4664_v31  ;;  %v3770_v2 = vcombine.high %v1789_v59, %v1793_v12 }
 0x47d   :  { %v1545_v55 = vmul.f32 %v5377_v17, %v1513_v36  ;;  %4512 = vrsqrt.f32 %v1465_v28  ;;  %v1440_v22 = vmul.f32 0.0078125, %v1399_v25  ;;  %2585 = vmatpush1.bf16.msra.mxu0 %v3791_v3  ;;  %2748 = vmatpush1.bf16.msra.mxu1 %v3793_v42  ;;  %v3769_v42 = vcombine.low %v1789_v59, %v1793_v12 }
 0x47e   :  { %v4507_v5 = vpop.eup %4506  ;;  %2586 = vmatprep.subr.bf16.mxu0 %v3784_v13  ;;  %2749 = vmatprep.subr.bf16.mxu1 %v3786_v33  ;;  %v1780_v33 = vld [vmem:[#allocation9 + $0xd0] sm:$0xff] }
 0x47f   :  { %v1577_v27 = vadd.f32 %v5389_v18, %v1545_v55  ;;  %v1514_v41 = vmul.f32 %v4507_v5, %v5272_v61  ;;  %v1466_v43 = vadd.f32 1e-12, %v1440_v22  ;;  %v3768_v61 = vcombine.high %v1788_v34, %v1792_v14  ;;  %v1785_v55 = vld [vmem:[#allocation9 + $0xf8] sm:$0xff] }
 0x480   :  { %v1401_v20 = vpop.xlane.xlu1 %1400  ;;  %v3760_v25 = vcombine.high %v1780_v33, %v1784_v6 }
 0x481   :  { %v4042_v48 = vpack.c.bf16 %v1577_v27, %v1576_v35  ;;  %4514 = vrsqrt.f32 %v1466_v43  ;;  %v1441_v57 = vmul.f32 0.0078125, %v1401_v20  ;;  %2587 = vmatpush1.bf16.msra.mxu0 %v3783_v53  ;;  %2750 = vmatpush1.bf16.msra.mxu1 %v3785_v54  ;;  %v1546_v58 = vmul.f32 %v5377_v17, %v1514_v41 }
 0x482   :  { %v4509_v1 = vpop.eup %4508  ;;  %v5431_v46 = vld [vmem:[#allocation2 + $0x8] sm:$0xff]   ;;  %2588 = vmatprep.subr.bf16.mxu0 %v3776_v23  ;;  %2751 = vmatprep.subr.bf16.mxu1 %v3778_v26  ;;  %v3759_v23 = vcombine.low %v1780_v33, %v1784_v6  ;;  %v3762_v26 = vcombine.high %v1781_v4, %v1785_v55  ;;  %v3761_v41 = vcombine.low %v1781_v4, %v1785_v55  ;;  %v1764_v4 = vld [vmem:[#allocation9 + $0x50] sm:$0xff] }
 0x483   :  { %4095 = vst [vmem:[#allocation2 + $0x10] sm:$0xff] %v4042_v48   ;;  %v1515_v62 = vmul.f32 %v4509_v1, %v5280_v38  ;;  %v1467_v37 = vadd.f32 1e-12, %v1441_v57  ;;  %2301 = vmatmul.mubr.bf16.gmra.mxu0 %v5431_v46  ;;  %2464 = vmatmul.mubr.bf16.gmra.mxu1 %v5431_v46  ;;  %v3767_v38 = vcombine.low %v1788_v34, %v1792_v14  ;;  %v1777_v6 = vld [vmem:[#allocation9 + $0xb8] sm:$0xff] }
 0x484   :  { %v1403_v39 = vpop.xlane.xlu0 %1402  ;;  %2310 = vmatprep.mubr.bf16.mxu0 %v4664_v31  ;;  %2473 = vmatprep.mubr.bf16.mxu1 %v4664_v31  ;;  %v1578_v13 = vadd.f32 %v5389_v18, %v1546_v58 }
 0x485   :  { %v1547_v45 = vmul.f32 %v5377_v17, %v1515_v62  ;;  %4516 = vrsqrt.f32 %v1467_v37  ;;  %v1442_v19 = vmul.f32 0.0078125, %v1403_v39  ;;  %2589 = vmatpush1.bf16.msra.mxu0 %v3775_v9  ;;  %2752 = vmatpush1.bf16.msra.mxu1 %v3777_v24 }
 0x486   :  { %v4511_v3 = vpop.eup %4510  ;;  %2590 = vmatprep.subr.bf16.mxu0 %v3768_v61  ;;  %2753 = vmatprep.subr.bf16.mxu1 %v3770_v2 }
 0x487   :  { %v1579_v49 = vadd.f32 %v5389_v18, %v1547_v45  ;;  %v1516_v36 = vmul.f32 %v4511_v3, %v5286_v44  ;;  %v1468_v28 = vadd.f32 1e-12, %v1442_v19 }
 0x488   :  { %v1405_v16 = vpop.xlane.xlu1 %1404 }
 0x489   :  { %v4047_v22 = vpack.c.bf16 %v1579_v49, %v1578_v13  ;;  %4518 = vrsqrt.f32 %v1468_v28  ;;  %v1443_v53 = vmul.f32 0.0078125, %v1405_v16  ;;  %2591 = vmatpush1.bf16.msra.mxu0 %v3767_v38  ;;  %2754 = vmatpush1.bf16.msra.mxu1 %v3769_v42  ;;  %v1548_v44 = vmul.f32 %v5377_v17, %v1516_v36  ;;  %v1772_v13 = vld [vmem:[#allocation9 + $0x90] sm:$0xff]  ;;  %v1773_v36 = vld [vmem:[#allocation9 + $0x98] sm:$0xff] }
 0x48a   :  { %v4513_v5 = vpop.eup %4512  ;;  %v5444_v54 = vld [vmem:[#allocation2 + $0x10] sm:$0xff]   ;;  %2592 = vmatprep.subr.bf16.mxu0 %v3760_v25  ;;  %2755 = vmatprep.subr.bf16.mxu1 %v3762_v26  ;;  %v1776_v49 = vld [vmem:[#allocation9 + $0xb0] sm:$0xff] }
 0x48b   :  { %4096 = vst [vmem:[#allocation2 + $0x18] sm:$0xff] %v4047_v22   ;;  %v1517_v35 = vmul.f32 %v4513_v5, %v5291_v11  ;;  %v1469_v27 = vadd.f32 1e-12, %v1443_v53  ;;  %2311 = vmatmul.mubr.bf16.gmra.mxu0 %v5444_v54  ;;  %2474 = vmatmul.mubr.bf16.gmra.mxu1 %v5444_v54  ;;  %v1580_v11 = vadd.f32 %v5389_v18, %v1548_v44  ;;  %v1768_v16 = vld [vmem:[#allocation9 + $0x70] sm:$0xff] }
 0x48c   :  { %v1407_v43 = vpop.xlane.xlu0 %1406  ;;  %2320 = vmatprep.mubr.bf16.mxu0 %v4664_v31  ;;  %2483 = vmatprep.mubr.bf16.mxu1 %v4664_v31  ;;  %v3752_v53 = vcombine.high %v1772_v13, %v1776_v49  ;;  %v3754_v5 = vcombine.high %v1773_v36, %v1777_v6  ;;  %v3751_v26 = vcombine.low %v1772_v13, %v1776_v49 }
 0x48d   :  { %v1549_v34 = vmul.f32 %v5377_v17, %v1517_v35  ;;  %4520 = vrsqrt.f32 %v1469_v27  ;;  %v1444_v14 = vmul.f32 0.0078125, %v1407_v43  ;;  %2593 = vmatpush1.bf16.msra.mxu0 %v3759_v23  ;;  %2756 = vmatpush1.bf16.msra.mxu1 %v3761_v41  ;;  %v3753_v44 = vcombine.low %v1773_v36, %v1777_v6  ;;  %v1765_v35 = vld [vmem:[#allocation9 + $0x58] sm:$0xff] }
 0x48e   :  { %v4515_v20 = vpop.eup %4514  ;;  %v1769_v27 = vld [vmem:[#allocation9 + $0x78] sm:$0xff]  ;;  %v3744_v43 = vcombine.high %v1764_v4, %v1768_v16  ;;  %2594 = vmatprep.subr.bf16.mxu0 %v3752_v53  ;;  %2757 = vmatprep.subr.bf16.mxu1 %v3754_v5 }
 0x48f   :  { %v1581_v59 = vadd.f32 %v5389_v18, %v1549_v34  ;;  %v1518_v12 = vmul.f32 %v4515_v20, %v5296_v15  ;;  %v1470_v48 = vadd.f32 1e-12, %v1444_v14  ;;  %v3746_v34 = vcombine.high %v1765_v35, %v1769_v27 }
 0x490   :  { %v1409_v57 = vpop.xlane.xlu1 %1408 }
 0x491   :  { %v4052_v1 = vpack.c.bf16 %v1581_v59, %v1580_v11  ;;  %4522 = vrsqrt.f32 %v1470_v48  ;;  %v1445_v9 = vmul.f32 0.0078125, %v1409_v57  ;;  %v1550_v58 = vmul.f32 %v5377_v17, %v1518_v12  ;;  %v1756_v12 = vld [vmem:[#allocation9 + $0x10] sm:$0xff]  ;;  %2595 = vmatpush1.bf16.msra.mxu0 %v3751_v26  ;;  %2758 = vmatpush1.bf16.msra.mxu1 %v3753_v44 }
 0x492   :  { %v4517_v24 = vpop.eup %4516  ;;  %v5456_v61 = vld [vmem:[#allocation2 + $0x18] sm:$0xff]   ;;  %v3743_v59 = vcombine.low %v1764_v4, %v1768_v16  ;;  %2596 = vmatprep.subr.bf16.mxu0 %v3744_v43  ;;  %2759 = vmatprep.subr.bf16.mxu1 %v3746_v34 }
 0x493   :  { %4097 = vst [vmem:[#allocation2 + $0x20] sm:$0xff] %v4052_v1   ;;  %v1519_v62 = vmul.f32 %v4517_v24, %v5301_v29  ;;  %v1471_v37 = vadd.f32 1e-12, %v1445_v9  ;;  %2321 = vmatmul.mubr.bf16.gmra.mxu0 %v5456_v61  ;;  %2484 = vmatmul.mubr.bf16.gmra.mxu1 %v5456_v61  ;;  %v1582_v19 = vadd.f32 %v5389_v18, %v1550_v58  ;;  %v1760_v24 = vld [vmem:[#allocation9 + $0x30] sm:$0xff]  ;;  %v1757_v58 = vld [vmem:[#allocation9 + $0x18] sm:$0xff] }
 0x494   :  { %v1411_v2 = vpop.xlane.xlu0 %1410  ;;  %2330 = vmatprep.mubr.bf16.mxu0 %v4664_v31  ;;  %2493 = vmatprep.mubr.bf16.mxu1 %v4664_v31  ;;  %v3745_v9 = vcombine.low %v1765_v35, %v1769_v27 }
 0x495   :  { %v1551_v15 = vmul.f32 %v5377_v17, %v1519_v62  ;;  %4524 = vrsqrt.f32 %v1471_v37  ;;  %v1446_v39 = vmul.f32 0.0078125, %v1411_v2  ;;  %v1761_v62 = vld [vmem:[#allocation9 + $0x38] sm:$0xff]  ;;  %2597 = vmatpush1.bf16.msra.mxu0 %v3743_v59 }
 0x496   :  { %v4519_v45 = vpop.eup %4518  ;;  %2760 = vmatpush1.bf16.msra.mxu1 %v3745_v9  ;;  %v3737_v13 = vcombine.low %v1757_v58, %v1761_v62 }
 0x497   :  { %v1583_v3 = vadd.f32 %v5389_v18, %v1551_v15  ;;  %v1520_v29 = vmul.f32 %v4519_v45, %v5306_v63  ;;  %v1472_v38 = vadd.f32 1e-12, %v1446_v39 }
 0x498   :  { %v1413_v42 = vpop.xlane.xlu1 %1412 }
 0x499   :  { %v4057_v28 = vpack.c.bf16 %v1583_v3, %v1582_v19  ;;  %4526 = vrsqrt.f32 %v1472_v38  ;;  %v1447_v33 = vmul.f32 0.0078125, %v1413_v42  ;;  %v1552_v55 = vmul.f32 %v5377_v17, %v1520_v29 }
 0x49a   :  { %v4521_v25 = vpop.eup %4520  ;;  %v5469_v22 = vld [vmem:[#allocation2 + $0x20] sm:$0xff]   ;;  %v3735_v19 = vcombine.low %v1756_v12, %v1760_v24  ;;  %v3736_v3 = vcombine.high %v1756_v12, %v1760_v24  ;;  %v3738_v29 = vcombine.high %v1757_v58, %v1761_v62 }
 0x49b   :  { %4098 = vst [vmem:[#allocation2 + $0x28] sm:$0xff] %v4057_v28   ;;  %v1521_v63 = vmul.f32 %v4521_v25, %v5311_v21  ;;  %v1473_v23 = vadd.f32 1e-12, %v1447_v33  ;;  %2331 = vmatmul.mubr.bf16.gmra.mxu0 %v5469_v22  ;;  %2494 = vmatmul.mubr.bf16.gmra.mxu1 %v5469_v22  ;;  %v1584_v11 = vadd.f32 %v5389_v18, %v1552_v55 }
 0x49c   :  { %v1415_v41 = vpop.xlane.xlu0 %1414  ;;  %2340 = vmatprep.mubr.bf16.mxu0 %v4664_v31  ;;  %2503 = vmatprep.mubr.bf16.mxu1 %v4664_v31 }
 0x49d   :  { %v1553_v14 = vmul.f32 %v5377_v17, %v1521_v63  ;;  %4528 = vrsqrt.f32 %v1473_v23  ;;  %v1448_v20 = vmul.f32 0.0078125, %v1415_v41  ;;  %2598 = vmatprep.subr.bf16.mxu0 %v3736_v3  ;;  %2761 = vmatprep.subr.bf16.mxu1 %v3738_v29 }
 0x49e   :  { %v4523_v21 = vpop.eup %4522  ;;  %2599 = vmatpush1.bf16.msra.mxu0 %v3735_v19  ;;  %2762 = vmatpush1.bf16.msra.mxu1 %v3737_v13 }
 0x49f   :  { %v1585_v48 = vadd.f32 %v5389_v18, %v1553_v14  ;;  %v1522_v57 = vmul.f32 %v4523_v21, %v5318_v32  ;;  %v1474_v1 = vadd.f32 1e-12, %v1448_v20 }
 0x4a0   :  { %v1417_v37 = vpop.xlane.xlu1 %1416 }
 0x4a1   :  { %v4062_v2 = vpack.c.bf16 %v1585_v48, %v1584_v11  ;;  %4530 = vrsqrt.f32 %v1474_v1  ;;  %v1449_v15 = vmul.f32 0.0078125, %v1417_v37  ;;  %v1554_v32 = vmul.f32 %v5377_v17, %v1522_v57 }
 0x4a2   :  { %v4525_v39 = vpop.eup %4524  ;;  %v5480_v45 = vld [vmem:[#allocation2 + $0x28] sm:$0xff]  }
 0x4a3   :  { %4099 = vst [vmem:[#allocation2 + $0x30] sm:$0xff] %v4062_v2   ;;  %v1523_v38 = vmul.f32 %v4525_v39, %v5323_v8  ;;  %v1475_v42 = vadd.f32 1e-12, %v1449_v15  ;;  %2341 = vmatmul.mubr.bf16.gmra.mxu0 %v5480_v45  ;;  %2504 = vmatmul.mubr.bf16.gmra.mxu1 %v5480_v45  ;;  %v1586_v8 = vadd.f32 %v5389_v18, %v1554_v32 }
 0x4a4   :  { %2350 = vmatprep.mubr.bf16.mxu0 %v4664_v31  ;;  %2513 = vmatprep.mubr.bf16.mxu1 %v4664_v31 }
 0x4a5   :  { %v1555_v49 = vmul.f32 %v5377_v17, %v1523_v38  ;;  %4532 = vrsqrt.f32 %v1475_v42 }
 0x4a6   :  { %v4527_v36 = vpop.eup %4526 }
 0x4a7   :  { %v1587_v28 = vadd.f32 %v5389_v18, %v1555_v49  ;;  %v1524_v33 = vmul.f32 %v4527_v36, %v5328_v40 }
 0x4a9   :  { %v4067_v6 = vpack.c.bf16 %v1587_v28, %v1586_v8  ;;  %v1556_v25 = vmul.f32 %v5377_v17, %v1524_v33 }
 0x4aa   :  { %v4529_v4 = vpop.eup %4528  ;;  %v5492_v16 = vld [vmem:[#allocation2 + $0x30] sm:$0xff]  }
 0x4ab   :  { %4100 = vst [vmem:[#allocation2 + $0x38] sm:$0xff] %v4067_v6   ;;  %v1525_v55 = vmul.f32 %v4529_v4, %v5333_v60  ;;  %2351 = vmatmul.mubr.bf16.gmra.mxu0 %v5492_v16  ;;  %2514 = vmatmul.mubr.bf16.gmra.mxu1 %v5492_v16  ;;  %v1588_v5 = vadd.f32 %v5389_v18, %v1556_v25 }
 0x4ac   :  { %2360 = vmatprep.mubr.bf16.mxu0 %v4664_v31  ;;  %2523 = vmatprep.mubr.bf16.mxu1 %v4664_v31 }
 0x4ad   :  { %v1557_v53 = vmul.f32 %v5377_v17, %v1525_v55 }
 0x4ae   :  { %v4531_v40 = vpop.eup %4530 }
 0x4af   :  { %v1589_v63 = vadd.f32 %v5389_v18, %v1557_v53  ;;  %v1526_v23 = vmul.f32 %v4531_v40, %v5338_v0 }
 0x4b1   :  { %v4072_v26 = vpack.c.bf16 %v1589_v63, %v1588_v5  ;;  %v1558_v35 = vmul.f32 %v5377_v17, %v1526_v23 }
 0x4b2   :  { %v4533_v44 = vpop.eup %4532  ;;  %v5504_v60 = vld [vmem:[#allocation2 + $0x38] sm:$0xff]  }
 0x4b3   :  { %4101 = vst [vmem:[#allocation2 + $0x40] sm:$0xff] %v4072_v26   ;;  %v1527_v27 = vmul.f32 %v4533_v44, %v5343_v10  ;;  %2361 = vmatmul.mubr.bf16.gmra.mxu0 %v5504_v60  ;;  %2524 = vmatmul.mubr.bf16.gmra.mxu1 %v5504_v60  ;;  %v1590_v0 = vadd.f32 %v5389_v18, %v1558_v35 }
 0x4b4   :  { %2370 = vmatprep.mubr.bf16.mxu0 %v4664_v31  ;;  %2533 = vmatprep.mubr.bf16.mxu1 %v4664_v31 }
 0x4b5   :  { %v1559_v41 = vmul.f32 %v5377_v17, %v1527_v27 }
 0x4b7   :  { %v1591_v43 = vadd.f32 %v5389_v18, %v1559_v41 }
 0x4b9   :  { %v4077_v34 = vpack.c.bf16 %v1591_v43, %v1590_v0 }
 0x4ba   :  { %v5515_v14 = vld [vmem:[#allocation2 + $0x40] sm:$0xff]  }
 0x4bb   :  { %4102 = vst [vmem:[#allocation2 + $0x48] sm:$0xff] %v4077_v34   ;;  %2371 = vmatmul.mubr.bf16.gmra.mxu0 %v5515_v14  ;;  %2534 = vmatmul.mubr.bf16.gmra.mxu1 %v5515_v14 }
 0x4bc   :  { %2380 = vmatprep.mubr.bf16.mxu0 %v4664_v31  ;;  %2543 = vmatprep.mubr.bf16.mxu1 %v4664_v31 }
 0x4c2   :  { %v5521_v10 = vld [vmem:[#allocation2 + $0x48] sm:$0xff]  }
 0x4c3   :  { %2381 = vmatmul.mubr.bf16.gmra.mxu0 %v5521_v10  ;;  %2544 = vmatmul.mubr.bf16.gmra.mxu1 %v5521_v10 }
 0x4c4   :  { %2390 = vmatprep.mubr.bf16.mxu0 %v4664_v31  ;;  %2553 = vmatprep.mubr.bf16.mxu1 %v4664_v31 }
 0x4e8   :  { %v1419_v20 = vpop.xlane.xlu0 %1418 }
 0x4e9   :  { %v1450_v21 = vmul.f32 0.0078125, %v1419_v20  ;;  %v5580_v20 = vld [vmem:[%s5876_s10] sm:$0xff] }
 0x4eb   :  { %v1476_v11 = vadd.f32 1e-12, %v1450_v21 }
 0x4ec   :  { %v1421_v59 = vpop.xlane.xlu1 %1420 }
 0x4ed   :  { %4534 = vrsqrt.f32 %v1476_v11  ;;  %v1451_v12 = vmul.f32 0.0078125, %v1421_v59 }
 0x4ef   :  { %v1477_v48 = vadd.f32 1e-12, %v1451_v12 }
 0x4f0   :  { %v1423_v57 = vpop.xlane.xlu0 %1422 }
 0x4f1   :  { %4536 = vrsqrt.f32 %v1477_v48  ;;  %v1452_v1 = vmul.f32 0.0078125, %v1423_v57 }
 0x4f3   :  { %v1478_v9 = vadd.f32 1e-12, %v1452_v1 }
 0x4f5   :  { %4538 = vrsqrt.f32 %v1478_v9  ;;  %v1425_v24 = vpop.xlane.xlu1 %1424 }
 0x4f6   :  { %v1453_v58 = vmul.f32 0.0078125, %v1425_v24 }
 0x4f8   :  { %v1479_v62 = vadd.f32 1e-12, %v1453_v58 }
 0x4f9   :  { %v1427_v37 = vpop.xlane.xlu0 %1426 }
 0x4fa   :  { %v4535_v2 = vpop.eup %4534  ;;  %4540 = vrsqrt.f32 %v1479_v62  ;;  %v1454_v15 = vmul.f32 0.0078125, %v1427_v37 }
 0x4fb   :  { %v1528_v39 = vmul.f32 %v4535_v2, %v5360_v56 }
 0x4fc   :  { %v1480_v19 = vadd.f32 1e-12, %v1454_v15  ;;  %v1429_v3 = vpop.xlane.xlu1 %1428 }
 0x4fd   :  { %v1455_v32 = vmul.f32 0.0078125, %v1429_v3  ;;  %v1560_v38 = vmul.f32 %v5377_v17, %v1528_v39 }
 0x4fe   :  { %v4537_v29 = vpop.eup %4536  ;;  %4542 = vrsqrt.f32 %v1480_v19 }
 0x4ff   :  { %v1529_v42 = vmul.f32 %v4537_v29, %v5365_v7  ;;  %v1481_v13 = vadd.f32 1e-12, %v1455_v32  ;;  %v1592_v8 = vadd.f32 %v5389_v18, %v1560_v38 }
 0x501   :  { %v1561_v49 = vmul.f32 %v5377_v17, %v1529_v42  ;;  %4544 = vrsqrt.f32 %v1481_v13 }
 0x502   :  { %v4539_v36 = vpop.eup %4538 }
 0x503   :  { %v1593_v28 = vadd.f32 %v5389_v18, %v1561_v49  ;;  %v1530_v56 = vmul.f32 %v4539_v36, %v5370_v51 }
 0x505   :  { %v4082_v33 = vpack.c.bf16 %v1593_v28, %v1592_v8  ;;  %v1562_v4 = vmul.f32 %v5377_v17, %v1530_v56 }
 0x507   :  { %v4541_v6 = vpop.eup %4540  ;;  %4103 = vst [vmem:[#allocation2 + $0x50] sm:$0xff] %v4082_v33   ;;  %v1594_v53 = vadd.f32 %v5389_v18, %v1562_v4 }
 0x508   :  { %v1531_v25 = vmul.f32 %v4541_v6, %v5381_v50 }
 0x50a   :  { %v1563_v7 = vmul.f32 %v5377_v17, %v1531_v25 }
 0x50b   :  { %v4543_v55 = vpop.eup %4542 }
 0x50c   :  { %v1595_v40 = vadd.f32 %v5389_v18, %v1563_v7  ;;  %v1532_v5 = vmul.f32 %v4543_v55, %v5393_v30 }
 0x50e   :  { %v4087_v63 = vpack.c.bf16 %v1595_v40, %v1594_v53  ;;  %v5540_v23 = vld [vmem:[#allocation2 + $0x50] sm:$0xff]   ;;  %v4545_v51 = vpop.eup %4544  ;;  %v1564_v26 = vmul.f32 %v5377_v17, %v1532_v5 }
 0x50f   :  { %v1533_v44 = vmul.f32 %v4545_v51, %v5402_v52  ;;  %2391 = vmatmul.mubr.bf16.gmra.mxu0 %v5540_v23  ;;  %2554 = vmatmul.mubr.bf16.gmra.mxu1 %v5540_v23 }
 0x510   :  { %4104 = vst [vmem:[#allocation2 + $0x58] sm:$0xff] %v4087_v63   ;;  %2400 = vmatprep.mubr.bf16.mxu0 %v4664_v31  ;;  %2563 = vmatprep.mubr.bf16.mxu1 %v4664_v31  ;;  %v1596_v30 = vadd.f32 %v5389_v18, %v1564_v26 }
 0x511   :  { %v1565_v50 = vmul.f32 %v5377_v17, %v1533_v44  ;;  %v1820_v17 = vlaneseq }
 0x513   :  { %v1597_v35 = vadd.f32 %v5389_v18, %v1565_v50  ;;  %v5571_v18 = vshrl.u32 %v1820_v17, 7 }
 0x515   :  { %v4092_v27 = vpack.c.bf16 %v1597_v35, %v1596_v30  ;;  %v1822_v0 = vsub.s32 0, %v5571_v18  ;;  %v1830_v43 = vsub.s32 2, %v5571_v18  ;;  %v1834_v34 = vsub.s32 3, %v5571_v18 }
 0x517   :  { %v5551_v41 = vld [vmem:[#allocation2 + $0x58] sm:$0xff]   ;;  %4105 = vst [vmem:[#allocation2 + $0x60] sm:$0xff] %v4092_v27   ;;  %v5590_v21 = vrot.slane %v5580_v20, %v1830_v43  ;;  %v5596_v59 = vrot.slane %v5580_v20, %v1834_v34 }
 0x518   :  { %2401 = vmatmul.mubr.bf16.gmra.mxu0 %v5551_v41  ;;  %2564 = vmatmul.mubr.bf16.gmra.mxu1 %v5551_v41 }
 0x519   :  { %2410 = vmatprep.mubr.bf16.mxu0 %v4664_v31  ;;  %2573 = vmatprep.mubr.bf16.mxu1 %v4664_v31 }
 0x51e   :  { %v5557_v52 = vld [vmem:[#allocation2 + $0x60] sm:$0xff]  }
 0x520   :  { %2411 = vmatmul.mubr.bf16.gmra.mxu0 %v5557_v52  ;;  %2574 = vmatmul.mubr.bf16.gmra.mxu1 %v5557_v52 }
 0x521   :  { %2616 = vmatprep.mubr.bf16.mxu0 %v4664_v31  ;;  %2779 = vmatprep.mubr.bf16.mxu1 %v4664_v31 }
 0x528   :  { %2617 = vmatmul.mubr.bf16.vlgmr.msra.gmra.mxu0 %v5414_v47  ;;  %2780 = vmatmul.mubr.bf16.vlgmr.msra.gmra.mxu1 %v5414_v47  ;;  %v1826_v47 = vsub.s32 1, %v5571_v18 }
 0x529   :  { %2626 = vmatprep.mubr.bf16.mxu0 %v4664_v31  ;;  %2789 = vmatprep.mubr.bf16.mxu1 %v4664_v31 }
 0x52a   :  { %v5593_v11 = vrot.slane %v5580_v20, %v1826_v47 }
 0x530   :  { %2627 = vmatmul.mubr.bf16.gmra.mxu0 %v5431_v46  ;;  %2790 = vmatmul.mubr.bf16.gmra.mxu1 %v5431_v46  ;;  %v5587_v46 = vrot.slane %v5580_v20, %v1822_v0 }
 0x531   :  { %2636 = vmatprep.mubr.bf16.mxu0 %v4664_v31  ;;  %2799 = vmatprep.mubr.bf16.mxu1 %v4664_v31 }
 0x538   :  { %2637 = vmatmul.mubr.bf16.gmra.mxu0 %v5444_v54  ;;  %2800 = vmatmul.mubr.bf16.gmra.mxu1 %v5444_v54 }
 0x539   :  { %2646 = vmatprep.mubr.bf16.mxu0 %v4664_v31  ;;  %2809 = vmatprep.mubr.bf16.mxu1 %v4664_v31 }
 0x53b   :  { %v2292_v12 = vpop.f32.mrf.mxu0  ;;  %v2455_v48 = vpop.f32.mrf.mxu1 }
 0x53c   :  { %v2293_v1 = vadd.f32 %v2292_v12, %v5587_v46  ;;  %v2456_v9 = vadd.f32 %v2455_v48, %v5590_v21 }
 0x53d   :  { %v2294_v57 = vpop.f32.mrf.mxu0  ;;  %v2457_v54 = vpop.f32.mrf.mxu1 }
 0x53e   :  { %v2295_v24 = vadd.f32 %v2294_v57, %v5593_v11  ;;  %v2458_v58 = vadd.f32 %v2457_v54, %v5596_v59 }
 0x53f   :  { %v2296_v62 = vpop.f32.mrf.mxu0  ;;  %v2459_v37 = vpop.f32.mrf.mxu1 }
 0x540   :  { %v3925_v2 = vpack.c.bf16 %v2295_v24, %v2293_v1  ;;  %v3926_v15 = vpack.c.bf16 %v2458_v58, %v2456_v9  ;;  %2647 = vmatmul.mubr.bf16.gmra.mxu0 %v5456_v61  ;;  %2810 = vmatmul.mubr.bf16.gmra.mxu1 %v5456_v61  ;;  %v2297_v3 = vadd.f32 %v2296_v62, %v5587_v46 }
 0x541   :  { %v2298_v39 = vpop.f32.mrf.mxu0  ;;  %v2461_v19 = vpop.f32.mrf.mxu1  ;;  %2656 = vmatprep.mubr.bf16.mxu0 %v4664_v31  ;;  %v2460_v29 = vadd.f32 %v2459_v37, %v5590_v21  ;;  %2819 = vmatprep.mubr.bf16.mxu1 %v4664_v31 }
 0x542   :  { %3534 = vst [vmem:[#allocation11] sm:$0xff] %v3925_v2  ;;  %3535 = vst [vmem:[#allocation11 + $0x8] sm:$0xff] %v3926_v15  ;;  %v2299_v32 = vadd.f32 %v2298_v39, %v5593_v11  ;;  %v2462_v38 = vadd.f32 %v2461_v19, %v5596_v59 }
 0x543   :  { %v2302_v42 = vpop.f32.mrf.mxu0  ;;  %v2465_v13 = vpop.f32.mrf.mxu1 }
 0x544   :  { %v3929_v49 = vpack.c.bf16 %v2299_v32, %v2297_v3  ;;  %v3930_v61 = vpack.c.bf16 %v2462_v38, %v2460_v29  ;;  %v2303_v28 = vadd.f32 %v2302_v42, %v5587_v46  ;;  %v2466_v56 = vadd.f32 %v2465_v13, %v5590_v21 }
 0x545   :  { %v2304_v36 = vpop.f32.mrf.mxu0  ;;  %v2467_v8 = vpop.f32.mrf.mxu1 }
 0x546   :  { %3538 = vst [vmem:[#allocation11 + $0x20] sm:$0xff] %v3929_v49  ;;  %3539 = vst [vmem:[#allocation11 + $0x28] sm:$0xff] %v3930_v61  ;;  %v2305_v33 = vadd.f32 %v2304_v36, %v5593_v11  ;;  %v2468_v6 = vadd.f32 %v2467_v8, %v5596_v59 }
 0x547   :  { %v2306_v4 = vpop.f32.mrf.mxu0  ;;  %v2469_v25 = vpop.f32.mrf.mxu1 }
 0x548   :  { %v3933_v7 = vpack.c.bf16 %v2305_v33, %v2303_v28  ;;  %v3934_v55 = vpack.c.bf16 %v2468_v6, %v2466_v56  ;;  %2657 = vmatmul.mubr.bf16.gmra.mxu0 %v5469_v22  ;;  %2820 = vmatmul.mubr.bf16.gmra.mxu1 %v5469_v22  ;;  %v2307_v5 = vadd.f32 %v2306_v4, %v5587_v46 }
 0x549   :  { %v2308_v53 = vpop.f32.mrf.mxu0  ;;  %v2471_v40 = vpop.f32.mrf.mxu1  ;;  %2666 = vmatprep.mubr.bf16.mxu0 %v4664_v31  ;;  %v2470_v63 = vadd.f32 %v2469_v25, %v5590_v21  ;;  %2829 = vmatprep.mubr.bf16.mxu1 %v4664_v31 }
 0x54a   :  { %3542 = vst [vmem:[#allocation11 + $0x40] sm:$0xff] %v3933_v7  ;;  %3543 = vst [vmem:[#allocation11 + $0x48] sm:$0xff] %v3934_v55  ;;  %v2309_v51 = vadd.f32 %v2308_v53, %v5593_v11  ;;  %v2472_v26 = vadd.f32 %v2471_v40, %v5596_v59 }
 0x54b   :  { %v2312_v44 = vpop.f32.mrf.mxu0  ;;  %v2475_v50 = vpop.f32.mrf.mxu1 }
 0x54c   :  { %v3937_v30 = vpack.c.bf16 %v2309_v51, %v2307_v5  ;;  %v3938_v22 = vpack.c.bf16 %v2472_v26, %v2470_v63  ;;  %v2313_v17 = vadd.f32 %v2312_v44, %v5587_v46  ;;  %v2476_v0 = vadd.f32 %v2475_v50, %v5590_v21 }
 0x54d   :  { %v2314_v35 = vpop.f32.mrf.mxu0  ;;  %v2477_v27 = vpop.f32.mrf.mxu1 }
 0x54e   :  { %3546 = vst [vmem:[#allocation11 + $0x60] sm:$0xff] %v3937_v30  ;;  %3547 = vst [vmem:[#allocation11 + $0x68] sm:$0xff] %v3938_v22  ;;  %v2315_v43 = vadd.f32 %v2314_v35, %v5593_v11  ;;  %v2478_v47 = vadd.f32 %v2477_v27, %v5596_v59 }
 0x54f   :  { %v2316_v34 = vpop.f32.mrf.mxu0  ;;  %v2479_v12 = vpop.f32.mrf.mxu1 }
 0x550   :  { %v3941_v48 = vpack.c.bf16 %v2315_v43, %v2313_v17  ;;  %v3942_v57 = vpack.c.bf16 %v2478_v47, %v2476_v0  ;;  %2667 = vmatmul.mubr.bf16.gmra.mxu0 %v5480_v45  ;;  %2830 = vmatmul.mubr.bf16.gmra.mxu1 %v5480_v45  ;;  %v2317_v9 = vadd.f32 %v2316_v34, %v5587_v46 }
 0x551   :  { %v2318_v54 = vpop.f32.mrf.mxu0  ;;  %v2481_v1 = vpop.f32.mrf.mxu1  ;;  %2676 = vmatprep.mubr.bf16.mxu0 %v4664_v31  ;;  %v2480_v24 = vadd.f32 %v2479_v12, %v5590_v21  ;;  %2839 = vmatprep.mubr.bf16.mxu1 %v4664_v31 }
 0x552   :  { %3550 = vst [vmem:[#allocation11 + $0x80] sm:$0xff] %v3941_v48  ;;  %3551 = vst [vmem:[#allocation11 + $0x88] sm:$0xff] %v3942_v57  ;;  %v2319_v58 = vadd.f32 %v2318_v54, %v5593_v11  ;;  %v2482_v62 = vadd.f32 %v2481_v1, %v5596_v59 }
 0x553   :  { %v2322_v37 = vpop.f32.mrf.mxu0  ;;  %v2485_v2 = vpop.f32.mrf.mxu1 }
 0x554   :  { %v3945_v15 = vpack.c.bf16 %v2319_v58, %v2317_v9  ;;  %v3946_v45 = vpack.c.bf16 %v2482_v62, %v2480_v24  ;;  %v2323_v3 = vadd.f32 %v2322_v37, %v5587_v46  ;;  %v2486_v29 = vadd.f32 %v2485_v2, %v5590_v21 }
 0x555   :  { %v2324_v39 = vpop.f32.mrf.mxu0  ;;  %v2487_v19 = vpop.f32.mrf.mxu1 }
 0x556   :  { %3554 = vst [vmem:[#allocation11 + $0xa0] sm:$0xff] %v3945_v15  ;;  %3555 = vst [vmem:[#allocation11 + $0xa8] sm:$0xff] %v3946_v45  ;;  %v2325_v32 = vadd.f32 %v2324_v39, %v5593_v11  ;;  %v2488_v38 = vadd.f32 %v2487_v19, %v5596_v59 }
 0x557   :  { %v2326_v42 = vpop.f32.mrf.mxu0  ;;  %v2489_v13 = vpop.f32.mrf.mxu1 }
 0x558   :  { %v3949_v49 = vpack.c.bf16 %v2325_v32, %v2323_v3  ;;  %v3950_v61 = vpack.c.bf16 %v2488_v38, %v2486_v29  ;;  %2677 = vmatmul.mubr.bf16.gmra.mxu0 %v5492_v16  ;;  %2840 = vmatmul.mubr.bf16.gmra.mxu1 %v5492_v16  ;;  %v2327_v28 = vadd.f32 %v2326_v42, %v5587_v46 }
 0x559   :  { %v2328_v36 = vpop.f32.mrf.mxu0  ;;  %v2491_v8 = vpop.f32.mrf.mxu1  ;;  %2686 = vmatprep.mubr.bf16.mxu0 %v4664_v31  ;;  %v2490_v56 = vadd.f32 %v2489_v13, %v5590_v21  ;;  %2849 = vmatprep.mubr.bf16.mxu1 %v4664_v31 }
 0x55a   :  { %3558 = vst [vmem:[#allocation11 + $0xc0] sm:$0xff] %v3949_v49  ;;  %3559 = vst [vmem:[#allocation11 + $0xc8] sm:$0xff] %v3950_v61  ;;  %v2329_v33 = vadd.f32 %v2328_v36, %v5593_v11  ;;  %v2492_v6 = vadd.f32 %v2491_v8, %v5596_v59 }
 0x55b   :  { %v2332_v4 = vpop.f32.mrf.mxu0  ;;  %v2495_v25 = vpop.f32.mrf.mxu1 }
 0x55c   :  { %v3953_v7 = vpack.c.bf16 %v2329_v33, %v2327_v28  ;;  %v3954_v16 = vpack.c.bf16 %v2492_v6, %v2490_v56  ;;  %v2333_v40 = vadd.f32 %v2332_v4, %v5587_v46  ;;  %v2496_v5 = vadd.f32 %v2495_v25, %v5590_v21 }
 0x55d   :  { %v2334_v55 = vpop.f32.mrf.mxu0  ;;  %v2497_v53 = vpop.f32.mrf.mxu1 }
 0x55e   :  { %3562 = vst [vmem:[#allocation11 + $0xe0] sm:$0xff] %v3953_v7  ;;  %3563 = vst [vmem:[#allocation11 + $0xe8] sm:$0xff] %v3954_v16  ;;  %v2335_v63 = vadd.f32 %v2334_v55, %v5593_v11  ;;  %v2498_v51 = vadd.f32 %v2497_v53, %v5596_v59 }
 0x55f   :  { %v2336_v26 = vpop.f32.mrf.mxu0  ;;  %v2499_v44 = vpop.f32.mrf.mxu1 }
 0x560   :  { %v3957_v50 = vpack.c.bf16 %v2335_v63, %v2333_v40  ;;  %v3958_v30 = vpack.c.bf16 %v2498_v51, %v2496_v5  ;;  %2687 = vmatmul.mubr.bf16.gmra.mxu0 %v5504_v60  ;;  %2850 = vmatmul.mubr.bf16.gmra.mxu1 %v5504_v60  ;;  %v2337_v27 = vadd.f32 %v2336_v26, %v5587_v46 }
 0x561   :  { %v2338_v22 = vpop.f32.mrf.mxu0  ;;  %v2501_v35 = vpop.f32.mrf.mxu1  ;;  %2696 = vmatprep.mubr.bf16.mxu0 %v4664_v31  ;;  %v2500_v17 = vadd.f32 %v2499_v44, %v5590_v21  ;;  %2859 = vmatprep.mubr.bf16.mxu1 %v4664_v31 }
 0x562   :  { %3566 = vst [vmem:[#allocation11 + $0x100] sm:$0xff] %v3957_v50  ;;  %3567 = vst [vmem:[#allocation11 + $0x108] sm:$0xff] %v3958_v30  ;;  %v2339_v0 = vadd.f32 %v2338_v22, %v5593_v11  ;;  %v2502_v43 = vadd.f32 %v2501_v35, %v5596_v59 }
 0x563   :  { %v2342_v47 = vpop.f32.mrf.mxu0  ;;  %v2505_v34 = vpop.f32.mrf.mxu1 }
 0x564   :  { %v3961_v12 = vpack.c.bf16 %v2339_v0, %v2337_v27  ;;  %v3962_v60 = vpack.c.bf16 %v2502_v43, %v2500_v17  ;;  %v2343_v54 = vadd.f32 %v2342_v47, %v5587_v46  ;;  %v2506_v1 = vadd.f32 %v2505_v34, %v5590_v21 }
 0x565   :  { %v2344_v48 = vpop.f32.mrf.mxu0  ;;  %v2507_v57 = vpop.f32.mrf.mxu1 }
 0x566   :  { %3570 = vst [vmem:[#allocation11 + $0x120] sm:$0xff] %v3961_v12  ;;  %3571 = vst [vmem:[#allocation11 + $0x128] sm:$0xff] %v3962_v60  ;;  %v2345_v9 = vadd.f32 %v2344_v48, %v5593_v11  ;;  %v2508_v24 = vadd.f32 %v2507_v57, %v5596_v59 }
 0x567   :  { %v2346_v58 = vpop.f32.mrf.mxu0  ;;  %v2509_v62 = vpop.f32.mrf.mxu1 }
 0x568   :  { %v3965_v37 = vpack.c.bf16 %v2345_v9, %v2343_v54  ;;  %v3966_v2 = vpack.c.bf16 %v2508_v24, %v2506_v1  ;;  %2697 = vmatmul.mubr.bf16.gmra.mxu0 %v5515_v14  ;;  %2860 = vmatmul.mubr.bf16.gmra.mxu1 %v5515_v14  ;;  %v2347_v39 = vadd.f32 %v2346_v58, %v5587_v46 }
 0x569   :  { %v2348_v15 = vpop.f32.mrf.mxu0  ;;  %v2511_v45 = vpop.f32.mrf.mxu1  ;;  %2706 = vmatprep.mubr.bf16.mxu0 %v4664_v31  ;;  %v2510_v19 = vadd.f32 %v2509_v62, %v5590_v21  ;;  %2869 = vmatprep.mubr.bf16.mxu1 %v4664_v31 }
 0x56a   :  { %3574 = vst [vmem:[#allocation11 + $0x140] sm:$0xff] %v3965_v37  ;;  %3575 = vst [vmem:[#allocation11 + $0x148] sm:$0xff] %v3966_v2  ;;  %v2349_v3 = vadd.f32 %v2348_v15, %v5593_v11  ;;  %v2512_v29 = vadd.f32 %v2511_v45, %v5596_v59 }
 0x56b   :  { %v2352_v32 = vpop.f32.mrf.mxu0  ;;  %v2515_v38 = vpop.f32.mrf.mxu1 }
 0x56c   :  { %v3969_v42 = vpack.c.bf16 %v2349_v3, %v2347_v39  ;;  %v3970_v14 = vpack.c.bf16 %v2512_v29, %v2510_v19  ;;  %v2353_v61 = vadd.f32 %v2352_v32, %v5587_v46  ;;  %v2516_v36 = vadd.f32 %v2515_v38, %v5590_v21 }
 0x56d   :  { %v2354_v13 = vpop.f32.mrf.mxu0  ;;  %v2517_v49 = vpop.f32.mrf.mxu1 }
 0x56e   :  { %3578 = vst [vmem:[#allocation11 + $0x160] sm:$0xff] %v3969_v42  ;;  %3579 = vst [vmem:[#allocation11 + $0x168] sm:$0xff] %v3970_v14  ;;  %v2355_v8 = vadd.f32 %v2354_v13, %v5593_v11  ;;  %v2518_v28 = vadd.f32 %v2517_v49, %v5596_v59 }
 0x56f   :  { %v2356_v56 = vpop.f32.mrf.mxu0  ;;  %v2519_v33 = vpop.f32.mrf.mxu1 }
 0x570   :  { %v3973_v6 = vpack.c.bf16 %v2355_v8, %v2353_v61  ;;  %v3974_v4 = vpack.c.bf16 %v2518_v28, %v2516_v36  ;;  %2707 = vmatmul.mubr.bf16.gmra.mxu0 %v5521_v10  ;;  %2870 = vmatmul.mubr.bf16.gmra.mxu1 %v5521_v10  ;;  %v2357_v16 = vadd.f32 %v2356_v56, %v5587_v46 }
 0x571   :  { %v2358_v25 = vpop.f32.mrf.mxu0  ;;  %v2521_v7 = vpop.f32.mrf.mxu1  ;;  %2716 = vmatprep.mubr.bf16.mxu0 %v4664_v31  ;;  %v2520_v55 = vadd.f32 %v2519_v33, %v5590_v21  ;;  %2879 = vmatprep.mubr.bf16.mxu1 %v4664_v31 }
 0x572   :  { %3582 = vst [vmem:[#allocation11 + $0x180] sm:$0xff] %v3973_v6  ;;  %3583 = vst [vmem:[#allocation11 + $0x188] sm:$0xff] %v3974_v4  ;;  %v2359_v53 = vadd.f32 %v2358_v25, %v5593_v11  ;;  %v2522_v40 = vadd.f32 %v2521_v7, %v5596_v59 }
 0x573   :  { %v2362_v5 = vpop.f32.mrf.mxu0  ;;  %v2525_v63 = vpop.f32.mrf.mxu1 }
 0x574   :  { %v3977_v51 = vpack.c.bf16 %v2359_v53, %v2357_v16  ;;  %v3978_v10 = vpack.c.bf16 %v2522_v40, %v2520_v55  ;;  %v2363_v50 = vadd.f32 %v2362_v5, %v5587_v46  ;;  %v2526_v30 = vadd.f32 %v2525_v63, %v5590_v21 }
 0x575   :  { %v2364_v26 = vpop.f32.mrf.mxu0  ;;  %v2527_v44 = vpop.f32.mrf.mxu1 }
 0x576   :  { %3586 = vst [vmem:[#allocation11 + $0x1a0] sm:$0xff] %v3977_v51  ;;  %3587 = vst [vmem:[#allocation11 + $0x1a8] sm:$0xff] %v3978_v10  ;;  %v2365_v22 = vadd.f32 %v2364_v26, %v5593_v11  ;;  %v2528_v35 = vadd.f32 %v2527_v44, %v5596_v59 }
 0x577   :  { %v2366_v27 = vpop.f32.mrf.mxu0  ;;  %v2529_v17 = vpop.f32.mrf.mxu1 }
 0x578   :  { %v3981_v0 = vpack.c.bf16 %v2365_v22, %v2363_v50  ;;  %v3982_v43 = vpack.c.bf16 %v2528_v35, %v2526_v30  ;;  %2717 = vmatmul.mubr.bf16.gmra.mxu0 %v5540_v23  ;;  %2880 = vmatmul.mubr.bf16.gmra.mxu1 %v5540_v23  ;;  %v2367_v12 = vadd.f32 %v2366_v27, %v5587_v46 }
 0x579   :  { %v2368_v47 = vpop.f32.mrf.mxu0  ;;  %v2531_v34 = vpop.f32.mrf.mxu1  ;;  %2726 = vmatprep.mubr.bf16.mxu0 %v4664_v31  ;;  %v2530_v60 = vadd.f32 %v2529_v17, %v5590_v21  ;;  %2889 = vmatprep.mubr.bf16.mxu1 %v4664_v31 }
 0x57a   :  { %3590 = vst [vmem:[#allocation11 + $0x1c0] sm:$0xff] %v3981_v0  ;;  %3591 = vst [vmem:[#allocation11 + $0x1c8] sm:$0xff] %v3982_v43  ;;  %v2369_v48 = vadd.f32 %v2368_v47, %v5593_v11  ;;  %v2532_v57 = vadd.f32 %v2531_v34, %v5596_v59 }
 0x57b   :  { %v2372_v54 = vpop.f32.mrf.mxu0  ;;  %v2535_v1 = vpop.f32.mrf.mxu1 }
 0x57c   :  { %v3985_v9 = vpack.c.bf16 %v2369_v48, %v2367_v12  ;;  %v3986_v23 = vpack.c.bf16 %v2532_v57, %v2530_v60  ;;  %v2373_v62 = vadd.f32 %v2372_v54, %v5587_v46  ;;  %v2536_v37 = vadd.f32 %v2535_v1, %v5590_v21 }
 0x57d   :  { %v2374_v24 = vpop.f32.mrf.mxu0  ;;  %v2537_v58 = vpop.f32.mrf.mxu1 }
 0x57e   :  { %3594 = vst [vmem:[#allocation11 + $0x1e0] sm:$0xff] %v3985_v9  ;;  %3595 = vst [vmem:[#allocation11 + $0x1e8] sm:$0xff] %v3986_v23  ;;  %v2375_v2 = vadd.f32 %v2374_v24, %v5593_v11  ;;  %v2538_v15 = vadd.f32 %v2537_v58, %v5596_v59 }
 0x57f   :  { %v2376_v45 = vpop.f32.mrf.mxu0  ;;  %v2539_v39 = vpop.f32.mrf.mxu1 }
 0x580   :  { %v3989_v19 = vpack.c.bf16 %v2375_v2, %v2373_v62  ;;  %v3990_v3 = vpack.c.bf16 %v2538_v15, %v2536_v37  ;;  %2727 = vmatmul.mubr.bf16.gmra.mxu0 %v5551_v41  ;;  %2890 = vmatmul.mubr.bf16.gmra.mxu1 %v5551_v41  ;;  %v2377_v38 = vadd.f32 %v2376_v45, %v5587_v46 }
 0x581   :  { %v2378_v29 = vpop.f32.mrf.mxu0  ;;  %v2541_v32 = vpop.f32.mrf.mxu1  ;;  %2736 = vmatprep.mubr.bf16.mxu0 %v4664_v31  ;;  %v2540_v42 = vadd.f32 %v2539_v39, %v5590_v21  ;;  %2899 = vmatprep.mubr.bf16.mxu1 %v4664_v31 }
 0x582   :  { %3598 = vst [vmem:[#allocation11 + $0x200] sm:$0xff] %v3989_v19  ;;  %3599 = vst [vmem:[#allocation11 + $0x208] sm:$0xff] %v3990_v3  ;;  %v2379_v14 = vadd.f32 %v2378_v29, %v5593_v11  ;;  %v2542_v13 = vadd.f32 %v2541_v32, %v5596_v59 }
 0x583   :  { %v2382_v49 = vpop.f32.mrf.mxu0  ;;  %v2545_v61 = vpop.f32.mrf.mxu1 }
 0x584   :  { %v3993_v36 = vpack.c.bf16 %v2379_v14, %v2377_v38  ;;  %v3994_v41 = vpack.c.bf16 %v2542_v13, %v2540_v42  ;;  %v2383_v56 = vadd.f32 %v2382_v49, %v5587_v46  ;;  %v2546_v33 = vadd.f32 %v2545_v61, %v5590_v21 }
 0x585   :  { %v2384_v8 = vpop.f32.mrf.mxu0  ;;  %v2547_v28 = vpop.f32.mrf.mxu1 }
 0x586   :  { %3602 = vst [vmem:[#allocation11 + $0x220] sm:$0xff] %v3993_v36  ;;  %3603 = vst [vmem:[#allocation11 + $0x228] sm:$0xff] %v3994_v41  ;;  %v2385_v6 = vadd.f32 %v2384_v8, %v5593_v11  ;;  %v2548_v4 = vadd.f32 %v2547_v28, %v5596_v59 }
 0x587   :  { %v2386_v25 = vpop.f32.mrf.mxu0  ;;  %v2549_v7 = vpop.f32.mrf.mxu1 }
 0x588   :  { %v3997_v16 = vpack.c.bf16 %v2385_v6, %v2383_v56  ;;  %v3998_v31 = vpack.c.bf16 %v2548_v4, %v2546_v33  ;;  %2737 = vmatmul.mubr.bf16.gmra.mxu0 %v5557_v52  ;;  %2900 = vmatmul.mubr.bf16.gmra.mxu1 %v5557_v52  ;;  %v2387_v40 = vadd.f32 %v2386_v25, %v5587_v46  ;;  %v1838_v6 = vsub.s32 4, %v5571_v18 }
 0x589   :  { %v2388_v55 = vpop.f32.mrf.mxu0  ;;  %v2551_v53 = vpop.f32.mrf.mxu1  ;;  %v2550_v5 = vadd.f32 %v2549_v7, %v5590_v21  ;;  %v1846_v4 = vsub.s32 6, %v5571_v18  ;;  %v1842_v25 = vsub.s32 5, %v5571_v18  ;;  %v1850_v7 = vsub.s32 7, %v5571_v18 }
 0x58a   :  { %3606 = vst [vmem:[#allocation11 + $0x240] sm:$0xff] %v3997_v16  ;;  %3607 = vst [vmem:[#allocation11 + $0x248] sm:$0xff] %v3998_v31  ;;  %v2389_v63 = vadd.f32 %v2388_v55, %v5593_v11  ;;  %v2552_v51 = vadd.f32 %v2551_v53, %v5596_v59 }
 0x58b   :  { %v5744_v18 = vrot.slane %v5580_v20, %v1846_v4 }
 0x58c   :  { %v4001_v10 = vpack.c.bf16 %v2389_v63, %v2387_v40  ;;  %v4002_v26 = vpack.c.bf16 %v2552_v51, %v2550_v5 }
 0x58e   :  { %3610 = vst [vmem:[#allocation11 + $0x260] sm:$0xff] %v4001_v10  ;;  %3611 = vst [vmem:[#allocation11 + $0x268] sm:$0xff] %v4002_v26 }
 0x5cf   :  { %v2392_v44 = vpop.f32.mrf.mxu0  ;;  %v2555_v50 = vpop.f32.mrf.mxu1 }
 0x5d0   :  { %v2393_v22 = vadd.f32 %v2392_v44, %v5587_v46  ;;  %v2556_v35 = vadd.f32 %v2555_v50, %v5590_v21  ;;  %v5741_v44 = vrot.slane %v5580_v20, %v1838_v6  ;;  %v5747_v50 = vrot.slane %v5580_v20, %v1842_v25 }
 0x5d1   :  { %v2394_v30 = vpop.f32.mrf.mxu0  ;;  %v2557_v52 = vpop.f32.mrf.mxu1 }
 0x5d2   :  { %v2395_v27 = vadd.f32 %v2394_v30, %v5593_v11  ;;  %v2558_v17 = vadd.f32 %v2557_v52, %v5596_v59  ;;  %v5750_v30 = vrot.slane %v5580_v20, %v1850_v7 }
 0x5d3   :  { %v2396_v0 = vpop.f32.mrf.mxu0  ;;  %v2559_v43 = vpop.f32.mrf.mxu1 }
 0x5d4   :  { %v4005_v47 = vpack.c.bf16 %v2395_v27, %v2393_v22  ;;  %v4006_v34 = vpack.c.bf16 %v2558_v17, %v2556_v35  ;;  %v2397_v48 = vadd.f32 %v2396_v0, %v5587_v46  ;;  %v2560_v57 = vadd.f32 %v2559_v43, %v5590_v21 }
 0x5d5   :  { %v2398_v12 = vpop.f32.mrf.mxu0  ;;  %v2561_v60 = vpop.f32.mrf.mxu1 }
 0x5d6   :  { %3614 = vst [vmem:[#allocation11 + $0x280] sm:$0xff] %v4005_v47  ;;  %3615 = vst [vmem:[#allocation11 + $0x288] sm:$0xff] %v4006_v34  ;;  %v2399_v54 = vadd.f32 %v2398_v12, %v5593_v11  ;;  %v2562_v1 = vadd.f32 %v2561_v60, %v5596_v59 }
 0x5d8   :  { %v4009_v9 = vpack.c.bf16 %v2399_v54, %v2397_v48  ;;  %v4010_v23 = vpack.c.bf16 %v2562_v1, %v2560_v57  ;;  %v2402_v24 = vpop.f32.mrf.mxu0  ;;  %v2565_v58 = vpop.f32.mrf.mxu1 }
 0x5d9   :  { %v2403_v2 = vadd.f32 %v2402_v24, %v5587_v46  ;;  %v2566_v15 = vadd.f32 %v2565_v58, %v5590_v21 }
 0x5da   :  { %3618 = vst [vmem:[#allocation11 + $0x2a0] sm:$0xff] %v4009_v9  ;;  %3619 = vst [vmem:[#allocation11 + $0x2a8] sm:$0xff] %v4010_v23  ;;  %v2404_v62 = vpop.f32.mrf.mxu0  ;;  %v2567_v37 = vpop.f32.mrf.mxu1 }
 0x5db   :  { %v2405_v45 = vadd.f32 %v2404_v62, %v5593_v11  ;;  %v2568_v39 = vadd.f32 %v2567_v37, %v5596_v59 }
 0x5dc   :  { %v2406_v19 = vpop.f32.mrf.mxu0  ;;  %v2569_v3 = vpop.f32.mrf.mxu1 }
 0x5dd   :  { %v4013_v29 = vpack.c.bf16 %v2405_v45, %v2403_v2  ;;  %v4014_v32 = vpack.c.bf16 %v2568_v39, %v2566_v15  ;;  %v2407_v14 = vadd.f32 %v2406_v19, %v5587_v46  ;;  %v2570_v13 = vadd.f32 %v2569_v3, %v5590_v21 }
 0x5de   :  { %v2408_v38 = vpop.f32.mrf.mxu0  ;;  %v2571_v42 = vpop.f32.mrf.mxu1 }
 0x5df   :  { %3622 = vst [vmem:[#allocation11 + $0x2c0] sm:$0xff] %v4013_v29  ;;  %3623 = vst [vmem:[#allocation11 + $0x2c8] sm:$0xff] %v4014_v32  ;;  %v2409_v49 = vadd.f32 %v2408_v38, %v5593_v11  ;;  %v2572_v61 = vadd.f32 %v2571_v42, %v5596_v59 }
 0x5e0   :  { %v2412_v36 = vpop.f32.mrf.mxu0  ;;  %v2575_v41 = vpop.f32.mrf.mxu1 }
 0x5e1   :  { %v4017_v8 = vpack.c.bf16 %v2409_v49, %v2407_v14  ;;  %v4018_v28 = vpack.c.bf16 %v2572_v61, %v2570_v13  ;;  %v2413_v16 = vadd.f32 %v2412_v36, %v5587_v46  ;;  %v2576_v31 = vadd.f32 %v2575_v41, %v5590_v21 }
 0x5e2   :  { %v2414_v56 = vpop.f32.mrf.mxu0  ;;  %v2577_v33 = vpop.f32.mrf.mxu1 }
 0x5e3   :  { %3626 = vst [vmem:[#allocation11 + $0x2e0] sm:$0xff] %v4017_v8  ;;  %3627 = vst [vmem:[#allocation11 + $0x2e8] sm:$0xff] %v4018_v28  ;;  %v2415_v55 = vadd.f32 %v2414_v56, %v5593_v11  ;;  %v2578_v53 = vadd.f32 %v2577_v33, %v5596_v59 }
 0x5e4   :  { %v2416_v40 = vpop.f32.mrf.mxu0  ;;  %v2579_v5 = vpop.f32.mrf.mxu1 }
 0x5e5   :  { %v4021_v63 = vpack.c.bf16 %v2415_v55, %v2413_v16  ;;  %v4022_v51 = vpack.c.bf16 %v2578_v53, %v2576_v31  ;;  %v2417_v52 = vadd.f32 %v2416_v40, %v5587_v46  ;;  %v2580_v22 = vadd.f32 %v2579_v5, %v5590_v21 }
 0x5e6   :  { %v2418_v10 = vpop.f32.mrf.mxu0  ;;  %v2581_v26 = vpop.f32.mrf.mxu1 }
 0x5e7   :  { %3630 = vst [vmem:[#allocation11 + $0x300] sm:$0xff] %v4021_v63  ;;  %3631 = vst [vmem:[#allocation11 + $0x308] sm:$0xff] %v4022_v51  ;;  %v2419_v35 = vadd.f32 %v2418_v10, %v5593_v11  ;;  %v2582_v27 = vadd.f32 %v2581_v26, %v5596_v59 }
 0x5e8   :  { %v2618_v17 = vpop.f32.mrf.mxu0  ;;  %v2781_v0 = vpop.f32.mrf.mxu1 }
 0x5e9   :  { %v4025_v43 = vpack.c.bf16 %v2419_v35, %v2417_v52  ;;  %v4026_v47 = vpack.c.bf16 %v2582_v27, %v2580_v22  ;;  %v2619_v20 = vadd.f32 %v2618_v17, %v5741_v44  ;;  %v2782_v60 = vadd.f32 %v2781_v0, %v5744_v18 }
 0x5ea   :  { %v2620_v34 = vpop.f32.mrf.mxu0  ;;  %v2783_v12 = vpop.f32.mrf.mxu1 }
 0x5eb   :  { %3634 = vst [vmem:[#allocation11 + $0x320] sm:$0xff] %v4025_v43  ;;  %3635 = vst [vmem:[#allocation11 + $0x328] sm:$0xff] %v4026_v47  ;;  %v2621_v46 = vadd.f32 %v2620_v34, %v5747_v50  ;;  %v2784_v21 = vadd.f32 %v2783_v12, %v5750_v30 }
 0x5ec   :  { %v2622_v48 = vpop.f32.mrf.mxu0  ;;  %v2785_v11 = vpop.f32.mrf.mxu1 }
 0x5ed   :  { %v3927_v57 = vpack.c.bf16 %v2621_v46, %v2619_v20  ;;  %v3928_v59 = vpack.c.bf16 %v2784_v21, %v2782_v60  ;;  %v2623_v9 = vadd.f32 %v2622_v48, %v5741_v44  ;;  %v2786_v23 = vadd.f32 %v2785_v11, %v5744_v18 }
 0x5ee   :  { %v2624_v54 = vpop.f32.mrf.mxu0  ;;  %v2787_v1 = vpop.f32.mrf.mxu1 }
 0x5ef   :  { %3536 = vst [vmem:[#allocation11 + $0x10] sm:$0xff] %v3927_v57  ;;  %3537 = vst [vmem:[#allocation11 + $0x18] sm:$0xff] %v3928_v59  ;;  %v2625_v24 = vadd.f32 %v2624_v54, %v5747_v50  ;;  %v2788_v58 = vadd.f32 %v2787_v1, %v5750_v30 }
 0x5f0   :  { %v2628_v62 = vpop.f32.mrf.mxu0  ;;  %v2791_v37 = vpop.f32.mrf.mxu1 }
 0x5f1   :  { %v3931_v2 = vpack.c.bf16 %v2625_v24, %v2623_v9  ;;  %v3932_v15 = vpack.c.bf16 %v2788_v58, %v2786_v23  ;;  %v2629_v19 = vadd.f32 %v2628_v62, %v5741_v44  ;;  %v2792_v3 = vadd.f32 %v2791_v37, %v5744_v18 }
 0x5f2   :  { %v2630_v45 = vpop.f32.mrf.mxu0  ;;  %v2793_v39 = vpop.f32.mrf.mxu1 }
 0x5f3   :  { %3540 = vst [vmem:[#allocation11 + $0x30] sm:$0xff] %v3931_v2  ;;  %3541 = vst [vmem:[#allocation11 + $0x38] sm:$0xff] %v3932_v15  ;;  %v2631_v29 = vadd.f32 %v2630_v45, %v5747_v50  ;;  %v2794_v32 = vadd.f32 %v2793_v39, %v5750_v30 }
 0x5f4   :  { %v2632_v38 = vpop.f32.mrf.mxu0  ;;  %v2795_v42 = vpop.f32.mrf.mxu1 }
 0x5f5   :  { %v3935_v14 = vpack.c.bf16 %v2631_v29, %v2629_v19  ;;  %v3936_v13 = vpack.c.bf16 %v2794_v32, %v2792_v3  ;;  %v2633_v36 = vadd.f32 %v2632_v38, %v5741_v44  ;;  %v2796_v41 = vadd.f32 %v2795_v42, %v5744_v18 }
 0x5f6   :  { %v2634_v49 = vpop.f32.mrf.mxu0  ;;  %v2797_v61 = vpop.f32.mrf.mxu1 }
 0x5f7   :  { %3544 = vst [vmem:[#allocation11 + $0x50] sm:$0xff] %v3935_v14  ;;  %3545 = vst [vmem:[#allocation11 + $0x58] sm:$0xff] %v3936_v13  ;;  %v2635_v8 = vadd.f32 %v2634_v49, %v5747_v50  ;;  %v2798_v28 = vadd.f32 %v2797_v61, %v5750_v30 }
 0x5f8   :  { %v2638_v56 = vpop.f32.mrf.mxu0  ;;  %v2801_v33 = vpop.f32.mrf.mxu1 }
 0x5f9   :  { %v3939_v6 = vpack.c.bf16 %v2635_v8, %v2633_v36  ;;  %v3940_v4 = vpack.c.bf16 %v2798_v28, %v2796_v41  ;;  %v2639_v16 = vadd.f32 %v2638_v56, %v5741_v44  ;;  %v2802_v31 = vadd.f32 %v2801_v33, %v5744_v18 }
 0x5fa   :  { %v2640_v25 = vpop.f32.mrf.mxu0  ;;  %v2803_v7 = vpop.f32.mrf.mxu1 }
 0x5fb   :  { %3548 = vst [vmem:[#allocation11 + $0x70] sm:$0xff] %v3939_v6  ;;  %3549 = vst [vmem:[#allocation11 + $0x78] sm:$0xff] %v3940_v4  ;;  %v2641_v55 = vadd.f32 %v2640_v25, %v5747_v50  ;;  %v2804_v53 = vadd.f32 %v2803_v7, %v5750_v30 }
 0x5fc   :  { %v2642_v40 = vpop.f32.mrf.mxu0  ;;  %v2805_v5 = vpop.f32.mrf.mxu1 }
 0x5fd   :  { %v3943_v63 = vpack.c.bf16 %v2641_v55, %v2639_v16  ;;  %v3944_v51 = vpack.c.bf16 %v2804_v53, %v2802_v31  ;;  %v2643_v52 = vadd.f32 %v2642_v40, %v5741_v44  ;;  %v2806_v22 = vadd.f32 %v2805_v5, %v5744_v18 }
 0x5fe   :  { %v2644_v10 = vpop.f32.mrf.mxu0  ;;  %v2807_v26 = vpop.f32.mrf.mxu1 }
 0x5ff   :  { %3552 = vst [vmem:[#allocation11 + $0x90] sm:$0xff] %v3943_v63  ;;  %3553 = vst [vmem:[#allocation11 + $0x98] sm:$0xff] %v3944_v51  ;;  %v2645_v35 = vadd.f32 %v2644_v10, %v5747_v50  ;;  %v2808_v27 = vadd.f32 %v2807_v26, %v5750_v30 }
 0x600   :  { %v2648_v17 = vpop.f32.mrf.mxu0  ;;  %v2811_v47 = vpop.f32.mrf.mxu1 }
 0x601   :  { %v3947_v0 = vpack.c.bf16 %v2645_v35, %v2643_v52  ;;  %v3948_v43 = vpack.c.bf16 %v2808_v27, %v2806_v22  ;;  %v2649_v12 = vadd.f32 %v2648_v17, %v5741_v44  ;;  %v2812_v46 = vadd.f32 %v2811_v47, %v5744_v18 }
 0x602   :  { %v2650_v34 = vpop.f32.mrf.mxu0  ;;  %v2813_v60 = vpop.f32.mrf.mxu1 }
 0x603   :  { %3556 = vst [vmem:[#allocation11 + $0xb0] sm:$0xff] %v3947_v0  ;;  %3557 = vst [vmem:[#allocation11 + $0xb8] sm:$0xff] %v3948_v43  ;;  %v2651_v20 = vadd.f32 %v2650_v34, %v5747_v50  ;;  %v2814_v21 = vadd.f32 %v2813_v60, %v5750_v30 }
 0x604   :  { %v2652_v48 = vpop.f32.mrf.mxu0  ;;  %v2815_v57 = vpop.f32.mrf.mxu1 }
 0x605   :  { %v3951_v11 = vpack.c.bf16 %v2651_v20, %v2649_v12  ;;  %v3952_v59 = vpack.c.bf16 %v2814_v21, %v2812_v46  ;;  %v2653_v1 = vadd.f32 %v2652_v48, %v5741_v44  ;;  %v2816_v24 = vadd.f32 %v2815_v57, %v5744_v18 }
 0x606   :  { %v2654_v54 = vpop.f32.mrf.mxu0  ;;  %v2817_v23 = vpop.f32.mrf.mxu1 }
 0x607   :  { %3560 = vst [vmem:[#allocation11 + $0xd0] sm:$0xff] %v3951_v11  ;;  %v2655_v9 = vadd.f32 %v2654_v54, %v5747_v50  ;;  %3561 = vst [vmem:[#allocation11 + $0xd8] sm:$0xff] %v3952_v59  ;;  %v2818_v58 = vadd.f32 %v2817_v23, %v5750_v30 }
 0x608   :  { %v2658_v62 = vpop.f32.mrf.mxu0  ;;  %v2821_v2 = vpop.f32.mrf.mxu1 }
 0x609   :  { %v3955_v37 = vpack.c.bf16 %v2655_v9, %v2653_v1  ;;  %v3956_v15 = vpack.c.bf16 %v2818_v58, %v2816_v24  ;;  %v2659_v39 = vadd.f32 %v2658_v62, %v5741_v44  ;;  %v2822_v29 = vadd.f32 %v2821_v2, %v5744_v18 }
 0x60a   :  { %v2660_v45 = vpop.f32.mrf.mxu0  ;;  %v2823_v3 = vpop.f32.mrf.mxu1 }
 0x60b   :  { %3564 = vst [vmem:[#allocation11 + $0xf0] sm:$0xff] %v3955_v37  ;;  %v2661_v19 = vadd.f32 %v2660_v45, %v5747_v50  ;;  %3565 = vst [vmem:[#allocation11 + $0xf8] sm:$0xff] %v3956_v15  ;;  %v2824_v32 = vadd.f32 %v2823_v3, %v5750_v30 }
 0x60c   :  { %v2662_v38 = vpop.f32.mrf.mxu0  ;;  %v2825_v14 = vpop.f32.mrf.mxu1 }
 0x60d   :  { %v3959_v42 = vpack.c.bf16 %v2661_v19, %v2659_v39  ;;  %v3960_v13 = vpack.c.bf16 %v2824_v32, %v2822_v29  ;;  %v2663_v61 = vadd.f32 %v2662_v38, %v5741_v44  ;;  %v2826_v8 = vadd.f32 %v2825_v14, %v5744_v18 }
 0x60e   :  { %v2664_v49 = vpop.f32.mrf.mxu0  ;;  %v2827_v41 = vpop.f32.mrf.mxu1 }
 0x60f   :  { %3568 = vst [vmem:[#allocation11 + $0x110] sm:$0xff] %v3959_v42  ;;  %v2665_v36 = vadd.f32 %v2664_v49, %v5747_v50  ;;  %3569 = vst [vmem:[#allocation11 + $0x118] sm:$0xff] %v3960_v13  ;;  %v2828_v28 = vadd.f32 %v2827_v41, %v5750_v30 }
 0x610   :  { %v2668_v56 = vpop.f32.mrf.mxu0  ;;  %v2831_v6 = vpop.f32.mrf.mxu1 }
 0x611   :  { %v3963_v33 = vpack.c.bf16 %v2665_v36, %v2663_v61  ;;  %v3964_v4 = vpack.c.bf16 %v2828_v28, %v2826_v8  ;;  %v2669_v7 = vadd.f32 %v2668_v56, %v5741_v44  ;;  %v2832_v55 = vadd.f32 %v2831_v6, %v5744_v18 }
 0x612   :  { %v2670_v25 = vpop.f32.mrf.mxu0  ;;  %v2833_v31 = vpop.f32.mrf.mxu1 }
 0x613   :  { %3572 = vst [vmem:[#allocation11 + $0x130] sm:$0xff] %v3963_v33  ;;  %v2671_v16 = vadd.f32 %v2670_v25, %v5747_v50  ;;  %3573 = vst [vmem:[#allocation11 + $0x138] sm:$0xff] %v3964_v4  ;;  %v2834_v53 = vadd.f32 %v2833_v31, %v5750_v30 }
 0x614   :  { %v2672_v40 = vpop.f32.mrf.mxu0  ;;  %v2835_v63 = vpop.f32.mrf.mxu1 }
 0x615   :  { %v3967_v5 = vpack.c.bf16 %v2671_v16, %v2669_v7  ;;  %v3968_v51 = vpack.c.bf16 %v2834_v53, %v2832_v55  ;;  %v2673_v26 = vadd.f32 %v2672_v40, %v5741_v44  ;;  %v2836_v35 = vadd.f32 %v2835_v63, %v5744_v18 }
 0x616   :  { %v2674_v10 = vpop.f32.mrf.mxu0  ;;  %v2837_v22 = vpop.f32.mrf.mxu1 }
 0x617   :  { %3576 = vst [vmem:[#allocation11 + $0x150] sm:$0xff] %v3967_v5  ;;  %v2675_v52 = vadd.f32 %v2674_v10, %v5747_v50  ;;  %3577 = vst [vmem:[#allocation11 + $0x158] sm:$0xff] %v3968_v51  ;;  %v2838_v27 = vadd.f32 %v2837_v22, %v5750_v30 }
 0x618   :  { %v2678_v17 = vpop.f32.mrf.mxu0  ;;  %v2841_v43 = vpop.f32.mrf.mxu1 }
 0x619   :  { %v3971_v0 = vpack.c.bf16 %v2675_v52, %v2673_v26  ;;  %v3972_v47 = vpack.c.bf16 %v2838_v27, %v2836_v35  ;;  %v2679_v12 = vadd.f32 %v2678_v17, %v5741_v44  ;;  %v2842_v46 = vadd.f32 %v2841_v43, %v5744_v18 }
 0x61a   :  { %v2680_v34 = vpop.f32.mrf.mxu0  ;;  %v2843_v60 = vpop.f32.mrf.mxu1 }
 0x61b   :  { %3580 = vst [vmem:[#allocation11 + $0x170] sm:$0xff] %v3971_v0  ;;  %v2681_v20 = vadd.f32 %v2680_v34, %v5747_v50  ;;  %3581 = vst [vmem:[#allocation11 + $0x178] sm:$0xff] %v3972_v47  ;;  %v2844_v21 = vadd.f32 %v2843_v60, %v5750_v30 }
 0x61c   :  { %v2682_v48 = vpop.f32.mrf.mxu0  ;;  %v2845_v57 = vpop.f32.mrf.mxu1 }
 0x61d   :  { %v3975_v11 = vpack.c.bf16 %v2681_v20, %v2679_v12  ;;  %v3976_v59 = vpack.c.bf16 %v2844_v21, %v2842_v46  ;;  %v2683_v1 = vadd.f32 %v2682_v48, %v5741_v44  ;;  %v2846_v24 = vadd.f32 %v2845_v57, %v5744_v18 }
 0x61e   :  { %v2684_v54 = vpop.f32.mrf.mxu0  ;;  %v2847_v23 = vpop.f32.mrf.mxu1 }
 0x61f   :  { %3584 = vst [vmem:[#allocation11 + $0x190] sm:$0xff] %v3975_v11  ;;  %v2685_v9 = vadd.f32 %v2684_v54, %v5747_v50  ;;  %3585 = vst [vmem:[#allocation11 + $0x198] sm:$0xff] %v3976_v59  ;;  %v2848_v58 = vadd.f32 %v2847_v23, %v5750_v30 }
 0x620   :  { %v2688_v62 = vpop.f32.mrf.mxu0  ;;  %v2851_v2 = vpop.f32.mrf.mxu1 }
 0x621   :  { %v3979_v37 = vpack.c.bf16 %v2685_v9, %v2683_v1  ;;  %v3980_v15 = vpack.c.bf16 %v2848_v58, %v2846_v24  ;;  %v2689_v39 = vadd.f32 %v2688_v62, %v5741_v44  ;;  %v2852_v29 = vadd.f32 %v2851_v2, %v5744_v18 }
 0x622   :  { %v2690_v45 = vpop.f32.mrf.mxu0  ;;  %v2853_v3 = vpop.f32.mrf.mxu1 }
 0x623   :  { %3588 = vst [vmem:[#allocation11 + $0x1b0] sm:$0xff] %v3979_v37  ;;  %v2691_v19 = vadd.f32 %v2690_v45, %v5747_v50  ;;  %3589 = vst [vmem:[#allocation11 + $0x1b8] sm:$0xff] %v3980_v15  ;;  %v2854_v32 = vadd.f32 %v2853_v3, %v5750_v30 }
 0x624   :  { %v2692_v38 = vpop.f32.mrf.mxu0  ;;  %v2855_v14 = vpop.f32.mrf.mxu1 }
 0x625   :  { %v3983_v42 = vpack.c.bf16 %v2691_v19, %v2689_v39  ;;  %v3984_v13 = vpack.c.bf16 %v2854_v32, %v2852_v29  ;;  %v2693_v61 = vadd.f32 %v2692_v38, %v5741_v44  ;;  %v2856_v8 = vadd.f32 %v2855_v14, %v5744_v18 }
 0x626   :  { %v2694_v49 = vpop.f32.mrf.mxu0  ;;  %v2857_v41 = vpop.f32.mrf.mxu1 }
 0x627   :  { %3592 = vst [vmem:[#allocation11 + $0x1d0] sm:$0xff] %v3983_v42  ;;  %v2695_v36 = vadd.f32 %v2694_v49, %v5747_v50  ;;  %3593 = vst [vmem:[#allocation11 + $0x1d8] sm:$0xff] %v3984_v13  ;;  %v2858_v28 = vadd.f32 %v2857_v41, %v5750_v30 }
 0x628   :  { %v2698_v56 = vpop.f32.mrf.mxu0  ;;  %v2861_v6 = vpop.f32.mrf.mxu1 }
 0x629   :  { %v3987_v33 = vpack.c.bf16 %v2695_v36, %v2693_v61  ;;  %v3988_v4 = vpack.c.bf16 %v2858_v28, %v2856_v8  ;;  %v2699_v7 = vadd.f32 %v2698_v56, %v5741_v44  ;;  %v2862_v55 = vadd.f32 %v2861_v6, %v5744_v18 }
 0x62a   :  { %v2700_v25 = vpop.f32.mrf.mxu0  ;;  %v2863_v31 = vpop.f32.mrf.mxu1 }
 0x62b   :  { %3596 = vst [vmem:[#allocation11 + $0x1f0] sm:$0xff] %v3987_v33  ;;  %v2701_v16 = vadd.f32 %v2700_v25, %v5747_v50  ;;  %3597 = vst [vmem:[#allocation11 + $0x1f8] sm:$0xff] %v3988_v4  ;;  %v2864_v53 = vadd.f32 %v2863_v31, %v5750_v30 }
 0x62c   :  { %v2702_v40 = vpop.f32.mrf.mxu0  ;;  %v2865_v63 = vpop.f32.mrf.mxu1 }
 0x62d   :  { %v3991_v5 = vpack.c.bf16 %v2701_v16, %v2699_v7  ;;  %v3992_v51 = vpack.c.bf16 %v2864_v53, %v2862_v55  ;;  %v2703_v26 = vadd.f32 %v2702_v40, %v5741_v44  ;;  %v2866_v35 = vadd.f32 %v2865_v63, %v5744_v18 }
 0x62e   :  { %v2704_v10 = vpop.f32.mrf.mxu0  ;;  %v2867_v22 = vpop.f32.mrf.mxu1 }
 0x62f   :  { %3600 = vst [vmem:[#allocation11 + $0x210] sm:$0xff] %v3991_v5  ;;  %v2705_v52 = vadd.f32 %v2704_v10, %v5747_v50  ;;  %3601 = vst [vmem:[#allocation11 + $0x218] sm:$0xff] %v3992_v51  ;;  %v2868_v27 = vadd.f32 %v2867_v22, %v5750_v30 }
 0x630   :  { %v2708_v17 = vpop.f32.mrf.mxu0  ;;  %v2871_v43 = vpop.f32.mrf.mxu1 }
 0x631   :  { %v3995_v0 = vpack.c.bf16 %v2705_v52, %v2703_v26  ;;  %v3996_v47 = vpack.c.bf16 %v2868_v27, %v2866_v35  ;;  %v2709_v12 = vadd.f32 %v2708_v17, %v5741_v44  ;;  %v2872_v46 = vadd.f32 %v2871_v43, %v5744_v18 }
 0x632   :  { %v2710_v34 = vpop.f32.mrf.mxu0  ;;  %v2873_v60 = vpop.f32.mrf.mxu1 }
 0x633   :  { %3604 = vst [vmem:[#allocation11 + $0x230] sm:$0xff] %v3995_v0  ;;  %v2711_v20 = vadd.f32 %v2710_v34, %v5747_v50  ;;  %3605 = vst [vmem:[#allocation11 + $0x238] sm:$0xff] %v3996_v47  ;;  %v2874_v21 = vadd.f32 %v2873_v60, %v5750_v30 }
 0x634   :  { %v2712_v48 = vpop.f32.mrf.mxu0  ;;  %v2875_v57 = vpop.f32.mrf.mxu1 }
 0x635   :  { %v3999_v11 = vpack.c.bf16 %v2711_v20, %v2709_v12  ;;  %v4000_v59 = vpack.c.bf16 %v2874_v21, %v2872_v46  ;;  %v2713_v1 = vadd.f32 %v2712_v48, %v5741_v44  ;;  %v2876_v24 = vadd.f32 %v2875_v57, %v5744_v18 }
 0x636   :  { %v2714_v54 = vpop.f32.mrf.mxu0  ;;  %v2877_v23 = vpop.f32.mrf.mxu1 }
 0x637   :  { %3608 = vst [vmem:[#allocation11 + $0x250] sm:$0xff] %v3999_v11  ;;  %v2715_v9 = vadd.f32 %v2714_v54, %v5747_v50  ;;  %3609 = vst [vmem:[#allocation11 + $0x258] sm:$0xff] %v4000_v59  ;;  %v2878_v58 = vadd.f32 %v2877_v23, %v5750_v30 }
 0x638   :  { %v2718_v62 = vpop.f32.mrf.mxu0  ;;  %v2881_v2 = vpop.f32.mrf.mxu1 }
 0x639   :  { %v4003_v37 = vpack.c.bf16 %v2715_v9, %v2713_v1  ;;  %v4004_v15 = vpack.c.bf16 %v2878_v58, %v2876_v24  ;;  %v2719_v39 = vadd.f32 %v2718_v62, %v5741_v44  ;;  %v2882_v29 = vadd.f32 %v2881_v2, %v5744_v18 }
 0x63a   :  { %v2720_v45 = vpop.f32.mrf.mxu0  ;;  %v2883_v3 = vpop.f32.mrf.mxu1 }
 0x63b   :  { %3612 = vst [vmem:[#allocation11 + $0x270] sm:$0xff] %v4003_v37  ;;  %v2721_v19 = vadd.f32 %v2720_v45, %v5747_v50  ;;  %3613 = vst [vmem:[#allocation11 + $0x278] sm:$0xff] %v4004_v15  ;;  %v2884_v32 = vadd.f32 %v2883_v3, %v5750_v30 }
 0x63c   :  { %v2722_v38 = vpop.f32.mrf.mxu0  ;;  %v2885_v14 = vpop.f32.mrf.mxu1 }
 0x63d   :  { %v4007_v42 = vpack.c.bf16 %v2721_v19, %v2719_v39  ;;  %v4008_v13 = vpack.c.bf16 %v2884_v32, %v2882_v29  ;;  %v2723_v61 = vadd.f32 %v2722_v38, %v5741_v44  ;;  %v2886_v8 = vadd.f32 %v2885_v14, %v5744_v18 }
 0x63e   :  { %v2724_v49 = vpop.f32.mrf.mxu0  ;;  %v2887_v41 = vpop.f32.mrf.mxu1 }
 0x63f   :  { %3616 = vst [vmem:[#allocation11 + $0x290] sm:$0xff] %v4007_v42  ;;  %v2725_v36 = vadd.f32 %v2724_v49, %v5747_v50  ;;  %3617 = vst [vmem:[#allocation11 + $0x298] sm:$0xff] %v4008_v13  ;;  %v2888_v28 = vadd.f32 %v2887_v41, %v5750_v30 }
 0x640   :  { %v2728_v56 = vpop.f32.mrf.mxu0  ;;  %v2891_v6 = vpop.f32.mrf.mxu1 }
 0x641   :  { %v4011_v33 = vpack.c.bf16 %v2725_v36, %v2723_v61  ;;  %v4012_v4 = vpack.c.bf16 %v2888_v28, %v2886_v8  ;;  %v2729_v7 = vadd.f32 %v2728_v56, %v5741_v44  ;;  %v2892_v55 = vadd.f32 %v2891_v6, %v5744_v18 }
 0x642   :  { %v2730_v25 = vpop.f32.mrf.mxu0  ;;  %v2893_v31 = vpop.f32.mrf.mxu1 }
 0x643   :  { %3620 = vst [vmem:[#allocation11 + $0x2b0] sm:$0xff] %v4011_v33  ;;  %v2731_v16 = vadd.f32 %v2730_v25, %v5747_v50  ;;  %3621 = vst [vmem:[#allocation11 + $0x2b8] sm:$0xff] %v4012_v4  ;;  %v2894_v53 = vadd.f32 %v2893_v31, %v5750_v30 }
 0x644   :  { %v2732_v40 = vpop.f32.mrf.mxu0  ;;  %v2895_v63 = vpop.f32.mrf.mxu1 }
 0x645   :  { %v4015_v5 = vpack.c.bf16 %v2731_v16, %v2729_v7  ;;  %v4016_v51 = vpack.c.bf16 %v2894_v53, %v2892_v55  ;;  %v2733_v26 = vadd.f32 %v2732_v40, %v5741_v44  ;;  %v2896_v35 = vadd.f32 %v2895_v63, %v5744_v18 }
 0x646   :  { %v2734_v10 = vpop.f32.mrf.mxu0  ;;  %v2897_v22 = vpop.f32.mrf.mxu1 }
 0x647   :  { %3624 = vst [vmem:[#allocation11 + $0x2d0] sm:$0xff] %v4015_v5  ;;  %v2735_v52 = vadd.f32 %v2734_v10, %v5747_v50  ;;  %3625 = vst [vmem:[#allocation11 + $0x2d8] sm:$0xff] %v4016_v51  ;;  %v2898_v27 = vadd.f32 %v2897_v22, %v5750_v30 }
 0x648   :  { %v2738_v17 = vpop.f32.mrf.mxu0  ;;  %v2901_v43 = vpop.f32.mrf.mxu1 }
 0x649   :  { %v4019_v0 = vpack.c.bf16 %v2735_v52, %v2733_v26  ;;  %v4020_v47 = vpack.c.bf16 %v2898_v27, %v2896_v35  ;;  %v2739_v12 = vadd.f32 %v2738_v17, %v5741_v44  ;;  %v2902_v46 = vadd.f32 %v2901_v43, %v5744_v18 }
 0x64a   :  { %v2740_v34 = vpop.f32.mrf.mxu0  ;;  %v2903_v60 = vpop.f32.mrf.mxu1 }
 0x64b   :  { %3628 = vst [vmem:[#allocation11 + $0x2f0] sm:$0xff] %v4019_v0  ;;  %v2741_v20 = vadd.f32 %v2740_v34, %v5747_v50  ;;  %3629 = vst [vmem:[#allocation11 + $0x2f8] sm:$0xff] %v4020_v47  ;;  %v2904_v21 = vadd.f32 %v2903_v60, %v5750_v30 }
 0x64c   :  { %v2742_v48 = vpop.f32.mrf.mxu0  ;;  %v2905_v57 = vpop.f32.mrf.mxu1 }
 0x64d   :  { %v4023_v11 = vpack.c.bf16 %v2741_v20, %v2739_v12  ;;  %v4024_v59 = vpack.c.bf16 %v2904_v21, %v2902_v46  ;;  %v2743_v1 = vadd.f32 %v2742_v48, %v5741_v44  ;;  %v2906_v24 = vadd.f32 %v2905_v57, %v5744_v18 }
 0x64e   :  { %v2744_v54 = vpop.f32.mrf.mxu0  ;;  %v2907_v23 = vpop.f32.mrf.mxu1 }
 0x64f   :  { %3632 = vst [vmem:[#allocation11 + $0x310] sm:$0xff] %v4023_v11  ;;  %v2745_v9 = vadd.f32 %v2744_v54, %v5747_v50  ;;  %3633 = vst [vmem:[#allocation11 + $0x318] sm:$0xff] %v4024_v59  ;;  %v2908_v58 = vadd.f32 %v2907_v23, %v5750_v30 }
 0x651   :  { %v4027_v62 = vpack.c.bf16 %v2745_v9, %v2743_v1  ;;  %v4028_v37 = vpack.c.bf16 %v2908_v58, %v2906_v24 }
 0x653   :  { %3636 = vst [vmem:[#allocation11 + $0x330] sm:$0xff] %v4027_v62  ;;  %3637 = vst [vmem:[#allocation11 + $0x338] sm:$0xff] %v4028_v37 }
 0x654   :  { %3642 = vsyncadd [#allocation5], 512  ;;  %s4665_s10 = smov [#allocation11]  }
 0x655   :  { %s3643_s26 = sshll.u32 %s4665_s10, 4  ;;  %s3644_s26 = int_to_ptr.vmem [resolvable:$true] %s3643_s26 }
 0x656   :  { %s4626_s27 = scalar_lea.vmem %s3644_s26, 12800  ;;  %s4630_s28 = scalar_lea.vmem %s3644_s26, 13312 }
 0x657   :  { %p4627_p6 = scmp.ne.s32.totalorder %s3644_s26, %s4626_s27  ;;  %p4631_p7 = scmp.lt.s32.totalorder %s3644_s26, %s3644_s26 }
 0x658   :  { %p4632_p8 = scmp.lt.s32.totalorder %s4630_s28, %s4626_s27 }
 0x65a   :  { %p4633_p9 = por %p4632_p8, %p4631_p7 }
 0x65c   :  { %p4634_p10 = pnand %p4633_p9, %p4627_p6 }
 0x65e   :  { %4637 = shalt.err (!%p4634_p10)
}
 0x65f   :  { %3649 = dma.vmem_to_hbm [thread:$0]  %s3644_s26, 12800, %s5877_s11, [#allocation5], %s4660_s0, %s4660_s0, %s4661_s17  }
 0x660   :  { %4652 = dma.done.wait [#allocation5], 13312  }
 0x661   :  { %4653 = vsyncadd [#allocation5], 4294953984 }
 0x662   :  { %3653 = vsyncpa [#allocation4], 1 }
 0x663   :  { %3654 = vsyncpa [#allocation7], 1 }
 0x664   :  { %3655 = vsyncpa [#allocation10], 1 }
 0x665   :  { %3656 = vsyncpa [#allocation5], 1 }

// kernel: tpu_custom_call.1
= control target key start
LH: loop header
LB: loop body
LE: loop exit
PB: predicated region body
PF: predicated region fallthrough
CT: control target
= control target key end

     0   :  { %16 = vsyncpa [#allocation4], 0  ;;  %s5866_s0 = inlined_call_operand.hbm [shape: bf16[208,128], index: 0, kind: input, shape index: {}]   ;;  %s5867_s1 = inlined_call_operand.hbm [shape: bf16[128,128], index: 1, kind: input, shape index: {}]   ;;  %s5868_s2 = inlined_call_operand.vmem [shape: f32[1,128], index: 2, kind: input, shape index: {}]   ;;  %s5869_s3 = inlined_call_operand.vmem [shape: f32[1,128], index: 3, kind: input, shape index: {}]   ;;  %s5870_s4 = inlined_call_operand.vmem [shape: f32[1,128], index: 4, kind: input, shape index: {}]   ;;  %s5871_s5 = inlined_call_operand.hbm [shape: bf16[128,128], index: 5, kind: input, shape index: {}]   ;;  %s5872_s6 = inlined_call_operand.vmem [shape: f32[1,128], index: 6, kind: input, shape index: {}]   ;;  %s5873_s7 = inlined_call_operand.vmem [shape: f32[1,128], index: 7, kind: input, shape index: {}]   ;;  %s5874_s8 = inlined_call_operand.vmem [shape: f32[1,128], index: 8, kind: input, shape index: {}]   ;;  %s5875_s9 = inlined_call_operand.hbm [shape: bf16[128,1024], index: 9, kind: input, shape index: {}]   ;;  %s5876_s10 = inlined_call_operand.vmem [shape: f32[1,1024], index: 10, kind: input, shape index: {}]   ;;  %s5877_s11 = inlined_call_operand.hbm [shape: bf16[200,1000], index: 11, kind: output, shape index: {}]  }
   0x1   :  { %17 = vsyncpa [#allocation7], 0 }
   0x2   :  { %18 = vsyncpa [#allocation10], 0 }
   0x3   :  { %19 = vsyncpa [#allocation5], 0  ;;  %s4654_s17 = smov [#allocation6]   ;;  %s4655_s19 = smov [#allocation3]  }
   0x4   :  { %s37_s18 = sshll.u32 %s4654_s17, 4  ;;  %s25_s20 = sshll.u32 %s4655_s19, 4  ;;  %s38_s18 = int_to_ptr.vmem [resolvable:$true] %s37_s18  ;;  %s26_s20 = int_to_ptr.vmem [resolvable:$true] %s25_s20 }
   0x5   :  { %s4554_s21 = scalar_lea.vmem %s38_s18, 1024  ;;  %p4559_p1 = scmp.lt.s32.totalorder %s38_s18, %s38_s18 }
   0x6   :  { %p4555_p0 = scmp.ne.s32.totalorder %s38_s18, %s4554_s21  ;;  %p4560_p2 = scmp.lt.s32.totalorder %s4554_s21, %s4554_s21 }
   0x8   :  { %p4561_p3 = por %p4560_p2, %p4559_p1 }
   0xa   :  { %p4562_p4 = pnand %p4561_p3, %p4555_p0 }
   0xc   :  { %4565 = shalt.err (!%p4562_p4)
}
   0xd   :  { %s4656_s22 = smov 64   ;;  %s4657_s23 = smov 4  }
   0xe   :  { %43 = dma.hbm_to_vmem [thread:$0]  %s5867_s1, 1024, %s38_s18, [#allocation7], %s4656_s22, %s4656_s22, %s4657_s23  }
   0xf   :  { %s4574_s26 = scalar_lea.vmem %s26_s20, 1664  ;;  %p4579_p6 = scmp.lt.s32.totalorder %s26_s20, %s26_s20 }
  0x10   :  { %p4575_p5 = scmp.ne.s32.totalorder %s26_s20, %s4574_s26  ;;  %p4580_p7 = scmp.lt.s32.totalorder %s4574_s26, %s4574_s26 }
  0x12   :  { %p4581_p8 = por %p4580_p7, %p4579_p6 }
  0x14   :  { %p4582_p9 = pnand %p4581_p8, %p4575_p5 }
  0x16   :  { %4585 = shalt.err (!%p4582_p9)
}
  0x17   :  { %31 = dma.hbm_to_vmem [thread:$0]  %s5866_s0, 1664, %s26_s20, [#allocation4], %s4656_s22, %s4656_s22, %s4657_s23  }
  0x18   :  { %s4658_s29 = smov [#allocation8]   ;;  %s4659_s12 = smov [#allocation9]  }
  0x19   :  { %s55_s30 = sshll.u32 %s4658_s29, 4  ;;  %s73_s13 = sshll.u32 %s4659_s12, 4  ;;  %s56_s30 = int_to_ptr.vmem [resolvable:$true] %s55_s30  ;;  %s74_s13 = int_to_ptr.vmem [resolvable:$true] %s73_s13 }
  0x1a   :  { %s4594_s14 = scalar_lea.vmem %s56_s30, 1024  ;;  %p4599_p11 = scmp.lt.s32.totalorder %s56_s30, %s56_s30 }
  0x1b   :  { %p4595_p10 = scmp.ne.s32.totalorder %s56_s30, %s4594_s14  ;;  %p4600_p12 = scmp.lt.s32.totalorder %s4594_s14, %s4594_s14 }
  0x1d   :  { %p4601_p13 = por %p4600_p12, %p4599_p11 }
  0x1f   :  { %p4602_p0 = pnand %p4601_p13, %p4595_p10 }
  0x21   :  { %4605 = shalt.err (!%p4602_p0)
}
  0x22   :  { %61 = dma.hbm_to_vmem [thread:$0]  %s5871_s5, 1024, %s56_s30, [#allocation7], %s4656_s22, %s4656_s22, %s4657_s23  }
  0x23   :  { %s4614_s16 = scalar_lea.vmem %s74_s13, 8192  ;;  %p4619_p2 = scmp.lt.s32.totalorder %s74_s13, %s74_s13 }
  0x24   :  { %p4615_p1 = scmp.ne.s32.totalorder %s74_s13, %s4614_s16  ;;  %p4620_p3 = scmp.lt.s32.totalorder %s4614_s16, %s4614_s16 }
  0x26   :  { %p4621_p4 = por %p4620_p3, %p4619_p2 }
  0x28   :  { %p4622_p5 = pnand %p4621_p4, %p4615_p1 }
  0x2a   :  { %4625 = shalt.err (!%p4622_p5)
}
  0x2b   :  { %s4660_s0 = smov 512   ;;  %s4661_s17 = smov 32  }
  0x2c   :  { %79 = dma.hbm_to_vmem [thread:$0]  %s5875_s9, 8192, %s74_s13, [#allocation10], %s4660_s0, %s4660_s0, %s4661_s17  }
  0x2d   :  { %4646 = dma.done.wait [#allocation4], 1664  }
  0x2e   :  { %4647 = vsyncadd [#allocation4], 4294965632 }
  0x2f   :  { %4648 = dma.done.wait [#allocation7], 2048  }
  0x30   :  { %4649 = vsyncadd [#allocation7], 4294965248 }
  0x31   :  { %4650 = dma.done.wait [#allocation10], 8192  }
  0x32   :  { %4651 = vsyncadd [#allocation10], 4294959104  ;;  %v4662_v0 = vmov 0.0   ;;  %vm4663_vm0 = vmmov 0   ;;  %v4296_v1 = vld [vmem:[#allocation6 + $0x38] sm:$0xff]   ;;  %v4297_v2 = vld [vmem:[#allocation6 + $0x30] sm:$0xff]  }
  0x33   :  { %4148 = vmatprep.subr.bf16.mxu0 %v4662_v0  ;;  %4164 = vmatprep.mubr.msk.bf16.mxu0 %vm4663_vm0, %v4662_v0  ;;  %v4298_v3 = vld [vmem:[#allocation6 + $0x28] sm:$0xff]   ;;  %v4299_v4 = vld [vmem:[#allocation6 + $0x20] sm:$0xff]   ;;  %v4300_v5 = vld [vmem:[#allocation6 + $0x18] sm:$0xff]  }
  0x34   :  { %4216 = vmatprep.subr.bf16.mxu1 %v4662_v0  ;;  %4232 = vmatprep.mubr.msk.bf16.mxu1 %vm4663_vm0, %v4662_v0  ;;  %v4301_v6 = vld [vmem:[#allocation6 + $0x10] sm:$0xff]   ;;  %v4302_v7 = vld [vmem:[#allocation6 + $0x8] sm:$0xff]   ;;  %v4303_v8 = vld [vmem:[#allocation6] sm:$0xff]  }
  0x35   :  { %4149 = vmatpush3.bf16.msra.mxu0 %v4296_v1  ;;  %v4304_v9 = vld [vmem:[#allocation3] sm:$0xff]   ;;  %v4305_v10 = vld [vmem:[#allocation3 + $0x8] sm:$0xff]   ;;  %v4306_v11 = vld [vmem:[#allocation3 + $0x10] sm:$0xff]  }
  0x36   :  { %4150 = vmatprep.subr.bf16.mxu0 %v4662_v0  ;;  %v4307_v12 = vld [vmem:[#allocation3 + $0x18] sm:$0xff]   ;;  %v4308_v13 = vld [vmem:[#allocation3 + $0x20] sm:$0xff]   ;;  %v4309_v14 = vld [vmem:[#allocation3 + $0x28] sm:$0xff]  }
  0x37   :  { %v4310_v15 = vld [vmem:[#allocation3 + $0x30] sm:$0xff]   ;;  %v4311_v16 = vld [vmem:[#allocation3 + $0x38] sm:$0xff]   ;;  %v4312_v17 = vld [vmem:[#allocation3 + $0x40] sm:$0xff]  }
  0x38   :  { %v4313_v18 = vld [vmem:[#allocation3 + $0x48] sm:$0xff]   ;;  %v4314_v19 = vld [vmem:[#allocation3 + $0x50] sm:$0xff]   ;;  %v4315_v20 = vld [vmem:[#allocation3 + $0x58] sm:$0xff]  }
  0x39   :  { %4151 = vmatpush3.bf16.msra.mxu0 %v4297_v2  ;;  %v4316_v21 = vld [vmem:[#allocation3 + $0x60] sm:$0xff]   ;;  %v4781_v22 = vld [vmem:[%s5868_s2] ss:$0 sm:$0xff] }
  0x3a   :  { %4152 = vmatprep.subr.bf16.mxu0 %v4662_v0 }
  0x3d   :  { %4153 = vmatpush3.bf16.msra.mxu0 %v4298_v3 }
  0x3e   :  { %4154 = vmatprep.subr.bf16.mxu0 %v4662_v0 }
  0x41   :  { %4155 = vmatpush3.bf16.msra.mxu0 %v4299_v4 }
  0x42   :  { %4156 = vmatprep.subr.bf16.mxu0 %v4662_v0 }
  0x45   :  { %4157 = vmatpush3.bf16.msra.mxu0 %v4300_v5 }
  0x46   :  { %4158 = vmatprep.subr.bf16.mxu0 %v4662_v0 }
  0x49   :  { %4159 = vmatpush3.bf16.msra.mxu0 %v4301_v6 }
  0x4a   :  { %4160 = vmatprep.subr.bf16.mxu0 %v4662_v0 }
  0x4d   :  { %4161 = vmatpush3.bf16.msra.mxu0 %v4302_v7 }
  0x4e   :  { %4162 = vmatprep.subr.bf16.mxu0 %v4662_v0 }
  0x51   :  { %4163 = vmatpush3.bf16.msra.mxu0 %v4303_v8 }
  0x54   :  { %4165 = vmatmul.mubr.bf16.vlgmr.msra.gmra.mxu0 %v4304_v9 }
  0x55   :  { %4168 = vmatprep.mubr.msk.bf16.mxu0 %vm4663_vm0, %v4662_v0 }
  0x5c   :  { %4169 = vmatmul.mubr.bf16.gmra.mxu0 %v4305_v10 }
  0x5d   :  { %4172 = vmatprep.mubr.msk.bf16.mxu0 %vm4663_vm0, %v4662_v0 }
  0x64   :  { %4173 = vmatmul.mubr.bf16.gmra.mxu0 %v4306_v11 }
  0x65   :  { %4176 = vmatprep.mubr.msk.bf16.mxu0 %vm4663_vm0, %v4662_v0 }
  0x6c   :  { %4177 = vmatmul.mubr.bf16.gmra.mxu0 %v4307_v12 }
  0x6d   :  { %4180 = vmatprep.mubr.msk.bf16.mxu0 %vm4663_vm0, %v4662_v0 }
  0x74   :  { %4181 = vmatmul.mubr.bf16.gmra.mxu0 %v4308_v13 }
  0x75   :  { %4184 = vmatprep.mubr.msk.bf16.mxu0 %vm4663_vm0, %v4662_v0 }
  0x7c   :  { %4185 = vmatmul.mubr.bf16.gmra.mxu0 %v4309_v14 }
  0x7d   :  { %4188 = vmatprep.mubr.msk.bf16.mxu0 %vm4663_vm0, %v4662_v0 }
  0x84   :  { %4189 = vmatmul.mubr.bf16.gmra.mxu0 %v4310_v15 }
  0x85   :  { %4192 = vmatprep.mubr.msk.bf16.mxu0 %vm4663_vm0, %v4662_v0 }
  0x8c   :  { %4193 = vmatmul.mubr.bf16.gmra.mxu0 %v4311_v16 }
  0x8d   :  { %4196 = vmatprep.mubr.msk.bf16.mxu0 %vm4663_vm0, %v4662_v0 }
  0x94   :  { %4197 = vmatmul.mubr.bf16.gmra.mxu0 %v4312_v17 }
  0x95   :  { %4200 = vmatprep.mubr.msk.bf16.mxu0 %vm4663_vm0, %v4662_v0 }
  0x9c   :  { %4201 = vmatmul.mubr.bf16.gmra.mxu0 %v4313_v18 }
  0x9d   :  { %4204 = vmatprep.mubr.msk.bf16.mxu0 %vm4663_vm0, %v4662_v0 }
  0xa4   :  { %4205 = vmatmul.mubr.bf16.gmra.mxu0 %v4314_v19 }
  0xa5   :  { %4208 = vmatprep.mubr.msk.bf16.mxu0 %vm4663_vm0, %v4662_v0 }
  0xac   :  { %4209 = vmatmul.mubr.bf16.gmra.mxu0 %v4315_v20 }
  0xad   :  { %4212 = vmatprep.mubr.msk.bf16.mxu0 %vm4663_vm0, %v4662_v0 }
  0xb4   :  { %4213 = vmatmul.mubr.bf16.gmra.mxu0 %v4316_v21 }
 0x114   :  { %v308_v23 = vpop.f32.mrf.mxu0 }
 0x115   :  { %v309_v24 = vadd.f32 %v4781_v22, %v308_v23 }
 0x116   :  { %v4166_v25 = vpop.f32.mrf.mxu0 }
 0x117   :  { %v438_v26 = vmul.f32 0.70710677, %v309_v24  ;;  %v411_v43 = vmul.f32 0.5, %v309_v24 }
 0x118   :  { %v311_v27 = vpop.f32.mrf.mxu0 }
 0x119   :  { %4338 = verf.f32 %v438_v26  ;;  %v312_v28 = vadd.f32 %v4781_v22, %v311_v27 }
 0x11a   :  { %v4167_v29 = vpop.f32.mrf.mxu0 }
 0x11b   :  { %v439_v30 = vmul.f32 0.70710677, %v312_v28  ;;  %v412_v51 = vmul.f32 0.5, %v312_v28 }
 0x11c   :  { %v316_v31 = vpop.f32.mrf.mxu0 }
 0x11d   :  { %4340 = verf.f32 %v439_v30  ;;  %v317_v32 = vadd.f32 %v4781_v22, %v316_v31 }
 0x11e   :  { %v4170_v33 = vpop.f32.mrf.mxu0 }
 0x11f   :  { %v440_v34 = vmul.f32 0.70710677, %v317_v32  ;;  %v413_v59 = vmul.f32 0.5, %v317_v32 }
 0x120   :  { %v319_v35 = vpop.f32.mrf.mxu0 }
 0x121   :  { %4342 = verf.f32 %v440_v34  ;;  %v320_v36 = vadd.f32 %v4781_v22, %v319_v35 }
 0x122   :  { %v4171_v37 = vpop.f32.mrf.mxu0 }
 0x123   :  { %v441_v38 = vmul.f32 0.70710677, %v320_v36  ;;  %v414_v4 = vmul.f32 0.5, %v320_v36 }
 0x124   :  { %v324_v39 = vpop.f32.mrf.mxu0 }
 0x125   :  { %4344 = verf.f32 %v441_v38  ;;  %v325_v40 = vadd.f32 %v4781_v22, %v324_v39 }
 0x126   :  { %v4339_v41 = vpop.eup %4338  ;;  %v4174_v42 = vpop.f32.mrf.mxu0 }
 0x127   :  { %v442_v44 = vmul.f32 0.70710677, %v325_v40  ;;  %v490_v45 = vadd.f32 1.0, %v4339_v41  ;;  %v415_v12 = vmul.f32 0.5, %v325_v40 }
 0x128   :  { %v327_v46 = vpop.f32.mrf.mxu0 }
 0x129   :  { %4346 = verf.f32 %v442_v44  ;;  %v328_v47 = vadd.f32 %v4781_v22, %v327_v46  ;;  %v4789_v48 = vmul.f32 %v490_v45, %v411_v43 }
 0x12a   :  { %v4341_v49 = vpop.eup %4340  ;;  %v4175_v50 = vpop.f32.mrf.mxu0 }
 0x12b   :  { %v443_v52 = vmul.f32 0.70710677, %v328_v47  ;;  %544 = vadd.xlane.f32.xlu0 %v4789_v48  ;;  %v491_v53 = vadd.f32 1.0, %v4341_v49  ;;  %v416_v20 = vmul.f32 0.5, %v328_v47 }
 0x12c   :  { %v332_v54 = vpop.f32.mrf.mxu0 }
 0x12d   :  { %4348 = verf.f32 %v443_v52  ;;  %v333_v55 = vadd.f32 %v4781_v22, %v332_v54  ;;  %v4793_v56 = vmul.f32 %v491_v53, %v412_v51 }
 0x12e   :  { %v4343_v57 = vpop.eup %4342  ;;  %v4178_v58 = vpop.f32.mrf.mxu0 }
 0x12f   :  { %v444_v60 = vmul.f32 0.70710677, %v333_v55  ;;  %546 = vadd.xlane.f32.xlu0 %v4793_v56  ;;  %v492_v61 = vadd.f32 1.0, %v4343_v57  ;;  %v417_v25 = vmul.f32 0.5, %v333_v55 }
 0x130   :  { %v335_v62 = vpop.f32.mrf.mxu0 }
 0x131   :  { %4350 = verf.f32 %v444_v60  ;;  %v336_v63 = vadd.f32 %v4781_v22, %v335_v62  ;;  %v4797_v1 = vmul.f32 %v492_v61, %v413_v59 }
 0x132   :  { %v4345_v2 = vpop.eup %4344  ;;  %v4179_v3 = vpop.f32.mrf.mxu0 }
 0x133   :  { %v445_v5 = vmul.f32 0.70710677, %v336_v63  ;;  %548 = vadd.xlane.f32.xlu1 %v4797_v1  ;;  %v493_v6 = vadd.f32 1.0, %v4345_v2  ;;  %v418_v33 = vmul.f32 0.5, %v336_v63 }
 0x134   :  { %v340_v7 = vpop.f32.mrf.mxu0 }
 0x135   :  { %4352 = verf.f32 %v445_v5  ;;  %v341_v8 = vadd.f32 %v4781_v22, %v340_v7  ;;  %v4801_v9 = vmul.f32 %v493_v6, %v414_v4 }
 0x136   :  { %v4347_v10 = vpop.eup %4346  ;;  %v4182_v11 = vpop.f32.mrf.mxu0 }
 0x137   :  { %v446_v13 = vmul.f32 0.70710677, %v341_v8  ;;  %550 = vadd.xlane.f32.xlu1 %v4801_v9  ;;  %v494_v14 = vadd.f32 1.0, %v4347_v10  ;;  %v419_v41 = vmul.f32 0.5, %v341_v8 }
 0x138   :  { %v343_v15 = vpop.f32.mrf.mxu0 }
 0x139   :  { %4354 = verf.f32 %v446_v13  ;;  %v344_v16 = vadd.f32 %v4781_v22, %v343_v15  ;;  %v4805_v17 = vmul.f32 %v494_v14, %v415_v12 }
 0x13a   :  { %v4349_v18 = vpop.eup %4348  ;;  %v4183_v19 = vpop.f32.mrf.mxu0 }
 0x13b   :  { %v447_v21 = vmul.f32 0.70710677, %v344_v16  ;;  %552 = vadd.xlane.f32.xlu0 %v4805_v17  ;;  %v495_v23 = vadd.f32 1.0, %v4349_v18  ;;  %v420_v50 = vmul.f32 0.5, %v344_v16 }
 0x13c   :  { %v348_v24 = vpop.f32.mrf.mxu0 }
 0x13d   :  { %4356 = verf.f32 %v447_v21  ;;  %v349_v26 = vadd.f32 %v4781_v22, %v348_v24  ;;  %v4809_v27 = vmul.f32 %v495_v23, %v416_v20 }
 0x13e   :  { %v4351_v28 = vpop.eup %4350  ;;  %v4186_v29 = vpop.f32.mrf.mxu0 }
 0x13f   :  { %v448_v30 = vmul.f32 0.70710677, %v349_v26  ;;  %554 = vadd.xlane.f32.xlu1 %v4809_v27  ;;  %v496_v31 = vadd.f32 1.0, %v4351_v28  ;;  %v421_v59 = vmul.f32 0.5, %v349_v26 }
 0x140   :  { %v351_v32 = vpop.f32.mrf.mxu0 }
 0x141   :  { %4358 = verf.f32 %v448_v30  ;;  %v352_v34 = vadd.f32 %v4781_v22, %v351_v32  ;;  %v4813_v35 = vmul.f32 %v496_v31, %v417_v25 }
 0x142   :  { %v4353_v36 = vpop.eup %4352  ;;  %v4187_v37 = vpop.f32.mrf.mxu0 }
 0x143   :  { %v449_v38 = vmul.f32 0.70710677, %v352_v34  ;;  %556 = vadd.xlane.f32.xlu0 %v4813_v35  ;;  %v497_v39 = vadd.f32 1.0, %v4353_v36  ;;  %v422_v5 = vmul.f32 0.5, %v352_v34 }
 0x144   :  { %v356_v40 = vpop.f32.mrf.mxu0 }
 0x145   :  { %4360 = verf.f32 %v449_v38  ;;  %v357_v42 = vadd.f32 %v4781_v22, %v356_v40  ;;  %v4817_v43 = vmul.f32 %v497_v39, %v418_v33 }
 0x146   :  { %v4355_v44 = vpop.eup %4354  ;;  %v4190_v45 = vpop.f32.mrf.mxu0 }
 0x147   :  { %v450_v46 = vmul.f32 0.70710677, %v357_v42  ;;  %558 = vadd.xlane.f32.xlu1 %v4817_v43  ;;  %v498_v47 = vadd.f32 1.0, %v4355_v44  ;;  %v423_v14 = vmul.f32 0.5, %v357_v42 }
 0x148   :  { %v359_v49 = vpop.f32.mrf.mxu0 }
 0x149   :  { %4362 = verf.f32 %v450_v46  ;;  %v360_v51 = vadd.f32 %v4781_v22, %v359_v49  ;;  %v4821_v52 = vmul.f32 %v498_v47, %v419_v41 }
 0x14a   :  { %v4357_v53 = vpop.eup %4356  ;;  %v4191_v54 = vpop.f32.mrf.mxu0 }
 0x14b   :  { %v451_v55 = vmul.f32 0.70710677, %v360_v51  ;;  %560 = vadd.xlane.f32.xlu0 %v4821_v52  ;;  %v499_v57 = vadd.f32 1.0, %v4357_v53  ;;  %v424_v24 = vmul.f32 0.5, %v360_v51 }
 0x14c   :  { %v364_v58 = vpop.f32.mrf.mxu0 }
 0x14d   :  { %4364 = verf.f32 %v451_v55  ;;  %v365_v60 = vadd.f32 %v4781_v22, %v364_v58  ;;  %v4825_v61 = vmul.f32 %v499_v57, %v420_v50 }
 0x14e   :  { %v4359_v62 = vpop.eup %4358  ;;  %v4194_v63 = vpop.f32.mrf.mxu0 }
 0x14f   :  { %v452_v2 = vmul.f32 0.70710677, %v365_v60  ;;  %562 = vadd.xlane.f32.xlu1 %v4825_v61  ;;  %v500_v3 = vadd.f32 1.0, %v4359_v62  ;;  %v425_v33 = vmul.f32 0.5, %v365_v60 }
 0x150   :  { %v367_v4 = vpop.f32.mrf.mxu0 }
 0x151   :  { %4366 = verf.f32 %v452_v2  ;;  %v368_v6 = vadd.f32 %v4781_v22, %v367_v4  ;;  %v4829_v7 = vmul.f32 %v500_v3, %v421_v59 }
 0x152   :  { %v4361_v8 = vpop.eup %4360  ;;  %v4195_v10 = vpop.f32.mrf.mxu0 }
 0x153   :  { %v453_v11 = vmul.f32 0.70710677, %v368_v6  ;;  %564 = vadd.xlane.f32.xlu0 %v4829_v7  ;;  %v501_v12 = vadd.f32 1.0, %v4361_v8  ;;  %v426_v42 = vmul.f32 0.5, %v368_v6 }
 0x154   :  { %v372_v13 = vpop.f32.mrf.mxu0 }
 0x155   :  { %4368 = verf.f32 %v453_v11  ;;  %v373_v15 = vadd.f32 %v4781_v22, %v372_v13  ;;  %v4833_v16 = vmul.f32 %v501_v12, %v422_v5 }
 0x156   :  { %v4363_v18 = vpop.eup %4362  ;;  %v4198_v19 = vpop.f32.mrf.mxu0 }
 0x157   :  { %v454_v20 = vmul.f32 0.70710677, %v373_v15  ;;  %566 = vadd.xlane.f32.xlu1 %v4833_v16  ;;  %v502_v21 = vadd.f32 1.0, %v4363_v18  ;;  %v427_v53 = vmul.f32 0.5, %v373_v15 }
 0x158   :  { %v375_v23 = vpop.f32.mrf.mxu0 }
 0x159   :  { %4370 = verf.f32 %v454_v20  ;;  %v376_v25 = vadd.f32 %v4781_v22, %v375_v23  ;;  %v4837_v26 = vmul.f32 %v502_v21, %v423_v14 }
 0x15a   :  { %v4365_v28 = vpop.eup %4364  ;;  %v4199_v29 = vpop.f32.mrf.mxu0 }
 0x15b   :  { %v455_v30 = vmul.f32 0.70710677, %v376_v25  ;;  %568 = vadd.xlane.f32.xlu0 %v4837_v26  ;;  %v503_v31 = vadd.f32 1.0, %v4365_v28  ;;  %v428_v60 = vmul.f32 0.5, %v376_v25  ;;  %v4317_v28 = vld [vmem:[#allocation8 + $0x38] sm:$0xff]  }
 0x15c   :  { %v380_v32 = vpop.f32.mrf.mxu0  ;;  %4217 = vmatpush3.bf16.msra.mxu1 %v4317_v28 }
 0x15d   :  { %4372 = verf.f32 %v455_v30  ;;  %v381_v34 = vadd.f32 %v4781_v22, %v380_v32  ;;  %v4841_v36 = vmul.f32 %v503_v31, %v424_v24  ;;  %4218 = vmatprep.subr.bf16.mxu1 %v4662_v0 }
 0x15e   :  { %v4367_v37 = vpop.eup %4366  ;;  %v4202_v38 = vpop.f32.mrf.mxu0 }
 0x15f   :  { %v456_v39 = vmul.f32 0.70710677, %v381_v34  ;;  %570 = vadd.xlane.f32.xlu1 %v4841_v36  ;;  %v504_v40 = vadd.f32 1.0, %v4367_v37  ;;  %v429_v5 = vmul.f32 0.5, %v381_v34 }
 0x160   :  { %v383_v41 = vpop.f32.mrf.mxu0 }
 0x161   :  { %4374 = verf.f32 %v456_v39  ;;  %v384_v44 = vadd.f32 %v4781_v22, %v383_v41  ;;  %v4845_v45 = vmul.f32 %v504_v40, %v425_v33 }
 0x162   :  { %v4369_v46 = vpop.eup %4368  ;;  %v4203_v47 = vpop.f32.mrf.mxu0 }
 0x163   :  { %v457_v49 = vmul.f32 0.70710677, %v384_v44  ;;  %572 = vadd.xlane.f32.xlu0 %v4845_v45  ;;  %v505_v50 = vadd.f32 1.0, %v4369_v46  ;;  %v430_v13 = vmul.f32 0.5, %v384_v44 }
 0x164   :  { %v388_v51 = vpop.f32.mrf.mxu0 }
 0x165   :  { %4376 = verf.f32 %v457_v49  ;;  %v4848_v54 = vmul.f32 %v505_v50, %v426_v42  ;;  %v389_v29 = vadd.f32 %v4781_v22, %v388_v51 }
 0x166   :  { %v4371_v55 = vpop.eup %4370  ;;  %v4206_v57 = vpop.f32.mrf.mxu0 }
 0x167   :  { %574 = vadd.xlane.f32.xlu1 %v4848_v54  ;;  %v506_v58 = vadd.f32 1.0, %v4371_v55  ;;  %v458_v30 = vmul.f32 0.70710677, %v389_v29  ;;  %v431_v49 = vmul.f32 0.5, %v389_v29  ;;  %v4318_v29 = vld [vmem:[#allocation8 + $0x30] sm:$0xff]  }
 0x168   :  { %v391_v59 = vpop.f32.mrf.mxu0  ;;  %4219 = vmatpush3.bf16.msra.mxu1 %v4318_v29 }
 0x169   :  { %v4851_v62 = vmul.f32 %v506_v58, %v427_v53  ;;  %v392_v31 = vadd.f32 %v4781_v22, %v391_v59  ;;  %4378 = verf.f32 %v458_v30  ;;  %4220 = vmatprep.subr.bf16.mxu1 %v4662_v0 }
 0x16a   :  { %v4373_v63 = vpop.eup %4372  ;;  %v4207_v2 = vpop.f32.mrf.mxu0 }
 0x16b   :  { %576 = vadd.xlane.f32.xlu0 %v4851_v62  ;;  %v507_v3 = vadd.f32 1.0, %v4373_v63  ;;  %v459_v32 = vmul.f32 0.70710677, %v392_v31 }
 0x16c   :  { %v396_v4 = vpop.f32.mrf.mxu0 }
 0x16d   :  { %v4854_v6 = vmul.f32 %v507_v3, %v428_v60  ;;  %v397_v33 = vadd.f32 %v4781_v22, %v396_v4  ;;  %4380 = verf.f32 %v459_v32  ;;  %v432_v60 = vmul.f32 0.5, %v392_v31 }
 0x16e   :  { %v4375_v8 = vpop.eup %4374  ;;  %v4210_v10 = vpop.f32.mrf.mxu0 }
 0x16f   :  { %578 = vadd.xlane.f32.xlu1 %v4854_v6  ;;  %v508_v11 = vadd.f32 1.0, %v4375_v8  ;;  %v460_v34 = vmul.f32 0.70710677, %v397_v33  ;;  %v433_v8 = vmul.f32 0.5, %v397_v33 }
 0x170   :  { %v399_v12 = vpop.f32.mrf.mxu0 }
 0x171   :  { %v4857_v14 = vmul.f32 %v508_v11, %v429_v5  ;;  %v400_v37 = vadd.f32 %v4781_v22, %v399_v12  ;;  %4382 = verf.f32 %v460_v34 }
 0x172   :  { %v4377_v15 = vpop.eup %4376  ;;  %v4211_v18 = vpop.f32.mrf.mxu0 }
 0x173   :  { %580 = vadd.xlane.f32.xlu0 %v4857_v14  ;;  %v509_v19 = vadd.f32 1.0, %v4377_v15  ;;  %v461_v38 = vmul.f32 0.70710677, %v400_v37 }
 0x174   :  { %v404_v20 = vpop.f32.mrf.mxu0 }
 0x175   :  { %v4860_v21 = vmul.f32 %v509_v19, %v430_v13  ;;  %v405_v39 = vadd.f32 %v4781_v22, %v404_v20  ;;  %4384 = verf.f32 %v461_v38  ;;  %v434_v19 = vmul.f32 0.5, %v400_v37 }
 0x176   :  { %v4214_v23 = vpop.f32.mrf.mxu0  ;;  %v4379_v41 = vpop.eup %4378 }
 0x177   :  { %582 = vadd.xlane.f32.xlu1 %v4860_v21  ;;  %v462_v42 = vmul.f32 0.70710677, %v405_v39  ;;  %v510_v51 = vadd.f32 1.0, %v4379_v41  ;;  %v435_v31 = vmul.f32 0.5, %v405_v39 }
 0x178   :  { %v407_v24 = vpop.f32.mrf.mxu0 }
 0x179   :  { %v408_v44 = vadd.f32 %v4781_v22, %v407_v24  ;;  %4386 = verf.f32 %v462_v42  ;;  %v4878_v63 = vmul.f32 %v510_v51, %v431_v49  ;;  %v4320_v51 = vld [vmem:[#allocation8 + $0x20] sm:$0xff]  }
 0x17a   :  { %v4215_v25 = vpop.f32.mrf.mxu0  ;;  %v4381_v58 = vpop.eup %4380 }
 0x17b   :  { %v463_v53 = vmul.f32 0.70710677, %v408_v44  ;;  %v511_v3 = vadd.f32 1.0, %v4381_v58  ;;  %v436_v39 = vmul.f32 0.5, %v408_v44  ;;  %v4321_v58 = vld [vmem:[#allocation8 + $0x18] sm:$0xff]  }
 0x17d   :  { %4388 = verf.f32 %v463_v53  ;;  %v4888_v12 = vmul.f32 %v511_v3, %v432_v60 }
 0x17e   :  { %v4383_v4 = vpop.eup %4382 }
 0x17f   :  { %v512_v13 = vadd.f32 1.0, %v4383_v4 }
 0x181   :  { %v4896_v24 = vmul.f32 %v512_v13, %v433_v8 }
 0x182   :  { %v4385_v15 = vpop.eup %4384 }
 0x183   :  { %v513_v25 = vadd.f32 1.0, %v4385_v15  ;;  %v4324_v15 = vld [vmem:[#allocation8] sm:$0xff]  }
 0x185   :  { %v4904_v34 = vmul.f32 %v513_v25, %v434_v19 }
 0x186   :  { %v4387_v28 = vpop.eup %4386 }
 0x187   :  { %v514_v37 = vadd.f32 1.0, %v4387_v28 }
 0x189   :  { %v4913_v49 = vmul.f32 %v514_v37, %v435_v31 }
 0x18a   :  { %v4389_v38 = vpop.eup %4388 }
 0x1b4   :  { %v545_v40 = vpop.xlane.xlu0 %544 }
 0x1b5   :  { %v597_v46 = vmul.f32 0.0078125, %v545_v40  ;;  %v4319_v40 = vld [vmem:[#allocation8 + $0x28] sm:$0xff]  }
 0x1b6   :  { %4221 = vmatpush3.bf16.msra.mxu1 %v4319_v40 }
 0x1b7   :  { %v4871_v47 = vsub.f32 %v4789_v48, %v597_v46  ;;  %4222 = vmatprep.subr.bf16.mxu1 %v4662_v0 }
 0x1b8   :  { %v547_v50 = vpop.xlane.xlu0 %546 }
 0x1b9   :  { %v598_v55 = vmul.f32 0.0078125, %v547_v50  ;;  %v649_v57 = vmul.f32 %v4871_v47, %v4871_v47  ;;  %v515_v50 = vadd.f32 1.0, %v4389_v38 }
 0x1ba   :  { %4223 = vmatpush3.bf16.msra.mxu1 %v4320_v51 }
 0x1bb   :  { %675 = vadd.xlane.f32.xlu0 %v649_v57  ;;  %v4876_v59 = vsub.f32 %v4793_v56, %v598_v55  ;;  %v4922_v57 = vmul.f32 %v515_v50, %v436_v39  ;;  %4224 = vmatprep.subr.bf16.mxu1 %v4662_v0 }
 0x1bc   :  { %v549_v22 = vpop.xlane.xlu1 %548 }
 0x1bd   :  { %v599_v48 = vmul.f32 0.0078125, %v549_v22  ;;  %v650_v2 = vmul.f32 %v4876_v59, %v4876_v59 }
 0x1be   :  { %4225 = vmatpush3.bf16.msra.mxu1 %v4321_v58 }
 0x1bf   :  { %677 = vadd.xlane.f32.xlu1 %v650_v2  ;;  %584 = vadd.xlane.f32.xlu0 %v4878_v63  ;;  %v4884_v5 = vsub.f32 %v4797_v1, %v599_v48  ;;  %v4322_v2 = vld [vmem:[#allocation8 + $0x10] sm:$0xff]  }
 0x1c0   :  { %v551_v56 = vpop.xlane.xlu1 %550  ;;  %4226 = vmatprep.subr.bf16.mxu1 %v4662_v0 }
 0x1c1   :  { %v600_v10 = vmul.f32 0.0078125, %v551_v56  ;;  %v651_v11 = vmul.f32 %v4884_v5, %v4884_v5  ;;  %v4323_v56 = vld [vmem:[#allocation8 + $0x8] sm:$0xff]  }
 0x1c2   :  { %4227 = vmatpush3.bf16.msra.mxu1 %v4322_v2 }
 0x1c3   :  { %679 = vadd.xlane.f32.xlu0 %v651_v11  ;;  %586 = vadd.xlane.f32.xlu1 %v4888_v12  ;;  %v4892_v18 = vsub.f32 %v4801_v9, %v600_v10 }
 0x1c4   :  { %v553_v20 = vpop.xlane.xlu0 %552  ;;  %4228 = vmatprep.subr.bf16.mxu1 %v4662_v0 }
 0x1c5   :  { %v601_v1 = vmul.f32 0.0078125, %v553_v20  ;;  %v652_v23 = vmul.f32 %v4892_v18, %v4892_v18 }
 0x1c6   :  { %4229 = vmatpush3.bf16.msra.mxu1 %v4323_v56 }
 0x1c7   :  { %681 = vadd.xlane.f32.xlu1 %v652_v23  ;;  %588 = vadd.xlane.f32.xlu0 %v4896_v24  ;;  %v4900_v30 = vsub.f32 %v4805_v17, %v601_v1 }
 0x1c8   :  { %v555_v9 = vpop.xlane.xlu1 %554  ;;  %4230 = vmatprep.subr.bf16.mxu1 %v4662_v0 }
 0x1c9   :  { %v602_v32 = vmul.f32 0.0078125, %v555_v9  ;;  %v653_v33 = vmul.f32 %v4900_v30, %v4900_v30 }
 0x1ca   :  { %4231 = vmatpush3.bf16.msra.mxu1 %v4324_v15 }
 0x1cb   :  { %683 = vadd.xlane.f32.xlu0 %v653_v33  ;;  %590 = vadd.xlane.f32.xlu1 %v4904_v34  ;;  %v4909_v17 = vsub.f32 %v4809_v27, %v602_v32 }
 0x1cc   :  { %v557_v41 = vpop.xlane.xlu0 %556 }
 0x1cd   :  { %v603_v42 = vmul.f32 0.0078125, %v557_v41  ;;  %v654_v46 = vmul.f32 %v4909_v17, %v4909_v17 }
 0x1cf   :  { %v4917_v53 = vsub.f32 %v4813_v35, %v603_v42  ;;  %685 = vadd.xlane.f32.xlu1 %v654_v46  ;;  %592 = vadd.xlane.f32.xlu0 %v4913_v49 }
 0x1d0   :  { %v559_v27 = vpop.xlane.xlu1 %558 }
 0x1d1   :  { %v604_v44 = vmul.f32 0.0078125, %v559_v27  ;;  %v655_v55 = vmul.f32 %v4917_v53, %v4917_v53 }
 0x1d3   :  { %v4926_v60 = vsub.f32 %v4817_v43, %v604_v44  ;;  %687 = vadd.xlane.f32.xlu0 %v655_v55  ;;  %594 = vadd.xlane.f32.xlu1 %v4922_v57 }
 0x1d4   :  { %v561_v35 = vpop.xlane.xlu0 %560 }
 0x1d5   :  { %v605_v22 = vmul.f32 0.0078125, %v561_v35  ;;  %v656_v48 = vmul.f32 %v4926_v60, %v4926_v60 }
 0x1d7   :  { %v4933_v3 = vsub.f32 %v4821_v52, %v605_v22  ;;  %689 = vadd.xlane.f32.xlu1 %v656_v48 }
 0x1d8   :  { %v563_v4 = vpop.xlane.xlu1 %562 }
 0x1d9   :  { %v606_v43 = vmul.f32 0.0078125, %v563_v4  ;;  %v657_v8 = vmul.f32 %v4933_v3, %v4933_v3 }
 0x1db   :  { %v4939_v10 = vsub.f32 %v4825_v61, %v606_v43  ;;  %691 = vadd.xlane.f32.xlu0 %v657_v8 }
 0x1dc   :  { %v565_v11 = vpop.xlane.xlu0 %564 }
 0x1dd   :  { %v607_v13 = vmul.f32 0.0078125, %v565_v11  ;;  %v658_v52 = vmul.f32 %v4939_v10, %v4939_v10 }
 0x1df   :  { %v4945_v19 = vsub.f32 %v4829_v7, %v607_v13  ;;  %693 = vadd.xlane.f32.xlu1 %v658_v52 }
 0x1e0   :  { %v567_v20 = vpop.xlane.xlu1 %566 }
 0x1e1   :  { %v608_v1 = vmul.f32 0.0078125, %v567_v20  ;;  %v659_v61 = vmul.f32 %v4945_v19, %v4945_v19 }
 0x1e3   :  { %v4950_v23 = vsub.f32 %v4833_v16, %v608_v1  ;;  %695 = vadd.xlane.f32.xlu0 %v659_v61 }
 0x1e4   :  { %v569_v25 = vpop.xlane.xlu0 %568 }
 0x1e5   :  { %v609_v28 = vmul.f32 0.0078125, %v569_v25  ;;  %v660_v29 = vmul.f32 %v4950_v23, %v4950_v23 }
 0x1e7   :  { %v4955_v31 = vsub.f32 %v4837_v26, %v609_v28  ;;  %697 = vadd.xlane.f32.xlu1 %v660_v29 }
 0x1e8   :  { %v571_v7 = vpop.xlane.xlu1 %570 }
 0x1e9   :  { %v610_v9 = vmul.f32 0.0078125, %v571_v7  ;;  %v661_v32 = vmul.f32 %v4955_v31, %v4955_v31 }
 0x1eb   :  { %v4960_v33 = vsub.f32 %v4841_v36, %v610_v9  ;;  %699 = vadd.xlane.f32.xlu0 %v661_v32 }
 0x1ec   :  { %v573_v16 = vpop.xlane.xlu0 %572 }
 0x1ed   :  { %v611_v37 = vmul.f32 0.0078125, %v573_v16  ;;  %v662_v38 = vmul.f32 %v4960_v33, %v4960_v33 }
 0x1ef   :  { %v4965_v40 = vsub.f32 %v4845_v45, %v611_v37  ;;  %701 = vadd.xlane.f32.xlu1 %v662_v38 }
 0x1f0   :  { %v575_v26 = vpop.xlane.xlu1 %574 }
 0x1f1   :  { %v612_v39 = vmul.f32 0.0078125, %v575_v26  ;;  %v663_v41 = vmul.f32 %v4965_v40, %v4965_v40 }
 0x1f3   :  { %v4970_v42 = vsub.f32 %v4848_v54, %v612_v39  ;;  %703 = vadd.xlane.f32.xlu0 %v663_v41 }
 0x1f4   :  { %v577_v36 = vpop.xlane.xlu0 %576 }
 0x1f5   :  { %v613_v46 = vmul.f32 0.0078125, %v577_v36  ;;  %v664_v50 = vmul.f32 %v4970_v42, %v4970_v42 }
 0x1f7   :  { %v4975_v51 = vsub.f32 %v4851_v62, %v613_v46  ;;  %705 = vadd.xlane.f32.xlu1 %v664_v50 }
 0x1f8   :  { %v579_v45 = vpop.xlane.xlu1 %578 }
 0x1f9   :  { %v614_v27 = vmul.f32 0.0078125, %v579_v45  ;;  %v665_v44 = vmul.f32 %v4975_v51, %v4975_v51 }
 0x1fb   :  { %v4980_v55 = vsub.f32 %v4854_v6, %v614_v27  ;;  %707 = vadd.xlane.f32.xlu0 %v665_v44 }
 0x1fc   :  { %v581_v54 = vpop.xlane.xlu0 %580 }
 0x1fd   :  { %v615_v58 = vmul.f32 0.0078125, %v581_v54  ;;  %v666_v35 = vmul.f32 %v4980_v55, %v4980_v55 }
 0x1ff   :  { %v4985_v22 = vsub.f32 %v4857_v14, %v615_v58  ;;  %709 = vadd.xlane.f32.xlu1 %v666_v35 }
 0x200   :  { %v583_v62 = vpop.xlane.xlu1 %582 }
 0x201   :  { %v616_v48 = vmul.f32 0.0078125, %v583_v62  ;;  %v667_v2 = vmul.f32 %v4985_v22, %v4985_v22 }
 0x203   :  { %v4990_v4 = vsub.f32 %v4860_v21, %v616_v48  ;;  %711 = vadd.xlane.f32.xlu0 %v667_v2  ;;  %v5018_v48 = vld [vmem:[%s5869_s3] ss:$0 sm:$0xff] }
 0x205   :  { %v668_v6 = vmul.f32 %v4990_v4, %v4990_v4 }
 0x207   :  { %713 = vadd.xlane.f32.xlu1 %v668_v6 }
 0x244   :  { %v676_v43 = vpop.xlane.xlu0 %675 }
 0x245   :  { %v727_v8 = vmul.f32 0.0078125, %v676_v43 }
 0x247   :  { %v753_v56 = vadd.f32 1e-12, %v727_v8 }
 0x248   :  { %v678_v11 = vpop.xlane.xlu1 %677  ;;  %v585_v14 = vpop.xlane.xlu0 %584 }
 0x249   :  { %4390 = vrsqrt.f32 %v753_v56  ;;  %v728_v13 = vmul.f32 0.0078125, %v678_v11  ;;  %v617_v52 = vmul.f32 0.0078125, %v585_v14 }
 0x24b   :  { %v754_v15 = vadd.f32 1e-12, %v728_v13  ;;  %v4995_v20 = vsub.f32 %v4878_v63, %v617_v52  ;;  %v5030_v52 = vld [vmem:[%s5870_s4] ss:$0 sm:$0xff] }
 0x24c   :  { %v680_v1 = vpop.xlane.xlu0 %679  ;;  %v587_v21 = vpop.xlane.xlu1 %586 }
 0x24d   :  { %4392 = vrsqrt.f32 %v754_v15  ;;  %v729_v61 = vmul.f32 0.0078125, %v680_v1  ;;  %v618_v25 = vmul.f32 0.0078125, %v587_v21  ;;  %v669_v28 = vmul.f32 %v4995_v20, %v4995_v20 }
 0x24f   :  { %v755_v29 = vadd.f32 1e-12, %v729_v61  ;;  %v5000_v7 = vsub.f32 %v4888_v12, %v618_v25  ;;  %715 = vadd.xlane.f32.xlu0 %v669_v28 }
 0x250   :  { %v682_v9 = vpop.xlane.xlu1 %681  ;;  %v589_v32 = vpop.xlane.xlu0 %588 }
 0x251   :  { %4394 = vrsqrt.f32 %v755_v29  ;;  %v730_v16 = vmul.f32 0.0078125, %v682_v9  ;;  %v619_v37 = vmul.f32 0.0078125, %v589_v32  ;;  %v670_v63 = vmul.f32 %v5000_v7, %v5000_v7 }
 0x253   :  { %v756_v38 = vadd.f32 1e-12, %v730_v16  ;;  %v5005_v26 = vsub.f32 %v4896_v24, %v619_v37  ;;  %717 = vadd.xlane.f32.xlu1 %v670_v63 }
 0x254   :  { %v684_v39 = vpop.xlane.xlu0 %683  ;;  %v591_v41 = vpop.xlane.xlu1 %590 }
 0x255   :  { %4396 = vrsqrt.f32 %v756_v38  ;;  %v731_v36 = vmul.f32 0.0078125, %v684_v39  ;;  %v620_v12 = vmul.f32 0.0078125, %v591_v41  ;;  %v671_v46 = vmul.f32 %v5005_v26, %v5005_v26 }
 0x256   :  { %v4391_v50 = vpop.eup %4390 }
 0x257   :  { %v757_v45 = vadd.f32 1e-12, %v731_v36  ;;  %v5010_v27 = vsub.f32 %v4904_v34, %v620_v12  ;;  %719 = vadd.xlane.f32.xlu0 %v671_v46  ;;  %v805_v24 = vmul.f32 %v4391_v50, %v4871_v47 }
 0x258   :  { %v686_v44 = vpop.xlane.xlu1 %685  ;;  %v593_v54 = vpop.xlane.xlu0 %592 }
 0x259   :  { %4398 = vrsqrt.f32 %v757_v45  ;;  %v732_v58 = vmul.f32 0.0078125, %v686_v44  ;;  %v621_v35 = vmul.f32 0.0078125, %v593_v54  ;;  %v672_v62 = vmul.f32 %v5010_v27, %v5010_v27 }
 0x25a   :  { %v4393_v2 = vpop.eup %4392  ;;  %v837_v56 = vmul.f32 %v5018_v48, %v805_v24 }
 0x25b   :  { %v758_v6 = vadd.f32 1e-12, %v732_v58  ;;  %v5021_v34 = vsub.f32 %v4913_v49, %v621_v35  ;;  %721 = vadd.xlane.f32.xlu1 %v672_v62  ;;  %v806_v43 = vmul.f32 %v4393_v2, %v4876_v59 }
 0x25c   :  { %v688_v47 = vpop.xlane.xlu0 %687  ;;  %v595_v8 = vpop.xlane.xlu1 %594  ;;  %v869_v25 = vadd.f32 %v5030_v52, %v837_v56 }
 0x25d   :  { %4400 = vrsqrt.f32 %v758_v6  ;;  %v733_v11 = vmul.f32 0.0078125, %v688_v47  ;;  %v622_v14 = vmul.f32 0.0078125, %v595_v8  ;;  %v673_v13 = vmul.f32 %v5021_v34, %v5021_v34 }
 0x25e   :  { %v4395_v49 = vpop.eup %4394  ;;  %v838_v15 = vmul.f32 %v5018_v48, %v806_v43 }
 0x25f   :  { %v759_v1 = vadd.f32 1e-12, %v733_v11  ;;  %v5034_v59 = vsub.f32 %v4922_v57, %v622_v14  ;;  %723 = vadd.xlane.f32.xlu0 %v673_v13  ;;  %v807_v21 = vmul.f32 %v4395_v49, %v4884_v5 }
 0x260   :  { %v690_v61 = vpop.xlane.xlu1 %689  ;;  %v870_v28 = vadd.f32 %v5030_v52, %v838_v15 }
 0x261   :  { %4402 = vrsqrt.f32 %v759_v1  ;;  %v734_v29 = vmul.f32 0.0078125, %v690_v61  ;;  %v674_v9 = vmul.f32 %v5034_v59, %v5034_v59  ;;  %v839_v63 = vmul.f32 %v5018_v48, %v807_v21 }
 0x262   :  { %v4397_v32 = vpop.eup %4396  ;;  %v895_v16 = vpack.c.bf16 %v870_v28, %v869_v25 }
 0x263   :  { %v760_v37 = vadd.f32 1e-12, %v734_v29  ;;  %725 = vadd.xlane.f32.xlu1 %v674_v9  ;;  %v808_v57 = vmul.f32 %v4397_v32, %v4892_v18  ;;  %v871_v12 = vadd.f32 %v5030_v52, %v839_v63 }
 0x264   :  { %4233 = vmatmul.mubr.bf16.vlgmr.msra.gmra.mxu1 %v895_v16  ;;  %v692_v5 = vpop.xlane.xlu0 %691 }
 0x265   :  { %4404 = vrsqrt.f32 %v760_v37  ;;  %v735_v38 = vmul.f32 0.0078125, %v692_v5  ;;  %4236 = vmatprep.mubr.msk.bf16.mxu1 %vm4663_vm0, %v4662_v0  ;;  %v840_v39 = vmul.f32 %v5018_v48, %v808_v57 }
 0x266   :  { %v4399_v41 = vpop.eup %4398 }
 0x267   :  { %v761_v36 = vadd.f32 1e-12, %v735_v38  ;;  %v872_v46 = vadd.f32 %v5030_v52, %v840_v39  ;;  %v809_v50 = vmul.f32 %v4399_v41, %v4900_v30 }
 0x268   :  { %v694_v18 = vpop.xlane.xlu1 %693 }
 0x269   :  { %4406 = vrsqrt.f32 %v761_v36  ;;  %v736_v45 = vmul.f32 0.0078125, %v694_v18  ;;  %v896_v44 = vpack.c.bf16 %v872_v46, %v871_v12  ;;  %v841_v35 = vmul.f32 %v5018_v48, %v809_v50 }
 0x26a   :  { %v4401_v54 = vpop.eup %4400 }
 0x26b   :  { %v762_v24 = vadd.f32 1e-12, %v736_v45  ;;  %v810_v58 = vmul.f32 %v4401_v54, %v4909_v17  ;;  %v873_v47 = vadd.f32 %v5030_v52, %v841_v35 }
 0x26c   :  { %4237 = vmatmul.mubr.bf16.gmra.mxu1 %v896_v44  ;;  %v696_v62 = vpop.xlane.xlu0 %695 }
 0x26d   :  { %4408 = vrsqrt.f32 %v762_v24  ;;  %v737_v2 = vmul.f32 0.0078125, %v696_v62  ;;  %4240 = vmatprep.mubr.msk.bf16.mxu1 %vm4663_vm0, %v4662_v0  ;;  %v842_v6 = vmul.f32 %v5018_v48, %v810_v58 }
 0x26e   :  { %v4403_v30 = vpop.eup %4402 }
 0x26f   :  { %v763_v43 = vadd.f32 1e-12, %v737_v2  ;;  %v874_v8 = vadd.f32 %v5030_v52, %v842_v6  ;;  %v811_v56 = vmul.f32 %v4403_v30, %v4917_v53 }
 0x270   :  { %v698_v17 = vpop.xlane.xlu1 %697 }
 0x271   :  { %4410 = vrsqrt.f32 %v763_v43  ;;  %v738_v11 = vmul.f32 0.0078125, %v698_v17  ;;  %v897_v14 = vpack.c.bf16 %v874_v8, %v873_v47  ;;  %v843_v1 = vmul.f32 %v5018_v48, %v811_v56 }
 0x272   :  { %v4405_v13 = vpop.eup %4404 }
 0x273   :  { %v764_v49 = vadd.f32 1e-12, %v738_v11  ;;  %v812_v15 = vmul.f32 %v4405_v13, %v4926_v60  ;;  %v875_v29 = vadd.f32 %v5030_v52, %v843_v1 }
 0x274   :  { %4241 = vmatmul.mubr.bf16.gmra.mxu1 %v897_v14  ;;  %v700_v21 = vpop.xlane.xlu0 %699 }
 0x275   :  { %4412 = vrsqrt.f32 %v764_v49  ;;  %v739_v61 = vmul.f32 0.0078125, %v700_v21  ;;  %4244 = vmatprep.mubr.msk.bf16.mxu1 %vm4663_vm0, %v4662_v0  ;;  %v844_v25 = vmul.f32 %v5018_v48, %v812_v15 }
 0x276   :  { %v4407_v53 = vpop.eup %4406 }
 0x277   :  { %v765_v28 = vadd.f32 1e-12, %v739_v61  ;;  %v876_v9 = vadd.f32 %v5030_v52, %v844_v25  ;;  %v813_v32 = vmul.f32 %v4407_v53, %v4933_v3 }
 0x278   :  { %v702_v60 = vpop.xlane.xlu1 %701 }
 0x279   :  { %4414 = vrsqrt.f32 %v765_v28  ;;  %v740_v16 = vmul.f32 0.0078125, %v702_v60  ;;  %v898_v37 = vpack.c.bf16 %v876_v9, %v875_v29  ;;  %v845_v38 = vmul.f32 %v5018_v48, %v813_v32 }
 0x27a   :  { %v4409_v57 = vpop.eup %4408 }
 0x27b   :  { %v766_v63 = vadd.f32 1e-12, %v740_v16  ;;  %v814_v5 = vmul.f32 %v4409_v57, %v4939_v10  ;;  %v877_v46 = vadd.f32 %v5030_v52, %v845_v38 }
 0x27c   :  { %4245 = vmatmul.mubr.bf16.gmra.mxu1 %v898_v37  ;;  %v704_v39 = vpop.xlane.xlu0 %703 }
 0x27d   :  { %4416 = vrsqrt.f32 %v766_v63  ;;  %v741_v41 = vmul.f32 0.0078125, %v704_v39  ;;  %4248 = vmatprep.mubr.msk.bf16.mxu1 %vm4663_vm0, %v4662_v0  ;;  %v846_v36 = vmul.f32 %v5018_v48, %v814_v5 }
 0x27e   :  { %v4411_v3 = vpop.eup %4410 }
 0x27f   :  { %v767_v12 = vadd.f32 1e-12, %v741_v41  ;;  %v878_v50 = vadd.f32 %v5030_v52, %v846_v36  ;;  %v815_v18 = vmul.f32 %v4411_v3, %v4945_v19 }
 0x280   :  { %v706_v10 = vpop.xlane.xlu1 %705 }
 0x281   :  { %4418 = vrsqrt.f32 %v767_v12  ;;  %v742_v45 = vmul.f32 0.0078125, %v706_v10  ;;  %v899_v44 = vpack.c.bf16 %v878_v50, %v877_v46  ;;  %v847_v35 = vmul.f32 %v5018_v48, %v815_v18 }
 0x282   :  { %v4413_v54 = vpop.eup %4412 }
 0x283   :  { %v768_v24 = vadd.f32 1e-12, %v742_v45  ;;  %v816_v58 = vmul.f32 %v4413_v54, %v4950_v23  ;;  %v879_v43 = vadd.f32 %v5030_v52, %v847_v35 }
 0x284   :  { %4249 = vmatmul.mubr.bf16.gmra.mxu1 %v899_v44  ;;  %v708_v62 = vpop.xlane.xlu0 %707 }
 0x285   :  { %4420 = vrsqrt.f32 %v768_v24  ;;  %v743_v2 = vmul.f32 0.0078125, %v708_v62  ;;  %4252 = vmatprep.mubr.msk.bf16.mxu1 %vm4663_vm0, %v4662_v0  ;;  %v848_v6 = vmul.f32 %v5018_v48, %v816_v58 }
 0x286   :  { %v4415_v19 = vpop.eup %4414 }
 0x287   :  { %v769_v30 = vadd.f32 1e-12, %v743_v2  ;;  %v880_v47 = vadd.f32 %v5030_v52, %v848_v6  ;;  %v817_v8 = vmul.f32 %v4415_v19, %v4955_v31 }
 0x288   :  { %v710_v23 = vpop.xlane.xlu1 %709 }
 0x289   :  { %4422 = vrsqrt.f32 %v769_v30  ;;  %v744_v56 = vmul.f32 0.0078125, %v710_v23  ;;  %v900_v17 = vpack.c.bf16 %v880_v47, %v879_v43  ;;  %v849_v49 = vmul.f32 %v5018_v48, %v817_v8 }
 0x28a   :  { %v4417_v11 = vpop.eup %4416 }
 0x28b   :  { %v770_v14 = vadd.f32 1e-12, %v744_v56  ;;  %v818_v13 = vmul.f32 %v4417_v11, %v4960_v33  ;;  %v881_v25 = vadd.f32 %v5030_v52, %v849_v49 }
 0x28c   :  { %4253 = vmatmul.mubr.bf16.gmra.mxu1 %v900_v17  ;;  %v712_v15 = vpop.xlane.xlu0 %711 }
 0x28d   :  { %4424 = vrsqrt.f32 %v770_v14  ;;  %v745_v1 = vmul.f32 0.0078125, %v712_v15  ;;  %4256 = vmatprep.mubr.msk.bf16.mxu1 %vm4663_vm0, %v4662_v0  ;;  %v850_v21 = vmul.f32 %v5018_v48, %v818_v13 }
 0x28e   :  { %v4419_v31 = vpop.eup %4418 }
 0x28f   :  { %v771_v61 = vadd.f32 1e-12, %v745_v1  ;;  %v882_v53 = vadd.f32 %v5030_v52, %v850_v21  ;;  %v819_v28 = vmul.f32 %v4419_v31, %v4965_v40 }
 0x290   :  { %v714_v33 = vpop.xlane.xlu1 %713 }
 0x291   :  { %4426 = vrsqrt.f32 %v771_v61  ;;  %v746_v29 = vmul.f32 0.0078125, %v714_v33  ;;  %v901_v9 = vpack.c.bf16 %v882_v53, %v881_v25  ;;  %v851_v37 = vmul.f32 %v5018_v48, %v819_v28 }
 0x292   :  { %v4421_v32 = vpop.eup %4420 }
 0x293   :  { %v772_v60 = vadd.f32 1e-12, %v746_v29  ;;  %v820_v16 = vmul.f32 %v4421_v32, %v4970_v42  ;;  %v883_v40 = vadd.f32 %v5030_v52, %v851_v37 }
 0x294   :  { %4257 = vmatmul.mubr.bf16.gmra.mxu1 %v901_v9 }
 0x295   :  { %4428 = vrsqrt.f32 %v772_v60  ;;  %4260 = vmatprep.mubr.msk.bf16.mxu1 %vm4663_vm0, %v4662_v0  ;;  %v852_v57 = vmul.f32 %v5018_v48, %v820_v16 }
 0x296   :  { %v4423_v63 = vpop.eup %4422 }
 0x297   :  { %v884_v5 = vadd.f32 %v5030_v52, %v852_v57  ;;  %v821_v38 = vmul.f32 %v4423_v63, %v4975_v51 }
 0x299   :  { %v902_v39 = vpack.c.bf16 %v884_v5, %v883_v40  ;;  %v853_v36 = vmul.f32 %v5018_v48, %v821_v38 }
 0x29a   :  { %v4425_v41 = vpop.eup %4424 }
 0x29b   :  { %v822_v42 = vmul.f32 %v4425_v41, %v4980_v55  ;;  %v885_v46 = vadd.f32 %v5030_v52, %v853_v36 }
 0x29c   :  { %4261 = vmatmul.mubr.bf16.gmra.mxu1 %v902_v39 }
 0x29d   :  { %4264 = vmatprep.mubr.msk.bf16.mxu1 %vm4663_vm0, %v4662_v0  ;;  %v854_v3 = vmul.f32 %v5018_v48, %v822_v42 }
 0x29e   :  { %v4427_v12 = vpop.eup %4426 }
 0x29f   :  { %v886_v50 = vadd.f32 %v5030_v52, %v854_v3  ;;  %v823_v18 = vmul.f32 %v4427_v12, %v4985_v22 }
 0x2a1   :  { %v903_v51 = vpack.c.bf16 %v886_v50, %v885_v46  ;;  %v855_v55 = vmul.f32 %v5018_v48, %v823_v18 }
 0x2a2   :  { %v4429_v10 = vpop.eup %4428 }
 0x2a3   :  { %v824_v45 = vmul.f32 %v4429_v10, %v4990_v4  ;;  %v887_v54 = vadd.f32 %v5030_v52, %v855_v55 }
 0x2a4   :  { %4265 = vmatmul.mubr.bf16.gmra.mxu1 %v903_v51 }
 0x2a5   :  { %4268 = vmatprep.mubr.msk.bf16.mxu1 %vm4663_vm0, %v4662_v0  ;;  %v856_v44 = vmul.f32 %v5018_v48, %v824_v45 }
 0x2a7   :  { %v888_v24 = vadd.f32 %v5030_v52, %v856_v44 }
 0x2a9   :  { %v904_v58 = vpack.c.bf16 %v888_v24, %v887_v54 }
 0x2ac   :  { %4269 = vmatmul.mubr.bf16.gmra.mxu1 %v904_v58 }
 0x2ad   :  { %4272 = vmatprep.mubr.msk.bf16.mxu1 %vm4663_vm0, %v4662_v0 }
 0x2d8   :  { %v716_v22 = vpop.xlane.xlu0 %715 }
 0x2d9   :  { %v747_v35 = vmul.f32 0.0078125, %v716_v22 }
 0x2db   :  { %v773_v4 = vadd.f32 1e-12, %v747_v35 }
 0x2dc   :  { %v718_v62 = vpop.xlane.xlu1 %717 }
 0x2dd   :  { %4430 = vrsqrt.f32 %v773_v4  ;;  %v748_v2 = vmul.f32 0.0078125, %v718_v62 }
 0x2df   :  { %v774_v6 = vadd.f32 1e-12, %v748_v2 }
 0x2e0   :  { %v720_v19 = vpop.xlane.xlu0 %719 }
 0x2e1   :  { %4432 = vrsqrt.f32 %v774_v6  ;;  %v749_v30 = vmul.f32 0.0078125, %v720_v19 }
 0x2e3   :  { %v775_v43 = vadd.f32 1e-12, %v749_v30 }
 0x2e4   :  { %v722_v47 = vpop.xlane.xlu1 %721 }
 0x2e5   :  { %4434 = vrsqrt.f32 %v775_v43  ;;  %v750_v8 = vmul.f32 0.0078125, %v722_v47 }
 0x2e7   :  { %v776_v23 = vadd.f32 1e-12, %v750_v8 }
 0x2e8   :  { %v724_v56 = vpop.xlane.xlu0 %723 }
 0x2e9   :  { %4436 = vrsqrt.f32 %v776_v23  ;;  %v751_v17 = vmul.f32 0.0078125, %v724_v56 }
 0x2ea   :  { %v4431_v11 = vpop.eup %4430 }
 0x2eb   :  { %v777_v14 = vadd.f32 1e-12, %v751_v17  ;;  %v825_v13 = vmul.f32 %v4431_v11, %v4995_v20 }
 0x2ec   :  { %v726_v49 = vpop.xlane.xlu1 %725 }
 0x2ed   :  { %4438 = vrsqrt.f32 %v777_v14  ;;  %v752_v15 = vmul.f32 0.0078125, %v726_v49  ;;  %v857_v61 = vmul.f32 %v5018_v48, %v825_v13 }
 0x2ee   :  { %v4433_v1 = vpop.eup %4432 }
 0x2ef   :  { %v778_v21 = vadd.f32 1e-12, %v752_v15  ;;  %v826_v31 = vmul.f32 %v4433_v1, %v5000_v7  ;;  %v889_v28 = vadd.f32 %v5030_v52, %v857_v61 }
 0x2f1   :  { %4440 = vrsqrt.f32 %v778_v21  ;;  %v858_v25 = vmul.f32 %v5018_v48, %v826_v31 }
 0x2f2   :  { %v4435_v53 = vpop.eup %4434 }
 0x2f3   :  { %v890_v33 = vadd.f32 %v5030_v52, %v858_v25  ;;  %v827_v29 = vmul.f32 %v4435_v53, %v5005_v26 }
 0x2f5   :  { %v905_v20 = vpack.c.bf16 %v890_v33, %v889_v28  ;;  %v859_v60 = vmul.f32 %v5018_v48, %v827_v29 }
 0x2f6   :  { %v4437_v9 = vpop.eup %4436 }
 0x2f7   :  { %4273 = vmatmul.mubr.bf16.gmra.mxu1 %v905_v20  ;;  %v828_v32 = vmul.f32 %v4437_v9, %v5010_v27  ;;  %v891_v37 = vadd.f32 %v5030_v52, %v859_v60 }
 0x2f8   :  { %4276 = vmatprep.mubr.msk.bf16.mxu1 %vm4663_vm0, %v4662_v0 }
 0x2f9   :  { %v860_v7 = vmul.f32 %v5018_v48, %v828_v32 }
 0x2fa   :  { %v4439_v16 = vpop.eup %4438 }
 0x2fb   :  { %v892_v57 = vadd.f32 %v5030_v52, %v860_v7  ;;  %v829_v63 = vmul.f32 %v4439_v16, %v5021_v34  ;;  %v5139_v34 = vld [vmem:[%s5872_s6] ss:$0 sm:$0xff] }
 0x2fd   :  { %v906_v26 = vpack.c.bf16 %v892_v57, %v891_v37  ;;  %v861_v27 = vmul.f32 %v5018_v48, %v829_v63 }
 0x2fe   :  { %v4441_v40 = vpop.eup %4440 }
 0x2ff   :  { %4277 = vmatmul.mubr.bf16.gmra.mxu1 %v906_v26  ;;  %v830_v5 = vmul.f32 %v4441_v40, %v5034_v59  ;;  %v893_v39 = vadd.f32 %v5030_v52, %v861_v27 }
 0x300   :  { %4280 = vmatprep.mubr.msk.bf16.mxu1 %vm4663_vm0, %v4662_v0 }
 0x301   :  { %v862_v38 = vmul.f32 %v5018_v48, %v830_v5 }
 0x303   :  { %v894_v41 = vadd.f32 %v5030_v52, %v862_v38 }
 0x305   :  { %v907_v42 = vpack.c.bf16 %v894_v41, %v893_v39 }
 0x307   :  { %4281 = vmatmul.mubr.bf16.gmra.mxu1 %v907_v42 }
 0x324   :  { %v1013_v36 = vpop.f32.mrf.mxu1 }
 0x325   :  { %v1014_v59 = vadd.f32 %v5139_v34, %v1013_v36 }
 0x326   :  { %v4234_v3 = vpop.f32.mrf.mxu1 }
 0x327   :  { %v1142_v12 = vmul.f32 0.70710677, %v1014_v59  ;;  %v1116_v4 = vmul.f32 0.5, %v1014_v59 }
 0x328   :  { %v1016_v46 = vpop.f32.mrf.mxu1 }
 0x329   :  { %4442 = verf.f32 %v1142_v12  ;;  %v1017_v0 = vadd.f32 %v5139_v34, %v1016_v46 }
 0x32a   :  { %v4235_v48 = vpop.f32.mrf.mxu1 }
 0x32b   :  { %v1143_v50 = vmul.f32 0.70710677, %v1017_v0  ;;  %v1117_v8 = vmul.f32 0.5, %v1017_v0 }
 0x32c   :  { %v1021_v18 = vpop.f32.mrf.mxu1 }
 0x32d   :  { %4444 = verf.f32 %v1143_v50  ;;  %v1022_v52 = vadd.f32 %v5139_v34, %v1021_v18 }
 0x32e   :  { %v4238_v51 = vpop.f32.mrf.mxu1 }
 0x32f   :  { %v1144_v10 = vmul.f32 0.70710677, %v1022_v52  ;;  %v1118_v15 = vmul.f32 0.5, %v1022_v52 }
 0x330   :  { %v1024_v45 = vpop.f32.mrf.mxu1 }
 0x331   :  { %4446 = verf.f32 %v1144_v10  ;;  %v1025_v55 = vadd.f32 %v5139_v34, %v1024_v45 }
 0x332   :  { %v4239_v44 = vpop.f32.mrf.mxu1 }
 0x333   :  { %v1145_v54 = vmul.f32 0.70710677, %v1025_v55  ;;  %v1119_v33 = vmul.f32 0.5, %v1025_v55 }
 0x334   :  { %v1029_v24 = vpop.f32.mrf.mxu1 }
 0x335   :  { %4448 = verf.f32 %v1145_v54  ;;  %v1030_v58 = vadd.f32 %v5139_v34, %v1029_v24 }
 0x336   :  { %v4443_v22 = vpop.eup %4442  ;;  %v4242_v35 = vpop.f32.mrf.mxu1 }
 0x337   :  { %v1146_v62 = vmul.f32 0.70710677, %v1030_v58  ;;  %v1194_v2 = vadd.f32 1.0, %v4443_v22  ;;  %v1120_v37 = vmul.f32 0.5, %v1030_v58 }
 0x338   :  { %v1032_v6 = vpop.f32.mrf.mxu1 }
 0x339   :  { %4450 = verf.f32 %v1146_v62  ;;  %v1033_v19 = vadd.f32 %v5139_v34, %v1032_v6  ;;  %v5147_v30 = vmul.f32 %v1194_v2, %v1116_v4 }
 0x33a   :  { %v4445_v43 = vpop.eup %4444  ;;  %v4243_v47 = vpop.f32.mrf.mxu1 }
 0x33b   :  { %v1147_v23 = vmul.f32 0.70710677, %v1033_v19  ;;  %1248 = vadd.xlane.f32.xlu0 %v5147_v30  ;;  %v1195_v56 = vadd.f32 1.0, %v4445_v43  ;;  %v1121_v39 = vmul.f32 0.5, %v1033_v19 }
 0x33c   :  { %v1037_v17 = vpop.f32.mrf.mxu1 }
 0x33d   :  { %4452 = verf.f32 %v1147_v23  ;;  %v1038_v11 = vadd.f32 %v5139_v34, %v1037_v17  ;;  %v5151_v14 = vmul.f32 %v1195_v56, %v1117_v8 }
 0x33e   :  { %v4447_v13 = vpop.eup %4446  ;;  %v4246_v49 = vpop.f32.mrf.mxu1 }
 0x33f   :  { %v1148_v1 = vmul.f32 0.70710677, %v1038_v11  ;;  %1250 = vadd.xlane.f32.xlu1 %v5151_v14  ;;  %v1196_v21 = vadd.f32 1.0, %v4447_v13  ;;  %v1122_v0 = vmul.f32 0.5, %v1038_v11 }
 0x340   :  { %v1040_v31 = vpop.f32.mrf.mxu1 }
 0x341   :  { %4454 = verf.f32 %v1148_v1  ;;  %v1041_v61 = vadd.f32 %v5139_v34, %v1040_v31  ;;  %v5155_v25 = vmul.f32 %v1196_v21, %v1118_v15 }
 0x342   :  { %v4449_v53 = vpop.eup %4448  ;;  %v4247_v28 = vpop.f32.mrf.mxu1 }
 0x343   :  { %v1149_v29 = vmul.f32 0.70710677, %v1041_v61  ;;  %1252 = vadd.xlane.f32.xlu0 %v5155_v25  ;;  %v1197_v20 = vadd.f32 1.0, %v4449_v53  ;;  %v1123_v55 = vmul.f32 0.5, %v1041_v61 }
 0x344   :  { %v1045_v9 = vpop.f32.mrf.mxu1 }
 0x345   :  { %4456 = verf.f32 %v1149_v29  ;;  %v1046_v32 = vadd.f32 %v5139_v34, %v1045_v9  ;;  %v5159_v60 = vmul.f32 %v1197_v20, %v1119_v33 }
 0x346   :  { %v4451_v7 = vpop.eup %4450  ;;  %v4250_v16 = vpop.f32.mrf.mxu1 }
 0x347   :  { %v1150_v57 = vmul.f32 0.70710677, %v1046_v32  ;;  %1254 = vadd.xlane.f32.xlu1 %v5159_v60  ;;  %v1198_v63 = vadd.f32 1.0, %v4451_v7  ;;  %v1124_v62 = vmul.f32 0.5, %v1046_v32 }
 0x348   :  { %v1048_v26 = vpop.f32.mrf.mxu1 }
 0x349   :  { %4458 = verf.f32 %v1150_v57  ;;  %v1049_v40 = vadd.f32 %v5139_v34, %v1048_v26  ;;  %v5163_v5 = vmul.f32 %v1198_v63, %v1120_v37 }
 0x34a   :  { %v4453_v27 = vpop.eup %4452  ;;  %v4251_v38 = vpop.f32.mrf.mxu1 }
 0x34b   :  { %v1151_v41 = vmul.f32 0.70710677, %v1049_v40  ;;  %1256 = vadd.xlane.f32.xlu0 %v5163_v5  ;;  %v1199_v42 = vadd.f32 1.0, %v4453_v27  ;;  %v1125_v56 = vmul.f32 0.5, %v1049_v40 }
 0x34c   :  { %v1053_v36 = vpop.f32.mrf.mxu1 }
 0x34d   :  { %4460 = verf.f32 %v1151_v41  ;;  %v1054_v59 = vadd.f32 %v5139_v34, %v1053_v36  ;;  %v5167_v3 = vmul.f32 %v1199_v42, %v1121_v39 }
 0x34e   :  { %v4455_v12 = vpop.eup %4454  ;;  %v4254_v46 = vpop.f32.mrf.mxu1 }
 0x34f   :  { %v1152_v48 = vmul.f32 0.70710677, %v1054_v59  ;;  %1258 = vadd.xlane.f32.xlu1 %v5167_v3  ;;  %v1200_v50 = vadd.f32 1.0, %v4455_v12  ;;  %v1126_v31 = vmul.f32 0.5, %v1054_v59 }
 0x350   :  { %v1056_v18 = vpop.f32.mrf.mxu1 }
 0x351   :  { %4462 = verf.f32 %v1152_v48  ;;  %v1057_v52 = vadd.f32 %v5139_v34, %v1056_v18  ;;  %v5171_v51 = vmul.f32 %v1200_v50, %v1122_v0 }
 0x352   :  { %v4457_v10 = vpop.eup %4456  ;;  %v4255_v45 = vpop.f32.mrf.mxu1 }
 0x353   :  { %v1153_v44 = vmul.f32 0.70710677, %v1057_v52  ;;  %1260 = vadd.xlane.f32.xlu0 %v5171_v51  ;;  %v1201_v54 = vadd.f32 1.0, %v4457_v10  ;;  %v1127_v32 = vmul.f32 0.5, %v1057_v52 }
 0x354   :  { %v1061_v24 = vpop.f32.mrf.mxu1 }
 0x355   :  { %4464 = verf.f32 %v1153_v44  ;;  %v1062_v58 = vadd.f32 %v5139_v34, %v1061_v24  ;;  %v5175_v22 = vmul.f32 %v1201_v54, %v1123_v55 }
 0x356   :  { %v4459_v35 = vpop.eup %4458  ;;  %v4258_v4 = vpop.f32.mrf.mxu1 }
 0x357   :  { %v1154_v2 = vmul.f32 0.70710677, %v1062_v58  ;;  %1262 = vadd.xlane.f32.xlu1 %v5175_v22  ;;  %v1202_v6 = vadd.f32 1.0, %v4459_v35  ;;  %v1128_v27 = vmul.f32 0.5, %v1062_v58 }
 0x358   :  { %v1064_v19 = vpop.f32.mrf.mxu1 }
 0x359   :  { %4466 = verf.f32 %v1154_v2  ;;  %v1065_v43 = vadd.f32 %v5139_v34, %v1064_v19  ;;  %v5179_v47 = vmul.f32 %v1202_v6, %v1124_v62 }
 0x35a   :  { %v4461_v8 = vpop.eup %4460  ;;  %v4259_v23 = vpop.f32.mrf.mxu1 }
 0x35b   :  { %v1155_v17 = vmul.f32 0.70710677, %v1065_v43  ;;  %1264 = vadd.xlane.f32.xlu0 %v5179_v47  ;;  %v1203_v11 = vadd.f32 1.0, %v4461_v8  ;;  %v1129_v46 = vmul.f32 0.5, %v1065_v43 }
 0x35c   :  { %v1069_v13 = vpop.f32.mrf.mxu1 }
 0x35d   :  { %4468 = verf.f32 %v1155_v17  ;;  %v1070_v49 = vadd.f32 %v5139_v34, %v1069_v13  ;;  %v5183_v15 = vmul.f32 %v1203_v11, %v1125_v56 }
 0x35e   :  { %v4463_v1 = vpop.eup %4462  ;;  %v4262_v21 = vpop.f32.mrf.mxu1 }
 0x35f   :  { %v1156_v61 = vmul.f32 0.70710677, %v1070_v49  ;;  %1266 = vadd.xlane.f32.xlu1 %v5183_v15  ;;  %v1204_v53 = vadd.f32 1.0, %v4463_v1  ;;  %v1130_v55 = vmul.f32 0.5, %v1070_v49 }
 0x360   :  { %v1072_v28 = vpop.f32.mrf.mxu1 }
 0x361   :  { %4470 = verf.f32 %v1156_v61  ;;  %v1073_v33 = vadd.f32 %v5139_v34, %v1072_v28  ;;  %v5187_v29 = vmul.f32 %v1204_v53, %v1126_v31 }
 0x362   :  { %v4465_v20 = vpop.eup %4464  ;;  %v4263_v9 = vpop.f32.mrf.mxu1 }
 0x363   :  { %v1157_v7 = vmul.f32 0.70710677, %v1073_v33  ;;  %1268 = vadd.xlane.f32.xlu0 %v5187_v29  ;;  %v1205_v16 = vadd.f32 1.0, %v4465_v20  ;;  %v1131_v2 = vmul.f32 0.5, %v1073_v33 }
 0x364   :  { %v1077_v37 = vpop.f32.mrf.mxu1 }
 0x365   :  { %4472 = verf.f32 %v1157_v7  ;;  %v1078_v57 = vadd.f32 %v5139_v34, %v1077_v37  ;;  %v5191_v63 = vmul.f32 %v1205_v16, %v1127_v32 }
 0x366   :  { %v4467_v26 = vpop.eup %4466  ;;  %v4266_v40 = vpop.f32.mrf.mxu1 }
 0x367   :  { %v1158_v38 = vmul.f32 0.70710677, %v1078_v57  ;;  %1270 = vadd.xlane.f32.xlu1 %v5191_v63  ;;  %v1206_v39 = vadd.f32 1.0, %v4467_v26  ;;  %v1132_v23 = vmul.f32 0.5, %v1078_v57 }
 0x368   :  { %v1080_v41 = vpop.f32.mrf.mxu1 }
 0x369   :  { %4474 = verf.f32 %v1158_v38  ;;  %v1081_v42 = vadd.f32 %v5139_v34, %v1080_v41  ;;  %v5195_v36 = vmul.f32 %v1206_v39, %v1128_v27 }
 0x36a   :  { %v4469_v59 = vpop.eup %4468  ;;  %v4267_v12 = vpop.f32.mrf.mxu1 }
 0x36b   :  { %v1159_v0 = vmul.f32 0.70710677, %v1081_v42  ;;  %1272 = vadd.xlane.f32.xlu0 %v5195_v36  ;;  %v1207_v48 = vadd.f32 1.0, %v4469_v59  ;;  %v1133_v13 = vmul.f32 0.5, %v1081_v42 }
 0x36c   :  { %v1085_v50 = vpop.f32.mrf.mxu1 }
 0x36d   :  { %4476 = verf.f32 %v1159_v0  ;;  %v1086_v18 = vadd.f32 %v5139_v34, %v1085_v50  ;;  %v5199_v52 = vmul.f32 %v1207_v48, %v1129_v46 }
 0x36e   :  { %v4471_v10 = vpop.eup %4470  ;;  %v4270_v45 = vpop.f32.mrf.mxu1 }
 0x36f   :  { %v1160_v44 = vmul.f32 0.70710677, %v1086_v18  ;;  %1274 = vadd.xlane.f32.xlu1 %v5199_v52  ;;  %v1208_v54 = vadd.f32 1.0, %v4471_v10  ;;  %v1134_v31 = vmul.f32 0.5, %v1086_v18 }
 0x370   :  { %v1088_v24 = vpop.f32.mrf.mxu1 }
 0x371   :  { %4478 = verf.f32 %v1160_v44  ;;  %v1089_v58 = vadd.f32 %v5139_v34, %v1088_v24  ;;  %v5203_v35 = vmul.f32 %v1208_v54, %v1130_v55 }
 0x372   :  { %v4473_v4 = vpop.eup %4472  ;;  %v4271_v62 = vpop.f32.mrf.mxu1 }
 0x373   :  { %v1161_v6 = vmul.f32 0.70710677, %v1089_v58  ;;  %1276 = vadd.xlane.f32.xlu0 %v5203_v35  ;;  %v1209_v19 = vadd.f32 1.0, %v4473_v4  ;;  %v1135_v33 = vmul.f32 0.5, %v1089_v58 }
 0x375   :  { %4480 = verf.f32 %v1161_v6  ;;  %v5206_v43 = vmul.f32 %v1209_v19, %v1131_v2 }
 0x376   :  { %v4475_v8 = vpop.eup %4474 }
 0x377   :  { %1278 = vadd.xlane.f32.xlu1 %v5206_v43  ;;  %v1210_v56 = vadd.f32 1.0, %v4475_v8 }
 0x379   :  { %v5209_v17 = vmul.f32 %v1210_v56, %v1132_v23 }
 0x37a   :  { %v4477_v11 = vpop.eup %4476 }
 0x37b   :  { %1280 = vadd.xlane.f32.xlu0 %v5209_v17  ;;  %v1211_v49 = vadd.f32 1.0, %v4477_v11 }
 0x37d   :  { %v5212_v1 = vmul.f32 %v1211_v49, %v1133_v13 }
 0x37e   :  { %v4479_v21 = vpop.eup %4478 }
 0x37f   :  { %1282 = vadd.xlane.f32.xlu1 %v5212_v1  ;;  %v1212_v61 = vadd.f32 1.0, %v4479_v21 }
 0x381   :  { %v5215_v53 = vmul.f32 %v1212_v61, %v1134_v31 }
 0x382   :  { %v4481_v28 = vpop.eup %4480 }
 0x383   :  { %1284 = vadd.xlane.f32.xlu0 %v5215_v53  ;;  %v1213_v20 = vadd.f32 1.0, %v4481_v28 }
 0x385   :  { %v5218_v9 = vmul.f32 %v1213_v20, %v1135_v33 }
 0x387   :  { %1286 = vadd.xlane.f32.xlu1 %v5218_v9 }
 0x3b7   :  { %v1093_v32 = vpop.f32.mrf.mxu1 }
 0x3b8   :  { %v1094_v7 = vadd.f32 %v5139_v34, %v1093_v32 }
 0x3b9   :  { %v4274_v16 = vpop.f32.mrf.mxu1 }
 0x3ba   :  { %v1162_v37 = vmul.f32 0.70710677, %v1094_v7  ;;  %v1136_v4 = vmul.f32 0.5, %v1094_v7 }
 0x3bb   :  { %v1096_v57 = vpop.f32.mrf.mxu1 }
 0x3bc   :  { %4482 = verf.f32 %v1162_v37  ;;  %v1097_v26 = vadd.f32 %v5139_v34, %v1096_v57 }
 0x3bd   :  { %v4275_v40 = vpop.f32.mrf.mxu1 }
 0x3be   :  { %v1163_v27 = vmul.f32 0.70710677, %v1097_v26  ;;  %v1137_v21 = vmul.f32 0.5, %v1097_v26 }
 0x3bf   :  { %v1101_v38 = vpop.f32.mrf.mxu1 }
 0x3c0   :  { %4484 = verf.f32 %v1163_v27  ;;  %v1102_v39 = vadd.f32 %v5139_v34, %v1101_v38 }
 0x3c1   :  { %v4278_v41 = vpop.f32.mrf.mxu1 }
 0x3c2   :  { %v1164_v42 = vmul.f32 0.70710677, %v1102_v39  ;;  %v1138_v7 = vmul.f32 0.5, %v1102_v39 }
 0x3c3   :  { %v1104_v59 = vpop.f32.mrf.mxu1 }
 0x3c4   :  { %4486 = verf.f32 %v1164_v42  ;;  %v1249_v12 = vpop.xlane.xlu0 %1248  ;;  %v1105_v46 = vadd.f32 %v5139_v34, %v1104_v59 }
 0x3c5   :  { %v1300_v0 = vmul.f32 0.0078125, %v1249_v12  ;;  %v4279_v48 = vpop.f32.mrf.mxu1 }
 0x3c6   :  { %v1165_v50 = vmul.f32 0.70710677, %v1105_v46  ;;  %v1139_v38 = vmul.f32 0.5, %v1105_v46  ;;  %v1810_v48 = vld [vmem:[#allocation9 + $0x1c0] sm:$0xff] }
 0x3c7   :  { %v5226_v18 = vsub.f32 %v5147_v30, %v1300_v0  ;;  %v1109_v10 = vpop.f32.mrf.mxu1 }
 0x3c8   :  { %4488 = verf.f32 %v1165_v50  ;;  %v1110_v45 = vadd.f32 %v5139_v34, %v1109_v10  ;;  %v1251_v55 = vpop.xlane.xlu1 %1250  ;;  %v1814_v50 = vld [vmem:[#allocation9 + $0x1e0] sm:$0xff]  ;;  %v1811_v10 = vld [vmem:[#allocation9 + $0x1c8] sm:$0xff] }
 0x3c9   :  { %v4483_v44 = vpop.eup %4482  ;;  %v1301_v54 = vmul.f32 0.0078125, %v1251_v55  ;;  %v4282_v24 = vpop.f32.mrf.mxu1  ;;  %v1352_v58 = vmul.f32 %v5226_v18, %v5226_v18 }
 0x3ca   :  { %v1166_v62 = vmul.f32 0.70710677, %v1110_v45  ;;  %v1214_v2 = vadd.f32 1.0, %v4483_v44  ;;  %v1140_v55 = vmul.f32 0.5, %v1110_v45  ;;  %v3788_v44 = vcombine.high %v1810_v48, %v1814_v50 }
 0x3cb   :  { %v5232_v6 = vsub.f32 %v5151_v14, %v1301_v54  ;;  %1378 = vadd.xlane.f32.xlu0 %v1352_v58  ;;  %v1112_v30 = vpop.f32.mrf.mxu1  ;;  %v1815_v54 = vld [vmem:[#allocation9 + $0x1e8] sm:$0xff]  ;;  %v3787_v24 = vcombine.low %v1810_v48, %v1814_v50  ;;  %v1786_v50 = vld [vmem:[#allocation9 + $0x100] sm:$0xff] }
 0x3cc   :  { %4490 = verf.f32 %v1166_v62  ;;  %v1253_v19 = vpop.xlane.xlu0 %1252  ;;  %v1113_v8 = vadd.f32 %v5139_v34, %v1112_v30  ;;  %v5235_v23 = vmul.f32 %v1214_v2, %v1136_v4  ;;  %2258 = vmatprep.subr.bf16.mxu0 %v3788_v44  ;;  %v3789_v62 = vcombine.low %v1811_v10, %v1815_v54 }
 0x3cd   :  { %v4485_v56 = vpop.eup %4484  ;;  %v1302_v11 = vmul.f32 0.0078125, %v1253_v19  ;;  %v4283_v13 = vpop.f32.mrf.mxu1  ;;  %v1353_v49 = vmul.f32 %v5232_v6, %v5232_v6  ;;  %v3790_v2 = vcombine.high %v1811_v10, %v1815_v54  ;;  %2259 = vmatpush1.bf16.msra.mxu0 %v3787_v24  ;;  %v1790_v10 = vld [vmem:[#allocation9 + $0x120] sm:$0xff] }
 0x3ce   :  { %v1167_v31 = vmul.f32 0.70710677, %v1113_v8  ;;  %v1215_v61 = vadd.f32 1.0, %v4485_v56  ;;  %v1802_v56 = vld [vmem:[#allocation9 + $0x180] sm:$0xff]  ;;  %v1141_v13 = vmul.f32 0.5, %v1113_v8  ;;  %v3763_v54 = vcombine.low %v1786_v50, %v1790_v10 }
 0x3cf   :  { %v5240_v14 = vsub.f32 %v5155_v25, %v1302_v11  ;;  %1288 = vadd.xlane.f32.xlu0 %v5235_v23  ;;  %1380 = vadd.xlane.f32.xlu1 %v1353_v49  ;;  %v1806_v11 = vld [vmem:[#allocation9 + $0x1a0] sm:$0xff] }
 0x3d0   :  { %4492 = verf.f32 %v1167_v31  ;;  %v1255_v28 = vpop.xlane.xlu1 %1254  ;;  %v5243_v34 = vmul.f32 %v1215_v61, %v1137_v21  ;;  %2421 = vmatprep.subr.bf16.mxu1 %v3790_v2  ;;  %v3780_v21 = vcombine.high %v1802_v56, %v1806_v11  ;;  %v1807_v31 = vld [vmem:[#allocation9 + $0x1a8] sm:$0xff] }
 0x3d1   :  { %v4487_v33 = vpop.eup %4486  ;;  %v1303_v20 = vmul.f32 0.0078125, %v1255_v28  ;;  %v1354_v32 = vmul.f32 %v5240_v14, %v5240_v14  ;;  %v3779_v28 = vcombine.low %v1802_v56, %v1806_v11  ;;  %2422 = vmatpush1.bf16.msra.mxu1 %v3789_v62  ;;  %v1779_v56 = vld [vmem:[#allocation9 + $0xc8] sm:$0xff] }
 0x3d2   :  { %v1216_v16 = vadd.f32 1.0, %v4487_v33  ;;  %2260 = vmatprep.subr.bf16.mxu0 %v3780_v21 }
 0x3d3   :  { %v5248_v37 = vsub.f32 %v5159_v60, %v1303_v20  ;;  %1382 = vadd.xlane.f32.xlu0 %v1354_v32  ;;  %1290 = vadd.xlane.f32.xlu1 %v5243_v34 }
 0x3d4   :  { %v1257_v25 = vpop.xlane.xlu0 %1256  ;;  %v5251_v57 = vmul.f32 %v1216_v16, %v1138_v7  ;;  %2261 = vmatpush1.bf16.msra.mxu0 %v3779_v28 }
 0x3d5   :  { %v4489_v26 = vpop.eup %4488  ;;  %v1304_v40 = vmul.f32 0.0078125, %v1257_v25  ;;  %v1355_v27 = vmul.f32 %v5248_v37, %v5248_v37  ;;  %v1794_v25 = vld [vmem:[#allocation9 + $0x140] sm:$0xff] }
 0x3d6   :  { %v1217_v41 = vadd.f32 1.0, %v4489_v26  ;;  %v1798_v26 = vld [vmem:[#allocation9 + $0x160] sm:$0xff] }
 0x3d7   :  { %v5256_v42 = vsub.f32 %v5163_v5, %v1304_v40  ;;  %1292 = vadd.xlane.f32.xlu0 %v5251_v57  ;;  %1384 = vadd.xlane.f32.xlu1 %v1355_v27  ;;  %v3772_v40 = vcombine.high %v1794_v25, %v1798_v26  ;;  %v1799_v27 = vld [vmem:[#allocation9 + $0x168] sm:$0xff] }
 0x3d8   :  { %v1259_v60 = vpop.xlane.xlu1 %1258  ;;  %v5259_v39 = vmul.f32 %v1217_v41, %v1139_v38  ;;  %v3771_v41 = vcombine.low %v1794_v25, %v1798_v26  ;;  %v1775_v25 = vld [vmem:[#allocation9 + $0xa8] sm:$0xff] }
 0x3d9   :  { %v4491_v59 = vpop.eup %4490  ;;  %v1305_v12 = vmul.f32 0.0078125, %v1259_v60  ;;  %v1356_v0 = vmul.f32 %v5256_v42, %v5256_v42  ;;  %2262 = vmatprep.subr.bf16.mxu0 %v3772_v40 }
 0x3da   :  { %v1218_v46 = vadd.f32 1.0, %v4491_v59  ;;  %2263 = vmatpush1.bf16.msra.mxu0 %v3771_v41 }
 0x3db   :  { %v5264_v5 = vsub.f32 %v5167_v3, %v1305_v12  ;;  %1386 = vadd.xlane.f32.xlu0 %v1356_v0  ;;  %1294 = vadd.xlane.f32.xlu1 %v5259_v39  ;;  %v1803_v3 = vld [vmem:[#allocation9 + $0x188] sm:$0xff] }
 0x3dc   :  { %v1261_v58 = vpop.xlane.xlu0 %1260  ;;  %v5267_v4 = vmul.f32 %v1218_v46, %v1140_v55  ;;  %v3781_v32 = vcombine.low %v1803_v3, %v1807_v31  ;;  %v3782_v7 = vcombine.high %v1803_v3, %v1807_v31  ;;  %v1787_v55 = vld [vmem:[#allocation9 + $0x108] sm:$0xff] }
 0x3dd   :  { %v4493_v30 = vpop.eup %4492  ;;  %v1306_v19 = vmul.f32 0.0078125, %v1261_v58  ;;  %v1357_v45 = vmul.f32 %v5264_v5, %v5264_v5  ;;  %v1791_v46 = vld [vmem:[#allocation9 + $0x128] sm:$0xff] }
 0x3de   :  { %v1219_v49 = vadd.f32 1.0, %v4493_v30  ;;  %2423 = vmatprep.subr.bf16.mxu1 %v3782_v7  ;;  %v3766_v24 = vcombine.high %v1787_v55, %v1791_v46  ;;  %v3765_v62 = vcombine.low %v1787_v55, %v1791_v46  ;;  %v1783_v3 = vld [vmem:[#allocation9 + $0xe8] sm:$0xff]  ;;  %v1774_v7 = vld [vmem:[#allocation9 + $0xa0] sm:$0xff] }
 0x3df   :  { %v5272_v61 = vsub.f32 %v5171_v51, %v1306_v19  ;;  %1296 = vadd.xlane.f32.xlu0 %v5267_v4  ;;  %1388 = vadd.xlane.f32.xlu1 %v1357_v45  ;;  %v1795_v51 = vld [vmem:[#allocation9 + $0x148] sm:$0xff]  ;;  %v1778_v19 = vld [vmem:[#allocation9 + $0xc0] sm:$0xff]  ;;  %v3757_v21 = vcombine.low %v1779_v56, %v1783_v3  ;;  %v3758_v31 = vcombine.high %v1779_v56, %v1783_v3 }
 0x3e0   :  { %v1263_v33 = vpop.xlane.xlu1 %1262  ;;  %v5275_v20 = vmul.f32 %v1219_v49, %v1141_v13  ;;  %2424 = vmatpush1.bf16.msra.mxu1 %v3781_v32  ;;  %v3773_v59 = vcombine.low %v1795_v51, %v1799_v27  ;;  %v3774_v12 = vcombine.high %v1795_v51, %v1799_v27  ;;  %v1782_v45 = vld [vmem:[#allocation9 + $0xe0] sm:$0xff] }
 0x3e1   :  { %v1307_v16 = vmul.f32 0.0078125, %v1263_v33  ;;  %v1358_v8 = vmul.f32 %v5272_v61, %v5272_v61  ;;  %v3755_v49 = vcombine.low %v1778_v19, %v1782_v45  ;;  %v1770_v32 = vld [vmem:[#allocation9 + $0x80] sm:$0xff] }
 0x3e2   :  { %2425 = vmatprep.subr.bf16.mxu1 %v3774_v12  ;;  %v3747_v51 = vcombine.low %v1770_v32, %v1774_v7  ;;  %v1766_v12 = vld [vmem:[#allocation9 + $0x60] sm:$0xff] }
 0x3e3   :  { %v5280_v38 = vsub.f32 %v5175_v22, %v1307_v16  ;;  %1390 = vadd.xlane.f32.xlu0 %v1358_v8  ;;  %1298 = vadd.xlane.f32.xlu1 %v5275_v20  ;;  %v3764_v22 = vcombine.high %v1786_v50, %v1790_v10  ;;  %v1771_v16 = vld [vmem:[#allocation9 + $0x88] sm:$0xff]  ;;  %v3748_v8 = vcombine.high %v1770_v32, %v1774_v7 }
 0x3e4   :  { %v1265_v60 = vpop.xlane.xlu0 %1264  ;;  %2426 = vmatpush1.bf16.msra.mxu1 %v3773_v59  ;;  %v3749_v40 = vcombine.low %v1771_v16, %v1775_v25  ;;  %v3750_v27 = vcombine.high %v1771_v16, %v1775_v25  ;;  %v1762_v59 = vld [vmem:[#allocation9 + $0x40] sm:$0xff]  ;;  %v1767_v50 = vld [vmem:[#allocation9 + $0x68] sm:$0xff] }
 0x3e5   :  { %v1308_v0 = vmul.f32 0.0078125, %v1265_v60  ;;  %v1359_v48 = vmul.f32 %v5280_v38, %v5280_v38  ;;  %2264 = vmatprep.subr.bf16.mxu0 %v3764_v22  ;;  %2427 = vmatprep.subr.bf16.mxu1 %v3766_v24  ;;  %v3739_v55 = vcombine.low %v1762_v59, %v1766_v12 }
 0x3e6   :  { %2265 = vmatpush1.bf16.msra.mxu0 %v3763_v54 }
 0x3e7   :  { %v5286_v44 = vsub.f32 %v5179_v47, %v1308_v0  ;;  %1392 = vadd.xlane.f32.xlu1 %v1359_v48  ;;  %v3756_v47 = vcombine.high %v1778_v19, %v1782_v45  ;;  %v1763_v0 = vld [vmem:[#allocation9 + $0x48] sm:$0xff]  ;;  %v3740_v48 = vcombine.high %v1762_v59, %v1766_v12 }
 0x3e8   :  { %v1267_v58 = vpop.xlane.xlu1 %1266  ;;  %2428 = vmatpush1.bf16.msra.mxu1 %v3765_v62  ;;  %v3741_v22 = vcombine.low %v1763_v0, %v1767_v50  ;;  %v3742_v46 = vcombine.high %v1763_v0, %v1767_v50  ;;  %v1758_v62 = vld [vmem:[#allocation9 + $0x20] sm:$0xff]  ;;  %v1759_v19 = vld [vmem:[#allocation9 + $0x28] sm:$0xff] }
 0x3e9   :  { %v1309_v2 = vmul.f32 0.0078125, %v1267_v58  ;;  %v1360_v30 = vmul.f32 %v5286_v44, %v5286_v44  ;;  %2266 = vmatprep.subr.bf16.mxu0 %v3756_v47  ;;  %2429 = vmatprep.subr.bf16.mxu1 %v3758_v31  ;;  %v1754_v58 = vld [vmem:[#allocation9] sm:$0xff]  ;;  %v4664_v31 = vmov 0  }
 0x3ea   :  { %2267 = vmatpush1.bf16.msra.mxu0 %v3755_v49  ;;  %v3731_v56 = vcombine.low %v1754_v58, %v1758_v62  ;;  %2290 = vmatprep.mubr.bf16.mxu0 %v4664_v31 }
 0x3eb   :  { %v5291_v11 = vsub.f32 %v5183_v15, %v1309_v2  ;;  %1394 = vadd.xlane.f32.xlu0 %v1360_v30  ;;  %2268 = vmatprep.subr.bf16.mxu0 %v3748_v8  ;;  %v1755_v2 = vld [vmem:[#allocation9 + $0x8] sm:$0xff]  ;;  %v3732_v30 = vcombine.high %v1754_v58, %v1758_v62 }
 0x3ec   :  { %v1269_v13 = vpop.xlane.xlu0 %1268  ;;  %2430 = vmatpush1.bf16.msra.mxu1 %v3757_v21  ;;  %v3733_v47 = vcombine.low %v1755_v2, %v1759_v19  ;;  %v3734_v3 = vcombine.high %v1755_v2, %v1759_v19  ;;  %2453 = vmatprep.mubr.bf16.mxu1 %v4664_v31 }
 0x3ed   :  { %v1310_v28 = vmul.f32 0.0078125, %v1269_v13  ;;  %v1361_v33 = vmul.f32 %v5291_v11, %v5291_v11  ;;  %2431 = vmatprep.subr.bf16.mxu1 %v3750_v27 }
 0x3ee   :  { %2269 = vmatpush1.bf16.msra.mxu0 %v3747_v51 }
 0x3ef   :  { %v5296_v15 = vsub.f32 %v5187_v29, %v1310_v28  ;;  %1396 = vadd.xlane.f32.xlu1 %v1361_v33  ;;  %2270 = vmatprep.subr.bf16.mxu0 %v3740_v48 }
 0x3f0   :  { %v1271_v26 = vpop.xlane.xlu1 %1270  ;;  %2432 = vmatpush1.bf16.msra.mxu1 %v3749_v40 }
 0x3f1   :  { %v1311_v41 = vmul.f32 0.0078125, %v1271_v26  ;;  %v1362_v60 = vmul.f32 %v5296_v15, %v5296_v15  ;;  %2433 = vmatprep.subr.bf16.mxu1 %v3742_v46 }
 0x3f2   :  { %2271 = vmatpush1.bf16.msra.mxu0 %v3739_v55  ;;  %v5347_v55 = vld [vmem:[#allocation9 + $0x1d0] sm:$0xff] }
 0x3f3   :  { %v5301_v29 = vsub.f32 %v5191_v63, %v1311_v41  ;;  %1398 = vadd.xlane.f32.xlu0 %v1362_v60  ;;  %2272 = vmatprep.subr.bf16.mxu0 %v3732_v30 }
 0x3f4   :  { %v1273_v10 = vpop.xlane.xlu0 %1272  ;;  %2434 = vmatpush1.bf16.msra.mxu1 %v3741_v22  ;;  %v5349_v22 = vld [vmem:[#allocation9 + $0x1f0] sm:$0xff] }
 0x3f5   :  { %v1312_v54 = vmul.f32 0.0078125, %v1273_v10  ;;  %v1363_v24 = vmul.f32 %v5301_v29, %v5301_v29  ;;  %2435 = vmatprep.subr.bf16.mxu1 %v3734_v3  ;;  %v3792_v46 = vcombine.high %v5347_v55, %v5349_v22 }
 0x3f6   :  { %2273 = vmatpush1.bf16.msra.mxu0 %v3731_v56 }
 0x3f7   :  { %v5306_v63 = vsub.f32 %v5195_v36, %v1312_v54  ;;  %1400 = vadd.xlane.f32.xlu1 %v1363_v24  ;;  %v5355_v54 = vld [vmem:[#allocation9 + $0x1f8] sm:$0xff]  ;;  %2584 = vmatprep.subr.bf16.mxu0 %v3792_v46 }
 0x3f8   :  { %v1275_v45 = vpop.xlane.xlu1 %1274  ;;  %2436 = vmatpush1.bf16.msra.mxu1 %v3733_v47 }
 0x3f9   :  { %v1313_v13 = vmul.f32 0.0078125, %v1275_v45  ;;  %v1364_v49 = vmul.f32 %v5306_v63, %v5306_v63 }
 0x3fb   :  { %v5311_v21 = vsub.f32 %v5199_v52, %v1313_v13  ;;  %1402 = vadd.xlane.f32.xlu0 %v1364_v49 }
 0x3fc   :  { %v1277_v36 = vpop.xlane.xlu0 %1276 }
 0x3fd   :  { %v1314_v28 = vmul.f32 0.0078125, %v1277_v36  ;;  %v1365_v33 = vmul.f32 %v5311_v21, %v5311_v21 }
 0x3ff   :  { %v5318_v32 = vsub.f32 %v5203_v35, %v1314_v28  ;;  %1404 = vadd.xlane.f32.xlu1 %v1365_v33 }
 0x400   :  { %v1279_v7 = vpop.xlane.xlu1 %1278 }
 0x401   :  { %v1315_v16 = vmul.f32 0.0078125, %v1279_v7  ;;  %v1366_v52 = vmul.f32 %v5318_v32, %v5318_v32 }
 0x403   :  { %v5323_v8 = vsub.f32 %v5206_v43, %v1315_v16  ;;  %1406 = vadd.xlane.f32.xlu0 %v1366_v52 }
 0x404   :  { %v1281_v25 = vpop.xlane.xlu0 %1280 }
 0x405   :  { %v1316_v26 = vmul.f32 0.0078125, %v1281_v25  ;;  %v1367_v51 = vmul.f32 %v5323_v8, %v5323_v8 }
 0x407   :  { %v5328_v40 = vsub.f32 %v5209_v17, %v1316_v26  ;;  %1408 = vadd.xlane.f32.xlu1 %v1367_v51 }
 0x408   :  { %v1283_v35 = vpop.xlane.xlu1 %1282 }
 0x409   :  { %v1317_v27 = vmul.f32 0.0078125, %v1283_v35  ;;  %v1368_v41 = vmul.f32 %v5328_v40, %v5328_v40 }
 0x40b   :  { %v5333_v60 = vsub.f32 %v5212_v1, %v1317_v27  ;;  %1410 = vadd.xlane.f32.xlu0 %v1368_v41 }
 0x40c   :  { %v1285_v43 = vpop.xlane.xlu0 %1284 }
 0x40d   :  { %v1318_v59 = vmul.f32 0.0078125, %v1285_v43  ;;  %v1369_v12 = vmul.f32 %v5333_v60, %v5333_v60 }
 0x40f   :  { %v5338_v0 = vsub.f32 %v5215_v53, %v1318_v59  ;;  %1412 = vadd.xlane.f32.xlu1 %v1369_v12  ;;  %v5351_v53 = vld [vmem:[#allocation9 + $0x1d8] sm:$0xff] }
 0x410   :  { %v1287_v17 = vpop.xlane.xlu1 %1286 }
 0x411   :  { %v1319_v48 = vmul.f32 0.0078125, %v1287_v17  ;;  %v1370_v50 = vmul.f32 %v5338_v0, %v5338_v0  ;;  %v5377_v17 = vld [vmem:[%s5873_s7] ss:$0 sm:$0xff] }
 0x413   :  { %v5343_v10 = vsub.f32 %v5218_v9, %v1319_v48  ;;  %1414 = vadd.xlane.f32.xlu0 %v1370_v50  ;;  %v3794_v9 = vcombine.high %v5351_v53, %v5355_v54 }
 0x415   :  { %v1371_v1 = vmul.f32 %v5343_v10, %v5343_v10  ;;  %2747 = vmatprep.subr.bf16.mxu1 %v3794_v9 }
 0x417   :  { %1416 = vadd.xlane.f32.xlu1 %v1371_v1 }
 0x454   :  { %v1379_v24 = vpop.xlane.xlu0 %1378 }
 0x455   :  { %v1430_v58 = vmul.f32 0.0078125, %v1379_v24 }
 0x457   :  { %v1456_v62 = vadd.f32 1e-12, %v1430_v58 }
 0x458   :  { %v1289_v2 = vpop.xlane.xlu0 %1288  ;;  %v1381_v30 = vpop.xlane.xlu1 %1380 }
 0x459   :  { %4494 = vrsqrt.f32 %v1456_v62  ;;  %v1320_v19 = vmul.f32 0.0078125, %v1289_v2  ;;  %v1431_v45 = vmul.f32 0.0078125, %v1381_v30 }
 0x45b   :  { %v5360_v56 = vsub.f32 %v5235_v23, %v1320_v19  ;;  %v1457_v47 = vadd.f32 1e-12, %v1431_v45 }
 0x45c   :  { %v1383_v3 = vpop.xlane.xlu0 %1382  ;;  %v1291_v13 = vpop.xlane.xlu1 %1290 }
 0x45d   :  { %4496 = vrsqrt.f32 %v1457_v47  ;;  %v1432_v49 = vmul.f32 0.0078125, %v1383_v3  ;;  %v1321_v36 = vmul.f32 0.0078125, %v1291_v13  ;;  %v1372_v28 = vmul.f32 %v5360_v56, %v5360_v56 }
 0x45f   :  { %v1458_v33 = vadd.f32 1e-12, %v1432_v49  ;;  %v5365_v7 = vsub.f32 %v5243_v34, %v1321_v36  ;;  %1418 = vadd.xlane.f32.xlu0 %v1372_v28 }
 0x460   :  { %v1293_v16 = vpop.xlane.xlu0 %1292  ;;  %v1385_v52 = vpop.xlane.xlu1 %1384 }
 0x461   :  { %4498 = vrsqrt.f32 %v1458_v33  ;;  %v1322_v25 = vmul.f32 0.0078125, %v1293_v16  ;;  %v1433_v23 = vmul.f32 0.0078125, %v1385_v52  ;;  %v1373_v26 = vmul.f32 %v5365_v7, %v5365_v7 }
 0x463   :  { %v5370_v51 = vsub.f32 %v5251_v57, %v1322_v25  ;;  %v1459_v35 = vadd.f32 1e-12, %v1433_v23  ;;  %1420 = vadd.xlane.f32.xlu1 %v1373_v26 }
 0x464   :  { %v1387_v27 = vpop.xlane.xlu0 %1386  ;;  %v1295_v41 = vpop.xlane.xlu1 %1294 }
 0x465   :  { %4500 = vrsqrt.f32 %v1459_v35  ;;  %v1434_v43 = vmul.f32 0.0078125, %v1387_v27  ;;  %v1323_v34 = vmul.f32 0.0078125, %v1295_v41  ;;  %v1374_v59 = vmul.f32 %v5370_v51, %v5370_v51 }
 0x466   :  { %v4495_v12 = vpop.eup %4494 }
 0x467   :  { %v1508_v48 = vmul.f32 %v4495_v12, %v5226_v18  ;;  %v1460_v57 = vadd.f32 1e-12, %v1434_v43  ;;  %v5381_v50 = vsub.f32 %v5259_v39, %v1323_v34  ;;  %1422 = vadd.xlane.f32.xlu0 %v1374_v59  ;;  %v5389_v18 = vld [vmem:[%s5874_s8] ss:$0 sm:$0xff] }
 0x468   :  { %v1297_v1 = vpop.xlane.xlu0 %1296  ;;  %v1389_v46 = vpop.xlane.xlu1 %1388 }
 0x469   :  { %4502 = vrsqrt.f32 %v1460_v57  ;;  %v1324_v9 = vmul.f32 0.0078125, %v1297_v1  ;;  %v1435_v24 = vmul.f32 0.0078125, %v1389_v46  ;;  %v1540_v62 = vmul.f32 %v5377_v17, %v1508_v48 }
 0x46a   :  { %v4497_v58 = vpop.eup %4496  ;;  %v1375_v2 = vmul.f32 %v5381_v50, %v5381_v50 }
 0x46b   :  { %v1509_v39 = vmul.f32 %v4497_v58, %v5232_v6  ;;  %v5393_v30 = vsub.f32 %v5267_v4, %v1324_v9  ;;  %v1461_v19 = vadd.f32 1e-12, %v1435_v24  ;;  %v1572_v28 = vadd.f32 %v5389_v18, %v1540_v62  ;;  %v1804_v9 = vld [vmem:[#allocation9 + $0x190] sm:$0xff]  ;;  %v1805_v62 = vld [vmem:[#allocation9 + $0x198] sm:$0xff] }
 0x46c   :  { %1424 = vadd.xlane.f32.xlu1 %v1375_v2  ;;  %v1391_v45 = vpop.xlane.xlu0 %1390  ;;  %v1299_v47 = vpop.xlane.xlu1 %1298  ;;  %v1808_v24 = vld [vmem:[#allocation9 + $0x1b0] sm:$0xff] }
 0x46d   :  { %v1541_v3 = vmul.f32 %v5377_v17, %v1509_v39  ;;  %4504 = vrsqrt.f32 %v1461_v19  ;;  %v1436_v13 = vmul.f32 0.0078125, %v1391_v45  ;;  %v1325_v49 = vmul.f32 0.0078125, %v1299_v47  ;;  %v5412_v19 = vld [vmem:[#allocation9 + $0x150] sm:$0xff] }
 0x46e   :  { %v4499_v36 = vpop.eup %4498  ;;  %v1376_v33 = vmul.f32 %v5393_v30, %v5393_v30 }
 0x46f   :  { %v1573_v6 = vadd.f32 %v5389_v18, %v1541_v3  ;;  %v1510_v4 = vmul.f32 %v4499_v36, %v5240_v14  ;;  %v1462_v16 = vadd.f32 1e-12, %v1436_v13  ;;  %v5402_v52 = vsub.f32 %v5275_v20, %v1325_v49 }
 0x470   :  { %1426 = vadd.xlane.f32.xlu0 %v1376_v33  ;;  %v1393_v25 = vpop.xlane.xlu1 %1392  ;;  %v3791_v3 = vcombine.low %v5347_v55, %v5349_v22  ;;  %v3784_v13 = vcombine.high %v1804_v9, %v1808_v24 }
 0x471   :  { %v4032_v23 = vpack.c.bf16 %v1573_v6, %v1572_v28  ;;  %4506 = vrsqrt.f32 %v1462_v16  ;;  %v1437_v26 = vmul.f32 0.0078125, %v1393_v25  ;;  %v1377_v27 = vmul.f32 %v5402_v52, %v5402_v52  ;;  %v1800_v6 = vld [vmem:[#allocation9 + $0x170] sm:$0xff]  ;;  %v1801_v16 = vld [vmem:[#allocation9 + $0x178] sm:$0xff] }
 0x472   :  { %v4501_v35 = vpop.eup %4500  ;;  %v1542_v41 = vmul.f32 %v5377_v17, %v1510_v4  ;;  %v1797_v4 = vld [vmem:[#allocation9 + $0x158] sm:$0xff] }
 0x473   :  { %4033 = vst [vmem:[#allocation2] sm:$0xff] %v4032_v23   ;;  %v1511_v43 = vmul.f32 %v4501_v35, %v5248_v37  ;;  %v1463_v34 = vadd.f32 1e-12, %v1437_v26  ;;  %1428 = vadd.xlane.f32.xlu1 %v1377_v27  ;;  %v1809_v37 = vld [vmem:[#allocation9 + $0x1b8] sm:$0xff]  ;;  %v3776_v23 = vcombine.high %v5412_v19, %v1800_v6  ;;  %v3778_v26 = vcombine.high %v1797_v4, %v1801_v16 }
 0x474   :  { %v1395_v14 = vpop.xlane.xlu0 %1394  ;;  %v1574_v48 = vadd.f32 %v5389_v18, %v1542_v41  ;;  %v3786_v33 = vcombine.high %v1805_v62, %v1809_v37 }
 0x475   :  { %v1543_v20 = vmul.f32 %v5377_v17, %v1511_v43  ;;  %4508 = vrsqrt.f32 %v1463_v34  ;;  %v1438_v59 = vmul.f32 0.0078125, %v1395_v14  ;;  %v1788_v34 = vld [vmem:[#allocation9 + $0x110] sm:$0xff] }
 0x476   :  { %v4503_v12 = vpop.eup %4502  ;;  %v1792_v14 = vld [vmem:[#allocation9 + $0x130] sm:$0xff] }
 0x477   :  { %v1575_v57 = vadd.f32 %v5389_v18, %v1543_v20  ;;  %v1512_v1 = vmul.f32 %v4503_v12, %v5256_v42  ;;  %v1464_v46 = vadd.f32 1e-12, %v1438_v59  ;;  %v3793_v42 = vcombine.low %v5351_v53, %v5355_v54  ;;  %v1789_v59 = vld [vmem:[#allocation9 + $0x118] sm:$0xff] }
 0x478   :  { %v1397_v58 = vpop.xlane.xlu1 %1396  ;;  %v3783_v53 = vcombine.low %v1804_v9, %v1808_v24  ;;  %v3785_v54 = vcombine.low %v1805_v62, %v1809_v37  ;;  %v1793_v12 = vld [vmem:[#allocation9 + $0x138] sm:$0xff]  ;;  %v3775_v9 = vcombine.low %v5412_v19, %v1800_v6  ;;  %v3777_v24 = vcombine.low %v1797_v4, %v1801_v16  ;;  %v1784_v6 = vld [vmem:[#allocation9 + $0xf0] sm:$0xff] }
 0x479   :  { %v4037_v2 = vpack.c.bf16 %v1575_v57, %v1574_v48  ;;  %4510 = vrsqrt.f32 %v1464_v46  ;;  %v1439_v39 = vmul.f32 0.0078125, %v1397_v58  ;;  %v1544_v49 = vmul.f32 %v5377_v17, %v1512_v1  ;;  %v1781_v4 = vld [vmem:[#allocation9 + $0xd8] sm:$0xff] }
 0x47a   :  { %v4505_v45 = vpop.eup %4504  ;;  %v5414_v47 = vld [vmem:[#allocation2] sm:$0xff]  }
 0x47b   :  { %4094 = vst [vmem:[#allocation2 + $0x8] sm:$0xff] %v4037_v2   ;;  %v1513_v36 = vmul.f32 %v4505_v45, %v5264_v5  ;;  %v1465_v28 = vadd.f32 1e-12, %v1439_v39  ;;  %2291 = vmatmul.mubr.bf16.vlgmr.msra.gmra.mxu0 %v5414_v47  ;;  %2454 = vmatmul.mubr.bf16.vlgmr.msra.gmra.mxu1 %v5414_v47  ;;  %v1576_v35 = vadd.f32 %v5389_v18, %v1544_v49 }
 0x47c   :  { %v1399_v25 = vpop.xlane.xlu0 %1398  ;;  %2300 = vmatprep.mubr.bf16.mxu0 %v4664_v31  ;;  %2463 = vmatprep.mubr.bf16.mxu1 %v4664_v31  ;;  %v3770_v2 = vcombine.high %v1789_v59, %v1793_v12 }
 0x47d   :  { %v1545_v55 = vmul.f32 %v5377_v17, %v1513_v36  ;;  %4512 = vrsqrt.f32 %v1465_v28  ;;  %v1440_v22 = vmul.f32 0.0078125, %v1399_v25  ;;  %2585 = vmatpush1.bf16.msra.mxu0 %v3791_v3  ;;  %2748 = vmatpush1.bf16.msra.mxu1 %v3793_v42  ;;  %v3769_v42 = vcombine.low %v1789_v59, %v1793_v12 }
 0x47e   :  { %v4507_v5 = vpop.eup %4506  ;;  %2586 = vmatprep.subr.bf16.mxu0 %v3784_v13  ;;  %2749 = vmatprep.subr.bf16.mxu1 %v3786_v33  ;;  %v1780_v33 = vld [vmem:[#allocation9 + $0xd0] sm:$0xff] }
 0x47f   :  { %v1577_v27 = vadd.f32 %v5389_v18, %v1545_v55  ;;  %v1514_v41 = vmul.f32 %v4507_v5, %v5272_v61  ;;  %v1466_v43 = vadd.f32 1e-12, %v1440_v22  ;;  %v3768_v61 = vcombine.high %v1788_v34, %v1792_v14  ;;  %v1785_v55 = vld [vmem:[#allocation9 + $0xf8] sm:$0xff] }
 0x480   :  { %v1401_v20 = vpop.xlane.xlu1 %1400  ;;  %v3760_v25 = vcombine.high %v1780_v33, %v1784_v6 }
 0x481   :  { %v4042_v48 = vpack.c.bf16 %v1577_v27, %v1576_v35  ;;  %4514 = vrsqrt.f32 %v1466_v43  ;;  %v1441_v57 = vmul.f32 0.0078125, %v1401_v20  ;;  %2587 = vmatpush1.bf16.msra.mxu0 %v3783_v53  ;;  %2750 = vmatpush1.bf16.msra.mxu1 %v3785_v54  ;;  %v1546_v58 = vmul.f32 %v5377_v17, %v1514_v41 }
 0x482   :  { %v4509_v1 = vpop.eup %4508  ;;  %v5431_v46 = vld [vmem:[#allocation2 + $0x8] sm:$0xff]   ;;  %2588 = vmatprep.subr.bf16.mxu0 %v3776_v23  ;;  %2751 = vmatprep.subr.bf16.mxu1 %v3778_v26  ;;  %v3759_v23 = vcombine.low %v1780_v33, %v1784_v6  ;;  %v3762_v26 = vcombine.high %v1781_v4, %v1785_v55  ;;  %v3761_v41 = vcombine.low %v1781_v4, %v1785_v55  ;;  %v1764_v4 = vld [vmem:[#allocation9 + $0x50] sm:$0xff] }
 0x483   :  { %4095 = vst [vmem:[#allocation2 + $0x10] sm:$0xff] %v4042_v48   ;;  %v1515_v62 = vmul.f32 %v4509_v1, %v5280_v38  ;;  %v1467_v37 = vadd.f32 1e-12, %v1441_v57  ;;  %2301 = vmatmul.mubr.bf16.gmra.mxu0 %v5431_v46  ;;  %2464 = vmatmul.mubr.bf16.gmra.mxu1 %v5431_v46  ;;  %v3767_v38 = vcombine.low %v1788_v34, %v1792_v14  ;;  %v1777_v6 = vld [vmem:[#allocation9 + $0xb8] sm:$0xff] }
 0x484   :  { %v1403_v39 = vpop.xlane.xlu0 %1402  ;;  %2310 = vmatprep.mubr.bf16.mxu0 %v4664_v31  ;;  %2473 = vmatprep.mubr.bf16.mxu1 %v4664_v31  ;;  %v1578_v13 = vadd.f32 %v5389_v18, %v1546_v58 }
 0x485   :  { %v1547_v45 = vmul.f32 %v5377_v17, %v1515_v62  ;;  %4516 = vrsqrt.f32 %v1467_v37  ;;  %v1442_v19 = vmul.f32 0.0078125, %v1403_v39  ;;  %2589 = vmatpush1.bf16.msra.mxu0 %v3775_v9  ;;  %2752 = vmatpush1.bf16.msra.mxu1 %v3777_v24 }
 0x486   :  { %v4511_v3 = vpop.eup %4510  ;;  %2590 = vmatprep.subr.bf16.mxu0 %v3768_v61  ;;  %2753 = vmatprep.subr.bf16.mxu1 %v3770_v2 }
 0x487   :  { %v1579_v49 = vadd.f32 %v5389_v18, %v1547_v45  ;;  %v1516_v36 = vmul.f32 %v4511_v3, %v5286_v44  ;;  %v1468_v28 = vadd.f32 1e-12, %v1442_v19 }
 0x488   :  { %v1405_v16 = vpop.xlane.xlu1 %1404 }
 0x489   :  { %v4047_v22 = vpack.c.bf16 %v1579_v49, %v1578_v13  ;;  %4518 = vrsqrt.f32 %v1468_v28  ;;  %v1443_v53 = vmul.f32 0.0078125, %v1405_v16  ;;  %2591 = vmatpush1.bf16.msra.mxu0 %v3767_v38  ;;  %2754 = vmatpush1.bf16.msra.mxu1 %v3769_v42  ;;  %v1548_v44 = vmul.f32 %v5377_v17, %v1516_v36  ;;  %v1772_v13 = vld [vmem:[#allocation9 + $0x90] sm:$0xff]  ;;  %v1773_v36 = vld [vmem:[#allocation9 + $0x98] sm:$0xff] }
 0x48a   :  { %v4513_v5 = vpop.eup %4512  ;;  %v5444_v54 = vld [vmem:[#allocation2 + $0x10] sm:$0xff]   ;;  %2592 = vmatprep.subr.bf16.mxu0 %v3760_v25  ;;  %2755 = vmatprep.subr.bf16.mxu1 %v3762_v26  ;;  %v1776_v49 = vld [vmem:[#allocation9 + $0xb0] sm:$0xff] }
 0x48b   :  { %4096 = vst [vmem:[#allocation2 + $0x18] sm:$0xff] %v4047_v22   ;;  %v1517_v35 = vmul.f32 %v4513_v5, %v5291_v11  ;;  %v1469_v27 = vadd.f32 1e-12, %v1443_v53  ;;  %2311 = vmatmul.mubr.bf16.gmra.mxu0 %v5444_v54  ;;  %2474 = vmatmul.mubr.bf16.gmra.mxu1 %v5444_v54  ;;  %v1580_v11 = vadd.f32 %v5389_v18, %v1548_v44  ;;  %v1768_v16 = vld [vmem:[#allocation9 + $0x70] sm:$0xff] }
 0x48c   :  { %v1407_v43 = vpop.xlane.xlu0 %1406  ;;  %2320 = vmatprep.mubr.bf16.mxu0 %v4664_v31  ;;  %2483 = vmatprep.mubr.bf16.mxu1 %v4664_v31  ;;  %v3752_v53 = vcombine.high %v1772_v13, %v1776_v49  ;;  %v3754_v5 = vcombine.high %v1773_v36, %v1777_v6  ;;  %v3751_v26 = vcombine.low %v1772_v13, %v1776_v49 }
 0x48d   :  { %v1549_v34 = vmul.f32 %v5377_v17, %v1517_v35  ;;  %4520 = vrsqrt.f32 %v1469_v27  ;;  %v1444_v14 = vmul.f32 0.0078125, %v1407_v43  ;;  %2593 = vmatpush1.bf16.msra.mxu0 %v3759_v23  ;;  %2756 = vmatpush1.bf16.msra.mxu1 %v3761_v41  ;;  %v3753_v44 = vcombine.low %v1773_v36, %v1777_v6  ;;  %v1765_v35 = vld [vmem:[#allocation9 + $0x58] sm:$0xff] }
 0x48e   :  { %v4515_v20 = vpop.eup %4514  ;;  %v1769_v27 = vld [vmem:[#allocation9 + $0x78] sm:$0xff]  ;;  %v3744_v43 = vcombine.high %v1764_v4, %v1768_v16  ;;  %2594 = vmatprep.subr.bf16.mxu0 %v3752_v53  ;;  %2757 = vmatprep.subr.bf16.mxu1 %v3754_v5 }
 0x48f   :  { %v1581_v59 = vadd.f32 %v5389_v18, %v1549_v34  ;;  %v1518_v12 = vmul.f32 %v4515_v20, %v5296_v15  ;;  %v1470_v48 = vadd.f32 1e-12, %v1444_v14  ;;  %v3746_v34 = vcombine.high %v1765_v35, %v1769_v27 }
 0x490   :  { %v1409_v57 = vpop.xlane.xlu1 %1408 }
 0x491   :  { %v4052_v1 = vpack.c.bf16 %v1581_v59, %v1580_v11  ;;  %4522 = vrsqrt.f32 %v1470_v48  ;;  %v1445_v9 = vmul.f32 0.0078125, %v1409_v57  ;;  %v1550_v58 = vmul.f32 %v5377_v17, %v1518_v12  ;;  %v1756_v12 = vld [vmem:[#allocation9 + $0x10] sm:$0xff]  ;;  %2595 = vmatpush1.bf16.msra.mxu0 %v3751_v26  ;;  %2758 = vmatpush1.bf16.msra.mxu1 %v3753_v44 }
 0x492   :  { %v4517_v24 = vpop.eup %4516  ;;  %v5456_v61 = vld [vmem:[#allocation2 + $0x18] sm:$0xff]   ;;  %v3743_v59 = vcombine.low %v1764_v4, %v1768_v16  ;;  %2596 = vmatprep.subr.bf16.mxu0 %v3744_v43  ;;  %2759 = vmatprep.subr.bf16.mxu1 %v3746_v34 }
 0x493   :  { %4097 = vst [vmem:[#allocation2 + $0x20] sm:$0xff] %v4052_v1   ;;  %v1519_v62 = vmul.f32 %v4517_v24, %v5301_v29  ;;  %v1471_v37 = vadd.f32 1e-12, %v1445_v9  ;;  %2321 = vmatmul.mubr.bf16.gmra.mxu0 %v5456_v61  ;;  %2484 = vmatmul.mubr.bf16.gmra.mxu1 %v5456_v61  ;;  %v1582_v19 = vadd.f32 %v5389_v18, %v1550_v58  ;;  %v1760_v24 = vld [vmem:[#allocation9 + $0x30] sm:$0xff]  ;;  %v1757_v58 = vld [vmem:[#allocation9 + $0x18] sm:$0xff] }
 0x494   :  { %v1411_v2 = vpop.xlane.xlu0 %1410  ;;  %2330 = vmatprep.mubr.bf16.mxu0 %v4664_v31  ;;  %2493 = vmatprep.mubr.bf16.mxu1 %v4664_v31  ;;  %v3745_v9 = vcombine.low %v1765_v35, %v1769_v27 }
 0x495   :  { %v1551_v15 = vmul.f32 %v5377_v17, %v1519_v62  ;;  %4524 = vrsqrt.f32 %v1471_v37  ;;  %v1446_v39 = vmul.f32 0.0078125, %v1411_v2  ;;  %v1761_v62 = vld [vmem:[#allocation9 + $0x38] sm:$0xff]  ;;  %2597 = vmatpush1.bf16.msra.mxu0 %v3743_v59 }
 0x496   :  { %v4519_v45 = vpop.eup %4518  ;;  %2760 = vmatpush1.bf16.msra.mxu1 %v3745_v9  ;;  %v3737_v13 = vcombine.low %v1757_v58, %v1761_v62 }
 0x497   :  { %v1583_v3 = vadd.f32 %v5389_v18, %v1551_v15  ;;  %v1520_v29 = vmul.f32 %v4519_v45, %v5306_v63  ;;  %v1472_v38 = vadd.f32 1e-12, %v1446_v39 }
 0x498   :  { %v1413_v42 = vpop.xlane.xlu1 %1412 }
 0x499   :  { %v4057_v28 = vpack.c.bf16 %v1583_v3, %v1582_v19  ;;  %4526 = vrsqrt.f32 %v1472_v38  ;;  %v1447_v33 = vmul.f32 0.0078125, %v1413_v42  ;;  %v1552_v55 = vmul.f32 %v5377_v17, %v1520_v29 }
 0x49a   :  { %v4521_v25 = vpop.eup %4520  ;;  %v5469_v22 = vld [vmem:[#allocation2 + $0x20] sm:$0xff]   ;;  %v3735_v19 = vcombine.low %v1756_v12, %v1760_v24  ;;  %v3736_v3 = vcombine.high %v1756_v12, %v1760_v24  ;;  %v3738_v29 = vcombine.high %v1757_v58, %v1761_v62 }
 0x49b   :  { %4098 = vst [vmem:[#allocation2 + $0x28] sm:$0xff] %v4057_v28   ;;  %v1521_v63 = vmul.f32 %v4521_v25, %v5311_v21  ;;  %v1473_v23 = vadd.f32 1e-12, %v1447_v33  ;;  %2331 = vmatmul.mubr.bf16.gmra.mxu0 %v5469_v22  ;;  %2494 = vmatmul.mubr.bf16.gmra.mxu1 %v5469_v22  ;;  %v1584_v11 = vadd.f32 %v5389_v18, %v1552_v55 }
 0x49c   :  { %v1415_v41 = vpop.xlane.xlu0 %1414  ;;  %2340 = vmatprep.mubr.bf16.mxu0 %v4664_v31  ;;  %2503 = vmatprep.mubr.bf16.mxu1 %v4664_v31 }
 0x49d   :  { %v1553_v14 = vmul.f32 %v5377_v17, %v1521_v63  ;;  %4528 = vrsqrt.f32 %v1473_v23  ;;  %v1448_v20 = vmul.f32 0.0078125, %v1415_v41  ;;  %2598 = vmatprep.subr.bf16.mxu0 %v3736_v3  ;;  %2761 = vmatprep.subr.bf16.mxu1 %v3738_v29 }
 0x49e   :  { %v4523_v21 = vpop.eup %4522  ;;  %2599 = vmatpush1.bf16.msra.mxu0 %v3735_v19  ;;  %2762 = vmatpush1.bf16.msra.mxu1 %v3737_v13 }
 0x49f   :  { %v1585_v48 = vadd.f32 %v5389_v18, %v1553_v14  ;;  %v1522_v57 = vmul.f32 %v4523_v21, %v5318_v32  ;;  %v1474_v1 = vadd.f32 1e-12, %v1448_v20 }
 0x4a0   :  { %v1417_v37 = vpop.xlane.xlu1 %1416 }
 0x4a1   :  { %v4062_v2 = vpack.c.bf16 %v1585_v48, %v1584_v11  ;;  %4530 = vrsqrt.f32 %v1474_v1  ;;  %v1449_v15 = vmul.f32 0.0078125, %v1417_v37  ;;  %v1554_v32 = vmul.f32 %v5377_v17, %v1522_v57 }
 0x4a2   :  { %v4525_v39 = vpop.eup %4524  ;;  %v5480_v45 = vld [vmem:[#allocation2 + $0x28] sm:$0xff]  }
 0x4a3   :  { %4099 = vst [vmem:[#allocation2 + $0x30] sm:$0xff] %v4062_v2   ;;  %v1523_v38 = vmul.f32 %v4525_v39, %v5323_v8  ;;  %v1475_v42 = vadd.f32 1e-12, %v1449_v15  ;;  %2341 = vmatmul.mubr.bf16.gmra.mxu0 %v5480_v45  ;;  %2504 = vmatmul.mubr.bf16.gmra.mxu1 %v5480_v45  ;;  %v1586_v8 = vadd.f32 %v5389_v18, %v1554_v32 }
 0x4a4   :  { %2350 = vmatprep.mubr.bf16.mxu0 %v4664_v31  ;;  %2513 = vmatprep.mubr.bf16.mxu1 %v4664_v31 }
 0x4a5   :  { %v1555_v49 = vmul.f32 %v5377_v17, %v1523_v38  ;;  %4532 = vrsqrt.f32 %v1475_v42 }
 0x4a6   :  { %v4527_v36 = vpop.eup %4526 }
 0x4a7   :  { %v1587_v28 = vadd.f32 %v5389_v18, %v1555_v49  ;;  %v1524_v33 = vmul.f32 %v4527_v36, %v5328_v40 }
 0x4a9   :  { %v4067_v6 = vpack.c.bf16 %v1587_v28, %v1586_v8  ;;  %v1556_v25 = vmul.f32 %v5377_v17, %v1524_v33 }
 0x4aa   :  { %v4529_v4 = vpop.eup %4528  ;;  %v5492_v16 = vld [vmem:[#allocation2 + $0x30] sm:$0xff]  }
 0x4ab   :  { %4100 = vst [vmem:[#allocation2 + $0x38] sm:$0xff] %v4067_v6   ;;  %v1525_v55 = vmul.f32 %v4529_v4, %v5333_v60  ;;  %2351 = vmatmul.mubr.bf16.gmra.mxu0 %v5492_v16  ;;  %2514 = vmatmul.mubr.bf16.gmra.mxu1 %v5492_v16  ;;  %v1588_v5 = vadd.f32 %v5389_v18, %v1556_v25 }
 0x4ac   :  { %2360 = vmatprep.mubr.bf16.mxu0 %v4664_v31  ;;  %2523 = vmatprep.mubr.bf16.mxu1 %v4664_v31 }
 0x4ad   :  { %v1557_v53 = vmul.f32 %v5377_v17, %v1525_v55 }
 0x4ae   :  { %v4531_v40 = vpop.eup %4530 }
 0x4af   :  { %v1589_v63 = vadd.f32 %v5389_v18, %v1557_v53  ;;  %v1526_v23 = vmul.f32 %v4531_v40, %v5338_v0 }
 0x4b1   :  { %v4072_v26 = vpack.c.bf16 %v1589_v63, %v1588_v5  ;;  %v1558_v35 = vmul.f32 %v5377_v17, %v1526_v23 }
 0x4b2   :  { %v4533_v44 = vpop.eup %4532  ;;  %v5504_v60 = vld [vmem:[#allocation2 + $0x38] sm:$0xff]  }
 0x4b3   :  { %4101 = vst [vmem:[#allocation2 + $0x40] sm:$0xff] %v4072_v26   ;;  %v1527_v27 = vmul.f32 %v4533_v44, %v5343_v10  ;;  %2361 = vmatmul.mubr.bf16.gmra.mxu0 %v5504_v60  ;;  %2524 = vmatmul.mubr.bf16.gmra.mxu1 %v5504_v60  ;;  %v1590_v0 = vadd.f32 %v5389_v18, %v1558_v35 }
 0x4b4   :  { %2370 = vmatprep.mubr.bf16.mxu0 %v4664_v31  ;;  %2533 = vmatprep.mubr.bf16.mxu1 %v4664_v31 }
 0x4b5   :  { %v1559_v41 = vmul.f32 %v5377_v17, %v1527_v27 }
 0x4b7   :  { %v1591_v43 = vadd.f32 %v5389_v18, %v1559_v41 }
 0x4b9   :  { %v4077_v34 = vpack.c.bf16 %v1591_v43, %v1590_v0 }
 0x4ba   :  { %v5515_v14 = vld [vmem:[#allocation2 + $0x40] sm:$0xff]  }
 0x4bb   :  { %4102 = vst [vmem:[#allocation2 + $0x48] sm:$0xff] %v4077_v34   ;;  %2371 = vmatmul.mubr.bf16.gmra.mxu0 %v5515_v14  ;;  %2534 = vmatmul.mubr.bf16.gmra.mxu1 %v5515_v14 }
 0x4bc   :  { %2380 = vmatprep.mubr.bf16.mxu0 %v4664_v31  ;;  %2543 = vmatprep.mubr.bf16.mxu1 %v4664_v31 }
 0x4c2   :  { %v5521_v10 = vld [vmem:[#allocation2 + $0x48] sm:$0xff]  }
 0x4c3   :  { %2381 = vmatmul.mubr.bf16.gmra.mxu0 %v5521_v10  ;;  %2544 = vmatmul.mubr.bf16.gmra.mxu1 %v5521_v10 }
 0x4c4   :  { %2390 = vmatprep.mubr.bf16.mxu0 %v4664_v31  ;;  %2553 = vmatprep.mubr.bf16.mxu1 %v4664_v31 }
 0x4e8   :  { %v1419_v20 = vpop.xlane.xlu0 %1418 }
 0x4e9   :  { %v1450_v21 = vmul.f32 0.0078125, %v1419_v20  ;;  %v5580_v20 = vld [vmem:[%s5876_s10] sm:$0xff] }
 0x4eb   :  { %v1476_v11 = vadd.f32 1e-12, %v1450_v21 }
 0x4ec   :  { %v1421_v59 = vpop.xlane.xlu1 %1420 }
 0x4ed   :  { %4534 = vrsqrt.f32 %v1476_v11  ;;  %v1451_v12 = vmul.f32 0.0078125, %v1421_v59 }
 0x4ef   :  { %v1477_v48 = vadd.f32 1e-12, %v1451_v12 }
 0x4f0   :  { %v1423_v57 = vpop.xlane.xlu0 %1422 }
 0x4f1   :  { %4536 = vrsqrt.f32 %v1477_v48  ;;  %v1452_v1 = vmul.f32 0.0078125, %v1423_v57 }
 0x4f3   :  { %v1478_v9 = vadd.f32 1e-12, %v1452_v1 }
 0x4f5   :  { %4538 = vrsqrt.f32 %v1478_v9  ;;  %v1425_v24 = vpop.xlane.xlu1 %1424 }
 0x4f6   :  { %v1453_v58 = vmul.f32 0.0078125, %v1425_v24 }
 0x4f8   :  { %v1479_v62 = vadd.f32 1e-12, %v1453_v58 }
 0x4f9   :  { %v1427_v37 = vpop.xlane.xlu0 %1426 }
 0x4fa   :  { %v4535_v2 = vpop.eup %4534  ;;  %4540 = vrsqrt.f32 %v1479_v62  ;;  %v1454_v15 = vmul.f32 0.0078125, %v1427_v37 }
 0x4fb   :  { %v1528_v39 = vmul.f32 %v4535_v2, %v5360_v56 }
 0x4fc   :  { %v1480_v19 = vadd.f32 1e-12, %v1454_v15  ;;  %v1429_v3 = vpop.xlane.xlu1 %1428 }
 0x4fd   :  { %v1455_v32 = vmul.f32 0.0078125, %v1429_v3  ;;  %v1560_v38 = vmul.f32 %v5377_v17, %v1528_v39 }
 0x4fe   :  { %v4537_v29 = vpop.eup %4536  ;;  %4542 = vrsqrt.f32 %v1480_v19 }
 0x4ff   :  { %v1529_v42 = vmul.f32 %v4537_v29, %v5365_v7  ;;  %v1481_v13 = vadd.f32 1e-12, %v1455_v32  ;;  %v1592_v8 = vadd.f32 %v5389_v18, %v1560_v38 }
 0x501   :  { %v1561_v49 = vmul.f32 %v5377_v17, %v1529_v42  ;;  %4544 = vrsqrt.f32 %v1481_v13 }
 0x502   :  { %v4539_v36 = vpop.eup %4538 }
 0x503   :  { %v1593_v28 = vadd.f32 %v5389_v18, %v1561_v49  ;;  %v1530_v56 = vmul.f32 %v4539_v36, %v5370_v51 }
 0x505   :  { %v4082_v33 = vpack.c.bf16 %v1593_v28, %v1592_v8  ;;  %v1562_v4 = vmul.f32 %v5377_v17, %v1530_v56 }
 0x507   :  { %v4541_v6 = vpop.eup %4540  ;;  %4103 = vst [vmem:[#allocation2 + $0x50] sm:$0xff] %v4082_v33   ;;  %v1594_v53 = vadd.f32 %v5389_v18, %v1562_v4 }
 0x508   :  { %v1531_v25 = vmul.f32 %v4541_v6, %v5381_v50 }
 0x50a   :  { %v1563_v7 = vmul.f32 %v5377_v17, %v1531_v25 }
 0x50b   :  { %v4543_v55 = vpop.eup %4542 }
 0x50c   :  { %v1595_v40 = vadd.f32 %v5389_v18, %v1563_v7  ;;  %v1532_v5 = vmul.f32 %v4543_v55, %v5393_v30 }
 0x50e   :  { %v4087_v63 = vpack.c.bf16 %v1595_v40, %v1594_v53  ;;  %v5540_v23 = vld [vmem:[#allocation2 + $0x50] sm:$0xff]   ;;  %v4545_v51 = vpop.eup %4544  ;;  %v1564_v26 = vmul.f32 %v5377_v17, %v1532_v5 }
 0x50f   :  { %v1533_v44 = vmul.f32 %v4545_v51, %v5402_v52  ;;  %2391 = vmatmul.mubr.bf16.gmra.mxu0 %v5540_v23  ;;  %2554 = vmatmul.mubr.bf16.gmra.mxu1 %v5540_v23 }
 0x510   :  { %4104 = vst [vmem:[#allocation2 + $0x58] sm:$0xff] %v4087_v63   ;;  %2400 = vmatprep.mubr.bf16.mxu0 %v4664_v31  ;;  %2563 = vmatprep.mubr.bf16.mxu1 %v4664_v31  ;;  %v1596_v30 = vadd.f32 %v5389_v18, %v1564_v26 }
 0x511   :  { %v1565_v50 = vmul.f32 %v5377_v17, %v1533_v44  ;;  %v1820_v17 = vlaneseq }
 0x513   :  { %v1597_v35 = vadd.f32 %v5389_v18, %v1565_v50  ;;  %v5571_v18 = vshrl.u32 %v1820_v17, 7 }
 0x515   :  { %v4092_v27 = vpack.c.bf16 %v1597_v35, %v1596_v30  ;;  %v1822_v0 = vsub.s32 0, %v5571_v18  ;;  %v1830_v43 = vsub.s32 2, %v5571_v18  ;;  %v1834_v34 = vsub.s32 3, %v5571_v18 }
 0x517   :  { %v5551_v41 = vld [vmem:[#allocation2 + $0x58] sm:$0xff]   ;;  %4105 = vst [vmem:[#allocation2 + $0x60] sm:$0xff] %v4092_v27   ;;  %v5590_v21 = vrot.slane %v5580_v20, %v1830_v43  ;;  %v5596_v59 = vrot.slane %v5580_v20, %v1834_v34 }
 0x518   :  { %2401 = vmatmul.mubr.bf16.gmra.mxu0 %v5551_v41  ;;  %2564 = vmatmul.mubr.bf16.gmra.mxu1 %v5551_v41 }
 0x519   :  { %2410 = vmatprep.mubr.bf16.mxu0 %v4664_v31  ;;  %2573 = vmatprep.mubr.bf16.mxu1 %v4664_v31 }
 0x51e   :  { %v5557_v52 = vld [vmem:[#allocation2 + $0x60] sm:$0xff]  }
 0x520   :  { %2411 = vmatmul.mubr.bf16.gmra.mxu0 %v5557_v52  ;;  %2574 = vmatmul.mubr.bf16.gmra.mxu1 %v5557_v52 }
 0x521   :  { %2616 = vmatprep.mubr.bf16.mxu0 %v4664_v31  ;;  %2779 = vmatprep.mubr.bf16.mxu1 %v4664_v31 }
 0x528   :  { %2617 = vmatmul.mubr.bf16.vlgmr.msra.gmra.mxu0 %v5414_v47  ;;  %2780 = vmatmul.mubr.bf16.vlgmr.msra.gmra.mxu1 %v5414_v47  ;;  %v1826_v47 = vsub.s32 1, %v5571_v18 }
 0x529   :  { %2626 = vmatprep.mubr.bf16.mxu0 %v4664_v31  ;;  %2789 = vmatprep.mubr.bf16.mxu1 %v4664_v31 }
 0x52a   :  { %v5593_v11 = vrot.slane %v5580_v20, %v1826_v47 }
 0x530   :  { %2627 = vmatmul.mubr.bf16.gmra.mxu0 %v5431_v46  ;;  %2790 = vmatmul.mubr.bf16.gmra.mxu1 %v5431_v46  ;;  %v5587_v46 = vrot.slane %v5580_v20, %v1822_v0 }
 0x531   :  { %2636 = vmatprep.mubr.bf16.mxu0 %v4664_v31  ;;  %2799 = vmatprep.mubr.bf16.mxu1 %v4664_v31 }
 0x538   :  { %2637 = vmatmul.mubr.bf16.gmra.mxu0 %v5444_v54  ;;  %2800 = vmatmul.mubr.bf16.gmra.mxu1 %v5444_v54 }
 0x539   :  { %2646 = vmatprep.mubr.bf16.mxu0 %v4664_v31  ;;  %2809 = vmatprep.mubr.bf16.mxu1 %v4664_v31 }
 0x53b   :  { %v2292_v12 = vpop.f32.mrf.mxu0  ;;  %v2455_v48 = vpop.f32.mrf.mxu1 }
 0x53c   :  { %v2293_v1 = vadd.f32 %v2292_v12, %v5587_v46  ;;  %v2456_v9 = vadd.f32 %v2455_v48, %v5590_v21 }
 0x53d   :  { %v2294_v57 = vpop.f32.mrf.mxu0  ;;  %v2457_v54 = vpop.f32.mrf.mxu1 }
 0x53e   :  { %v2295_v24 = vadd.f32 %v2294_v57, %v5593_v11  ;;  %v2458_v58 = vadd.f32 %v2457_v54, %v5596_v59 }
 0x53f   :  { %v2296_v62 = vpop.f32.mrf.mxu0  ;;  %v2459_v37 = vpop.f32.mrf.mxu1 }
 0x540   :  { %v3925_v2 = vpack.c.bf16 %v2295_v24, %v2293_v1  ;;  %v3926_v15 = vpack.c.bf16 %v2458_v58, %v2456_v9  ;;  %2647 = vmatmul.mubr.bf16.gmra.mxu0 %v5456_v61  ;;  %2810 = vmatmul.mubr.bf16.gmra.mxu1 %v5456_v61  ;;  %v2297_v3 = vadd.f32 %v2296_v62, %v5587_v46 }
 0x541   :  { %v2298_v39 = vpop.f32.mrf.mxu0  ;;  %v2461_v19 = vpop.f32.mrf.mxu1  ;;  %2656 = vmatprep.mubr.bf16.mxu0 %v4664_v31  ;;  %v2460_v29 = vadd.f32 %v2459_v37, %v5590_v21  ;;  %2819 = vmatprep.mubr.bf16.mxu1 %v4664_v31 }
 0x542   :  { %3534 = vst [vmem:[#allocation11] sm:$0xff] %v3925_v2  ;;  %3535 = vst [vmem:[#allocation11 + $0x8] sm:$0xff] %v3926_v15  ;;  %v2299_v32 = vadd.f32 %v2298_v39, %v5593_v11  ;;  %v2462_v38 = vadd.f32 %v2461_v19, %v5596_v59 }
 0x543   :  { %v2302_v42 = vpop.f32.mrf.mxu0  ;;  %v2465_v13 = vpop.f32.mrf.mxu1 }
 0x544   :  { %v3929_v49 = vpack.c.bf16 %v2299_v32, %v2297_v3  ;;  %v3930_v61 = vpack.c.bf16 %v2462_v38, %v2460_v29  ;;  %v2303_v28 = vadd.f32 %v2302_v42, %v5587_v46  ;;  %v2466_v56 = vadd.f32 %v2465_v13, %v5590_v21 }
 0x545   :  { %v2304_v36 = vpop.f32.mrf.mxu0  ;;  %v2467_v8 = vpop.f32.mrf.mxu1 }
 0x546   :  { %3538 = vst [vmem:[#allocation11 + $0x20] sm:$0xff] %v3929_v49  ;;  %3539 = vst [vmem:[#allocation11 + $0x28] sm:$0xff] %v3930_v61  ;;  %v2305_v33 = vadd.f32 %v2304_v36, %v5593_v11  ;;  %v2468_v6 = vadd.f32 %v2467_v8, %v5596_v59 }
 0x547   :  { %v2306_v4 = vpop.f32.mrf.mxu0  ;;  %v2469_v25 = vpop.f32.mrf.mxu1 }
 0x548   :  { %v3933_v7 = vpack.c.bf16 %v2305_v33, %v2303_v28  ;;  %v3934_v55 = vpack.c.bf16 %v2468_v6, %v2466_v56  ;;  %2657 = vmatmul.mubr.bf16.gmra.mxu0 %v5469_v22  ;;  %2820 = vmatmul.mubr.bf16.gmra.mxu1 %v5469_v22  ;;  %v2307_v5 = vadd.f32 %v2306_v4, %v5587_v46 }
 0x549   :  { %v2308_v53 = vpop.f32.mrf.mxu0  ;;  %v2471_v40 = vpop.f32.mrf.mxu1  ;;  %2666 = vmatprep.mubr.bf16.mxu0 %v4664_v31  ;;  %v2470_v63 = vadd.f32 %v2469_v25, %v5590_v21  ;;  %2829 = vmatprep.mubr.bf16.mxu1 %v4664_v31 }
 0x54a   :  { %3542 = vst [vmem:[#allocation11 + $0x40] sm:$0xff] %v3933_v7  ;;  %3543 = vst [vmem:[#allocation11 + $0x48] sm:$0xff] %v3934_v55  ;;  %v2309_v51 = vadd.f32 %v2308_v53, %v5593_v11  ;;  %v2472_v26 = vadd.f32 %v2471_v40, %v5596_v59 }
 0x54b   :  { %v2312_v44 = vpop.f32.mrf.mxu0  ;;  %v2475_v50 = vpop.f32.mrf.mxu1 }
 0x54c   :  { %v3937_v30 = vpack.c.bf16 %v2309_v51, %v2307_v5  ;;  %v3938_v22 = vpack.c.bf16 %v2472_v26, %v2470_v63  ;;  %v2313_v17 = vadd.f32 %v2312_v44, %v5587_v46  ;;  %v2476_v0 = vadd.f32 %v2475_v50, %v5590_v21 }
 0x54d   :  { %v2314_v35 = vpop.f32.mrf.mxu0  ;;  %v2477_v27 = vpop.f32.mrf.mxu1 }
 0x54e   :  { %3546 = vst [vmem:[#allocation11 + $0x60] sm:$0xff] %v3937_v30  ;;  %3547 = vst [vmem:[#allocation11 + $0x68] sm:$0xff] %v3938_v22  ;;  %v2315_v43 = vadd.f32 %v2314_v35, %v5593_v11  ;;  %v2478_v47 = vadd.f32 %v2477_v27, %v5596_v59 }
 0x54f   :  { %v2316_v34 = vpop.f32.mrf.mxu0  ;;  %v2479_v12 = vpop.f32.mrf.mxu1 }
 0x550   :  { %v3941_v48 = vpack.c.bf16 %v2315_v43, %v2313_v17  ;;  %v3942_v57 = vpack.c.bf16 %v2478_v47, %v2476_v0  ;;  %2667 = vmatmul.mubr.bf16.gmra.mxu0 %v5480_v45  ;;  %2830 = vmatmul.mubr.bf16.gmra.mxu1 %v5480_v45  ;;  %v2317_v9 = vadd.f32 %v2316_v34, %v5587_v46 }
 0x551   :  { %v2318_v54 = vpop.f32.mrf.mxu0  ;;  %v2481_v1 = vpop.f32.mrf.mxu1  ;;  %2676 = vmatprep.mubr.bf16.mxu0 %v4664_v31  ;;  %v2480_v24 = vadd.f32 %v2479_v12, %v5590_v21  ;;  %2839 = vmatprep.mubr.bf16.mxu1 %v4664_v31 }
 0x552   :  { %3550 = vst [vmem:[#allocation11 + $0x80] sm:$0xff] %v3941_v48  ;;  %3551 = vst [vmem:[#allocation11 + $0x88] sm:$0xff] %v3942_v57  ;;  %v2319_v58 = vadd.f32 %v2318_v54, %v5593_v11  ;;  %v2482_v62 = vadd.f32 %v2481_v1, %v5596_v59 }
 0x553   :  { %v2322_v37 = vpop.f32.mrf.mxu0  ;;  %v2485_v2 = vpop.f32.mrf.mxu1 }
 0x554   :  { %v3945_v15 = vpack.c.bf16 %v2319_v58, %v2317_v9  ;;  %v3946_v45 = vpack.c.bf16 %v2482_v62, %v2480_v24  ;;  %v2323_v3 = vadd.f32 %v2322_v37, %v5587_v46  ;;  %v2486_v29 = vadd.f32 %v2485_v2, %v5590_v21 }
 0x555   :  { %v2324_v39 = vpop.f32.mrf.mxu0  ;;  %v2487_v19 = vpop.f32.mrf.mxu1 }
 0x556   :  { %3554 = vst [vmem:[#allocation11 + $0xa0] sm:$0xff] %v3945_v15  ;;  %3555 = vst [vmem:[#allocation11 + $0xa8] sm:$0xff] %v3946_v45  ;;  %v2325_v32 = vadd.f32 %v2324_v39, %v5593_v11  ;;  %v2488_v38 = vadd.f32 %v2487_v19, %v5596_v59 }
 0x557   :  { %v2326_v42 = vpop.f32.mrf.mxu0  ;;  %v2489_v13 = vpop.f32.mrf.mxu1 }
 0x558   :  { %v3949_v49 = vpack.c.bf16 %v2325_v32, %v2323_v3  ;;  %v3950_v61 = vpack.c.bf16 %v2488_v38, %v2486_v29  ;;  %2677 = vmatmul.mubr.bf16.gmra.mxu0 %v5492_v16  ;;  %2840 = vmatmul.mubr.bf16.gmra.mxu1 %v5492_v16  ;;  %v2327_v28 = vadd.f32 %v2326_v42, %v5587_v46 }
 0x559   :  { %v2328_v36 = vpop.f32.mrf.mxu0  ;;  %v2491_v8 = vpop.f32.mrf.mxu1  ;;  %2686 = vmatprep.mubr.bf16.mxu0 %v4664_v31  ;;  %v2490_v56 = vadd.f32 %v2489_v13, %v5590_v21  ;;  %2849 = vmatprep.mubr.bf16.mxu1 %v4664_v31 }
 0x55a   :  { %3558 = vst [vmem:[#allocation11 + $0xc0] sm:$0xff] %v3949_v49  ;;  %3559 = vst [vmem:[#allocation11 + $0xc8] sm:$0xff] %v3950_v61  ;;  %v2329_v33 = vadd.f32 %v2328_v36, %v5593_v11  ;;  %v2492_v6 = vadd.f32 %v2491_v8, %v5596_v59 }
 0x55b   :  { %v2332_v4 = vpop.f32.mrf.mxu0  ;;  %v2495_v25 = vpop.f32.mrf.mxu1 }
 0x55c   :  { %v3953_v7 = vpack.c.bf16 %v2329_v33, %v2327_v28  ;;  %v3954_v16 = vpack.c.bf16 %v2492_v6, %v2490_v56  ;;  %v2333_v40 = vadd.f32 %v2332_v4, %v5587_v46  ;;  %v2496_v5 = vadd.f32 %v2495_v25, %v5590_v21 }
 0x55d   :  { %v2334_v55 = vpop.f32.mrf.mxu0  ;;  %v2497_v53 = vpop.f32.mrf.mxu1 }
 0x55e   :  { %3562 = vst [vmem:[#allocation11 + $0xe0] sm:$0xff] %v3953_v7  ;;  %3563 = vst [vmem:[#allocation11 + $0xe8] sm:$0xff] %v3954_v16  ;;  %v2335_v63 = vadd.f32 %v2334_v55, %v5593_v11  ;;  %v2498_v51 = vadd.f32 %v2497_v53, %v5596_v59 }
 0x55f   :  { %v2336_v26 = vpop.f32.mrf.mxu0  ;;  %v2499_v44 = vpop.f32.mrf.mxu1 }
 0x560   :  { %v3957_v50 = vpack.c.bf16 %v2335_v63, %v2333_v40  ;;  %v3958_v30 = vpack.c.bf16 %v2498_v51, %v2496_v5  ;;  %2687 = vmatmul.mubr.bf16.gmra.mxu0 %v5504_v60  ;;  %2850 = vmatmul.mubr.bf16.gmra.mxu1 %v5504_v60  ;;  %v2337_v27 = vadd.f32 %v2336_v26, %v5587_v46 }
 0x561   :  { %v2338_v22 = vpop.f32.mrf.mxu0  ;;  %v2501_v35 = vpop.f32.mrf.mxu1  ;;  %2696 = vmatprep.mubr.bf16.mxu0 %v4664_v31  ;;  %v2500_v17 = vadd.f32 %v2499_v44, %v5590_v21  ;;  %2859 = vmatprep.mubr.bf16.mxu1 %v4664_v31 }
 0x562   :  { %3566 = vst [vmem:[#allocation11 + $0x100] sm:$0xff] %v3957_v50  ;;  %3567 = vst [vmem:[#allocation11 + $0x108] sm:$0xff] %v3958_v30  ;;  %v2339_v0 = vadd.f32 %v2338_v22, %v5593_v11  ;;  %v2502_v43 = vadd.f32 %v2501_v35, %v5596_v59 }
 0x563   :  { %v2342_v47 = vpop.f32.mrf.mxu0  ;;  %v2505_v34 = vpop.f32.mrf.mxu1 }
 0x564   :  { %v3961_v12 = vpack.c.bf16 %v2339_v0, %v2337_v27  ;;  %v3962_v60 = vpack.c.bf16 %v2502_v43, %v2500_v17  ;;  %v2343_v54 = vadd.f32 %v2342_v47, %v5587_v46  ;;  %v2506_v1 = vadd.f32 %v2505_v34, %v5590_v21 }
 0x565   :  { %v2344_v48 = vpop.f32.mrf.mxu0  ;;  %v2507_v57 = vpop.f32.mrf.mxu1 }
 0x566   :  { %3570 = vst [vmem:[#allocation11 + $0x120] sm:$0xff] %v3961_v12  ;;  %3571 = vst [vmem:[#allocation11 + $0x128] sm:$0xff] %v3962_v60  ;;  %v2345_v9 = vadd.f32 %v2344_v48, %v5593_v11  ;;  %v2508_v24 = vadd.f32 %v2507_v57, %v5596_v59 }
 0x567   :  { %v2346_v58 = vpop.f32.mrf.mxu0  ;;  %v2509_v62 = vpop.f32.mrf.mxu1 }
 0x568   :  { %v3965_v37 = vpack.c.bf16 %v2345_v9, %v2343_v54  ;;  %v3966_v2 = vpack.c.bf16 %v2508_v24, %v2506_v1  ;;  %2697 = vmatmul.mubr.bf16.gmra.mxu0 %v5515_v14  ;;  %2860 = vmatmul.mubr.bf16.gmra.mxu1 %v5515_v14  ;;  %v2347_v39 = vadd.f32 %v2346_v58, %v5587_v46 }
 0x569   :  { %v2348_v15 = vpop.f32.mrf.mxu0  ;;  %v2511_v45 = vpop.f32.mrf.mxu1  ;;  %2706 = vmatprep.mubr.bf16.mxu0 %v4664_v31  ;;  %v2510_v19 = vadd.f32 %v2509_v62, %v5590_v21  ;;  %2869 = vmatprep.mubr.bf16.mxu1 %v4664_v31 }
 0x56a   :  { %3574 = vst [vmem:[#allocation11 + $0x140] sm:$0xff] %v3965_v37  ;;  %3575 = vst [vmem:[#allocation11 + $0x148] sm:$0xff] %v3966_v2  ;;  %v2349_v3 = vadd.f32 %v2348_v15, %v5593_v11  ;;  %v2512_v29 = vadd.f32 %v2511_v45, %v5596_v59 }
 0x56b   :  { %v2352_v32 = vpop.f32.mrf.mxu0  ;;  %v2515_v38 = vpop.f32.mrf.mxu1 }
 0x56c   :  { %v3969_v42 = vpack.c.bf16 %v2349_v3, %v2347_v39  ;;  %v3970_v14 = vpack.c.bf16 %v2512_v29, %v2510_v19  ;;  %v2353_v61 = vadd.f32 %v2352_v32, %v5587_v46  ;;  %v2516_v36 = vadd.f32 %v2515_v38, %v5590_v21 }
 0x56d   :  { %v2354_v13 = vpop.f32.mrf.mxu0  ;;  %v2517_v49 = vpop.f32.mrf.mxu1 }
 0x56e   :  { %3578 = vst [vmem:[#allocation11 + $0x160] sm:$0xff] %v3969_v42  ;;  %3579 = vst [vmem:[#allocation11 + $0x168] sm:$0xff] %v3970_v14  ;;  %v2355_v8 = vadd.f32 %v2354_v13, %v5593_v11  ;;  %v2518_v28 = vadd.f32 %v2517_v49, %v5596_v59 }
 0x56f   :  { %v2356_v56 = vpop.f32.mrf.mxu0  ;;  %v2519_v33 = vpop.f32.mrf.mxu1 }
 0x570   :  { %v3973_v6 = vpack.c.bf16 %v2355_v8, %v2353_v61  ;;  %v3974_v4 = vpack.c.bf16 %v2518_v28, %v2516_v36  ;;  %2707 = vmatmul.mubr.bf16.gmra.mxu0 %v5521_v10  ;;  %2870 = vmatmul.mubr.bf16.gmra.mxu1 %v5521_v10  ;;  %v2357_v16 = vadd.f32 %v2356_v56, %v5587_v46 }
 0x571   :  { %v2358_v25 = vpop.f32.mrf.mxu0  ;;  %v2521_v7 = vpop.f32.mrf.mxu1  ;;  %2716 = vmatprep.mubr.bf16.mxu0 %v4664_v31  ;;  %v2520_v55 = vadd.f32 %v2519_v33, %v5590_v21  ;;  %2879 = vmatprep.mubr.bf16.mxu1 %v4664_v31 }
 0x572   :  { %3582 = vst [vmem:[#allocation11 + $0x180] sm:$0xff] %v3973_v6  ;;  %3583 = vst [vmem:[#allocation11 + $0x188] sm:$0xff] %v3974_v4  ;;  %v2359_v53 = vadd.f32 %v2358_v25, %v5593_v11  ;;  %v2522_v40 = vadd.f32 %v2521_v7, %v5596_v59 }
 0x573   :  { %v2362_v5 = vpop.f32.mrf.mxu0  ;;  %v2525_v63 = vpop.f32.mrf.mxu1 }
 0x574   :  { %v3977_v51 = vpack.c.bf16 %v2359_v53, %v2357_v16  ;;  %v3978_v10 = vpack.c.bf16 %v2522_v40, %v2520_v55  ;;  %v2363_v50 = vadd.f32 %v2362_v5, %v5587_v46  ;;  %v2526_v30 = vadd.f32 %v2525_v63, %v5590_v21 }
 0x575   :  { %v2364_v26 = vpop.f32.mrf.mxu0  ;;  %v2527_v44 = vpop.f32.mrf.mxu1 }
 0x576   :  { %3586 = vst [vmem:[#allocation11 + $0x1a0] sm:$0xff] %v3977_v51  ;;  %3587 = vst [vmem:[#allocation11 + $0x1a8] sm:$0xff] %v3978_v10  ;;  %v2365_v22 = vadd.f32 %v2364_v26, %v5593_v11  ;;  %v2528_v35 = vadd.f32 %v2527_v44, %v5596_v59 }
 0x577   :  { %v2366_v27 = vpop.f32.mrf.mxu0  ;;  %v2529_v17 = vpop.f32.mrf.mxu1 }
 0x578   :  { %v3981_v0 = vpack.c.bf16 %v2365_v22, %v2363_v50  ;;  %v3982_v43 = vpack.c.bf16 %v2528_v35, %v2526_v30  ;;  %2717 = vmatmul.mubr.bf16.gmra.mxu0 %v5540_v23  ;;  %2880 = vmatmul.mubr.bf16.gmra.mxu1 %v5540_v23  ;;  %v2367_v12 = vadd.f32 %v2366_v27, %v5587_v46 }
 0x579   :  { %v2368_v47 = vpop.f32.mrf.mxu0  ;;  %v2531_v34 = vpop.f32.mrf.mxu1  ;;  %2726 = vmatprep.mubr.bf16.mxu0 %v4664_v31  ;;  %v2530_v60 = vadd.f32 %v2529_v17, %v5590_v21  ;;  %2889 = vmatprep.mubr.bf16.mxu1 %v4664_v31 }
 0x57a   :  { %3590 = vst [vmem:[#allocation11 + $0x1c0] sm:$0xff] %v3981_v0  ;;  %3591 = vst [vmem:[#allocation11 + $0x1c8] sm:$0xff] %v3982_v43  ;;  %v2369_v48 = vadd.f32 %v2368_v47, %v5593_v11  ;;  %v2532_v57 = vadd.f32 %v2531_v34, %v5596_v59 }
 0x57b   :  { %v2372_v54 = vpop.f32.mrf.mxu0  ;;  %v2535_v1 = vpop.f32.mrf.mxu1 }
 0x57c   :  { %v3985_v9 = vpack.c.bf16 %v2369_v48, %v2367_v12  ;;  %v3986_v23 = vpack.c.bf16 %v2532_v57, %v2530_v60  ;;  %v2373_v62 = vadd.f32 %v2372_v54, %v5587_v46  ;;  %v2536_v37 = vadd.f32 %v2535_v1, %v5590_v21 }
 0x57d   :  { %v2374_v24 = vpop.f32.mrf.mxu0  ;;  %v2537_v58 = vpop.f32.mrf.mxu1 }
 0x57e   :  { %3594 = vst [vmem:[#allocation11 + $0x1e0] sm:$0xff] %v3985_v9  ;;  %3595 = vst [vmem:[#allocation11 + $0x1e8] sm:$0xff] %v3986_v23  ;;  %v2375_v2 = vadd.f32 %v2374_v24, %v5593_v11  ;;  %v2538_v15 = vadd.f32 %v2537_v58, %v5596_v59 }
 0x57f   :  { %v2376_v45 = vpop.f32.mrf.mxu0  ;;  %v2539_v39 = vpop.f32.mrf.mxu1 }
 0x580   :  { %v3989_v19 = vpack.c.bf16 %v2375_v2, %v2373_v62  ;;  %v3990_v3 = vpack.c.bf16 %v2538_v15, %v2536_v37  ;;  %2727 = vmatmul.mubr.bf16.gmra.mxu0 %v5551_v41  ;;  %2890 = vmatmul.mubr.bf16.gmra.mxu1 %v5551_v41  ;;  %v2377_v38 = vadd.f32 %v2376_v45, %v5587_v46 }
 0x581   :  { %v2378_v29 = vpop.f32.mrf.mxu0  ;;  %v2541_v32 = vpop.f32.mrf.mxu1  ;;  %2736 = vmatprep.mubr.bf16.mxu0 %v4664_v31  ;;  %v2540_v42 = vadd.f32 %v2539_v39, %v5590_v21  ;;  %2899 = vmatprep.mubr.bf16.mxu1 %v4664_v31 }
 0x582   :  { %3598 = vst [vmem:[#allocation11 + $0x200] sm:$0xff] %v3989_v19  ;;  %3599 = vst [vmem:[#allocation11 + $0x208] sm:$0xff] %v3990_v3  ;;  %v2379_v14 = vadd.f32 %v2378_v29, %v5593_v11  ;;  %v2542_v13 = vadd.f32 %v2541_v32, %v5596_v59 }
 0x583   :  { %v2382_v49 = vpop.f32.mrf.mxu0  ;;  %v2545_v61 = vpop.f32.mrf.mxu1 }
 0x584   :  { %v3993_v36 = vpack.c.bf16 %v2379_v14, %v2377_v38  ;;  %v3994_v41 = vpack.c.bf16 %v2542_v13, %v2540_v42  ;;  %v2383_v56 = vadd.f32 %v2382_v49, %v5587_v46  ;;  %v2546_v33 = vadd.f32 %v2545_v61, %v5590_v21 }
 0x585   :  { %v2384_v8 = vpop.f32.mrf.mxu0  ;;  %v2547_v28 = vpop.f32.mrf.mxu1 }
 0x586   :  { %3602 = vst [vmem:[#allocation11 + $0x220] sm:$0xff] %v3993_v36  ;;  %3603 = vst [vmem:[#allocation11 + $0x228] sm:$0xff] %v3994_v41  ;;  %v2385_v6 = vadd.f32 %v2384_v8, %v5593_v11  ;;  %v2548_v4 = vadd.f32 %v2547_v28, %v5596_v59 }
 0x587   :  { %v2386_v25 = vpop.f32.mrf.mxu0  ;;  %v2549_v7 = vpop.f32.mrf.mxu1 }
 0x588   :  { %v3997_v16 = vpack.c.bf16 %v2385_v6, %v2383_v56  ;;  %v3998_v31 = vpack.c.bf16 %v2548_v4, %v2546_v33  ;;  %2737 = vmatmul.mubr.bf16.gmra.mxu0 %v5557_v52  ;;  %2900 = vmatmul.mubr.bf16.gmra.mxu1 %v5557_v52  ;;  %v2387_v40 = vadd.f32 %v2386_v25, %v5587_v46  ;;  %v1838_v6 = vsub.s32 4, %v5571_v18 }
 0x589   :  { %v2388_v55 = vpop.f32.mrf.mxu0  ;;  %v2551_v53 = vpop.f32.mrf.mxu1  ;;  %v2550_v5 = vadd.f32 %v2549_v7, %v5590_v21  ;;  %v1846_v4 = vsub.s32 6, %v5571_v18  ;;  %v1842_v25 = vsub.s32 5, %v5571_v18  ;;  %v1850_v7 = vsub.s32 7, %v5571_v18 }
 0x58a   :  { %3606 = vst [vmem:[#allocation11 + $0x240] sm:$0xff] %v3997_v16  ;;  %3607 = vst [vmem:[#allocation11 + $0x248] sm:$0xff] %v3998_v31  ;;  %v2389_v63 = vadd.f32 %v2388_v55, %v5593_v11  ;;  %v2552_v51 = vadd.f32 %v2551_v53, %v5596_v59 }
 0x58b   :  { %v5744_v18 = vrot.slane %v5580_v20, %v1846_v4 }
 0x58c   :  { %v4001_v10 = vpack.c.bf16 %v2389_v63, %v2387_v40  ;;  %v4002_v26 = vpack.c.bf16 %v2552_v51, %v2550_v5 }
 0x58e   :  { %3610 = vst [vmem:[#allocation11 + $0x260] sm:$0xff] %v4001_v10  ;;  %3611 = vst [vmem:[#allocation11 + $0x268] sm:$0xff] %v4002_v26 }
 0x5cf   :  { %v2392_v44 = vpop.f32.mrf.mxu0  ;;  %v2555_v50 = vpop.f32.mrf.mxu1 }
 0x5d0   :  { %v2393_v22 = vadd.f32 %v2392_v44, %v5587_v46  ;;  %v2556_v35 = vadd.f32 %v2555_v50, %v5590_v21  ;;  %v5741_v44 = vrot.slane %v5580_v20, %v1838_v6  ;;  %v5747_v50 = vrot.slane %v5580_v20, %v1842_v25 }
 0x5d1   :  { %v2394_v30 = vpop.f32.mrf.mxu0  ;;  %v2557_v52 = vpop.f32.mrf.mxu1 }
 0x5d2   :  { %v2395_v27 = vadd.f32 %v2394_v30, %v5593_v11  ;;  %v2558_v17 = vadd.f32 %v2557_v52, %v5596_v59  ;;  %v5750_v30 = vrot.slane %v5580_v20, %v1850_v7 }
 0x5d3   :  { %v2396_v0 = vpop.f32.mrf.mxu0  ;;  %v2559_v43 = vpop.f32.mrf.mxu1 }
 0x5d4   :  { %v4005_v47 = vpack.c.bf16 %v2395_v27, %v2393_v22  ;;  %v4006_v34 = vpack.c.bf16 %v2558_v17, %v2556_v35  ;;  %v2397_v48 = vadd.f32 %v2396_v0, %v5587_v46  ;;  %v2560_v57 = vadd.f32 %v2559_v43, %v5590_v21 }
 0x5d5   :  { %v2398_v12 = vpop.f32.mrf.mxu0  ;;  %v2561_v60 = vpop.f32.mrf.mxu1 }
 0x5d6   :  { %3614 = vst [vmem:[#allocation11 + $0x280] sm:$0xff] %v4005_v47  ;;  %3615 = vst [vmem:[#allocation11 + $0x288] sm:$0xff] %v4006_v34  ;;  %v2399_v54 = vadd.f32 %v2398_v12, %v5593_v11  ;;  %v2562_v1 = vadd.f32 %v2561_v60, %v5596_v59 }
 0x5d8   :  { %v4009_v9 = vpack.c.bf16 %v2399_v54, %v2397_v48  ;;  %v4010_v23 = vpack.c.bf16 %v2562_v1, %v2560_v57  ;;  %v2402_v24 = vpop.f32.mrf.mxu0  ;;  %v2565_v58 = vpop.f32.mrf.mxu1 }
 0x5d9   :  { %v2403_v2 = vadd.f32 %v2402_v24, %v5587_v46  ;;  %v2566_v15 = vadd.f32 %v2565_v58, %v5590_v21 }
 0x5da   :  { %3618 = vst [vmem:[#allocation11 + $0x2a0] sm:$0xff] %v4009_v9  ;;  %3619 = vst [vmem:[#allocation11 + $0x2a8] sm:$0xff] %v4010_v23  ;;  %v2404_v62 = vpop.f32.mrf.mxu0  ;;  %v2567_v37 = vpop.f32.mrf.mxu1 }
 0x5db   :  { %v2405_v45 = vadd.f32 %v2404_v62, %v5593_v11  ;;  %v2568_v39 = vadd.f32 %v2567_v37, %v5596_v59 }
 0x5dc   :  { %v2406_v19 = vpop.f32.mrf.mxu0  ;;  %v2569_v3 = vpop.f32.mrf.mxu1 }
 0x5dd   :  { %v4013_v29 = vpack.c.bf16 %v2405_v45, %v2403_v2  ;;  %v4014_v32 = vpack.c.bf16 %v2568_v39, %v2566_v15  ;;  %v2407_v14 = vadd.f32 %v2406_v19, %v5587_v46  ;;  %v2570_v13 = vadd.f32 %v2569_v3, %v5590_v21 }
 0x5de   :  { %v2408_v38 = vpop.f32.mrf.mxu0  ;;  %v2571_v42 = vpop.f32.mrf.mxu1 }
 0x5df   :  { %3622 = vst [vmem:[#allocation11 + $0x2c0] sm:$0xff] %v4013_v29  ;;  %3623 = vst [vmem:[#allocation11 + $0x2c8] sm:$0xff] %v4014_v32  ;;  %v2409_v49 = vadd.f32 %v2408_v38, %v5593_v11  ;;  %v2572_v61 = vadd.f32 %v2571_v42, %v5596_v59 }
 0x5e0   :  { %v2412_v36 = vpop.f32.mrf.mxu0  ;;  %v2575_v41 = vpop.f32.mrf.mxu1 }
 0x5e1   :  { %v4017_v8 = vpack.c.bf16 %v2409_v49, %v2407_v14  ;;  %v4018_v28 = vpack.c.bf16 %v2572_v61, %v2570_v13  ;;  %v2413_v16 = vadd.f32 %v2412_v36, %v5587_v46  ;;  %v2576_v31 = vadd.f32 %v2575_v41, %v5590_v21 }
 0x5e2   :  { %v2414_v56 = vpop.f32.mrf.mxu0  ;;  %v2577_v33 = vpop.f32.mrf.mxu1 }
 0x5e3   :  { %3626 = vst [vmem:[#allocation11 + $0x2e0] sm:$0xff] %v4017_v8  ;;  %3627 = vst [vmem:[#allocation11 + $0x2e8] sm:$0xff] %v4018_v28  ;;  %v2415_v55 = vadd.f32 %v2414_v56, %v5593_v11  ;;  %v2578_v53 = vadd.f32 %v2577_v33, %v5596_v59 }
 0x5e4   :  { %v2416_v40 = vpop.f32.mrf.mxu0  ;;  %v2579_v5 = vpop.f32.mrf.mxu1 }
 0x5e5   :  { %v4021_v63 = vpack.c.bf16 %v2415_v55, %v2413_v16  ;;  %v4022_v51 = vpack.c.bf16 %v2578_v53, %v2576_v31  ;;  %v2417_v52 = vadd.f32 %v2416_v40, %v5587_v46  ;;  %v2580_v22 = vadd.f32 %v2579_v5, %v5590_v21 }
 0x5e6   :  { %v2418_v10 = vpop.f32.mrf.mxu0  ;;  %v2581_v26 = vpop.f32.mrf.mxu1 }
 0x5e7   :  { %3630 = vst [vmem:[#allocation11 + $0x300] sm:$0xff] %v4021_v63  ;;  %3631 = vst [vmem:[#allocation11 + $0x308] sm:$0xff] %v4022_v51  ;;  %v2419_v35 = vadd.f32 %v2418_v10, %v5593_v11  ;;  %v2582_v27 = vadd.f32 %v2581_v26, %v5596_v59 }
 0x5e8   :  { %v2618_v17 = vpop.f32.mrf.mxu0  ;;  %v2781_v0 = vpop.f32.mrf.mxu1 }
 0x5e9   :  { %v4025_v43 = vpack.c.bf16 %v2419_v35, %v2417_v52  ;;  %v4026_v47 = vpack.c.bf16 %v2582_v27, %v2580_v22  ;;  %v2619_v20 = vadd.f32 %v2618_v17, %v5741_v44  ;;  %v2782_v60 = vadd.f32 %v2781_v0, %v5744_v18 }
 0x5ea   :  { %v2620_v34 = vpop.f32.mrf.mxu0  ;;  %v2783_v12 = vpop.f32.mrf.mxu1 }
 0x5eb   :  { %3634 = vst [vmem:[#allocation11 + $0x320] sm:$0xff] %v4025_v43  ;;  %3635 = vst [vmem:[#allocation11 + $0x328] sm:$0xff] %v4026_v47  ;;  %v2621_v46 = vadd.f32 %v2620_v34, %v5747_v50  ;;  %v2784_v21 = vadd.f32 %v2783_v12, %v5750_v30 }
 0x5ec   :  { %v2622_v48 = vpop.f32.mrf.mxu0  ;;  %v2785_v11 = vpop.f32.mrf.mxu1 }
 0x5ed   :  { %v3927_v57 = vpack.c.bf16 %v2621_v46, %v2619_v20  ;;  %v3928_v59 = vpack.c.bf16 %v2784_v21, %v2782_v60  ;;  %v2623_v9 = vadd.f32 %v2622_v48, %v5741_v44  ;;  %v2786_v23 = vadd.f32 %v2785_v11, %v5744_v18 }
 0x5ee   :  { %v2624_v54 = vpop.f32.mrf.mxu0  ;;  %v2787_v1 = vpop.f32.mrf.mxu1 }
 0x5ef   :  { %3536 = vst [vmem:[#allocation11 + $0x10] sm:$0xff] %v3927_v57  ;;  %3537 = vst [vmem:[#allocation11 + $0x18] sm:$0xff] %v3928_v59  ;;  %v2625_v24 = vadd.f32 %v2624_v54, %v5747_v50  ;;  %v2788_v58 = vadd.f32 %v2787_v1, %v5750_v30 }
 0x5f0   :  { %v2628_v62 = vpop.f32.mrf.mxu0  ;;  %v2791_v37 = vpop.f32.mrf.mxu1 }
 0x5f1   :  { %v3931_v2 = vpack.c.bf16 %v2625_v24, %v2623_v9  ;;  %v3932_v15 = vpack.c.bf16 %v2788_v58, %v2786_v23  ;;  %v2629_v19 = vadd.f32 %v2628_v62, %v5741_v44  ;;  %v2792_v3 = vadd.f32 %v2791_v37, %v5744_v18 }
 0x5f2   :  { %v2630_v45 = vpop.f32.mrf.mxu0  ;;  %v2793_v39 = vpop.f32.mrf.mxu1 }
 0x5f3   :  { %3540 = vst [vmem:[#allocation11 + $0x30] sm:$0xff] %v3931_v2  ;;  %3541 = vst [vmem:[#allocation11 + $0x38] sm:$0xff] %v3932_v15  ;;  %v2631_v29 = vadd.f32 %v2630_v45, %v5747_v50  ;;  %v2794_v32 = vadd.f32 %v2793_v39, %v5750_v30 }
 0x5f4   :  { %v2632_v38 = vpop.f32.mrf.mxu0  ;;  %v2795_v42 = vpop.f32.mrf.mxu1 }
 0x5f5   :  { %v3935_v14 = vpack.c.bf16 %v2631_v29, %v2629_v19  ;;  %v3936_v13 = vpack.c.bf16 %v2794_v32, %v2792_v3  ;;  %v2633_v36 = vadd.f32 %v2632_v38, %v5741_v44  ;;  %v2796_v41 = vadd.f32 %v2795_v42, %v5744_v18 }
 0x5f6   :  { %v2634_v49 = vpop.f32.mrf.mxu0  ;;  %v2797_v61 = vpop.f32.mrf.mxu1 }
 0x5f7   :  { %3544 = vst [vmem:[#allocation11 + $0x50] sm:$0xff] %v3935_v14  ;;  %3545 = vst [vmem:[#allocation11 + $0x58] sm:$0xff] %v3936_v13  ;;  %v2635_v8 = vadd.f32 %v2634_v49, %v5747_v50  ;;  %v2798_v28 = vadd.f32 %v2797_v61, %v5750_v30 }
 0x5f8   :  { %v2638_v56 = vpop.f32.mrf.mxu0  ;;  %v2801_v33 = vpop.f32.mrf.mxu1 }
 0x5f9   :  { %v3939_v6 = vpack.c.bf16 %v2635_v8, %v2633_v36  ;;  %v3940_v4 = vpack.c.bf16 %v2798_v28, %v2796_v41  ;;  %v2639_v16 = vadd.f32 %v2638_v56, %v5741_v44  ;;  %v2802_v31 = vadd.f32 %v2801_v33, %v5744_v18 }
 0x5fa   :  { %v2640_v25 = vpop.f32.mrf.mxu0  ;;  %v2803_v7 = vpop.f32.mrf.mxu1 }
 0x5fb   :  { %3548 = vst [vmem:[#allocation11 + $0x70] sm:$0xff] %v3939_v6  ;;  %3549 = vst [vmem:[#allocation11 + $0x78] sm:$0xff] %v3940_v4  ;;  %v2641_v55 = vadd.f32 %v2640_v25, %v5747_v50  ;;  %v2804_v53 = vadd.f32 %v2803_v7, %v5750_v30 }
 0x5fc   :  { %v2642_v40 = vpop.f32.mrf.mxu0  ;;  %v2805_v5 = vpop.f32.mrf.mxu1 }
 0x5fd   :  { %v3943_v63 = vpack.c.bf16 %v2641_v55, %v2639_v16  ;;  %v3944_v51 = vpack.c.bf16 %v2804_v53, %v2802_v31  ;;  %v2643_v52 = vadd.f32 %v2642_v40, %v5741_v44  ;;  %v2806_v22 = vadd.f32 %v2805_v5, %v5744_v18 }
 0x5fe   :  { %v2644_v10 = vpop.f32.mrf.mxu0  ;;  %v2807_v26 = vpop.f32.mrf.mxu1 }
 0x5ff   :  { %3552 = vst [vmem:[#allocation11 + $0x90] sm:$0xff] %v3943_v63  ;;  %3553 = vst [vmem:[#allocation11 + $0x98] sm:$0xff] %v3944_v51  ;;  %v2645_v35 = vadd.f32 %v2644_v10, %v5747_v50  ;;  %v2808_v27 = vadd.f32 %v2807_v26, %v5750_v30 }
 0x600   :  { %v2648_v17 = vpop.f32.mrf.mxu0  ;;  %v2811_v47 = vpop.f32.mrf.mxu1 }
 0x601   :  { %v3947_v0 = vpack.c.bf16 %v2645_v35, %v2643_v52  ;;  %v3948_v43 = vpack.c.bf16 %v2808_v27, %v2806_v22  ;;  %v2649_v12 = vadd.f32 %v2648_v17, %v5741_v44  ;;  %v2812_v46 = vadd.f32 %v2811_v47, %v5744_v18 }
 0x602   :  { %v2650_v34 = vpop.f32.mrf.mxu0  ;;  %v2813_v60 = vpop.f32.mrf.mxu1 }
 0x603   :  { %3556 = vst [vmem:[#allocation11 + $0xb0] sm:$0xff] %v3947_v0  ;;  %3557 = vst [vmem:[#allocation11 + $0xb8] sm:$0xff] %v3948_v43  ;;  %v2651_v20 = vadd.f32 %v2650_v34, %v5747_v50  ;;  %v2814_v21 = vadd.f32 %v2813_v60, %v5750_v30 }
 0x604   :  { %v2652_v48 = vpop.f32.mrf.mxu0  ;;  %v2815_v57 = vpop.f32.mrf.mxu1 }
 0x605   :  { %v3951_v11 = vpack.c.bf16 %v2651_v20, %v2649_v12  ;;  %v3952_v59 = vpack.c.bf16 %v2814_v21, %v2812_v46  ;;  %v2653_v1 = vadd.f32 %v2652_v48, %v5741_v44  ;;  %v2816_v24 = vadd.f32 %v2815_v57, %v5744_v18 }
 0x606   :  { %v2654_v54 = vpop.f32.mrf.mxu0  ;;  %v2817_v23 = vpop.f32.mrf.mxu1 }
 0x607   :  { %3560 = vst [vmem:[#allocation11 + $0xd0] sm:$0xff] %v3951_v11  ;;  %v2655_v9 = vadd.f32 %v2654_v54, %v5747_v50  ;;  %3561 = vst [vmem:[#allocation11 + $0xd8] sm:$0xff] %v3952_v59  ;;  %v2818_v58 = vadd.f32 %v2817_v23, %v5750_v30 }
 0x608   :  { %v2658_v62 = vpop.f32.mrf.mxu0  ;;  %v2821_v2 = vpop.f32.mrf.mxu1 }
 0x609   :  { %v3955_v37 = vpack.c.bf16 %v2655_v9, %v2653_v1  ;;  %v3956_v15 = vpack.c.bf16 %v2818_v58, %v2816_v24  ;;  %v2659_v39 = vadd.f32 %v2658_v62, %v5741_v44  ;;  %v2822_v29 = vadd.f32 %v2821_v2, %v5744_v18 }
 0x60a   :  { %v2660_v45 = vpop.f32.mrf.mxu0  ;;  %v2823_v3 = vpop.f32.mrf.mxu1 }
 0x60b   :  { %3564 = vst [vmem:[#allocation11 + $0xf0] sm:$0xff] %v3955_v37  ;;  %v2661_v19 = vadd.f32 %v2660_v45, %v5747_v50  ;;  %3565 = vst [vmem:[#allocation11 + $0xf8] sm:$0xff] %v3956_v15  ;;  %v2824_v32 = vadd.f32 %v2823_v3, %v5750_v30 }
 0x60c   :  { %v2662_v38 = vpop.f32.mrf.mxu0  ;;  %v2825_v14 = vpop.f32.mrf.mxu1 }
 0x60d   :  { %v3959_v42 = vpack.c.bf16 %v2661_v19, %v2659_v39  ;;  %v3960_v13 = vpack.c.bf16 %v2824_v32, %v2822_v29  ;;  %v2663_v61 = vadd.f32 %v2662_v38, %v5741_v44  ;;  %v2826_v8 = vadd.f32 %v2825_v14, %v5744_v18 }
 0x60e   :  { %v2664_v49 = vpop.f32.mrf.mxu0  ;;  %v2827_v41 = vpop.f32.mrf.mxu1 }
 0x60f   :  { %3568 = vst [vmem:[#allocation11 + $0x110] sm:$0xff] %v3959_v42  ;;  %v2665_v36 = vadd.f32 %v2664_v49, %v5747_v50  ;;  %3569 = vst [vmem:[#allocation11 + $0x118] sm:$0xff] %v3960_v13  ;;  %v2828_v28 = vadd.f32 %v2827_v41, %v5750_v30 }
 0x610   :  { %v2668_v56 = vpop.f32.mrf.mxu0  ;;  %v2831_v6 = vpop.f32.mrf.mxu1 }
 0x611   :  { %v3963_v33 = vpack.c.bf16 %v2665_v36, %v2663_v61  ;;  %v3964_v4 = vpack.c.bf16 %v2828_v28, %v2826_v8  ;;  %v2669_v7 = vadd.f32 %v2668_v56, %v5741_v44  ;;  %v2832_v55 = vadd.f32 %v2831_v6, %v5744_v18 }
 0x612   :  { %v2670_v25 = vpop.f32.mrf.mxu0  ;;  %v2833_v31 = vpop.f32.mrf.mxu1 }
 0x613   :  { %3572 = vst [vmem:[#allocation11 + $0x130] sm:$0xff] %v3963_v33  ;;  %v2671_v16 = vadd.f32 %v2670_v25, %v5747_v50  ;;  %3573 = vst [vmem:[#allocation11 + $0x138] sm:$0xff] %v3964_v4  ;;  %v2834_v53 = vadd.f32 %v2833_v31, %v5750_v30 }
 0x614   :  { %v2672_v40 = vpop.f32.mrf.mxu0  ;;  %v2835_v63 = vpop.f32.mrf.mxu1 }
 0x615   :  { %v3967_v5 = vpack.c.bf16 %v2671_v16, %v2669_v7  ;;  %v3968_v51 = vpack.c.bf16 %v2834_v53, %v2832_v55  ;;  %v2673_v26 = vadd.f32 %v2672_v40, %v5741_v44  ;;  %v2836_v35 = vadd.f32 %v2835_v63, %v5744_v18 }
 0x616   :  { %v2674_v10 = vpop.f32.mrf.mxu0  ;;  %v2837_v22 = vpop.f32.mrf.mxu1 }
 0x617   :  { %3576 = vst [vmem:[#allocation11 + $0x150] sm:$0xff] %v3967_v5  ;;  %v2675_v52 = vadd.f32 %v2674_v10, %v5747_v50  ;;  %3577 = vst [vmem:[#allocation11 + $0x158] sm:$0xff] %v3968_v51  ;;  %v2838_v27 = vadd.f32 %v2837_v22, %v5750_v30 }
 0x618   :  { %v2678_v17 = vpop.f32.mrf.mxu0  ;;  %v2841_v43 = vpop.f32.mrf.mxu1 }
 0x619   :  { %v3971_v0 = vpack.c.bf16 %v2675_v52, %v2673_v26  ;;  %v3972_v47 = vpack.c.bf16 %v2838_v27, %v2836_v35  ;;  %v2679_v12 = vadd.f32 %v2678_v17, %v5741_v44  ;;  %v2842_v46 = vadd.f32 %v2841_v43, %v5744_v18 }
 0x61a   :  { %v2680_v34 = vpop.f32.mrf.mxu0  ;;  %v2843_v60 = vpop.f32.mrf.mxu1 }
 0x61b   :  { %3580 = vst [vmem:[#allocation11 + $0x170] sm:$0xff] %v3971_v0  ;;  %v2681_v20 = vadd.f32 %v2680_v34, %v5747_v50  ;;  %3581 = vst [vmem:[#allocation11 + $0x178] sm:$0xff] %v3972_v47  ;;  %v2844_v21 = vadd.f32 %v2843_v60, %v5750_v30 }
 0x61c   :  { %v2682_v48 = vpop.f32.mrf.mxu0  ;;  %v2845_v57 = vpop.f32.mrf.mxu1 }
 0x61d   :  { %v3975_v11 = vpack.c.bf16 %v2681_v20, %v2679_v12  ;;  %v3976_v59 = vpack.c.bf16 %v2844_v21, %v2842_v46  ;;  %v2683_v1 = vadd.f32 %v2682_v48, %v5741_v44  ;;  %v2846_v24 = vadd.f32 %v2845_v57, %v5744_v18 }
 0x61e   :  { %v2684_v54 = vpop.f32.mrf.mxu0  ;;  %v2847_v23 = vpop.f32.mrf.mxu1 }
 0x61f   :  { %3584 = vst [vmem:[#allocation11 + $0x190] sm:$0xff] %v3975_v11  ;;  %v2685_v9 = vadd.f32 %v2684_v54, %v5747_v50  ;;  %3585 = vst [vmem:[#allocation11 + $0x198] sm:$0xff] %v3976_v59  ;;  %v2848_v58 = vadd.f32 %v2847_v23, %v5750_v30 }
 0x620   :  { %v2688_v62 = vpop.f32.mrf.mxu0  ;;  %v2851_v2 = vpop.f32.mrf.mxu1 }
 0x621   :  { %v3979_v37 = vpack.c.bf16 %v2685_v9, %v2683_v1  ;;  %v3980_v15 = vpack.c.bf16 %v2848_v58, %v2846_v24  ;;  %v2689_v39 = vadd.f32 %v2688_v62, %v5741_v44  ;;  %v2852_v29 = vadd.f32 %v2851_v2, %v5744_v18 }
 0x622   :  { %v2690_v45 = vpop.f32.mrf.mxu0  ;;  %v2853_v3 = vpop.f32.mrf.mxu1 }
 0x623   :  { %3588 = vst [vmem:[#allocation11 + $0x1b0] sm:$0xff] %v3979_v37  ;;  %v2691_v19 = vadd.f32 %v2690_v45, %v5747_v50  ;;  %3589 = vst [vmem:[#allocation11 + $0x1b8] sm:$0xff] %v3980_v15  ;;  %v2854_v32 = vadd.f32 %v2853_v3, %v5750_v30 }
 0x624   :  { %v2692_v38 = vpop.f32.mrf.mxu0  ;;  %v2855_v14 = vpop.f32.mrf.mxu1 }
 0x625   :  { %v3983_v42 = vpack.c.bf16 %v2691_v19, %v2689_v39  ;;  %v3984_v13 = vpack.c.bf16 %v2854_v32, %v2852_v29  ;;  %v2693_v61 = vadd.f32 %v2692_v38, %v5741_v44  ;;  %v2856_v8 = vadd.f32 %v2855_v14, %v5744_v18 }
 0x626   :  { %v2694_v49 = vpop.f32.mrf.mxu0  ;;  %v2857_v41 = vpop.f32.mrf.mxu1 }
 0x627   :  { %3592 = vst [vmem:[#allocation11 + $0x1d0] sm:$0xff] %v3983_v42  ;;  %v2695_v36 = vadd.f32 %v2694_v49, %v5747_v50  ;;  %3593 = vst [vmem:[#allocation11 + $0x1d8] sm:$0xff] %v3984_v13  ;;  %v2858_v28 = vadd.f32 %v2857_v41, %v5750_v30 }
 0x628   :  { %v2698_v56 = vpop.f32.mrf.mxu0  ;;  %v2861_v6 = vpop.f32.mrf.mxu1 }
 0x629   :  { %v3987_v33 = vpack.c.bf16 %v2695_v36, %v2693_v61  ;;  %v3988_v4 = vpack.c.bf16 %v2858_v28, %v2856_v8  ;;  %v2699_v7 = vadd.f32 %v2698_v56, %v5741_v44  ;;  %v2862_v55 = vadd.f32 %v2861_v6, %v5744_v18 }
 0x62a   :  { %v2700_v25 = vpop.f32.mrf.mxu0  ;;  %v2863_v31 = vpop.f32.mrf.mxu1 }
 0x62b   :  { %3596 = vst [vmem:[#allocation11 + $0x1f0] sm:$0xff] %v3987_v33  ;;  %v2701_v16 = vadd.f32 %v2700_v25, %v5747_v50  ;;  %3597 = vst [vmem:[#allocation11 + $0x1f8] sm:$0xff] %v3988_v4  ;;  %v2864_v53 = vadd.f32 %v2863_v31, %v5750_v30 }
 0x62c   :  { %v2702_v40 = vpop.f32.mrf.mxu0  ;;  %v2865_v63 = vpop.f32.mrf.mxu1 }
 0x62d   :  { %v3991_v5 = vpack.c.bf16 %v2701_v16, %v2699_v7  ;;  %v3992_v51 = vpack.c.bf16 %v2864_v53, %v2862_v55  ;;  %v2703_v26 = vadd.f32 %v2702_v40, %v5741_v44  ;;  %v2866_v35 = vadd.f32 %v2865_v63, %v5744_v18 }
 0x62e   :  { %v2704_v10 = vpop.f32.mrf.mxu0  ;;  %v2867_v22 = vpop.f32.mrf.mxu1 }
 0x62f   :  { %3600 = vst [vmem:[#allocation11 + $0x210] sm:$0xff] %v3991_v5  ;;  %v2705_v52 = vadd.f32 %v2704_v10, %v5747_v50  ;;  %3601 = vst [vmem:[#allocation11 + $0x218] sm:$0xff] %v3992_v51  ;;  %v2868_v27 = vadd.f32 %v2867_v22, %v5750_v30 }
 0x630   :  { %v2708_v17 = vpop.f32.mrf.mxu0  ;;  %v2871_v43 = vpop.f32.mrf.mxu1 }
 0x631   :  { %v3995_v0 = vpack.c.bf16 %v2705_v52, %v2703_v26  ;;  %v3996_v47 = vpack.c.bf16 %v2868_v27, %v2866_v35  ;;  %v2709_v12 = vadd.f32 %v2708_v17, %v5741_v44  ;;  %v2872_v46 = vadd.f32 %v2871_v43, %v5744_v18 }
 0x632   :  { %v2710_v34 = vpop.f32.mrf.mxu0  ;;  %v2873_v60 = vpop.f32.mrf.mxu1 }
 0x633   :  { %3604 = vst [vmem:[#allocation11 + $0x230] sm:$0xff] %v3995_v0  ;;  %v2711_v20 = vadd.f32 %v2710_v34, %v5747_v50  ;;  %3605 = vst [vmem:[#allocation11 + $0x238] sm:$0xff] %v3996_v47  ;;  %v2874_v21 = vadd.f32 %v2873_v60, %v5750_v30 }
 0x634   :  { %v2712_v48 = vpop.f32.mrf.mxu0  ;;  %v2875_v57 = vpop.f32.mrf.mxu1 }
 0x635   :  { %v3999_v11 = vpack.c.bf16 %v2711_v20, %v2709_v12  ;;  %v4000_v59 = vpack.c.bf16 %v2874_v21, %v2872_v46  ;;  %v2713_v1 = vadd.f32 %v2712_v48, %v5741_v44  ;;  %v2876_v24 = vadd.f32 %v2875_v57, %v5744_v18 }
 0x636   :  { %v2714_v54 = vpop.f32.mrf.mxu0  ;;  %v2877_v23 = vpop.f32.mrf.mxu1 }
 0x637   :  { %3608 = vst [vmem:[#allocation11 + $0x250] sm:$0xff] %v3999_v11  ;;  %v2715_v9 = vadd.f32 %v2714_v54, %v5747_v50  ;;  %3609 = vst [vmem:[#allocation11 + $0x258] sm:$0xff] %v4000_v59  ;;  %v2878_v58 = vadd.f32 %v2877_v23, %v5750_v30 }
 0x638   :  { %v2718_v62 = vpop.f32.mrf.mxu0  ;;  %v2881_v2 = vpop.f32.mrf.mxu1 }
 0x639   :  { %v4003_v37 = vpack.c.bf16 %v2715_v9, %v2713_v1  ;;  %v4004_v15 = vpack.c.bf16 %v2878_v58, %v2876_v24  ;;  %v2719_v39 = vadd.f32 %v2718_v62, %v5741_v44  ;;  %v2882_v29 = vadd.f32 %v2881_v2, %v5744_v18 }
 0x63a   :  { %v2720_v45 = vpop.f32.mrf.mxu0  ;;  %v2883_v3 = vpop.f32.mrf.mxu1 }
 0x63b   :  { %3612 = vst [vmem:[#allocation11 + $0x270] sm:$0xff] %v4003_v37  ;;  %v2721_v19 = vadd.f32 %v2720_v45, %v5747_v50  ;;  %3613 = vst [vmem:[#allocation11 + $0x278] sm:$0xff] %v4004_v15  ;;  %v2884_v32 = vadd.f32 %v2883_v3, %v5750_v30 }
 0x63c   :  { %v2722_v38 = vpop.f32.mrf.mxu0  ;;  %v2885_v14 = vpop.f32.mrf.mxu1 }
 0x63d   :  { %v4007_v42 = vpack.c.bf16 %v2721_v19, %v2719_v39  ;;  %v4008_v13 = vpack.c.bf16 %v2884_v32, %v2882_v29  ;;  %v2723_v61 = vadd.f32 %v2722_v38, %v5741_v44  ;;  %v2886_v8 = vadd.f32 %v2885_v14, %v5744_v18 }
 0x63e   :  { %v2724_v49 = vpop.f32.mrf.mxu0  ;;  %v2887_v41 = vpop.f32.mrf.mxu1 }
 0x63f   :  { %3616 = vst [vmem:[#allocation11 + $0x290] sm:$0xff] %v4007_v42  ;;  %v2725_v36 = vadd.f32 %v2724_v49, %v5747_v50  ;;  %3617 = vst [vmem:[#allocation11 + $0x298] sm:$0xff] %v4008_v13  ;;  %v2888_v28 = vadd.f32 %v2887_v41, %v5750_v30 }
 0x640   :  { %v2728_v56 = vpop.f32.mrf.mxu0  ;;  %v2891_v6 = vpop.f32.mrf.mxu1 }
 0x641   :  { %v4011_v33 = vpack.c.bf16 %v2725_v36, %v2723_v61  ;;  %v4012_v4 = vpack.c.bf16 %v2888_v28, %v2886_v8  ;;  %v2729_v7 = vadd.f32 %v2728_v56, %v5741_v44  ;;  %v2892_v55 = vadd.f32 %v2891_v6, %v5744_v18 }
 0x642   :  { %v2730_v25 = vpop.f32.mrf.mxu0  ;;  %v2893_v31 = vpop.f32.mrf.mxu1 }
 0x643   :  { %3620 = vst [vmem:[#allocation11 + $0x2b0] sm:$0xff] %v4011_v33  ;;  %v2731_v16 = vadd.f32 %v2730_v25, %v5747_v50  ;;  %3621 = vst [vmem:[#allocation11 + $0x2b8] sm:$0xff] %v4012_v4  ;;  %v2894_v53 = vadd.f32 %v2893_v31, %v5750_v30 }
 0x644   :  { %v2732_v40 = vpop.f32.mrf.mxu0  ;;  %v2895_v63 = vpop.f32.mrf.mxu1 }
 0x645   :  { %v4015_v5 = vpack.c.bf16 %v2731_v16, %v2729_v7  ;;  %v4016_v51 = vpack.c.bf16 %v2894_v53, %v2892_v55  ;;  %v2733_v26 = vadd.f32 %v2732_v40, %v5741_v44  ;;  %v2896_v35 = vadd.f32 %v2895_v63, %v5744_v18 }
 0x646   :  { %v2734_v10 = vpop.f32.mrf.mxu0  ;;  %v2897_v22 = vpop.f32.mrf.mxu1 }
 0x647   :  { %3624 = vst [vmem:[#allocation11 + $0x2d0] sm:$0xff] %v4015_v5  ;;  %v2735_v52 = vadd.f32 %v2734_v10, %v5747_v50  ;;  %3625 = vst [vmem:[#allocation11 + $0x2d8] sm:$0xff] %v4016_v51  ;;  %v2898_v27 = vadd.f32 %v2897_v22, %v5750_v30 }
 0x648   :  { %v2738_v17 = vpop.f32.mrf.mxu0  ;;  %v2901_v43 = vpop.f32.mrf.mxu1 }
 0x649   :  { %v4019_v0 = vpack.c.bf16 %v2735_v52, %v2733_v26  ;;  %v4020_v47 = vpack.c.bf16 %v2898_v27, %v2896_v35  ;;  %v2739_v12 = vadd.f32 %v2738_v17, %v5741_v44  ;;  %v2902_v46 = vadd.f32 %v2901_v43, %v5744_v18 }
 0x64a   :  { %v2740_v34 = vpop.f32.mrf.mxu0  ;;  %v2903_v60 = vpop.f32.mrf.mxu1 }
 0x64b   :  { %3628 = vst [vmem:[#allocation11 + $0x2f0] sm:$0xff] %v4019_v0  ;;  %v2741_v20 = vadd.f32 %v2740_v34, %v5747_v50  ;;  %3629 = vst [vmem:[#allocation11 + $0x2f8] sm:$0xff] %v4020_v47  ;;  %v2904_v21 = vadd.f32 %v2903_v60, %v5750_v30 }
 0x64c   :  { %v2742_v48 = vpop.f32.mrf.mxu0  ;;  %v2905_v57 = vpop.f32.mrf.mxu1 }
 0x64d   :  { %v4023_v11 = vpack.c.bf16 %v2741_v20, %v2739_v12  ;;  %v4024_v59 = vpack.c.bf16 %v2904_v21, %v2902_v46  ;;  %v2743_v1 = vadd.f32 %v2742_v48, %v5741_v44  ;;  %v2906_v24 = vadd.f32 %v2905_v57, %v5744_v18 }
 0x64e   :  { %v2744_v54 = vpop.f32.mrf.mxu0  ;;  %v2907_v23 = vpop.f32.mrf.mxu1 }
 0x64f   :  { %3632 = vst [vmem:[#allocation11 + $0x310] sm:$0xff] %v4023_v11  ;;  %v2745_v9 = vadd.f32 %v2744_v54, %v5747_v50  ;;  %3633 = vst [vmem:[#allocation11 + $0x318] sm:$0xff] %v4024_v59  ;;  %v2908_v58 = vadd.f32 %v2907_v23, %v5750_v30 }
 0x651   :  { %v4027_v62 = vpack.c.bf16 %v2745_v9, %v2743_v1  ;;  %v4028_v37 = vpack.c.bf16 %v2908_v58, %v2906_v24 }
 0x653   :  { %3636 = vst [vmem:[#allocation11 + $0x330] sm:$0xff] %v4027_v62  ;;  %3637 = vst [vmem:[#allocation11 + $0x338] sm:$0xff] %v4028_v37 }
 0x654   :  { %3642 = vsyncadd [#allocation5], 512  ;;  %s4665_s10 = smov [#allocation11]  }
 0x655   :  { %s3643_s26 = sshll.u32 %s4665_s10, 4  ;;  %s3644_s26 = int_to_ptr.vmem [resolvable:$true] %s3643_s26 }
 0x656   :  { %s4626_s27 = scalar_lea.vmem %s3644_s26, 12800  ;;  %s4630_s28 = scalar_lea.vmem %s3644_s26, 13312 }
 0x657   :  { %p4627_p6 = scmp.ne.s32.totalorder %s3644_s26, %s4626_s27  ;;  %p4631_p7 = scmp.lt.s32.totalorder %s3644_s26, %s3644_s26 }
 0x658   :  { %p4632_p8 = scmp.lt.s32.totalorder %s4630_s28, %s4626_s27 }
 0x65a   :  { %p4633_p9 = por %p4632_p8, %p4631_p7 }
 0x65c   :  { %p4634_p10 = pnand %p4633_p9, %p4627_p6 }
 0x65e   :  { %4637 = shalt.err (!%p4634_p10)
}
 0x65f   :  { %3649 = dma.vmem_to_hbm [thread:$0]  %s3644_s26, 12800, %s5877_s11, [#allocation5], %s4660_s0, %s4660_s0, %s4661_s17  }
 0x660   :  { %4652 = dma.done.wait [#allocation5], 13312  }
 0x661   :  { %4653 = vsyncadd [#allocation5], 4294953984 }
 0x662   :  { %3653 = vsyncpa [#allocation4], 1 }
 0x663   :  { %3654 = vsyncpa [#allocation7], 1 }
 0x664   :  { %3655 = vsyncpa [#allocation10], 1 }
 0x665   :  { %3656 = vsyncpa [#allocation5], 1 }

</bundles_post_ra>
